<compile_context>
chip_gen: v7x
topology: tpu7x:2x2x1
jax: 0.10.0
libtpu: 0.0.40
codegen_flags: <defaults>
</compile_context>

<pallas_src>
import functools

import jax
import jax.numpy as jnp
import numpy as np
from jax.experimental import pallas as pl
from jax.experimental.pallas import tpu as pltpu


# ---------------------------------------------------------------------------
# One-time host-side parameter preparation (hoisted out of the per-call path).
# ---------------------------------------------------------------------------
def _banded_conv_weight(w_hwio, W, dtype):
    """Fold a (3, 3, Cin, Cout) HWIO conv kernel into 3 banded matrices.

    B[ky] has shape (W*Cin, W*Cout) with
        B[ky][wp*Cin + ci, w*Cout + co] = w[ky, wp - w + 1, ci, co]
    for |wp - w| <= 1 and zero otherwise, i.e. a lane-folded input row times
    B[ky] gives the ky-th row contribution of a SAME 3x3 conv (the clipped
    band is exactly the zero width-padding).
    """
    KH, KW, _, _ = w_hwio.shape
    bands = []
    for ky in range(KH):
        blk = 0.0
        for kx in range(KW):
            blk = blk + jnp.kron(jnp.eye(W, k=1 - kx, dtype=w_hwio.dtype),
                                 w_hwio[ky, kx])
        bands.append(blk)
    return jnp.stack(bands).astype(dtype)


def prepare_rcab_params(params, *, H, W, compute_dtype=jnp.bfloat16):
    """Transform RCAB parameters into lane-folded kernel operands (run once)."""
    w1, b1, w2, b2, wd1, bd1, wd2, bd2 = params
    C = w1.shape[2]
    bw1 = _banded_conv_weight(w1, W, compute_dtype)                  # (3, WC, WC)
    bw2 = _banded_conv_weight(w2, W, compute_dtype)                  # (3, WC, WC)
    b1_t = jnp.tile(b1.reshape(1, C), (1, W)).astype(jnp.float32)    # (1, WC)
    b2_t = jnp.tile(b2.reshape(1, C), (1, W)).astype(jnp.float32)    # (1, WC)
    # CALayer: fold the W replication and the 1/(H*W) average-pool scale into
    # the first 1x1 conv and pre-tile the second 1x1 conv to full lane width,
    # so the in-kernel epilogue is two small lane-dense matmuls.
    wd1_f = (jnp.tile(wd1, (W, 1)) / float(H * W)).astype(jnp.float32)  # (WC, Cr)
    bd1_f = bd1.reshape(1, -1).astype(jnp.float32)                      # (1, Cr)
    wd2_t = jnp.tile(wd2, (1, W)).astype(jnp.float32)                   # (Cr, WC)
    bd2_t = jnp.tile(bd2.reshape(1, C), (1, W)).astype(jnp.float32)     # (1, WC)
    return (bw1, b1_t, bw2, b2_t, wd1_f, bd1_f, wd2_t, bd2_t)


# ---------------------------------------------------------------------------
# Kernel: one batch block (B_blk images stacked along the matmul M axis).
# ---------------------------------------------------------------------------
def _rcab_kernel(x_ref, w1_ref, b1_ref, w2_ref, b2_ref,
                 wd1_ref, bd1_ref, wd2_ref, bd2_ref, out_ref,
                 *, H, B_blk, compute_dtype):
    f32 = jnp.float32
    M = B_blk * H                                    # stacked image rows

    x = x_ref[...]                                   # (M, WC) f32

    # Per-row "neighbour row is inside the same image" masks.  Images are
    # stacked along the row axis; pltpu.roll wraps / crosses image boundaries
    # and the masks zero exactly those rows (this is the SAME height padding).
    row_in_img = jax.lax.broadcasted_iota(jnp.int32, (M, 1), 0) % H
    has_up = row_in_img > 0
    has_dn = row_in_img < (H - 1)

    def banded_conv3x3(v, w_ref, b_row):
        # Row shifts via XLU rolls + VPU masks: no misaligned sublane slices.
        up = jnp.where(has_up, pltpu.roll(v, shift=1, axis=0), 0.0)
        dn = jnp.where(has_dn, pltpu.roll(v, shift=M - 1, axis=0), 0.0)
        acc = jnp.dot(up.astype(compute_dtype), w_ref[0],
                      preferred_element_type=f32)
        acc = acc + jnp.dot(v.astype(compute_dtype), w_ref[1],
                            preferred_element_type=f32)
        acc = acc + jnp.dot(dn.astype(compute_dtype), w_ref[2],
                            preferred_element_type=f32)
        return acc + b_row

    h1 = jnp.maximum(banded_conv3x3(x, w1_ref, b1_ref[...]), 0.0)   # conv+ReLU
    h2 = banded_conv3x3(h1, w2_ref, b2_ref[...])                    # conv

    # ---- channel attention (CALayer), all f32 ------------------------------
    # Per-image row sums (aligned, full-lane-width slices); the W fold and the
    # 1/(H*W) pooling scale are already folded into wd1_f.
    sums = [jnp.sum(h2[n * H:(n + 1) * H, :], axis=0, keepdims=True)
            for n in range(B_blk)]
    row_sum = sums[0] if B_blk == 1 else jnp.concatenate(sums, axis=0)
    y = jnp.maximum(
        jnp.dot(row_sum, wd1_ref[...], preferred_element_type=f32)
        + bd1_ref[...], 0.0)                                        # (B_blk, Cr)
    scale = jax.nn.sigmoid(
        jnp.dot(y, wd2_ref[...], preferred_element_type=f32)
        + bd2_ref[...])                                             # (B_blk, WC)

    # ---- channel scale + residual: dense, full-lane-width stores -----------
    for n in range(B_blk):
        out_ref[pl.ds(n * H, H), :] = (
            h2[n * H:(n + 1) * H, :] * scale[n:n + 1, :]
            + x[n * H:(n + 1) * H, :]).astype(out_ref.dtype)


# ---------------------------------------------------------------------------
# pallas_call wrapper
# ---------------------------------------------------------------------------
def _make_rcab_call(num_blocks, B_blk, H, WC, Cr, compute_dtype,
                    single_buffer_weights):
    M = B_blk * H

    def const_spec(shape):
        idx = lambda n: (0,) * len(shape)
        if single_buffer_weights:
            # Grid-invariant operand: fetched once, never revisited -> single
            # buffer (saves ~3 MiB of VMEM vs. default double buffering).
            return pl.BlockSpec(shape, idx, pipeline_mode=pl.Buffered(1))
        return pl.BlockSpec(shape, idx)

    grid_spec = pltpu.PrefetchScalarGridSpec(
        num_scalar_prefetch=0,
        grid=(num_blocks,),
        in_specs=[
            pl.BlockSpec((None, M, WC), lambda n: (n, 0, 0)),   # x (f32)
            const_spec((3, WC, WC)),                            # banded w1
            const_spec((1, WC)),                                # b1 tiled
            const_spec((3, WC, WC)),                            # banded w2
            const_spec((1, WC)),                                # b2 tiled
            const_spec((WC, Cr)),                               # wd1 folded
            const_spec((1, Cr)),                                # bd1
            const_spec((Cr, WC)),                               # wd2 tiled
            const_spec((1, WC)),                                # bd2 tiled
        ],
        out_specs=pl.BlockSpec((None, M, WC), lambda n: (n, 0, 0)),
    )
    kernel = functools.partial(_rcab_kernel, H=H, B_blk=B_blk,
                               compute_dtype=compute_dtype)
    return pl.pallas_call(
        kernel,
        out_shape=jax.ShapeDtypeStruct((num_blocks, M, WC), jnp.float32),
        grid_spec=grid_spec,
        compiler_params=pltpu.CompilerParams(
            dimension_semantics=("parallel",)),
    )


def rcab_forward(x_nhwc, prepared, *, batch_block=None,
                 compute_dtype=jnp.bfloat16):
    """x_nhwc: (N, H, W, C) float32; prepared: output of prepare_rcab_params."""
    (bw1, b1_t, bw2, b2_t, wd1_f, bd1_f, wd2_t, bd2_t) = prepared
    N, H, W, C = x_nhwc.shape
    WC = W * C
    Cr = wd1_f.shape[1]
    assert WC % 128 == 0, "W*C must be a multiple of 128 lanes"

    # Batch blocking: target M = B_blk*H ~ 128 rows so the banded matmuls fill
    # the MXU and the weight fetch / per-grid-step overhead is amortised.
    if batch_block is None:
        batch_block = max(1, min(N, max(1, 128 // H)))
    B_blk = int(batch_block)
    pad_n = (-N) % B_blk
    if pad_n:
        x_nhwc = jnp.pad(x_nhwc, ((0, pad_n),) + ((0, 0),) * 3)
    num_blocks = (N + pad_n) // B_blk
    M = B_blk * H

    x_flat = x_nhwc.reshape(num_blocks, M, WC).astype(jnp.float32)
    args = (x_flat, bw1, b1_t, bw2, b2_t, wd1_f, bd1_f, wd2_t, bd2_t)

    try:
        call = _make_rcab_call(num_blocks, B_blk, H, WC, Cr, compute_dtype,
                               single_buffer_weights=True)
        out_flat = call(*args)
    except Exception:
        # Fallback for jaxlibs that do not accept pl.Buffered(1) on the
        # grid-invariant weight specs: default double-buffered pipelining.
        call = _make_rcab_call(num_blocks, B_blk, H, WC, Cr, compute_dtype,
                               single_buffer_weights=False)
        out_flat = call(*args)

    out = out_flat.reshape(N + pad_n, H, W, C)
    return out[:N] if pad_n else out


# ---------------------------------------------------------------------------
# Pure-JAX reference (same math as the PyTorch module) + param construction
# ---------------------------------------------------------------------------
def rcab_reference(x_nhwc, params):
    (w1, b1, w2, b2, wd1, bd1, wd2, bd2) = params
    dn = jax.lax.conv_dimension_numbers(x_nhwc.shape, w1.shape,
                                        ('NHWC', 'HWIO', 'NHWC'))
    h = jax.lax.conv_general_dilated(x_nhwc, w1, (1, 1), 'SAME',
                                     dimension_numbers=dn) + b1.reshape(1, 1, 1, -1)
    h = jnp.maximum(h, 0.0)
    h = jax.lax.conv_general_dilated(h, w2, (1, 1), 'SAME',
                                     dimension_numbers=dn) + b2.reshape(1, 1, 1, -1)
    pooled = jnp.mean(h, axis=(1, 2))                 # (N, C)
    y = jnp.maximum(pooled @ wd1 + bd1, 0.0)
    y = jax.nn.sigmoid(y @ wd2 + bd2)                 # (N, C)
    res = h * y[:, None, None, :]
    return res + x_nhwc


def make_params(key, n_feat, reduction):
    c_red = n_feat // reduction
    ks = jax.random.split(key, 8)
    scale = 0.1
    w1 = scale * jax.random.normal(ks[0], (3, 3, n_feat, n_feat), jnp.float32)
    b1 = scale * jax.random.normal(ks[1], (1, n_feat), jnp.float32)
    w2 = scale * jax.random.normal(ks[2], (3, 3, n_feat, n_feat), jnp.float32)
    b2 = scale * jax.random.normal(ks[3], (1, n_feat), jnp.float32)
    wd1 = scale * jax.random.normal(ks[4], (n_feat, c_red), jnp.float32)
    bd1 = scale * jax.random.normal(ks[5], (1, c_red), jnp.float32)
    wd2 = scale * jax.random.normal(ks[6], (c_red, n_feat), jnp.float32)
    bd2 = scale * jax.random.normal(ks[7], (1, n_feat), jnp.float32)
    return (w1, b1, w2, b2, wd1, bd1, wd2, bd2)


if __name__ == "__main__":
    N, C, H, W = 2, 32, 16, 16          # n_feat = 32
    reduction = 4

    key = jax.random.PRNGKey(0)
    kx, kp = jax.random.split(key)
    x_nchw = jax.random.normal(kx, (N, C, H, W), jnp.float32)   # PyTorch layout
    params = make_params(kp, C, reduction)

    x_nhwc = jnp.transpose(x_nchw, (0, 2, 3, 1))                # NCHW -> NHWC

    prepared = prepare_rcab_params(params, H=H, W=W)            # one-time prep
    out = rcab_forward(x_nhwc, prepared)
    out = jax.block_until_ready(out)

    ref = rcab_reference(x_nhwc, params)
    # bf16 conv operands (f32 accumulation) vs. the f32 reference.
    np.testing.assert_allclose(np.asarray(out), np.asarray(ref),
                               rtol=5e-2, atol=5e-2)

    print("KERNEL_OK")
</pallas_src>

<mosaic_0001>
module attributes {stable_mosaic.version = 11 : i64} {
  func.func @_rcab_kernel(%arg0: i32, %arg1: memref<1x32x512xf32, #tpu.memory_space<vmem>>, %arg2: memref<3x512x512xbf16, #tpu.memory_space<vmem>>, %arg3: memref<1x512xf32, #tpu.memory_space<vmem>>, %arg4: memref<3x512x512xbf16, #tpu.memory_space<vmem>>, %arg5: memref<1x512xf32, #tpu.memory_space<vmem>>, %arg6: memref<512x8xf32, #tpu.memory_space<vmem>>, %arg7: memref<1x8xf32, #tpu.memory_space<vmem>>, %arg8: memref<8x512xf32, #tpu.memory_space<vmem>>, %arg9: memref<1x512xf32, #tpu.memory_space<vmem>>, %arg10: memref<1x32x512xf32, #tpu.memory_space<vmem>>) attributes {dimension_semantics = [#tpu.dimension_semantics<parallel>], iteration_bounds = array<i64: 1>, scalar_prefetch = 0 : i64, scratch_operands = 0 : i64, tpu.core_type = #tpu.core_type<tc>, window_params = [{transform_indices = @transform_0, window_bounds = array<i64: 1, 32, 512>}, {pipeline_mode = #tpu.pipeline_mode<synchronous>, transform_indices = @transform_1, window_bounds = array<i64: 3, 512, 512>}, {pipeline_mode = #tpu.pipeline_mode<synchronous>, transform_indices = @transform_2, window_bounds = array<i64: 1, 512>}, {pipeline_mode = #tpu.pipeline_mode<synchronous>, transform_indices = @transform_3, window_bounds = array<i64: 3, 512, 512>}, {pipeline_mode = #tpu.pipeline_mode<synchronous>, transform_indices = @transform_4, window_bounds = array<i64: 1, 512>}, {pipeline_mode = #tpu.pipeline_mode<synchronous>, transform_indices = @transform_5, window_bounds = array<i64: 512, 8>}, {pipeline_mode = #tpu.pipeline_mode<synchronous>, transform_indices = @transform_6, window_bounds = array<i64: 1, 8>}, {pipeline_mode = #tpu.pipeline_mode<synchronous>, transform_indices = @transform_7, window_bounds = array<i64: 8, 512>}, {pipeline_mode = #tpu.pipeline_mode<synchronous>, transform_indices = @transform_8, window_bounds = array<i64: 1, 512>}, {transform_indices = @transform_9, window_bounds = array<i64: 1, 32, 512>}]} {
    %c0 = arith.constant 0 : index
    %c0_0 = arith.constant 0 : index
    %c0_1 = arith.constant 0 : index
    %0 = vector.load %arg1[%c0, %c0_0, %c0_1] : memref<1x32x512xf32, #tpu.memory_space<vmem>>, vector<1x32x512xf32>
    %1 = vector.shape_cast %0 : vector<1x32x512xf32> to vector<32x512xf32>
    %2 = tpu.iota {dimensions = array<i32: 0>} : vector<32x1xi32>
    %c16_i32 = arith.constant 16 : i32
    %c0_i32 = arith.constant 0 : i32
    %3 = arith.cmpi eq, %c16_i32, %c0_i32 : i32
    %c1_i32 = arith.constant 1 : i32
    %4 = arith.select %3, %c1_i32, %c16_i32 : i32
    %5 = vector.broadcast %4 : i32 to vector<32x1xi32>
    %6 = arith.remsi %2, %5 : vector<32x1xi32>
    %c0_i32_2 = arith.constant 0 : i32
    %7 = vector.broadcast %c0_i32_2 : i32 to vector<32x1xi32>
    %8 = arith.cmpi ne, %6, %7 : vector<32x1xi32>
    %c0_i32_3 = arith.constant 0 : i32
    %9 = vector.broadcast %c0_i32_3 : i32 to vector<32x1xi32>
    %10 = arith.cmpi slt, %6, %9 : vector<32x1xi32>
    %c0_i32_4 = arith.constant 0 : i32
    %11 = arith.cmpi slt, %4, %c0_i32_4 : i32
    %12 = vector.broadcast %11 : i1 to vector<32x1xi1>
    %13 = vector.broadcast %12 : vector<32x1xi1> to vector<32x1xi1>
    %14 = arith.xori %10, %13 : vector<32x1xi1>
    %15 = arith.andi %14, %8 : vector<32x1xi1>
    %16 = vector.broadcast %4 : i32 to vector<32x1xi32>
    %17 = arith.addi %6, %16 : vector<32x1xi32>
    %18 = arith.select %15, %17, %6 : vector<32x1xi1>, vector<32x1xi32>
    %c0_i32_5 = arith.constant 0 : i32
    %19 = vector.broadcast %c0_i32_5 : i32 to vector<32x1xi32>
    %20 = arith.cmpi sgt, %18, %19 : vector<32x1xi32>
    %c15_i32 = arith.constant 15 : i32
    %21 = vector.broadcast %c15_i32 : i32 to vector<32x1xi32>
    %22 = arith.cmpi slt, %18, %21 : vector<32x1xi32>
    %c0_6 = arith.constant 0 : index
    %c0_7 = arith.constant 0 : index
    %23 = vector.load %arg3[%c0_6, %c0_7] : memref<1x512xf32, #tpu.memory_space<vmem>>, vector<1x512xf32>
    %c1_i32_8 = arith.constant 1 : i32
    %24 = tpu.dynamic_rotate %1 by %c1_i32_8 dim 0 : vector<32x512xf32>, i32 -> vector<32x512xf32>
    %cst = arith.constant 0.000000e+00 : f32
    %25 = vector.shape_cast %20 : vector<32x1xi1> to vector<32x1xi1>
    %26 = vector.broadcast %25 : vector<32x1xi1> to vector<32x512xi1>
    %27 = vector.broadcast %cst : f32 to vector<32x512xf32>
    %28 = arith.select %26, %24, %27 : vector<32x512xi1>, vector<32x512xf32>
    %c31_i32 = arith.constant 31 : i32
    %29 = tpu.dynamic_rotate %1 by %c31_i32 dim 0 : vector<32x512xf32>, i32 -> vector<32x512xf32>
    %cst_9 = arith.constant 0.000000e+00 : f32
    %30 = vector.shape_cast %22 : vector<32x1xi1> to vector<32x1xi1>
    %31 = vector.broadcast %30 : vector<32x1xi1> to vector<32x512xi1>
    %32 = vector.broadcast %cst_9 : f32 to vector<32x512xf32>
    %33 = arith.select %31, %29, %32 : vector<32x512xi1>, vector<32x512xf32>
    %34 = arith.truncf %28 : vector<32x512xf32> to vector<32x512xbf16>
    %c0_10 = arith.constant 0 : index
    %c0_11 = arith.constant 0 : index
    %c0_12 = arith.constant 0 : index
    %35 = vector.load %arg2[%c0_10, %c0_11, %c0_12] : memref<3x512x512xbf16, #tpu.memory_space<vmem>>, vector<1x512x512xbf16>
    %36 = vector.shape_cast %35 : vector<1x512x512xbf16> to vector<512x512xbf16>
    %cst_13 = arith.constant dense<0.000000e+00> : vector<32x512xf32>
    %37 = tpu.matmul %34, %36, %cst_13 {dimension_numbers = #tpu.dot_dimension_numbers<[1], [0], [0], [1], [0, 0, 1, 1], [], []>} : vector<32x512xbf16>, vector<512x512xbf16>, vector<32x512xf32> -> vector<32x512xf32>
    %38 = arith.truncf %1 : vector<32x512xf32> to vector<32x512xbf16>
    %c1 = arith.constant 1 : index
    %c0_14 = arith.constant 0 : index
    %c0_15 = arith.constant 0 : index
    %39 = vector.load %arg2[%c1, %c0_14, %c0_15] : memref<3x512x512xbf16, #tpu.memory_space<vmem>>, vector<1x512x512xbf16>
    %40 = vector.shape_cast %39 : vector<1x512x512xbf16> to vector<512x512xbf16>
    %cst_16 = arith.constant dense<0.000000e+00> : vector<32x512xf32>
    %41 = tpu.matmul %38, %40, %cst_16 {dimension_numbers = #tpu.dot_dimension_numbers<[1], [0], [0], [1], [0, 0, 1, 1], [], []>} : vector<32x512xbf16>, vector<512x512xbf16>, vector<32x512xf32> -> vector<32x512xf32>
    %42 = arith.addf %37, %41 : vector<32x512xf32>
    %43 = arith.truncf %33 : vector<32x512xf32> to vector<32x512xbf16>
    %c2 = arith.constant 2 : index
    %c0_17 = arith.constant 0 : index
    %c0_18 = arith.constant 0 : index
    %44 = vector.load %arg2[%c2, %c0_17, %c0_18] : memref<3x512x512xbf16, #tpu.memory_space<vmem>>, vector<1x512x512xbf16>
    %45 = vector.shape_cast %44 : vector<1x512x512xbf16> to vector<512x512xbf16>
    %cst_19 = arith.constant dense<0.000000e+00> : vector<32x512xf32>
    %46 = tpu.matmul %43, %45, %cst_19 {dimension_numbers = #tpu.dot_dimension_numbers<[1], [0], [0], [1], [0, 0, 1, 1], [], []>} : vector<32x512xbf16>, vector<512x512xbf16>, vector<32x512xf32> -> vector<32x512xf32>
    %47 = arith.addf %42, %46 : vector<32x512xf32>
    %48 = vector.broadcast %23 : vector<1x512xf32> to vector<32x512xf32>
    %49 = arith.addf %47, %48 : vector<32x512xf32>
    %cst_20 = arith.constant 0.000000e+00 : f32
    %50 = vector.broadcast %cst_20 : f32 to vector<32x512xf32>
    %51 = arith.maximumf %49, %50 : vector<32x512xf32>
    %c0_21 = arith.constant 0 : index
    %c0_22 = arith.constant 0 : index
    %52 = vector.load %arg5[%c0_21, %c0_22] : memref<1x512xf32, #tpu.memory_space<vmem>>, vector<1x512xf32>
    %c1_i32_23 = arith.constant 1 : i32
    %53 = tpu.dynamic_rotate %51 by %c1_i32_23 dim 0 : vector<32x512xf32>, i32 -> vector<32x512xf32>
    %cst_24 = arith.constant 0.000000e+00 : f32
    %54 = vector.shape_cast %20 : vector<32x1xi1> to vector<32x1xi1>
    %55 = vector.broadcast %54 : vector<32x1xi1> to vector<32x512xi1>
    %56 = vector.broadcast %cst_24 : f32 to vector<32x512xf32>
    %57 = arith.select %55, %53, %56 : vector<32x512xi1>, vector<32x512xf32>
    %c31_i32_25 = arith.constant 31 : i32
    %58 = tpu.dynamic_rotate %51 by %c31_i32_25 dim 0 : vector<32x512xf32>, i32 -> vector<32x512xf32>
    %cst_26 = arith.constant 0.000000e+00 : f32
    %59 = vector.shape_cast %22 : vector<32x1xi1> to vector<32x1xi1>
    %60 = vector.broadcast %59 : vector<32x1xi1> to vector<32x512xi1>
    %61 = vector.broadcast %cst_26 : f32 to vector<32x512xf32>
    %62 = arith.select %60, %58, %61 : vector<32x512xi1>, vector<32x512xf32>
    %63 = arith.truncf %57 : vector<32x512xf32> to vector<32x512xbf16>
    %c0_27 = arith.constant 0 : index
    %c0_28 = arith.constant 0 : index
    %c0_29 = arith.constant 0 : index
    %64 = vector.load %arg4[%c0_27, %c0_28, %c0_29] : memref<3x512x512xbf16, #tpu.memory_space<vmem>>, vector<1x512x512xbf16>
    %65 = vector.shape_cast %64 : vector<1x512x512xbf16> to vector<512x512xbf16>
    %cst_30 = arith.constant dense<0.000000e+00> : vector<32x512xf32>
    %66 = tpu.matmul %63, %65, %cst_30 {dimension_numbers = #tpu.dot_dimension_numbers<[1], [0], [0], [1], [0, 0, 1, 1], [], []>} : vector<32x512xbf16>, vector<512x512xbf16>, vector<32x512xf32> -> vector<32x512xf32>
    %67 = arith.truncf %51 : vector<32x512xf32> to vector<32x512xbf16>
    %c1_31 = arith.constant 1 : index
    %c0_32 = arith.constant 0 : index
    %c0_33 = arith.constant 0 : index
    %68 = vector.load %arg4[%c1_31, %c0_32, %c0_33] : memref<3x512x512xbf16, #tpu.memory_space<vmem>>, vector<1x512x512xbf16>
    %69 = vector.shape_cast %68 : vector<1x512x512xbf16> to vector<512x512xbf16>
    %cst_34 = arith.constant dense<0.000000e+00> : vector<32x512xf32>
    %70 = tpu.matmul %67, %69, %cst_34 {dimension_numbers = #tpu.dot_dimension_numbers<[1], [0], [0], [1], [0, 0, 1, 1], [], []>} : vector<32x512xbf16>, vector<512x512xbf16>, vector<32x512xf32> -> vector<32x512xf32>
    %71 = arith.addf %66, %70 : vector<32x512xf32>
    %72 = arith.truncf %62 : vector<32x512xf32> to vector<32x512xbf16>
    %c2_35 = arith.constant 2 : index
    %c0_36 = arith.constant 0 : index
    %c0_37 = arith.constant 0 : index
    %73 = vector.load %arg4[%c2_35, %c0_36, %c0_37] : memref<3x512x512xbf16, #tpu.memory_space<vmem>>, vector<1x512x512xbf16>
    %74 = vector.shape_cast %73 : vector<1x512x512xbf16> to vector<512x512xbf16>
    %cst_38 = arith.constant dense<0.000000e+00> : vector<32x512xf32>
    %75 = tpu.matmul %72, %74, %cst_38 {dimension_numbers = #tpu.dot_dimension_numbers<[1], [0], [0], [1], [0, 0, 1, 1], [], []>} : vector<32x512xbf16>, vector<512x512xbf16>, vector<32x512xf32> -> vector<32x512xf32>
    %76 = arith.addf %71, %75 : vector<32x512xf32>
    %77 = vector.broadcast %52 : vector<1x512xf32> to vector<32x512xf32>
    %78 = arith.addf %76, %77 : vector<32x512xf32>
    %79 = vector.extract_strided_slice %78 {offsets = [0, 0], sizes = [16, 512], strides = [1, 1]} : vector<32x512xf32> to vector<16x512xf32>
    %cst_39 = arith.constant dense<0.000000e+00> : vector<512xf32>
    %80 = vector.multi_reduction <add>, %79, %cst_39 [0] : vector<16x512xf32> to vector<512xf32>
    %81 = vector.shape_cast %80 : vector<512xf32> to vector<1x512xf32>
    %82 = vector.extract_strided_slice %78 {offsets = [16, 0], sizes = [16, 512], strides = [1, 1]} : vector<32x512xf32> to vector<16x512xf32>
    %cst_40 = arith.constant dense<0.000000e+00> : vector<512xf32>
    %83 = vector.multi_reduction <add>, %82, %cst_40 [0] : vector<16x512xf32> to vector<512xf32>
    %84 = vector.shape_cast %83 : vector<512xf32> to vector<1x512xf32>
    %85 = tpu.concatenate %81, %84 in 0 : vector<1x512xf32>, vector<1x512xf32> -> vector<2x512xf32>
    %c0_41 = arith.constant 0 : index
    %c0_42 = arith.constant 0 : index
    %86 = vector.load %arg6[%c0_41, %c0_42] : memref<512x8xf32, #tpu.memory_space<vmem>>, vector<512x8xf32>
    %cst_43 = arith.constant dense<0.000000e+00> : vector<2x8xf32>
    %87 = tpu.matmul %85, %86, %cst_43 {dimension_numbers = #tpu.dot_dimension_numbers<[1], [0], [0], [1], [0, 0, 1, 1], [], []>} : vector<2x512xf32>, vector<512x8xf32>, vector<2x8xf32> -> vector<2x8xf32>
    %c0_44 = arith.constant 0 : index
    %c0_45 = arith.constant 0 : index
    %88 = vector.load %arg7[%c0_44, %c0_45] : memref<1x8xf32, #tpu.memory_space<vmem>>, vector<1x8xf32>
    %89 = vector.broadcast %88 : vector<1x8xf32> to vector<2x8xf32>
    %90 = arith.addf %87, %89 : vector<2x8xf32>
    %cst_46 = arith.constant 0.000000e+00 : f32
    %91 = vector.broadcast %cst_46 : f32 to vector<2x8xf32>
    %92 = arith.maximumf %90, %91 : vector<2x8xf32>
    %c0_47 = arith.constant 0 : index
    %c0_48 = arith.constant 0 : index
    %93 = vector.load %arg8[%c0_47, %c0_48] : memref<8x512xf32, #tpu.memory_space<vmem>>, vector<8x512xf32>
    %cst_49 = arith.constant dense<0.000000e+00> : vector<2x512xf32>
    %94 = tpu.matmul %92, %93, %cst_49 {dimension_numbers = #tpu.dot_dimension_numbers<[1], [0], [0], [1], [0, 0, 1, 1], [], []>} : vector<2x8xf32>, vector<8x512xf32>, vector<2x512xf32> -> vector<2x512xf32>
    %c0_50 = arith.constant 0 : index
    %c0_51 = arith.constant 0 : index
    %95 = vector.load %arg9[%c0_50, %c0_51] : memref<1x512xf32, #tpu.memory_space<vmem>>, vector<1x512xf32>
    %96 = vector.broadcast %95 : vector<1x512xf32> to vector<2x512xf32>
    %97 = arith.addf %94, %96 : vector<2x512xf32>
    %98 = arith.negf %97 : vector<2x512xf32>
    %99 = math.exp %98 : vector<2x512xf32>
    %cst_52 = arith.constant 1.000000e+00 : f32
    %100 = vector.broadcast %cst_52 : f32 to vector<2x512xf32>
    %101 = arith.addf %100, %99 : vector<2x512xf32>
    %102 = arith.divf %100, %101 : vector<2x512xf32>
    %103 = vector.extract_strided_slice %78 {offsets = [0, 0], sizes = [16, 512], strides = [1, 1]} : vector<32x512xf32> to vector<16x512xf32>
    %104 = vector.extract_strided_slice %102 {offsets = [0, 0], sizes = [1, 512], strides = [1, 1]} : vector<2x512xf32> to vector<1x512xf32>
    %105 = vector.broadcast %104 : vector<1x512xf32> to vector<16x512xf32>
    %106 = arith.mulf %103, %105 : vector<16x512xf32>
    %107 = vector.extract_strided_slice %1 {offsets = [0, 0], sizes = [16, 512], strides = [1, 1]} : vector<32x512xf32> to vector<16x512xf32>
    %108 = arith.addf %106, %107 : vector<16x512xf32>
    %c0_53 = arith.constant 0 : index
    %c0_54 = arith.constant 0 : index
    %c0_55 = arith.constant 0 : index
    %109 = vector.load %arg10[%c0_53, %c0_54, %c0_55] : memref<1x32x512xf32, #tpu.memory_space<vmem>>, vector<1x16x512xf32>
    %110 = vector.shape_cast %109 : vector<1x16x512xf32> to vector<16x512xf32>
    %111 = vector.shape_cast %108 : vector<16x512xf32> to vector<1x16x512xf32>
    tpu.vector_store %arg10[%c0_53, %c0_54, %c0_55], %111 {strides = array<i32>} : memref<1x32x512xf32, #tpu.memory_space<vmem>>, vector<1x16x512xf32>,
    %112 = vector.extract_strided_slice %78 {offsets = [16, 0], sizes = [16, 512], strides = [1, 1]} : vector<32x512xf32> to vector<16x512xf32>
    %113 = vector.extract_strided_slice %102 {offsets = [1, 0], sizes = [1, 512], strides = [1, 1]} : vector<2x512xf32> to vector<1x512xf32>
    %114 = vector.broadcast %113 : vector<1x512xf32> to vector<16x512xf32>
    %115 = arith.mulf %112, %114 : vector<16x512xf32>
    %116 = vector.extract_strided_slice %1 {offsets = [16, 0], sizes = [16, 512], strides = [1, 1]} : vector<32x512xf32> to vector<16x512xf32>
    %117 = arith.addf %115, %116 : vector<16x512xf32>
    %c0_56 = arith.constant 0 : index
    %c16 = arith.constant 16 : index
    %c0_57 = arith.constant 0 : index
    %118 = vector.load %arg10[%c0_56, %c16, %c0_57] : memref<1x32x512xf32, #tpu.memory_space<vmem>>, vector<1x16x512xf32>
    %119 = vector.shape_cast %118 : vector<1x16x512xf32> to vector<16x512xf32>
    %120 = vector.shape_cast %117 : vector<16x512xf32> to vector<1x16x512xf32>
    tpu.vector_store %arg10[%c0_56, %c16, %c0_57], %120 {strides = array<i32>} : memref<1x32x512xf32, #tpu.memory_space<vmem>>, vector<1x16x512xf32>,
    return
  }
  func.func @transform_0(%arg0: i32) -> (i32, i32, i32) {
    %c0_i32 = arith.constant 0 : i32
    %c0_i32_0 = arith.constant 0 : i32
    %c0_i32_1 = arith.constant 0 : i32
    return %arg0, %c0_i32, %c0_i32_0 : i32, i32, i32
  }
  func.func @transform_1(%arg0: i32) -> (i32, i32, i32) {
    %c0_i32 = arith.constant 0 : i32
    %c0_i32_0 = arith.constant 0 : i32
    %c0_i32_1 = arith.constant 0 : i32
    %c0_i32_2 = arith.constant 0 : i32
    return %c0_i32, %c0_i32_0, %c0_i32_1 : i32, i32, i32
  }
  func.func @transform_2(%arg0: i32) -> (i32, i32) {
    %c0_i32 = arith.constant 0 : i32
    %c0_i32_0 = arith.constant 0 : i32
    %c0_i32_1 = arith.constant 0 : i32
    return %c0_i32, %c0_i32_0 : i32, i32
  }
  func.func @transform_3(%arg0: i32) -> (i32, i32, i32) {
    %c0_i32 = arith.constant 0 : i32
    %c0_i32_0 = arith.constant 0 : i32
    %c0_i32_1 = arith.constant 0 : i32
    %c0_i32_2 = arith.constant 0 : i32
    return %c0_i32, %c0_i32_0, %c0_i32_1 : i32, i32, i32
  }
  func.func @transform_4(%arg0: i32) -> (i32, i32) {
    %c0_i32 = arith.constant 0 : i32
    %c0_i32_0 = arith.constant 0 : i32
    %c0_i32_1 = arith.constant 0 : i32
    return %c0_i32, %c0_i32_0 : i32, i32
  }
  func.func @transform_5(%arg0: i32) -> (i32, i32) {
    %c0_i32 = arith.constant 0 : i32
    %c0_i32_0 = arith.constant 0 : i32
    %c0_i32_1 = arith.constant 0 : i32
    return %c0_i32, %c0_i32_0 : i32, i32
  }
  func.func @transform_6(%arg0: i32) -> (i32, i32) {
    %c0_i32 = arith.constant 0 : i32
    %c0_i32_0 = arith.constant 0 : i32
    %c0_i32_1 = arith.constant 0 : i32
    return %c0_i32, %c0_i32_0 : i32, i32
  }
  func.func @transform_7(%arg0: i32) -> (i32, i32) {
    %c0_i32 = arith.constant 0 : i32
    %c0_i32_0 = arith.constant 0 : i32
    %c0_i32_1 = arith.constant 0 : i32
    return %c0_i32, %c0_i32_0 : i32, i32
  }
  func.func @transform_8(%arg0: i32) -> (i32, i32) {
    %c0_i32 = arith.constant 0 : i32
    %c0_i32_0 = arith.constant 0 : i32
    %c0_i32_1 = arith.constant 0 : i32
    return %c0_i32, %c0_i32_0 : i32, i32
  }
  func.func @transform_9(%arg0: i32) -> (i32, i32, i32) {
    %c0_i32 = arith.constant 0 : i32
    %c0_i32_0 = arith.constant 0 : i32
    %c0_i32_1 = arith.constant 0 : i32
    return %arg0, %c0_i32, %c0_i32_0 : i32, i32, i32
  }
}

module attributes {stable_mosaic.version = 11 : i64} {
  func.func @_rcab_kernel(%arg0: i32, %arg1: memref<1x32x512xf32, #tpu.memory_space<vmem>>, %arg2: memref<3x512x512xbf16, #tpu.memory_space<vmem>>, %arg3: memref<1x512xf32, #tpu.memory_space<vmem>>, %arg4: memref<3x512x512xbf16, #tpu.memory_space<vmem>>, %arg5: memref<1x512xf32, #tpu.memory_space<vmem>>, %arg6: memref<512x8xf32, #tpu.memory_space<vmem>>, %arg7: memref<1x8xf32, #tpu.memory_space<vmem>>, %arg8: memref<8x512xf32, #tpu.memory_space<vmem>>, %arg9: memref<1x512xf32, #tpu.memory_space<vmem>>, %arg10: memref<1x32x512xf32, #tpu.memory_space<vmem>>) attributes {dimension_semantics = [#tpu.dimension_semantics<parallel>], iteration_bounds = array<i64: 1>, scalar_prefetch = 0 : i64, scratch_operands = 0 : i64, tpu.core_type = #tpu.core_type<tc>, window_params = [{transform_indices = @transform_0, window_bounds = array<i64: 1, 32, 512>}, {pipeline_mode = #tpu.pipeline_mode<synchronous>, transform_indices = @transform_1, window_bounds = array<i64: 3, 512, 512>}, {pipeline_mode = #tpu.pipeline_mode<synchronous>, transform_indices = @transform_2, window_bounds = array<i64: 1, 512>}, {pipeline_mode = #tpu.pipeline_mode<synchronous>, transform_indices = @transform_3, window_bounds = array<i64: 3, 512, 512>}, {pipeline_mode = #tpu.pipeline_mode<synchronous>, transform_indices = @transform_4, window_bounds = array<i64: 1, 512>}, {pipeline_mode = #tpu.pipeline_mode<synchronous>, transform_indices = @transform_5, window_bounds = array<i64: 512, 8>}, {pipeline_mode = #tpu.pipeline_mode<synchronous>, transform_indices = @transform_6, window_bounds = array<i64: 1, 8>}, {pipeline_mode = #tpu.pipeline_mode<synchronous>, transform_indices = @transform_7, window_bounds = array<i64: 8, 512>}, {pipeline_mode = #tpu.pipeline_mode<synchronous>, transform_indices = @transform_8, window_bounds = array<i64: 1, 512>}, {transform_indices = @transform_9, window_bounds = array<i64: 1, 32, 512>}]} {
    %c0 = arith.constant 0 : index
    %c0_0 = arith.constant 0 : index
    %c0_1 = arith.constant 0 : index
    %0 = vector.load %arg1[%c0, %c0_0, %c0_1] : memref<1x32x512xf32, #tpu.memory_space<vmem>>, vector<1x32x512xf32>
    %1 = vector.shape_cast %0 : vector<1x32x512xf32> to vector<32x512xf32>
    %2 = tpu.iota {dimensions = array<i32: 0>} : vector<32x1xi32>
    %c16_i32 = arith.constant 16 : i32
    %c0_i32 = arith.constant 0 : i32
    %3 = arith.cmpi eq, %c16_i32, %c0_i32 : i32
    %c1_i32 = arith.constant 1 : i32
    %4 = arith.select %3, %c1_i32, %c16_i32 : i32
    %5 = vector.broadcast %4 : i32 to vector<32x1xi32>
    %6 = arith.remsi %2, %5 : vector<32x1xi32>
    %c0_i32_2 = arith.constant 0 : i32
    %7 = vector.broadcast %c0_i32_2 : i32 to vector<32x1xi32>
    %8 = arith.cmpi ne, %6, %7 : vector<32x1xi32>
    %c0_i32_3 = arith.constant 0 : i32
    %9 = vector.broadcast %c0_i32_3 : i32 to vector<32x1xi32>
    %10 = arith.cmpi slt, %6, %9 : vector<32x1xi32>
    %c0_i32_4 = arith.constant 0 : i32
    %11 = arith.cmpi slt, %4, %c0_i32_4 : i32
    %12 = vector.broadcast %11 : i1 to vector<32x1xi1>
    %13 = vector.broadcast %12 : vector<32x1xi1> to vector<32x1xi1>
    %14 = arith.xori %10, %13 : vector<32x1xi1>
    %15 = arith.andi %14, %8 : vector<32x1xi1>
    %16 = vector.broadcast %4 : i32 to vector<32x1xi32>
    %17 = arith.addi %6, %16 : vector<32x1xi32>
    %18 = arith.select %15, %17, %6 : vector<32x1xi1>, vector<32x1xi32>
    %c0_i32_5 = arith.constant 0 : i32
    %19 = vector.broadcast %c0_i32_5 : i32 to vector<32x1xi32>
    %20 = arith.cmpi sgt, %18, %19 : vector<32x1xi32>
    %c15_i32 = arith.constant 15 : i32
    %21 = vector.broadcast %c15_i32 : i32 to vector<32x1xi32>
    %22 = arith.cmpi slt, %18, %21 : vector<32x1xi32>
    %c0_6 = arith.constant 0 : index
    %c0_7 = arith.constant 0 : index
    %23 = vector.load %arg3[%c0_6, %c0_7] : memref<1x512xf32, #tpu.memory_space<vmem>>, vector<1x512xf32>
    %c1_i32_8 = arith.constant 1 : i32
    %24 = tpu.dynamic_rotate %1 by %c1_i32_8 dim 0 : vector<32x512xf32>, i32 -> vector<32x512xf32>
    %cst = arith.constant 0.000000e+00 : f32
    %25 = vector.shape_cast %20 : vector<32x1xi1> to vector<32x1xi1>
    %26 = vector.broadcast %25 : vector<32x1xi1> to vector<32x512xi1>
    %27 = vector.broadcast %cst : f32 to vector<32x512xf32>
    %28 = arith.select %26, %24, %27 : vector<32x512xi1>, vector<32x512xf32>
    %c31_i32 = arith.constant 31 : i32
    %29 = tpu.dynamic_rotate %1 by %c31_i32 dim 0 : vector<32x512xf32>, i32 -> vector<32x512xf32>
    %cst_9 = arith.constant 0.000000e+00 : f32
    %30 = vector.shape_cast %22 : vector<32x1xi1> to vector<32x1xi1>
    %31 = vector.broadcast %30 : vector<32x1xi1> to vector<32x512xi1>
    %32 = vector.broadcast %cst_9 : f32 to vector<32x512xf32>
    %33 = arith.select %31, %29, %32 : vector<32x512xi1>, vector<32x512xf32>
    %34 = arith.truncf %28 : vector<32x512xf32> to vector<32x512xbf16>
    %c0_10 = arith.constant 0 : index
    %c0_11 = arith.constant 0 : index
    %c0_12 = arith.constant 0 : index
    %35 = vector.load %arg2[%c0_10, %c0_11, %c0_12] : memref<3x512x512xbf16, #tpu.memory_space<vmem>>, vector<1x512x512xbf16>
    %36 = vector.shape_cast %35 : vector<1x512x512xbf16> to vector<512x512xbf16>
    %cst_13 = arith.constant dense<0.000000e+00> : vector<32x512xf32>
    %37 = tpu.matmul %34, %36, %cst_13 {dimension_numbers = #tpu.dot_dimension_numbers<[1], [0], [0], [1], [0, 0, 1, 1], [], []>} : vector<32x512xbf16>, vector<512x512xbf16>, vector<32x512xf32> -> vector<32x512xf32>
    %38 = arith.truncf %1 : vector<32x512xf32> to vector<32x512xbf16>
    %c1 = arith.constant 1 : index
    %c0_14 = arith.constant 0 : index
    %c0_15 = arith.constant 0 : index
    %39 = vector.load %arg2[%c1, %c0_14, %c0_15] : memref<3x512x512xbf16, #tpu.memory_space<vmem>>, vector<1x512x512xbf16>
    %40 = vector.shape_cast %39 : vector<1x512x512xbf16> to vector<512x512xbf16>
    %cst_16 = arith.constant dense<0.000000e+00> : vector<32x512xf32>
    %41 = tpu.matmul %38, %40, %cst_16 {dimension_numbers = #tpu.dot_dimension_numbers<[1], [0], [0], [1], [0, 0, 1, 1], [], []>} : vector<32x512xbf16>, vector<512x512xbf16>, vector<32x512xf32> -> vector<32x512xf32>
    %42 = arith.addf %37, %41 : vector<32x512xf32>
    %43 = arith.truncf %33 : vector<32x512xf32> to vector<32x512xbf16>
    %c2 = arith.constant 2 : index
    %c0_17 = arith.constant 0 : index
    %c0_18 = arith.constant 0 : index
    %44 = vector.load %arg2[%c2, %c0_17, %c0_18] : memref<3x512x512xbf16, #tpu.memory_space<vmem>>, vector<1x512x512xbf16>
    %45 = vector.shape_cast %44 : vector<1x512x512xbf16> to vector<512x512xbf16>
    %cst_19 = arith.constant dense<0.000000e+00> : vector<32x512xf32>
    %46 = tpu.matmul %43, %45, %cst_19 {dimension_numbers = #tpu.dot_dimension_numbers<[1], [0], [0], [1], [0, 0, 1, 1], [], []>} : vector<32x512xbf16>, vector<512x512xbf16>, vector<32x512xf32> -> vector<32x512xf32>
    %47 = arith.addf %42, %46 : vector<32x512xf32>
    %48 = vector.broadcast %23 : vector<1x512xf32> to vector<32x512xf32>
    %49 = arith.addf %47, %48 : vector<32x512xf32>
    %cst_20 = arith.constant 0.000000e+00 : f32
    %50 = vector.broadcast %cst_20 : f32 to vector<32x512xf32>
    %51 = arith.maximumf %49, %50 : vector<32x512xf32>
    %c0_21 = arith.constant 0 : index
    %c0_22 = arith.constant 0 : index
    %52 = vector.load %arg5[%c0_21, %c0_22] : memref<1x512xf32, #tpu.memory_space<vmem>>, vector<1x512xf32>
    %c1_i32_23 = arith.constant 1 : i32
    %53 = tpu.dynamic_rotate %51 by %c1_i32_23 dim 0 : vector<32x512xf32>, i32 -> vector<32x512xf32>
    %cst_24 = arith.constant 0.000000e+00 : f32
    %54 = vector.shape_cast %20 : vector<32x1xi1> to vector<32x1xi1>
    %55 = vector.broadcast %54 : vector<32x1xi1> to vector<32x512xi1>
    %56 = vector.broadcast %cst_24 : f32 to vector<32x512xf32>
    %57 = arith.select %55, %53, %56 : vector<32x512xi1>, vector<32x512xf32>
    %c31_i32_25 = arith.constant 31 : i32
    %58 = tpu.dynamic_rotate %51 by %c31_i32_25 dim 0 : vector<32x512xf32>, i32 -> vector<32x512xf32>
    %cst_26 = arith.constant 0.000000e+00 : f32
    %59 = vector.shape_cast %22 : vector<32x1xi1> to vector<32x1xi1>
    %60 = vector.broadcast %59 : vector<32x1xi1> to vector<32x512xi1>
    %61 = vector.broadcast %cst_26 : f32 to vector<32x512xf32>
    %62 = arith.select %60, %58, %61 : vector<32x512xi1>, vector<32x512xf32>
    %63 = arith.truncf %57 : vector<32x512xf32> to vector<32x512xbf16>
    %c0_27 = arith.constant 0 : index
    %c0_28 = arith.constant 0 : index
    %c0_29 = arith.constant 0 : index
    %64 = vector.load %arg4[%c0_27, %c0_28, %c0_29] : memref<3x512x512xbf16, #tpu.memory_space<vmem>>, vector<1x512x512xbf16>
    %65 = vector.shape_cast %64 : vector<1x512x512xbf16> to vector<512x512xbf16>
    %cst_30 = arith.constant dense<0.000000e+00> : vector<32x512xf32>
    %66 = tpu.matmul %63, %65, %cst_30 {dimension_numbers = #tpu.dot_dimension_numbers<[1], [0], [0], [1], [0, 0, 1, 1], [], []>} : vector<32x512xbf16>, vector<512x512xbf16>, vector<32x512xf32> -> vector<32x512xf32>
    %67 = arith.truncf %51 : vector<32x512xf32> to vector<32x512xbf16>
    %c1_31 = arith.constant 1 : index
    %c0_32 = arith.constant 0 : index
    %c0_33 = arith.constant 0 : index
    %68 = vector.load %arg4[%c1_31, %c0_32, %c0_33] : memref<3x512x512xbf16, #tpu.memory_space<vmem>>, vector<1x512x512xbf16>
    %69 = vector.shape_cast %68 : vector<1x512x512xbf16> to vector<512x512xbf16>
    %cst_34 = arith.constant dense<0.000000e+00> : vector<32x512xf32>
    %70 = tpu.matmul %67, %69, %cst_34 {dimension_numbers = #tpu.dot_dimension_numbers<[1], [0], [0], [1], [0, 0, 1, 1], [], []>} : vector<32x512xbf16>, vector<512x512xbf16>, vector<32x512xf32> -> vector<32x512xf32>
    %71 = arith.addf %66, %70 : vector<32x512xf32>
    %72 = arith.truncf %62 : vector<32x512xf32> to vector<32x512xbf16>
    %c2_35 = arith.constant 2 : index
    %c0_36 = arith.constant 0 : index
    %c0_37 = arith.constant 0 : index
    %73 = vector.load %arg4[%c2_35, %c0_36, %c0_37] : memref<3x512x512xbf16, #tpu.memory_space<vmem>>, vector<1x512x512xbf16>
    %74 = vector.shape_cast %73 : vector<1x512x512xbf16> to vector<512x512xbf16>
    %cst_38 = arith.constant dense<0.000000e+00> : vector<32x512xf32>
    %75 = tpu.matmul %72, %74, %cst_38 {dimension_numbers = #tpu.dot_dimension_numbers<[1], [0], [0], [1], [0, 0, 1, 1], [], []>} : vector<32x512xbf16>, vector<512x512xbf16>, vector<32x512xf32> -> vector<32x512xf32>
    %76 = arith.addf %71, %75 : vector<32x512xf32>
    %77 = vector.broadcast %52 : vector<1x512xf32> to vector<32x512xf32>
    %78 = arith.addf %76, %77 : vector<32x512xf32>
    %79 = vector.extract_strided_slice %78 {offsets = [0, 0], sizes = [16, 512], strides = [1, 1]} : vector<32x512xf32> to vector<16x512xf32>
    %cst_39 = arith.constant dense<0.000000e+00> : vector<512xf32>
    %80 = vector.multi_reduction <add>, %79, %cst_39 [0] : vector<16x512xf32> to vector<512xf32>
    %81 = vector.shape_cast %80 : vector<512xf32> to vector<1x512xf32>
    %82 = vector.extract_strided_slice %78 {offsets = [16, 0], sizes = [16, 512], strides = [1, 1]} : vector<32x512xf32> to vector<16x512xf32>
    %cst_40 = arith.constant dense<0.000000e+00> : vector<512xf32>
    %83 = vector.multi_reduction <add>, %82, %cst_40 [0] : vector<16x512xf32> to vector<512xf32>
    %84 = vector.shape_cast %83 : vector<512xf32> to vector<1x512xf32>
    %85 = tpu.concatenate %81, %84 in 0 : vector<1x512xf32>, vector<1x512xf32> -> vector<2x512xf32>
    %c0_41 = arith.constant 0 : index
    %c0_42 = arith.constant 0 : index
    %86 = vector.load %arg6[%c0_41, %c0_42] : memref<512x8xf32, #tpu.memory_space<vmem>>, vector<512x8xf32>
    %cst_43 = arith.constant dense<0.000000e+00> : vector<2x8xf32>
    %87 = tpu.matmul %85, %86, %cst_43 {dimension_numbers = #tpu.dot_dimension_numbers<[1], [0], [0], [1], [0, 0, 1, 1], [], []>} : vector<2x512xf32>, vector<512x8xf32>, vector<2x8xf32> -> vector<2x8xf32>
    %c0_44 = arith.constant 0 : index
    %c0_45 = arith.constant 0 : index
    %88 = vector.load %arg7[%c0_44, %c0_45] : memref<1x8xf32, #tpu.memory_space<vmem>>, vector<1x8xf32>
    %89 = vector.broadcast %88 : vector<1x8xf32> to vector<2x8xf32>
    %90 = arith.addf %87, %89 : vector<2x8xf32>
    %cst_46 = arith.constant 0.000000e+00 : f32
    %91 = vector.broadcast %cst_46 : f32 to vector<2x8xf32>
    %92 = arith.maximumf %90, %91 : vector<2x8xf32>
    %c0_47 = arith.constant 0 : index
    %c0_48 = arith.constant 0 : index
    %93 = vector.load %arg8[%c0_47, %c0_48] : memref<8x512xf32, #tpu.memory_space<vmem>>, vector<8x512xf32>
    %cst_49 = arith.constant dense<0.000000e+00> : vector<2x512xf32>
    %94 = tpu.matmul %92, %93, %cst_49 {dimension_numbers = #tpu.dot_dimension_numbers<[1], [0], [0], [1], [0, 0, 1, 1], [], []>} : vector<2x8xf32>, vector<8x512xf32>, vector<2x512xf32> -> vector<2x512xf32>
    %c0_50 = arith.constant 0 : index
    %c0_51 = arith.constant 0 : index
    %95 = vector.load %arg9[%c0_50, %c0_51] : memref<1x512xf32, #tpu.memory_space<vmem>>, vector<1x512xf32>
    %96 = vector.broadcast %95 : vector<1x512xf32> to vector<2x512xf32>
    %97 = arith.addf %94, %96 : vector<2x512xf32>
    %98 = arith.negf %97 : vector<2x512xf32>
    %99 = math.exp %98 : vector<2x512xf32>
    %cst_52 = arith.constant 1.000000e+00 : f32
    %100 = vector.broadcast %cst_52 : f32 to vector<2x512xf32>
    %101 = arith.addf %100, %99 : vector<2x512xf32>
    %102 = arith.divf %100, %101 : vector<2x512xf32>
    %103 = vector.extract_strided_slice %78 {offsets = [0, 0], sizes = [16, 512], strides = [1, 1]} : vector<32x512xf32> to vector<16x512xf32>
    %104 = vector.extract_strided_slice %102 {offsets = [0, 0], sizes = [1, 512], strides = [1, 1]} : vector<2x512xf32> to vector<1x512xf32>
    %105 = vector.broadcast %104 : vector<1x512xf32> to vector<16x512xf32>
    %106 = arith.mulf %103, %105 : vector<16x512xf32>
    %107 = vector.extract_strided_slice %1 {offsets = [0, 0], sizes = [16, 512], strides = [1, 1]} : vector<32x512xf32> to vector<16x512xf32>
    %108 = arith.addf %106, %107 : vector<16x512xf32>
    %c0_53 = arith.constant 0 : index
    %c0_54 = arith.constant 0 : index
    %c0_55 = arith.constant 0 : index
    %109 = vector.load %arg10[%c0_53, %c0_54, %c0_55] : memref<1x32x512xf32, #tpu.memory_space<vmem>>, vector<1x16x512xf32>
    %110 = vector.shape_cast %109 : vector<1x16x512xf32> to vector<16x512xf32>
    %111 = vector.shape_cast %108 : vector<16x512xf32> to vector<1x16x512xf32>
    tpu.vector_store %arg10[%c0_53, %c0_54, %c0_55], %111 {strides = array<i32>} : memref<1x32x512xf32, #tpu.memory_space<vmem>>, vector<1x16x512xf32>,
    %112 = vector.extract_strided_slice %78 {offsets = [16, 0], sizes = [16, 512], strides = [1, 1]} : vector<32x512xf32> to vector<16x512xf32>
    %113 = vector.extract_strided_slice %102 {offsets = [1, 0], sizes = [1, 512], strides = [1, 1]} : vector<2x512xf32> to vector<1x512xf32>
    %114 = vector.broadcast %113 : vector<1x512xf32> to vector<16x512xf32>
    %115 = arith.mulf %112, %114 : vector<16x512xf32>
    %116 = vector.extract_strided_slice %1 {offsets = [16, 0], sizes = [16, 512], strides = [1, 1]} : vector<32x512xf32> to vector<16x512xf32>
    %117 = arith.addf %115, %116 : vector<16x512xf32>
    %c0_56 = arith.constant 0 : index
    %c16 = arith.constant 16 : index
    %c0_57 = arith.constant 0 : index
    %118 = vector.load %arg10[%c0_56, %c16, %c0_57] : memref<1x32x512xf32, #tpu.memory_space<vmem>>, vector<1x16x512xf32>
    %119 = vector.shape_cast %118 : vector<1x16x512xf32> to vector<16x512xf32>
    %120 = vector.shape_cast %117 : vector<16x512xf32> to vector<1x16x512xf32>
    tpu.vector_store %arg10[%c0_56, %c16, %c0_57], %120 {strides = array<i32>} : memref<1x32x512xf32, #tpu.memory_space<vmem>>, vector<1x16x512xf32>,
    return
  }
  func.func @transform_0(%arg0: i32) -> (i32, i32, i32) {
    %c0_i32 = arith.constant 0 : i32
    %c0_i32_0 = arith.constant 0 : i32
    %c0_i32_1 = arith.constant 0 : i32
    return %arg0, %c0_i32, %c0_i32_0 : i32, i32, i32
  }
  func.func @transform_1(%arg0: i32) -> (i32, i32, i32) {
    %c0_i32 = arith.constant 0 : i32
    %c0_i32_0 = arith.constant 0 : i32
    %c0_i32_1 = arith.constant 0 : i32
    %c0_i32_2 = arith.constant 0 : i32
    return %c0_i32, %c0_i32_0, %c0_i32_1 : i32, i32, i32
  }
  func.func @transform_2(%arg0: i32) -> (i32, i32) {
    %c0_i32 = arith.constant 0 : i32
    %c0_i32_0 = arith.constant 0 : i32
    %c0_i32_1 = arith.constant 0 : i32
    return %c0_i32, %c0_i32_0 : i32, i32
  }
  func.func @transform_3(%arg0: i32) -> (i32, i32, i32) {
    %c0_i32 = arith.constant 0 : i32
    %c0_i32_0 = arith.constant 0 : i32
    %c0_i32_1 = arith.constant 0 : i32
    %c0_i32_2 = arith.constant 0 : i32
    return %c0_i32, %c0_i32_0, %c0_i32_1 : i32, i32, i32
  }
  func.func @transform_4(%arg0: i32) -> (i32, i32) {
    %c0_i32 = arith.constant 0 : i32
    %c0_i32_0 = arith.constant 0 : i32
    %c0_i32_1 = arith.constant 0 : i32
    return %c0_i32, %c0_i32_0 : i32, i32
  }
  func.func @transform_5(%arg0: i32) -> (i32, i32) {
    %c0_i32 = arith.constant 0 : i32
    %c0_i32_0 = arith.constant 0 : i32
    %c0_i32_1 = arith.constant 0 : i32
    return %c0_i32, %c0_i32_0 : i32, i32
  }
  func.func @transform_6(%arg0: i32) -> (i32, i32) {
    %c0_i32 = arith.constant 0 : i32
    %c0_i32_0 = arith.constant 0 : i32
    %c0_i32_1 = arith.constant 0 : i32
    return %c0_i32, %c0_i32_0 : i32, i32
  }
  func.func @transform_7(%arg0: i32) -> (i32, i32) {
    %c0_i32 = arith.constant 0 : i32
    %c0_i32_0 = arith.constant 0 : i32
    %c0_i32_1 = arith.constant 0 : i32
    return %c0_i32, %c0_i32_0 : i32, i32
  }
  func.func @transform_8(%arg0: i32) -> (i32, i32) {
    %c0_i32 = arith.constant 0 : i32
    %c0_i32_0 = arith.constant 0 : i32
    %c0_i32_1 = arith.constant 0 : i32
    return %c0_i32, %c0_i32_0 : i32, i32
  }
  func.func @transform_9(%arg0: i32) -> (i32, i32, i32) {
    %c0_i32 = arith.constant 0 : i32
    %c0_i32_0 = arith.constant 0 : i32
    %c0_i32_1 = arith.constant 0 : i32
    return %arg0, %c0_i32, %c0_i32_0 : i32, i32, i32
  }
}

</mosaic_0001>

<bundles_post_ra>
// kernel: tpu_custom_call.1
= control target key start
LH: loop header
LB: loop body
LE: loop exit
PB: predicated region body
PF: predicated region fallthrough
CT: control target
= control target key end

     0   :  { %14 = vsyncpa [#allocation3], 0  ;;  %s10818_s0 = inlined_call_operand.hbm [shape: f32[1,32,512], index: 0, kind: input, shape index: {}]   ;;  %s10819_s1 = inlined_call_operand.hbm [shape: bf16[3,512,512], index: 1, kind: input, shape index: {}]   ;;  %s10820_s2 = inlined_call_operand.hbm [shape: f32[1,512], index: 2, kind: input, shape index: {}]   ;;  %s10821_s3 = inlined_call_operand.hbm [shape: bf16[3,512,512], index: 3, kind: input, shape index: {}]   ;;  %s10822_s4 = inlined_call_operand.hbm [shape: f32[1,512], index: 4, kind: input, shape index: {}]   ;;  %s10823_s5 = inlined_call_operand.vmem [shape: f32[512,8], index: 5, kind: input, shape index: {}]   ;;  %s10824_s6 = inlined_call_operand.hbm [shape: f32[1,8], index: 6, kind: input, shape index: {}]   ;;  %s10825_s7 = inlined_call_operand.hbm [shape: f32[8,512], index: 7, kind: input, shape index: {}]   ;;  %s10826_s8 = inlined_call_operand.hbm [shape: f32[1,512], index: 8, kind: input, shape index: {}]   ;;  %s10827_s9 = inlined_call_operand.hbm [shape: f32[1,32,512], index: 9, kind: output, shape index: {}]  }
   0x1   :  { %15 = vsyncpa [#allocation6], 0 }
   0x2   :  { %16 = vsyncpa [#allocation9], 0 }
   0x3   :  { %17 = vsyncpa [#allocation12], 0 }
   0x4   :  { %18 = vsyncpa [#allocation15], 0 }
   0x5   :  { %19 = vsyncpa [#allocation4], 0  ;;  %s9731_s30 = smov [#allocation5]   ;;  %s9521_s13 = scalar_lea.hbm %s10819_s1, 49152 }
   0x6   :  { %s37_s10 = sshll.u32 %s9731_s30, 4  ;;  %p9522_p0 = scmp.ne.s32.totalorder %s10819_s1, %s9521_s13  ;;  %s38_s10 = int_to_ptr.vmem [resolvable:$true] %s37_s10 }
   0x7   :  { %p9525_p1 = scmp.lt.u32.totalorder %s9521_s13, %s10819_s1 }
   0x9   :  { %p9527_p2 = pnand %p9525_p1, %p9522_p0 }
   0xb   :  { %9530 = shalt.err (!%p9527_p2)
}
   0xc   :  { %s9531_s18 = scalar_lea.vmem %s38_s10, 49152  ;;  %p9536_p4 = scmp.lt.s32.totalorder %s38_s10, %s38_s10 }
   0xd   :  { %p9532_p3 = scmp.ne.s32.totalorder %s38_s10, %s9531_s18  ;;  %p9537_p5 = scmp.lt.s32.totalorder %s9531_s18, %s9531_s18 }
   0xf   :  { %p9538_p6 = por %p9537_p5, %p9536_p4 }
  0x11   :  { %p9539_p7 = pnand %p9538_p6, %p9532_p3 }
  0x13   :  { %9542 = shalt.err (!%p9539_p7)
}
  0x14   :  { %s9732_s19 = smov 256   ;;  %s9733_s20 = smov 16  }
  0x15   :  { %43 = dma.hbm_to_vmem [thread:$0]  %s10819_s1, 49152, %s38_s10, [#allocation6], %s9732_s19, %s9732_s19, %s9733_s20  }
  0x16   :  { %s9734_s23 = smov [#allocation8]   ;;  %s9735_s25 = smov [#allocation11]  }
  0x17   :  { %s59_s24 = sshll.u32 %s9734_s23, 4  ;;  %s84_s26 = sshll.u32 %s9735_s25, 4  ;;  %s60_s24 = int_to_ptr.vmem [resolvable:$true] %s59_s24  ;;  %s85_s26 = int_to_ptr.vmem [resolvable:$true] %s84_s26 }
  0x18   :  { %s9543_s29 = scalar_lea.hbm %s10821_s3, 49152 }
  0x19   :  { %p9544_p8 = scmp.ne.s32.totalorder %s10821_s3, %s9543_s29  ;;  %p9547_p9 = scmp.lt.u32.totalorder %s9543_s29, %s10821_s3 }
  0x1b   :  { %p9549_p10 = pnand %p9547_p9, %p9544_p8 }
  0x1d   :  { %9552 = shalt.err (!%p9549_p10)
}
  0x1e   :  { %s9553_s1 = scalar_lea.vmem %s60_s24, 49152  ;;  %p9558_p12 = scmp.lt.s32.totalorder %s60_s24, %s60_s24 }
  0x1f   :  { %p9554_p11 = scmp.ne.s32.totalorder %s60_s24, %s9553_s1  ;;  %p9559_p13 = scmp.lt.s32.totalorder %s9553_s1, %s9553_s1 }
  0x21   :  { %p9560_p0 = por %p9559_p13, %p9558_p12 }
  0x23   :  { %p9561_p1 = pnand %p9560_p0, %p9554_p11 }
  0x25   :  { %9564 = shalt.err (!%p9561_p1)
}
  0x26   :  { %65 = dma.hbm_to_vmem [thread:$0]  %s10821_s3, 49152, %s60_s24, [#allocation9], %s9732_s19, %s9732_s19, %s9733_s20  }
  0x27   :  { %s9565_s17 = scalar_lea.hbm %s10824_s6, 16 }
  0x28   :  { %p9566_p2 = scmp.ne.s32.totalorder %s10824_s6, %s9565_s17  ;;  %p9569_p3 = scmp.lt.u32.totalorder %s9565_s17, %s10824_s6 }
  0x2a   :  { %p9571_p4 = pnand %p9569_p3, %p9566_p2 }
  0x2c   :  { %9574 = shalt.err (!%p9571_p4)
}
  0x2d   :  { %s9575_s25 = scalar_lea.vmem %s85_s26, 16  ;;  %s9579_s27 = scalar_lea.vmem %s85_s26, 32 }
  0x2e   :  { %p9576_p5 = scmp.ne.s32.totalorder %s85_s26, %s9575_s25  ;;  %p9580_p6 = scmp.lt.s32.totalorder %s85_s26, %s85_s26 }
  0x2f   :  { %p9581_p7 = scmp.lt.s32.totalorder %s9579_s27, %s9575_s25 }
  0x31   :  { %p9582_p8 = por %p9581_p7, %p9580_p6 }
  0x33   :  { %p9583_p9 = pnand %p9582_p8, %p9576_p5 }
  0x35   :  { %9586 = shalt.err (!%p9583_p9)
}
  0x36   :  { %87 = dma.hbm_to_vmem [thread:$0]  %s10824_s6, 16, %s85_s26, [#allocation12]  }
  0x37   :  { %s9736_s20 = smov [#allocation2]   ;;  %s9587_s30 = scalar_lea.hbm %s10818_s0, 2048 }
  0x38   :  { %s25_s24 = sshll.u32 %s9736_s20, 4  ;;  %p9588_p10 = scmp.ne.s32.totalorder %s10818_s0, %s9587_s30  ;;  %s26_s24 = int_to_ptr.vmem [resolvable:$true] %s25_s24 }
  0x39   :  { %p9591_p11 = scmp.lt.u32.totalorder %s9587_s30, %s10818_s0 }
  0x3b   :  { %p9593_p12 = pnand %p9591_p11, %p9588_p10 }
  0x3d   :  { %9596 = shalt.err (!%p9593_p12)
}
  0x3e   :  { %s9597_s10 = scalar_lea.vmem %s26_s24, 2048  ;;  %p9602_p0 = scmp.lt.s32.totalorder %s26_s24, %s26_s24 }
  0x3f   :  { %p9598_p13 = scmp.ne.s32.totalorder %s26_s24, %s9597_s10  ;;  %p9603_p1 = scmp.lt.s32.totalorder %s9597_s10, %s9597_s10 }
  0x41   :  { %p9604_p2 = por %p9603_p1, %p9602_p0 }
  0x43   :  { %p9605_p3 = pnand %p9604_p2, %p9598_p13 }
  0x45   :  { %9608 = shalt.err (!%p9605_p3)
}
  0x46   :  { %s9737_s6 = smov 512   ;;  %s9738_s26 = smov 32  }
  0x47   :  { %31 = dma.hbm_to_vmem [thread:$0]  %s10818_s0, 2048, %s26_s24, [#allocation3], %s9737_s6, %s9737_s6, %s9738_s26  }
  0x48   :  { %s9739_s16 = smov [#allocation7]   ;;  %s9740_s18 = smov [#allocation10]  }
  0x49   :  { %s50_s17 = sshll.u32 %s9739_s16, 4  ;;  %s72_s21 = sshll.u32 %s9740_s18, 4  ;;  %s51_s17 = int_to_ptr.vmem [resolvable:$true] %s50_s17  ;;  %s73_s21 = int_to_ptr.vmem [resolvable:$true] %s72_s21 }
  0x4a   :  { %s9609_s25 = scalar_lea.hbm %s10820_s2, 64 }
  0x4b   :  { %p9610_p4 = scmp.ne.s32.totalorder %s10820_s2, %s9609_s25  ;;  %p9613_p5 = scmp.lt.u32.totalorder %s9609_s25, %s10820_s2 }
  0x4d   :  { %p9615_p6 = pnand %p9613_p5, %p9610_p4 }
  0x4f   :  { %9618 = shalt.err (!%p9615_p6)
}
  0x50   :  { %s9619_s0 = scalar_lea.vmem %s51_s17, 64  ;;  %p9624_p8 = scmp.lt.s32.totalorder %s51_s17, %s51_s17 }
  0x51   :  { %p9620_p7 = scmp.ne.s32.totalorder %s51_s17, %s9619_s0  ;;  %p9625_p9 = scmp.lt.s32.totalorder %s9619_s0, %s9619_s0 }
  0x53   :  { %p9626_p10 = por %p9625_p9, %p9624_p8 }
  0x55   :  { %p9627_p11 = pnand %p9626_p10, %p9620_p7 }
  0x57   :  { %9630 = shalt.err (!%p9627_p11)
}
  0x58   :  { %53 = dma.hbm_to_vmem [thread:$0]  %s10820_s2, 64, %s51_s17, [#allocation6]  }
  0x59   :  { %s9631_s11 = scalar_lea.hbm %s10822_s4, 64 }
  0x5a   :  { %p9632_p12 = scmp.ne.s32.totalorder %s10822_s4, %s9631_s11  ;;  %p9635_p13 = scmp.lt.u32.totalorder %s9631_s11, %s10822_s4 }
  0x5c   :  { %p9637_p0 = pnand %p9635_p13, %p9632_p12 }
  0x5e   :  { %9640 = shalt.err (!%p9637_p0)
}
  0x5f   :  { %s9641_s14 = scalar_lea.vmem %s73_s21, 64  ;;  %p9646_p2 = scmp.lt.s32.totalorder %s73_s21, %s73_s21 }
  0x60   :  { %p9642_p1 = scmp.ne.s32.totalorder %s73_s21, %s9641_s14  ;;  %p9647_p3 = scmp.lt.s32.totalorder %s9641_s14, %s9641_s14 }
  0x62   :  { %p9648_p4 = por %p9647_p3, %p9646_p2 }
  0x64   :  { %p9649_p5 = pnand %p9648_p4, %p9642_p1 }
  0x66   :  { %9652 = shalt.err (!%p9649_p5)
}
  0x67   :  { %75 = dma.hbm_to_vmem [thread:$0]  %s10822_s4, 64, %s73_s21, [#allocation9]  }
  0x68   :  { %s9741_s16 = smov [#allocation13]   ;;  %s9742_s18 = smov [#allocation14]  }
  0x69   :  { %s94_s17 = sshll.u32 %s9741_s16, 4  ;;  %s104_s22 = sshll.u32 %s9742_s18, 4  ;;  %s95_s17 = int_to_ptr.vmem [resolvable:$true] %s94_s17  ;;  %s105_s22 = int_to_ptr.vmem [resolvable:$true] %s104_s22 }
  0x6a   :  { %s9653_s27 = scalar_lea.hbm %s10825_s7, 512 }
  0x6b   :  { %p9654_p6 = scmp.ne.s32.totalorder %s10825_s7, %s9653_s27  ;;  %p9657_p7 = scmp.lt.u32.totalorder %s9653_s27, %s10825_s7 }
  0x6d   :  { %p9659_p8 = pnand %p9657_p7, %p9654_p6 }
  0x6f   :  { %9662 = shalt.err (!%p9659_p8)
}
  0x70   :  { %s9663_s4 = scalar_lea.vmem %s95_s17, 512  ;;  %p9668_p10 = scmp.lt.s32.totalorder %s95_s17, %s95_s17 }
  0x71   :  { %p9664_p9 = scmp.ne.s32.totalorder %s95_s17, %s9663_s4  ;;  %p9669_p11 = scmp.lt.s32.totalorder %s9663_s4, %s9663_s4 }
  0x73   :  { %p9670_p12 = por %p9669_p11, %p9668_p10 }
  0x75   :  { %p9671_p13 = pnand %p9670_p12, %p9664_p9 }
  0x77   :  { %9674 = shalt.err (!%p9671_p13)
}
  0x78   :  { %97 = dma.hbm_to_vmem [thread:$0]  %s10825_s7, 512, %s95_s17, [#allocation12]  }
  0x79   :  { %s9675_s30 = scalar_lea.hbm %s10826_s8, 64 }
  0x7a   :  { %p9676_p0 = scmp.ne.s32.totalorder %s10826_s8, %s9675_s30  ;;  %p9679_p1 = scmp.lt.u32.totalorder %s9675_s30, %s10826_s8 }
  0x7c   :  { %p9681_p2 = pnand %p9679_p1, %p9676_p0 }
  0x7e   :  { %9684 = shalt.err (!%p9681_p2)
}
  0x7f   :  { %s9685_s10 = scalar_lea.vmem %s105_s22, 64  ;;  %p9690_p4 = scmp.lt.s32.totalorder %s105_s22, %s105_s22 }
  0x80   :  { %p9686_p3 = scmp.ne.s32.totalorder %s105_s22, %s9685_s10  ;;  %p9691_p5 = scmp.lt.s32.totalorder %s9685_s10, %s9685_s10 }
  0x82   :  { %p9692_p6 = por %p9691_p5, %p9690_p4 }
  0x84   :  { %p9693_p7 = pnand %p9692_p6, %p9686_p3 }
  0x86   :  { %9696 = shalt.err (!%p9693_p7)
}
  0x87   :  { %107 = dma.hbm_to_vmem [thread:$0]  %s10826_s8, 64, %s105_s22, [#allocation15]  }
  0x88   :  { %9719 = dma.done.wait [#allocation3], 2048  }
  0x89   :  { %9720 = vsyncadd [#allocation3], 4294965248 }
  0x8a   :  { %9721 = dma.done.wait [#allocation6], 49216  }
  0x8b   :  { %9722 = vsyncadd [#allocation6], 4294918080 }
  0x8c   :  { %9723 = dma.done.wait [#allocation9], 49216  }
  0x8d   :  { %9724 = vsyncadd [#allocation9], 4294918080 }
  0x8e   :  { %9725 = dma.done.wait [#allocation12], 528  }
  0x8f   :  { %9726 = vsyncadd [#allocation12], 4294966768 }
  0x90   :  { %9727 = dma.done.wait [#allocation15], 64  }
  0x91   :  { %9728 = vsyncadd [#allocation15], 4294967232  ;;  %v8321_v0 = vld [vmem:[#allocation5 + $0x404] ss:$16 sps:$4 sm:$0xff]   ;;  %v8323_v1 = vld [vmem:[#allocation5 + $0x40c] ss:$16 sps:$4 sm:$0xff]  }
  0x92   :  { %1237 = vmatprep.subr.bf16.mxu0 %v8321_v0  ;;  %v8325_v2 = vld [vmem:[#allocation5 + $0x400] ss:$16 sps:$4 sm:$0xff]   ;;  %v8326_v3 = vld [vmem:[#allocation5 + $0x408] ss:$16 sps:$4 sm:$0xff]   ;;  %1343 = vmatprep.subr.bf16.mxu1 %v8323_v1  ;;  %v8327_v4 = vld [vmem:[#allocation5 + $0x424] ss:$16 sps:$4 sm:$0xff]  }
  0x93   :  { %1238 = vmatpush1.bf16.msra.mxu0 %v8325_v2  ;;  %1344 = vmatpush1.bf16.msra.mxu1 %v8326_v3  ;;  %v8329_v5 = vld [vmem:[#allocation5 + $0x42c] ss:$16 sps:$4 sm:$0xff]   ;;  %v8331_v6 = vld [vmem:[#allocation5 + $0x420] ss:$16 sps:$4 sm:$0xff]   ;;  %v8332_v7 = vld [vmem:[#allocation5 + $0x428] ss:$16 sps:$4 sm:$0xff]  }
  0x94   :  { %1239 = vmatprep.subr.bf16.mxu0 %v8327_v4  ;;  %1345 = vmatprep.subr.bf16.mxu1 %v8329_v5  ;;  %v8333_v8 = vld [vmem:[#allocation5 + $0x444] ss:$16 sps:$4 sm:$0xff]   ;;  %v8335_v9 = vld [vmem:[#allocation5 + $0x44c] ss:$16 sps:$4 sm:$0xff]   ;;  %v8337_v10 = vld [vmem:[#allocation5 + $0x440] ss:$16 sps:$4 sm:$0xff]  }
  0x95   :  { %v8338_v11 = vld [vmem:[#allocation5 + $0x448] ss:$16 sps:$4 sm:$0xff]   ;;  %v8339_v12 = vld [vmem:[#allocation5 + $0x464] ss:$16 sps:$4 sm:$0xff]   ;;  %v8341_v13 = vld [vmem:[#allocation5 + $0x46c] ss:$16 sps:$4 sm:$0xff]  }
  0x96   :  { %v8343_v14 = vld [vmem:[#allocation5 + $0x460] ss:$16 sps:$4 sm:$0xff]   ;;  %v8344_v15 = vld [vmem:[#allocation5 + $0x468] ss:$16 sps:$4 sm:$0xff]   ;;  %v8345_v16 = vld [vmem:[#allocation5 + $0x484] ss:$16 sps:$4 sm:$0xff]  }
  0x97   :  { %1240 = vmatpush1.bf16.msra.mxu0 %v8331_v6  ;;  %1346 = vmatpush1.bf16.msra.mxu1 %v8332_v7  ;;  %v8347_v17 = vld [vmem:[#allocation5 + $0x48c] ss:$16 sps:$4 sm:$0xff]   ;;  %v8349_v18 = vld [vmem:[#allocation5 + $0x480] ss:$16 sps:$4 sm:$0xff]   ;;  %v8350_v19 = vld [vmem:[#allocation5 + $0x488] ss:$16 sps:$4 sm:$0xff]  }
  0x98   :  { %1241 = vmatprep.subr.bf16.mxu0 %v8333_v8  ;;  %1347 = vmatprep.subr.bf16.mxu1 %v8335_v9  ;;  %v8351_v20 = vld [vmem:[#allocation5 + $0x4a4] ss:$16 sps:$4 sm:$0xff]   ;;  %v8353_v21 = vld [vmem:[#allocation5 + $0x4ac] ss:$16 sps:$4 sm:$0xff]   ;;  %v8355_v22 = vld [vmem:[#allocation5 + $0x4a0] ss:$16 sps:$4 sm:$0xff]  }
  0x99   :  { %v8356_v23 = vld [vmem:[#allocation5 + $0x4a8] ss:$16 sps:$4 sm:$0xff]   ;;  %v8357_v24 = vld [vmem:[#allocation5 + $0x4c4] ss:$16 sps:$4 sm:$0xff]   ;;  %v8359_v25 = vld [vmem:[#allocation5 + $0x4cc] ss:$16 sps:$4 sm:$0xff]  }
  0x9a   :  { %v8361_v26 = vld [vmem:[#allocation5 + $0x4c0] ss:$16 sps:$4 sm:$0xff]   ;;  %v8362_v27 = vld [vmem:[#allocation5 + $0x4c8] ss:$16 sps:$4 sm:$0xff]   ;;  %v8363_v28 = vld [vmem:[#allocation5 + $0x4e4] ss:$16 sps:$4 sm:$0xff]  }
  0x9b   :  { %1242 = vmatpush1.bf16.msra.mxu0 %v8337_v10  ;;  %1348 = vmatpush1.bf16.msra.mxu1 %v8338_v11  ;;  %v8365_v29 = vld [vmem:[#allocation5 + $0x4ec] ss:$16 sps:$4 sm:$0xff]   ;;  %v8367_v30 = vld [vmem:[#allocation5 + $0x4e0] ss:$16 sps:$4 sm:$0xff]   ;;  %v8368_v31 = vld [vmem:[#allocation5 + $0x4e8] ss:$16 sps:$4 sm:$0xff]  }
  0x9c   :  { %1243 = vmatprep.subr.bf16.mxu0 %v8339_v12  ;;  %1349 = vmatprep.subr.bf16.mxu1 %v8341_v13  ;;  %v8369_v32 = vld [vmem:[#allocation5 + $0x504] ss:$16 sps:$4 sm:$0xff]   ;;  %v8371_v33 = vld [vmem:[#allocation5 + $0x50c] ss:$16 sps:$4 sm:$0xff]   ;;  %v8373_v34 = vld [vmem:[#allocation5 + $0x500] ss:$16 sps:$4 sm:$0xff]  }
  0x9d   :  { %v8374_v35 = vld [vmem:[#allocation5 + $0x508] ss:$16 sps:$4 sm:$0xff]   ;;  %v8375_v36 = vld [vmem:[#allocation5 + $0x524] ss:$16 sps:$4 sm:$0xff]   ;;  %v8377_v37 = vld [vmem:[#allocation5 + $0x52c] ss:$16 sps:$4 sm:$0xff]  }
  0x9e   :  { %v8379_v38 = vld [vmem:[#allocation5 + $0x520] ss:$16 sps:$4 sm:$0xff]   ;;  %v8380_v39 = vld [vmem:[#allocation5 + $0x528] ss:$16 sps:$4 sm:$0xff]   ;;  %v8381_v40 = vld [vmem:[#allocation5 + $0x544] ss:$16 sps:$4 sm:$0xff]  }
  0x9f   :  { %1244 = vmatpush1.bf16.msra.mxu0 %v8343_v14  ;;  %1350 = vmatpush1.bf16.msra.mxu1 %v8344_v15  ;;  %v8383_v41 = vld [vmem:[#allocation5 + $0x54c] ss:$16 sps:$4 sm:$0xff]   ;;  %v8385_v42 = vld [vmem:[#allocation5 + $0x540] ss:$16 sps:$4 sm:$0xff]   ;;  %v8386_v43 = vld [vmem:[#allocation5 + $0x548] ss:$16 sps:$4 sm:$0xff]  }
  0xa0   :  { %1245 = vmatprep.subr.bf16.mxu0 %v8345_v16  ;;  %1351 = vmatprep.subr.bf16.mxu1 %v8347_v17  ;;  %v8387_v44 = vld [vmem:[#allocation5 + $0x564] ss:$16 sps:$4 sm:$0xff]   ;;  %v8389_v45 = vld [vmem:[#allocation5 + $0x56c] ss:$16 sps:$4 sm:$0xff]   ;;  %v8391_v48 = vld [vmem:[#allocation5 + $0x560] ss:$16 sps:$4 sm:$0xff]  }
  0xa1   :  { %v9895_v46 = vld [vmem:[#allocation2 + $0x8] sm:$0xff]  ;;  %v8393_v50 = vld [vmem:[#allocation5 + $0x584] ss:$16 sps:$4 sm:$0xff]   ;;  %v8397_v53 = vld [vmem:[#allocation5 + $0x580] ss:$16 sps:$4 sm:$0xff]   ;;  %vm9743_vm2 = vmmov 1  }
  0xa2   :  { %v9897_v47 = vld [vmem:[#allocation2 + $0x28] sm:$0xff]  ;;  %v8399_v55 = vld [vmem:[#allocation5 + $0x5a4] ss:$16 sps:$4 sm:$0xff]   ;;  %v8403_v57 = vld [vmem:[#allocation5 + $0x5a0] ss:$16 sps:$4 sm:$0xff]   ;;  %vm6531_vm11 = vcmask 1040384  }
  0xa3   :  { %1246 = vmatpush1.bf16.msra.mxu0 %v8349_v18  ;;  %1352 = vmatpush1.bf16.msra.mxu1 %v8350_v19  ;;  %v8392_v49 = vld [vmem:[#allocation5 + $0x568] ss:$16 sps:$4 sm:$0xff]   ;;  %v461_v51 = vpack.c.bf16 %v9897_v47, %v9895_v46  ;;  %v8395_v52 = vld [vmem:[#allocation5 + $0x58c] ss:$16 sps:$4 sm:$0xff]   ;;  %v8405_v59 = vld [vmem:[#allocation5 + $0x5c4] ss:$16 sps:$4 sm:$0xff]  }
  0xa4   :  { %1247 = vmatprep.subr.bf16.mxu0 %v8351_v20  ;;  %1353 = vmatprep.subr.bf16.mxu1 %v8353_v21  ;;  %v8398_v54 = vld [vmem:[#allocation5 + $0x588] ss:$16 sps:$4 sm:$0xff]   ;;  %v8401_v56 = vld [vmem:[#allocation5 + $0x5ac] ss:$16 sps:$4 sm:$0xff]   ;;  %v8409_v61 = vld [vmem:[#allocation5 + $0x5c0] ss:$16 sps:$4 sm:$0xff]  }
  0xa5   :  { %1269 = vmatprep.mubr.bf16.mxu0 %v461_v51  ;;  %1375 = vmatprep.mubr.bf16.mxu1 %v461_v51  ;;  %v8404_v58 = vld [vmem:[#allocation5 + $0x5a8] ss:$16 sps:$4 sm:$0xff]   ;;  %v8407_v60 = vld [vmem:[#allocation5 + $0x5cc] ss:$16 sps:$4 sm:$0xff]   ;;  %v8411_v63 = vld [vmem:[#allocation5 + $0x5e4] ss:$16 sps:$4 sm:$0xff]  }
  0xa6   :  { %v8410_v62 = vld [vmem:[#allocation5 + $0x5c8] ss:$16 sps:$4 sm:$0xff]   ;;  %v8413_v0 = vld [vmem:[#allocation5 + $0x5ec] ss:$16 sps:$4 sm:$0xff]   ;;  %v8415_v1 = vld [vmem:[#allocation5 + $0x5e0] ss:$16 sps:$4 sm:$0xff]  }
  0xa7   :  { %1248 = vmatpush1.bf16.msra.mxu0 %v8355_v22  ;;  %1354 = vmatpush1.bf16.msra.mxu1 %v8356_v23  ;;  %v8416_v2 = vld [vmem:[#allocation5 + $0x5e8] ss:$16 sps:$4 sm:$0xff]   ;;  %v9901_v3 = vld [vmem:[#allocation2] sm:$0xff]  ;;  %v8422_v6 = vld [vmem:[#allocation5 + $0x60c] ss:$16 sps:$4 sm:$0xff]   ;;  %vm6774_vm12 = vcmask 64512  }
  0xa8   :  { %1249 = vmatprep.subr.bf16.mxu0 %v8357_v24  ;;  %1355 = vmatprep.subr.bf16.mxu1 %v8359_v25  ;;  %v9903_v4 = vld [vmem:[#allocation2 + $0x20] sm:$0xff]  ;;  %v8420_v9 = vld [vmem:[#allocation5 + $0x608] ss:$16 sps:$4 sm:$0xff]   ;;  %v8428_v11 = vld [vmem:[#allocation5 + $0x62c] ss:$16 sps:$4 sm:$0xff]  }
  0xa9   :  { %v8419_v5 = vld [vmem:[#allocation5 + $0x604] ss:$16 sps:$4 sm:$0xff]   ;;  %v460_v7 = vpack.c.bf16 %v9903_v4, %v9901_v3  ;;  %v8417_v8 = vld [vmem:[#allocation5 + $0x600] ss:$16 sps:$4 sm:$0xff]   ;;  %v8426_v13 = vld [vmem:[#allocation5 + $0x628] ss:$16 sps:$4 sm:$0xff]  }
  0xaa   :  { %v8425_v10 = vld [vmem:[#allocation5 + $0x624] ss:$16 sps:$4 sm:$0xff]   ;;  %v8423_v12 = vld [vmem:[#allocation5 + $0x620] ss:$16 sps:$4 sm:$0xff]   ;;  %v8434_v15 = vld [vmem:[#allocation5 + $0x64c] ss:$16 sps:$4 sm:$0xff]  }
  0xab   :  { %1250 = vmatpush1.bf16.msra.mxu0 %v8361_v26  ;;  %1356 = vmatpush1.bf16.msra.mxu1 %v8362_v27  ;;  %v8431_v14 = vld [vmem:[#allocation5 + $0x644] ss:$16 sps:$4 sm:$0xff]   ;;  %v8429_v16 = vld [vmem:[#allocation5 + $0x640] ss:$16 sps:$4 sm:$0xff]   ;;  %v8432_v17 = vld [vmem:[#allocation5 + $0x648] ss:$16 sps:$4 sm:$0xff]  }
  0xac   :  { %1251 = vmatprep.subr.bf16.mxu0 %v8363_v28  ;;  %1357 = vmatprep.subr.bf16.mxu1 %v8365_v29  ;;  %v8437_v18 = vld [vmem:[#allocation5 + $0x664] ss:$16 sps:$4 sm:$0xff]   ;;  %v8440_v19 = vld [vmem:[#allocation5 + $0x66c] ss:$16 sps:$4 sm:$0xff]   ;;  %v8435_v20 = vld [vmem:[#allocation5 + $0x660] ss:$16 sps:$4 sm:$0xff]  }
  0xad   :  { %v8438_v21 = vld [vmem:[#allocation5 + $0x668] ss:$16 sps:$4 sm:$0xff]   ;;  %v8443_v22 = vld [vmem:[#allocation5 + $0x684] ss:$16 sps:$4 sm:$0xff]   ;;  %v8446_v23 = vld [vmem:[#allocation5 + $0x68c] ss:$16 sps:$4 sm:$0xff]  }
  0xae   :  { %v8441_v24 = vld [vmem:[#allocation5 + $0x680] ss:$16 sps:$4 sm:$0xff]   ;;  %v8444_v25 = vld [vmem:[#allocation5 + $0x688] ss:$16 sps:$4 sm:$0xff]   ;;  %v8449_v26 = vld [vmem:[#allocation5 + $0x6a4] ss:$16 sps:$4 sm:$0xff]  }
  0xaf   :  { %1252 = vmatpush1.bf16.msra.mxu0 %v8367_v30  ;;  %1358 = vmatpush1.bf16.msra.mxu1 %v8368_v31  ;;  %v8452_v27 = vld [vmem:[#allocation5 + $0x6ac] ss:$16 sps:$4 sm:$0xff]   ;;  %v8447_v30 = vld [vmem:[#allocation5 + $0x6a0] ss:$16 sps:$4 sm:$0xff]   ;;  %v8450_v31 = vld [vmem:[#allocation5 + $0x6a8] ss:$16 sps:$4 sm:$0xff]  }
  0xb0   :  { %1253 = vmatprep.subr.bf16.mxu0 %v8369_v32  ;;  %1359 = vmatprep.subr.bf16.mxu1 %v8371_v33  ;;  %v9907_v28 = vld [vmem:[#allocation2 + $0x48] sm:$0xff]  ;;  %v8455_v33 = vld [vmem:[#allocation5 + $0x6c4] ss:$16 sps:$4 sm:$0xff]   ;;  %v8465_v51 = vld [vmem:[#allocation5 + $0x700] ss:$16 sps:$4 sm:$0xff]  }
  0xb1   :  { %v9909_v29 = vld [vmem:[#allocation2 + $0x68] sm:$0xff] }
  0xb2   :  { %v465_v32 = vpack.c.bf16 %v9909_v29, %v9907_v28 }
  0xb3   :  { %1254 = vmatpush1.bf16.msra.mxu0 %v8373_v34  ;;  %1360 = vmatpush1.bf16.msra.mxu1 %v8374_v35  ;;  %v8458_v34 = vld [vmem:[#allocation5 + $0x6cc] ss:$16 sps:$4 sm:$0xff]   ;;  %v9913_v35 = vld [vmem:[#allocation2 + $0x40] sm:$0xff] }
  0xb4   :  { %1255 = vmatprep.subr.bf16.mxu0 %v8375_v36  ;;  %1361 = vmatprep.subr.bf16.mxu1 %v8377_v37  ;;  %v9915_v36 = vld [vmem:[#allocation2 + $0x60] sm:$0xff] }
  0xb5   :  { %v8453_v37 = vld [vmem:[#allocation5 + $0x6c0] ss:$16 sps:$4 sm:$0xff]  }
  0xb7   :  { %1256 = vmatpush1.bf16.msra.mxu0 %v8379_v38  ;;  %1362 = vmatpush1.bf16.msra.mxu1 %v8380_v39  ;;  %v8456_v38 = vld [vmem:[#allocation5 + $0x6c8] ss:$16 sps:$4 sm:$0xff]   ;;  %v464_v39 = vpack.c.bf16 %v9915_v36, %v9913_v35 }
  0xb8   :  { %1257 = vmatprep.subr.bf16.mxu0 %v8381_v40  ;;  %1363 = vmatprep.subr.bf16.mxu1 %v8383_v41  ;;  %v8461_v40 = vld [vmem:[#allocation5 + $0x6e4] ss:$16 sps:$4 sm:$0xff]   ;;  %v8464_v41 = vld [vmem:[#allocation5 + $0x6ec] ss:$16 sps:$4 sm:$0xff]  }
  0xbb   :  { %1258 = vmatpush1.bf16.msra.mxu0 %v8385_v42  ;;  %1364 = vmatpush1.bf16.msra.mxu1 %v8386_v43  ;;  %v9919_v42 = vld [vmem:[#allocation2 + $0x18] sm:$0xff] }
  0xbc   :  { %1259 = vmatprep.subr.bf16.mxu0 %v8387_v44  ;;  %1365 = vmatprep.subr.bf16.mxu1 %v8389_v45  ;;  %v9921_v43 = vld [vmem:[#allocation2 + $0x38] sm:$0xff]  ;;  %v8459_v45 = vld [vmem:[#allocation5 + $0x6e0] ss:$16 sps:$4 sm:$0xff]  }
  0xbd   :  { %v463_v44 = vpack.c.bf16 %v9921_v43, %v9919_v42 }
  0xbf   :  { %1260 = vmatpush1.bf16.msra.mxu0 %v8391_v48  ;;  %1366 = vmatpush1.bf16.msra.mxu1 %v8392_v49  ;;  %v8462_v48 = vld [vmem:[#allocation5 + $0x6e8] ss:$16 sps:$4 sm:$0xff]   ;;  %v8467_v49 = vld [vmem:[#allocation5 + $0x704] ss:$16 sps:$4 sm:$0xff]  }
  0xc0   :  { %1261 = vmatprep.subr.bf16.mxu0 %v8393_v50  ;;  %1367 = vmatprep.subr.bf16.mxu1 %v8395_v52  ;;  %v8470_v50 = vld [vmem:[#allocation5 + $0x70c] ss:$16 sps:$4 sm:$0xff]   ;;  %v8468_v52 = vld [vmem:[#allocation5 + $0x708] ss:$16 sps:$4 sm:$0xff]  }
  0xc3   :  { %1262 = vmatpush1.bf16.msra.mxu0 %v8397_v53  ;;  %1368 = vmatpush1.bf16.msra.mxu1 %v8398_v54  ;;  %v8473_v53 = vld [vmem:[#allocation5 + $0x724] ss:$16 sps:$4 sm:$0xff]   ;;  %v8476_v54 = vld [vmem:[#allocation5 + $0x72c] ss:$16 sps:$4 sm:$0xff]  }
  0xc4   :  { %1263 = vmatprep.subr.bf16.mxu0 %v8399_v55  ;;  %1369 = vmatprep.subr.bf16.mxu1 %v8401_v56  ;;  %v8471_v55 = vld [vmem:[#allocation5 + $0x720] ss:$16 sps:$4 sm:$0xff]   ;;  %v8474_v56 = vld [vmem:[#allocation5 + $0x728] ss:$16 sps:$4 sm:$0xff]  }
  0xc7   :  { %1264 = vmatpush1.bf16.msra.mxu0 %v8403_v57  ;;  %1370 = vmatpush1.bf16.msra.mxu1 %v8404_v58  ;;  %v8479_v57 = vld [vmem:[#allocation5 + $0x744] ss:$16 sps:$4 sm:$0xff]   ;;  %v8482_v58 = vld [vmem:[#allocation5 + $0x74c] ss:$16 sps:$4 sm:$0xff]  }
  0xc8   :  { %1265 = vmatprep.subr.bf16.mxu0 %v8405_v59  ;;  %1371 = vmatprep.subr.bf16.mxu1 %v8407_v60  ;;  %v8477_v59 = vld [vmem:[#allocation5 + $0x740] ss:$16 sps:$4 sm:$0xff]   ;;  %v8480_v60 = vld [vmem:[#allocation5 + $0x748] ss:$16 sps:$4 sm:$0xff]  }
  0xcb   :  { %1266 = vmatpush1.bf16.msra.mxu0 %v8409_v61  ;;  %1372 = vmatpush1.bf16.msra.mxu1 %v8410_v62  ;;  %v8485_v61 = vld [vmem:[#allocation5 + $0x764] ss:$16 sps:$4 sm:$0xff]   ;;  %v8488_v62 = vld [vmem:[#allocation5 + $0x76c] ss:$16 sps:$4 sm:$0xff]  }
  0xcc   :  { %1267 = vmatprep.subr.bf16.mxu0 %v8411_v63  ;;  %1373 = vmatprep.subr.bf16.mxu1 %v8413_v0  ;;  %v8483_v63 = vld [vmem:[#allocation5 + $0x760] ss:$16 sps:$4 sm:$0xff]   ;;  %v8486_v0 = vld [vmem:[#allocation5 + $0x768] ss:$16 sps:$4 sm:$0xff]  }
  0xcf   :  { %1268 = vmatpush1.bf16.msra.mxu0 %v8415_v1  ;;  %1374 = vmatpush1.bf16.msra.mxu1 %v8416_v2  ;;  %v8491_v1 = vld [vmem:[#allocation5 + $0x784] ss:$16 sps:$4 sm:$0xff]   ;;  %v8494_v2 = vld [vmem:[#allocation5 + $0x78c] ss:$16 sps:$4 sm:$0xff]  }
  0xd0   :  { %1290 = vmatprep.subr.bf16.mxu0 %v8419_v5  ;;  %1396 = vmatprep.subr.bf16.mxu1 %v8422_v6  ;;  %v8489_v5 = vld [vmem:[#allocation5 + $0x780] ss:$16 sps:$4 sm:$0xff]   ;;  %v8492_v6 = vld [vmem:[#allocation5 + $0x788] ss:$16 sps:$4 sm:$0xff]  }
  0xd2   :  { %1270 = vmatmul.mubr.bf16.vlgmr.msra.gmra.mrb[0].mxu0 %v460_v7  ;;  %1376 = vmatmul.mubr.bf16.vlgmr.msra.gmra.mrb[0].mxu1 %v460_v7  ;;  %v8497_v7 = vld [vmem:[#allocation5 + $0x7a4] ss:$16 sps:$4 sm:$0xff]  }
  0xd3   :  { %1291 = vmatpush1.bf16.msra.mxu0 %v8417_v8  ;;  %1397 = vmatpush1.bf16.msra.mxu1 %v8420_v9  ;;  %v8500_v8 = vld [vmem:[#allocation5 + $0x7ac] ss:$16 sps:$4 sm:$0xff]   ;;  %v8495_v9 = vld [vmem:[#allocation5 + $0x7a0] ss:$16 sps:$4 sm:$0xff]  }
  0xd4   :  { %1292 = vmatprep.subr.bf16.mxu0 %v8425_v10  ;;  %1398 = vmatprep.subr.bf16.mxu1 %v8428_v11  ;;  %v8498_v10 = vld [vmem:[#allocation5 + $0x7a8] ss:$16 sps:$4 sm:$0xff]   ;;  %v8503_v11 = vld [vmem:[#allocation5 + $0x7c4] ss:$16 sps:$4 sm:$0xff]  }
  0xd5   :  { %1279 = vmatprep.mubr.bf16.mxu0 %v465_v32  ;;  %1385 = vmatprep.mubr.bf16.mxu1 %v465_v32  ;;  %v9933_v32 = vld [vmem:[#allocation2 + $0x58] sm:$0xff] }
  0xd7   :  { %1293 = vmatpush1.bf16.msra.mxu0 %v8423_v12  ;;  %1399 = vmatpush1.bf16.msra.mxu1 %v8426_v13  ;;  %v8506_v12 = vld [vmem:[#allocation5 + $0x7cc] ss:$16 sps:$4 sm:$0xff]   ;;  %v8501_v13 = vld [vmem:[#allocation5 + $0x7c0] ss:$16 sps:$4 sm:$0xff]  }
  0xd8   :  { %1294 = vmatprep.subr.bf16.mxu0 %v8431_v14  ;;  %1400 = vmatprep.subr.bf16.mxu1 %v8434_v15  ;;  %v8504_v14 = vld [vmem:[#allocation5 + $0x7c8] ss:$16 sps:$4 sm:$0xff]   ;;  %v8509_v15 = vld [vmem:[#allocation5 + $0x7e4] ss:$16 sps:$4 sm:$0xff]  }
  0xda   :  { %1280 = vmatmul.mubr.bf16.gmra.mrb[4].mxu0 %v464_v39  ;;  %1386 = vmatmul.mubr.bf16.gmra.mrb[4].mxu1 %v464_v39 }
  0xdb   :  { %1295 = vmatpush1.bf16.msra.mxu0 %v8429_v16  ;;  %1401 = vmatpush1.bf16.msra.mxu1 %v8432_v17  ;;  %v8512_v16 = vld [vmem:[#allocation5 + $0x7ec] ss:$16 sps:$4 sm:$0xff]   ;;  %v8507_v17 = vld [vmem:[#allocation5 + $0x7e0] ss:$16 sps:$4 sm:$0xff]  }
  0xdc   :  { %1296 = vmatprep.subr.bf16.mxu0 %v8437_v18  ;;  %1402 = vmatprep.subr.bf16.mxu1 %v8440_v19  ;;  %v148_v18 = vlaneseq  ;;  %v8510_v19 = vld [vmem:[#allocation5 + $0x7e8] ss:$16 sps:$4 sm:$0xff]  }
  0xdd   :  { %1322 = vmatprep.mubr.bf16.mxu0 %v463_v44  ;;  %1428 = vmatprep.mubr.bf16.mxu1 %v463_v44 }
  0xdf   :  { %1297 = vmatpush1.bf16.msra.mxu0 %v8435_v20  ;;  %1403 = vmatpush1.bf16.msra.mxu1 %v8438_v21  ;;  %v9925_v20 = vld [vmem:[#allocation2 + $0x10] sm:$0xff] }
  0xe0   :  { %1298 = vmatprep.subr.bf16.mxu0 %v8443_v22  ;;  %1404 = vmatprep.subr.bf16.mxu1 %v8446_v23  ;;  %v9927_v21 = vld [vmem:[#allocation2 + $0x30] sm:$0xff]  ;;  %v8518_v23 = vld [vmem:[#allocation5 + $0xc] ss:$16 sps:$4 sm:$0xff]  }
  0xe1   :  { %v8515_v22 = vld [vmem:[#allocation5 + $0x4] ss:$16 sps:$4 sm:$0xff]  }
  0xe3   :  { %1299 = vmatpush1.bf16.msra.mxu0 %v8441_v24  ;;  %1405 = vmatpush1.bf16.msra.mxu1 %v8444_v25  ;;  %v8513_v24 = vld [vmem:[#allocation5] ss:$16 sps:$4 sm:$0xff]   ;;  %v9929_v25 = vshrl.u32 %v148_v18, 7  ;;  %v8564_v18 = vld [vmem:[#allocation5 + $0x108] ss:$16 sps:$4 sm:$0xff]  }
  0xe4   :  { %1300 = vmatprep.subr.bf16.mxu0 %v8449_v26  ;;  %1406 = vmatprep.subr.bf16.mxu1 %v8452_v27  ;;  %v8516_v26 = vld [vmem:[#allocation5 + $0x8] ss:$16 sps:$4 sm:$0xff]   ;;  %v462_v27 = vpack.c.bf16 %v9927_v21, %v9925_v20 }
  0xe5   :  { %v157_v44 = vand.u32 15, %v9929_v25  ;;  %vm226_vm0 = vcmp.lt.s32.totalorder %v9929_v25, 1  ;;  %vm283_vm6 = vcmp.lt.s32.totalorder %v9929_v25, 7 }
  0xe7   :  { %1301 = vmatpush1.bf16.msra.mxu0 %v8447_v30  ;;  %1407 = vmatpush1.bf16.msra.mxu1 %v8450_v31  ;;  %v8521_v30 = vld [vmem:[#allocation5 + $0x24] ss:$16 sps:$4 sm:$0xff]   ;;  %v8524_v31 = vld [vmem:[#allocation5 + $0x2c] ss:$16 sps:$4 sm:$0xff]   ;;  %vm201_vm1 = vcmp.gt.s32.totalorder %v157_v44, 0 }
  0xe8   :  { %1302 = vmatprep.subr.bf16.mxu0 %v8455_v33  ;;  %1408 = vmatprep.subr.bf16.mxu1 %v8458_v34  ;;  %v9935_v33 = vld [vmem:[#allocation2 + $0x78] sm:$0xff]  ;;  %v211_v34 = vrot.slane %v9895_v46, 7  ;;  %v9946_v46 = vld [vmem:[#allocation2 + $0x70] sm:$0xff]  ;;  %vm9959_vm3 = vmpackc.low %vm9743_vm2, %vm201_vm1 }
  0xe9   :  { %v467_v39 = vpack.c.bf16 %v9935_v33, %v9933_v32  ;;  %v8587_v44 = vld [vmem:[#allocation5 + $0x184] ss:$16 sps:$4 sm:$0xff]  }
  0xeb   :  { %1303 = vmatpush1.bf16.msra.mxu0 %v8453_v37  ;;  %1409 = vmatpush1.bf16.msra.mxu1 %v8456_v38  ;;  %v215_v37 = vrot.slane %v9897_v47, 7  ;;  %v8519_v38 = vld [vmem:[#allocation5 + $0x20] ss:$16 sps:$4 sm:$0xff]  }
  0xec   :  { %1304 = vmatprep.subr.bf16.mxu0 %v8461_v40  ;;  %1410 = vmatprep.subr.bf16.mxu1 %v8464_v41  ;;  %v223_v40 = vrot.slane %v9909_v29, 7  ;;  %v8522_v41 = vld [vmem:[#allocation5 + $0x28] ss:$16 sps:$4 sm:$0xff]   ;;  %v217_v29 = vrot.slane %v9921_v43, 7 }
  0xed   :  { %v9490_v43 = vld [vmem:[#allocation2 + $0x28] sm:$0xff] }
  0xef   :  { %1305 = vmatpush1.bf16.msra.mxu0 %v8459_v45  ;;  %1411 = vmatpush1.bf16.msra.mxu1 %v8462_v48  ;;  %v8527_v45 = vld [vmem:[#allocation5 + $0x44] ss:$16 sps:$4 sm:$0xff]  }
  0xf0   :  { %1306 = vmatprep.subr.bf16.mxu0 %v8467_v49  ;;  %1412 = vmatprep.subr.bf16.mxu1 %v8470_v50  ;;  %v9944_v48 = vld [vmem:[#allocation2 + $0x50] sm:$0xff]  ;;  %v8530_v49 = vld [vmem:[#allocation5 + $0x4c] ss:$16 sps:$4 sm:$0xff]  }
  0xf1   :  { %v8525_v50 = vld [vmem:[#allocation5 + $0x40] ss:$16 sps:$4 sm:$0xff]  }
  0xf3   :  { %1307 = vmatpush1.bf16.msra.mxu0 %v8465_v51  ;;  %1413 = vmatpush1.bf16.msra.mxu1 %v8468_v52  ;;  %v8528_v51 = vld [vmem:[#allocation5 + $0x48] ss:$16 sps:$4 sm:$0xff]   ;;  %v466_v52 = vpack.c.bf16 %v9946_v46, %v9944_v48 }
  0xf4   :  { %1308 = vmatprep.subr.bf16.mxu0 %v8473_v53  ;;  %1414 = vmatprep.subr.bf16.mxu1 %v8476_v54  ;;  %v236_v53 = vsel %vm226_vm0, %v211_v34, %v215_v37  ;;  %v240_v54 = vsel %vm226_vm0, %v223_v40, %v211_v34  ;;  %v8581_v34 = vld [vmem:[#allocation5 + $0x164] ss:$16 sps:$4 sm:$0xff]  }
  0xf7   :  { %1309 = vmatpush1.bf16.msra.mxu0 %v8471_v55  ;;  %1415 = vmatpush1.bf16.msra.mxu1 %v8474_v56  ;;  %v8533_v55 = vld [vmem:[#allocation5 + $0x64] ss:$16 sps:$4 sm:$0xff]   ;;  %v8536_v56 = vld [vmem:[#allocation5 + $0x6c] ss:$16 sps:$4 sm:$0xff]  }
  0xf8   :  { %1310 = vmatprep.subr.bf16.mxu0 %v8479_v57  ;;  %1416 = vmatprep.subr.bf16.mxu1 %v8482_v58  ;;  %v7302_v58 = vpack.c.bf16 %v236_v53, %v240_v54  ;;  %v8591_v53 = vld [vmem:[#allocation5 + $0x1a0] ss:$16 sps:$4 sm:$0xff]   ;;  %v8594_v54 = vld [vmem:[#allocation5 + $0x1a8] ss:$16 sps:$4 sm:$0xff]   ;;  %v9296_v57 = vld [vmem:[#allocation8 + $0x848] ss:$16 sps:$4 sm:$0xff]  }
  0xfb   :  { %1311 = vmatpush1.bf16.msra.mxu0 %v8477_v59  ;;  %1417 = vmatpush1.bf16.msra.mxu1 %v8480_v60  ;;  %v8531_v59 = vld [vmem:[#allocation5 + $0x60] ss:$16 sps:$4 sm:$0xff]   ;;  %v8534_v60 = vld [vmem:[#allocation5 + $0x68] ss:$16 sps:$4 sm:$0xff]  }
  0xfc   :  { %1312 = vmatprep.subr.bf16.mxu0 %v8485_v61  ;;  %1418 = vmatprep.subr.bf16.mxu1 %v8488_v62  ;;  %v8539_v61 = vld [vmem:[#allocation5 + $0x84] ss:$16 sps:$4 sm:$0xff]   ;;  %v8542_v62 = vld [vmem:[#allocation5 + $0x8c] ss:$16 sps:$4 sm:$0xff]  }
  0xff   :  { %1313 = vmatpush1.bf16.msra.mxu0 %v8483_v63  ;;  %1419 = vmatpush1.bf16.msra.mxu1 %v8486_v0  ;;  %v8537_v63 = vld [vmem:[#allocation5 + $0x80] ss:$16 sps:$4 sm:$0xff]   ;;  %v8540_v0 = vld [vmem:[#allocation5 + $0x88] ss:$16 sps:$4 sm:$0xff]  }
 0x100   :  { %1314 = vmatprep.subr.bf16.mxu0 %v8491_v1  ;;  %1420 = vmatprep.subr.bf16.mxu1 %v8494_v2  ;;  %v8545_v1 = vld [vmem:[#allocation5 + $0xa4] ss:$16 sps:$4 sm:$0xff]   ;;  %v8548_v2 = vld [vmem:[#allocation5 + $0xac] ss:$16 sps:$4 sm:$0xff]  }
 0x103   :  { %1315 = vmatpush1.bf16.msra.mxu0 %v8489_v5  ;;  %1421 = vmatpush1.bf16.msra.mxu1 %v8492_v6  ;;  %v8543_v5 = vld [vmem:[#allocation5 + $0xa0] ss:$16 sps:$4 sm:$0xff]   ;;  %v8546_v6 = vld [vmem:[#allocation5 + $0xa8] ss:$16 sps:$4 sm:$0xff]  }
 0x104   :  { %1316 = vmatprep.subr.bf16.mxu0 %v8497_v7  ;;  %1422 = vmatprep.subr.bf16.mxu1 %v8500_v8  ;;  %v8551_v7 = vld [vmem:[#allocation5 + $0xc4] ss:$16 sps:$4 sm:$0xff]   ;;  %v8554_v8 = vld [vmem:[#allocation5 + $0xcc] ss:$16 sps:$4 sm:$0xff]  }
 0x107   :  { %1317 = vmatpush1.bf16.msra.mxu0 %v8495_v9  ;;  %1423 = vmatpush1.bf16.msra.mxu1 %v8498_v10  ;;  %v8549_v9 = vld [vmem:[#allocation5 + $0xc0] ss:$16 sps:$4 sm:$0xff]   ;;  %v8552_v10 = vld [vmem:[#allocation5 + $0xc8] ss:$16 sps:$4 sm:$0xff]  }
 0x108   :  { %1318 = vmatprep.subr.bf16.mxu0 %v8503_v11  ;;  %1424 = vmatprep.subr.bf16.mxu1 %v8506_v12  ;;  %v8557_v11 = vld [vmem:[#allocation5 + $0xe4] ss:$16 sps:$4 sm:$0xff]   ;;  %v8560_v12 = vld [vmem:[#allocation5 + $0xec] ss:$16 sps:$4 sm:$0xff]  }
 0x10b   :  { %1319 = vmatpush1.bf16.msra.mxu0 %v8501_v13  ;;  %1425 = vmatpush1.bf16.msra.mxu1 %v8504_v14  ;;  %v8555_v13 = vld [vmem:[#allocation5 + $0xe0] ss:$16 sps:$4 sm:$0xff]   ;;  %v8558_v14 = vld [vmem:[#allocation5 + $0xe8] ss:$16 sps:$4 sm:$0xff]  }
 0x10c   :  { %1320 = vmatprep.subr.bf16.mxu0 %v8509_v15  ;;  %1426 = vmatprep.subr.bf16.mxu1 %v8512_v16  ;;  %v8563_v15 = vld [vmem:[#allocation5 + $0x104] ss:$16 sps:$4 sm:$0xff]   ;;  %v8566_v16 = vld [vmem:[#allocation5 + $0x10c] ss:$16 sps:$4 sm:$0xff]  }
 0x10f   :  { %1321 = vmatpush1.bf16.msra.mxu0 %v8507_v17  ;;  %1427 = vmatpush1.bf16.msra.mxu1 %v8510_v19  ;;  %v8561_v17 = vld [vmem:[#allocation5 + $0x100] ss:$16 sps:$4 sm:$0xff]   ;;  %v8569_v19 = vld [vmem:[#allocation5 + $0x124] ss:$16 sps:$4 sm:$0xff]  }
 0x110   :  { %2089 = vmatprep.subr.bf16.mxu0 %v8515_v22  ;;  %2195 = vmatprep.subr.bf16.mxu1 %v8518_v23  ;;  %v8572_v22 = vld [vmem:[#allocation5 + $0x12c] ss:$16 sps:$4 sm:$0xff]   ;;  %v8567_v23 = vld [vmem:[#allocation5 + $0x120] ss:$16 sps:$4 sm:$0xff]  }
 0x112   :  { %1323 = vmatmul.mubr.bf16.vlgmr.msra.gmra.mrb[0].mxu0 %v462_v27  ;;  %1429 = vmatmul.mubr.bf16.vlgmr.msra.gmra.mrb[0].mxu1 %v462_v27  ;;  %v8578_v27 = vld [vmem:[#allocation5 + $0x14c] ss:$16 sps:$4 sm:$0xff]  }
 0x113   :  { %2090 = vmatpush1.bf16.msra.mxu0 %v8513_v24  ;;  %2196 = vmatpush1.bf16.msra.mxu1 %v8516_v26  ;;  %v8570_v24 = vld [vmem:[#allocation5 + $0x128] ss:$16 sps:$4 sm:$0xff]   ;;  %v8575_v26 = vld [vmem:[#allocation5 + $0x144] ss:$16 sps:$4 sm:$0xff]  }
 0x114   :  { %2091 = vmatprep.subr.bf16.mxu0 %v8521_v30  ;;  %2197 = vmatprep.subr.bf16.mxu1 %v8524_v31  ;;  %v8573_v30 = vld [vmem:[#allocation5 + $0x140] ss:$16 sps:$4 sm:$0xff]   ;;  %v8576_v31 = vld [vmem:[#allocation5 + $0x148] ss:$16 sps:$4 sm:$0xff]  }
 0x115   :  { %1332 = vmatprep.mubr.bf16.mxu0 %v467_v39  ;;  %1438 = vmatprep.mubr.bf16.mxu1 %v467_v39  ;;  %v8579_v39 = vld [vmem:[#allocation5 + $0x160] ss:$16 sps:$4 sm:$0xff]  }
 0x117   :  { %2092 = vmatpush1.bf16.msra.mxu0 %v8519_v38  ;;  %2198 = vmatpush1.bf16.msra.mxu1 %v8522_v41  ;;  %v8584_v38 = vld [vmem:[#allocation5 + $0x16c] ss:$16 sps:$4 sm:$0xff]   ;;  %v8582_v41 = vld [vmem:[#allocation5 + $0x168] ss:$16 sps:$4 sm:$0xff]  }
 0x118   :  { %2093 = vmatprep.subr.bf16.mxu0 %v8527_v45  ;;  %2199 = vmatprep.subr.bf16.mxu1 %v8530_v49  ;;  %v8590_v45 = vld [vmem:[#allocation5 + $0x18c] ss:$16 sps:$4 sm:$0xff]   ;;  %v8585_v49 = vld [vmem:[#allocation5 + $0x180] ss:$16 sps:$4 sm:$0xff]  }
 0x11a   :  { %1333 = vmatmul.mubr.bf16.gmra.mrb[4].mxu0 %v466_v52  ;;  %1439 = vmatmul.mubr.bf16.gmra.mrb[4].mxu1 %v466_v52  ;;  %v8596_v52 = vld [vmem:[#allocation5 + $0x1ac] ss:$16 sps:$4 sm:$0xff]  }
 0x11b   :  { %2094 = vmatpush1.bf16.msra.mxu0 %v8525_v50  ;;  %2200 = vmatpush1.bf16.msra.mxu1 %v8528_v51  ;;  %v8588_v50 = vld [vmem:[#allocation5 + $0x188] ss:$16 sps:$4 sm:$0xff]   ;;  %v8593_v51 = vld [vmem:[#allocation5 + $0x1a4] ss:$16 sps:$4 sm:$0xff]  }
 0x11c   :  { %2095 = vmatprep.subr.bf16.mxu0 %v8533_v55  ;;  %2201 = vmatprep.subr.bf16.mxu1 %v8536_v56  ;;  %v8599_v55 = vld [vmem:[#allocation5 + $0x1c4] ss:$16 sps:$4 sm:$0xff]   ;;  %v8602_v56 = vld [vmem:[#allocation5 + $0x1cc] ss:$16 sps:$4 sm:$0xff]  }
 0x11d   :  { %7303 = vmatprep.mubr.msk.bf16.mxu0 %vm9959_vm3, %v7302_v58  ;;  %7327 = vmatprep.mubr.msk.bf16.mxu1 %vm9959_vm3, %v7302_v58  ;;  %v210_v58 = vrot.slane %v9901_v3, 7 }
 0x11f   :  { %2096 = vmatpush1.bf16.msra.mxu0 %v8531_v59  ;;  %2202 = vmatpush1.bf16.msra.mxu1 %v8534_v60  ;;  %v8597_v59 = vld [vmem:[#allocation5 + $0x1c0] ss:$16 sps:$4 sm:$0xff]   ;;  %v8600_v60 = vld [vmem:[#allocation5 + $0x1c8] ss:$16 sps:$4 sm:$0xff]  }
 0x120   :  { %2097 = vmatprep.subr.bf16.mxu0 %v8539_v61  ;;  %2203 = vmatprep.subr.bf16.mxu1 %v8542_v62  ;;  %v151_v61 = vadd.s32 16, %v9929_v25  ;;  %v214_v62 = vrot.slane %v9903_v4, 7  ;;  %v8611_v4 = vld [vmem:[#allocation5 + $0x204] ss:$16 sps:$4 sm:$0xff]  }
 0x122   :  { %v235_v3 = vsel %vm226_vm0, %v210_v58, %v214_v62 }
 0x123   :  { %2098 = vmatpush1.bf16.msra.mxu0 %v8537_v63  ;;  %2204 = vmatpush1.bf16.msra.mxu1 %v8540_v0  ;;  %v222_v63 = vrot.slane %v9915_v36, 7  ;;  %v8605_v0 = vld [vmem:[#allocation5 + $0x1e4] ss:$16 sps:$4 sm:$0xff]   ;;  %v8614_v36 = vld [vmem:[#allocation5 + $0x20c] ss:$16 sps:$4 sm:$0xff]  }
 0x124   :  { %2099 = vmatprep.subr.bf16.mxu0 %v8545_v1  ;;  %2205 = vmatprep.subr.bf16.mxu1 %v8548_v2  ;;  %v8608_v1 = vld [vmem:[#allocation5 + $0x1ec] ss:$16 sps:$4 sm:$0xff]   ;;  %v219_v2 = vrot.slane %v9907_v28, 7 }
 0x126   :  { %v228_v28 = vsel %vm226_vm0, %v219_v2, %v223_v40  ;;  %v9308_v40 = vld [vmem:[#allocation8 + $0x888] ss:$16 sps:$4 sm:$0xff]  }
 0x127   :  { %2100 = vmatpush1.bf16.msra.mxu0 %v8543_v5  ;;  %2206 = vmatpush1.bf16.msra.mxu1 %v8546_v6  ;;  %v8603_v5 = vld [vmem:[#allocation5 + $0x1e0] ss:$16 sps:$4 sm:$0xff]   ;;  %v8606_v6 = vld [vmem:[#allocation5 + $0x1e8] ss:$16 sps:$4 sm:$0xff]  }
 0x128   :  { %2101 = vmatprep.subr.bf16.mxu0 %v8551_v7  ;;  %2207 = vmatprep.subr.bf16.mxu1 %v8554_v8  ;;  %v171_v7 = vand.u32 15, %v151_v61  ;;  %v239_v8 = vsel %vm226_vm0, %v222_v63, %v210_v58  ;;  %v8645_v58 = vld [vmem:[#allocation5 + $0x2c0] ss:$16 sps:$4 sm:$0xff]   ;;  %v8656_v61 = vld [vmem:[#allocation5 + $0x2ec] ss:$16 sps:$4 sm:$0xff]  }
 0x12a   :  { %vm203_vm4 = vcmp.gt.s32.totalorder %v171_v7, 0  ;;  %v8668_v7 = vld [vmem:[#allocation5 + $0x32c] ss:$16 sps:$4 sm:$0xff]  }
 0x12b   :  { %2102 = vmatpush1.bf16.msra.mxu0 %v8549_v9  ;;  %2208 = vmatpush1.bf16.msra.mxu1 %v8552_v10  ;;  %v8609_v9 = vld [vmem:[#allocation5 + $0x200] ss:$16 sps:$4 sm:$0xff]   ;;  %v8612_v10 = vld [vmem:[#allocation5 + $0x208] ss:$16 sps:$4 sm:$0xff]   ;;  %vm9988_vm5 = vmpackc.low %vm9743_vm2, %vm203_vm4 }
 0x12c   :  { %2103 = vmatprep.subr.bf16.mxu0 %v8557_v11  ;;  %2209 = vmatprep.subr.bf16.mxu1 %v8560_v12  ;;  %v7305_v11 = vpack.c.bf16 %v235_v3, %v239_v8  ;;  %v232_v12 = vsel %vm226_vm0, %v215_v37, %v219_v2  ;;  %v225_v37 = vrot.slane %v9935_v33, 7  ;;  %v8657_v2 = vld [vmem:[#allocation5 + $0x300] ss:$16 sps:$4 sm:$0xff]   ;;  %v8666_v8 = vld [vmem:[#allocation5 + $0x328] ss:$16 sps:$4 sm:$0xff]  }
 0x12d   :  { %v7308_v47 = vpack.c.bf16 %v228_v28, %v232_v12  ;;  %v8663_v3 = vld [vmem:[#allocation5 + $0x320] ss:$16 sps:$4 sm:$0xff]   ;;  %v8680_v28 = vld [vmem:[#allocation5 + $0x36c] ss:$16 sps:$4 sm:$0xff]  }
 0x12e   :  { %v8675_v12 = vld [vmem:[#allocation5 + $0x360] ss:$16 sps:$4 sm:$0xff]  }
 0x12f   :  { %2104 = vmatpush1.bf16.msra.mxu0 %v8555_v13  ;;  %2210 = vmatpush1.bf16.msra.mxu1 %v8558_v14  ;;  %v218_v13 = vrot.slane %v9913_v35, 7  ;;  %v8617_v14 = vld [vmem:[#allocation5 + $0x224] ss:$16 sps:$4 sm:$0xff]   ;;  %v8615_v35 = vld [vmem:[#allocation5 + $0x220] ss:$16 sps:$4 sm:$0xff]  }
 0x130   :  { %2105 = vmatprep.subr.bf16.mxu0 %v8563_v15  ;;  %2211 = vmatprep.subr.bf16.mxu1 %v8566_v16  ;;  %v8620_v15 = vld [vmem:[#allocation5 + $0x22c] ss:$16 sps:$4 sm:$0xff]   ;;  %v213_v16 = vrot.slane %v9919_v42, 7  ;;  %v8623_v42 = vld [vmem:[#allocation5 + $0x244] ss:$16 sps:$4 sm:$0xff]  }
 0x133   :  { %2106 = vmatpush1.bf16.msra.mxu0 %v8561_v17  ;;  %2212 = vmatpush1.bf16.msra.mxu1 %v8564_v18  ;;  %v8618_v17 = vld [vmem:[#allocation5 + $0x228] ss:$16 sps:$4 sm:$0xff]   ;;  %v227_v18 = vsel %vm226_vm0, %v218_v13, %v222_v63 }
 0x134   :  { %2107 = vmatprep.subr.bf16.mxu0 %v8569_v19  ;;  %2213 = vmatprep.subr.bf16.mxu1 %v8572_v22  ;;  %v231_v19 = vsel %vm226_vm0, %v214_v62, %v218_v13  ;;  %v8626_v22 = vld [vmem:[#allocation5 + $0x24c] ss:$16 sps:$4 sm:$0xff]   ;;  %v8651_v62 = vld [vmem:[#allocation5 + $0x2e0] ss:$16 sps:$4 sm:$0xff]   ;;  %v8654_v63 = vld [vmem:[#allocation5 + $0x2e8] ss:$16 sps:$4 sm:$0xff]  }
 0x135   :  { %v8678_v13 = vld [vmem:[#allocation5 + $0x368] ss:$16 sps:$4 sm:$0xff]  }
 0x137   :  { %2108 = vmatpush1.bf16.msra.mxu0 %v8567_v23  ;;  %2214 = vmatpush1.bf16.msra.mxu1 %v8570_v24  ;;  %v8621_v23 = vld [vmem:[#allocation5 + $0x240] ss:$16 sps:$4 sm:$0xff]   ;;  %v8624_v24 = vld [vmem:[#allocation5 + $0x248] ss:$16 sps:$4 sm:$0xff]  }
 0x138   :  { %2109 = vmatprep.subr.bf16.mxu0 %v8575_v26  ;;  %2215 = vmatprep.subr.bf16.mxu1 %v8578_v27  ;;  %v7311_v26 = vpack.c.bf16 %v227_v18, %v231_v19  ;;  %v238_v27 = vsel %vm226_vm0, %v213_v16, %v217_v29  ;;  %v8690_v18 = vld [vmem:[#allocation5 + $0x3a8] ss:$16 sps:$4 sm:$0xff]   ;;  %v8695_v19 = vld [vmem:[#allocation5 + $0x3c4] ss:$16 sps:$4 sm:$0xff]  }
 0x13b   :  { %2110 = vmatpush1.bf16.msra.mxu0 %v8573_v30  ;;  %2216 = vmatpush1.bf16.msra.mxu1 %v8576_v31  ;;  %v242_v30 = vsel %vm226_vm0, %v225_v37, %v213_v16  ;;  %v8629_v31 = vld [vmem:[#allocation5 + $0x264] ss:$16 sps:$4 sm:$0xff]   ;;  %v8681_v16 = vld [vmem:[#allocation5 + $0x380] ss:$16 sps:$4 sm:$0xff]  }
 0x13c   :  { %2111 = vmatprep.subr.bf16.mxu0 %v8581_v34  ;;  %2217 = vmatprep.subr.bf16.mxu1 %v8584_v38  ;;  %v8632_v34 = vld [vmem:[#allocation5 + $0x26c] ss:$16 sps:$4 sm:$0xff]   ;;  %v7314_v38 = vpack.c.bf16 %v238_v27, %v242_v30  ;;  %v224_v27 = vrot.slane %v9946_v46, 7  ;;  %v8696_v30 = vld [vmem:[#allocation5 + $0x3c8] ss:$16 sps:$4 sm:$0xff]  }
 0x13d   :  { %v8707_v46 = vld [vmem:[#allocation5 + $0x804] ss:$16 sps:$4 sm:$0xff]  }
 0x13f   :  { %2112 = vmatpush1.bf16.msra.mxu0 %v8579_v39  ;;  %2218 = vmatpush1.bf16.msra.mxu1 %v8582_v41  ;;  %v8627_v39 = vld [vmem:[#allocation5 + $0x260] ss:$16 sps:$4 sm:$0xff]   ;;  %v8630_v41 = vld [vmem:[#allocation5 + $0x268] ss:$16 sps:$4 sm:$0xff]  }
 0x140   :  { %2113 = vmatprep.subr.bf16.mxu0 %v8587_v44  ;;  %2219 = vmatprep.subr.bf16.mxu1 %v8590_v45  ;;  %v8635_v44 = vld [vmem:[#allocation5 + $0x284] ss:$16 sps:$4 sm:$0xff]   ;;  %v8638_v45 = vld [vmem:[#allocation5 + $0x28c] ss:$16 sps:$4 sm:$0xff]  }
 0x143   :  { %2114 = vmatpush1.bf16.msra.mxu0 %v8585_v49  ;;  %2220 = vmatpush1.bf16.msra.mxu1 %v8588_v50  ;;  %v8633_v49 = vld [vmem:[#allocation5 + $0x280] ss:$16 sps:$4 sm:$0xff]   ;;  %v8636_v50 = vld [vmem:[#allocation5 + $0x288] ss:$16 sps:$4 sm:$0xff]  }
 0x144   :  { %2115 = vmatprep.subr.bf16.mxu0 %v8593_v51  ;;  %2221 = vmatprep.subr.bf16.mxu1 %v8596_v52  ;;  %v8641_v51 = vld [vmem:[#allocation5 + $0x2a4] ss:$16 sps:$4 sm:$0xff]   ;;  %v8644_v52 = vld [vmem:[#allocation5 + $0x2ac] ss:$16 sps:$4 sm:$0xff]  }
 0x147   :  { %2116 = vmatpush1.bf16.msra.mxu0 %v8591_v53  ;;  %2222 = vmatpush1.bf16.msra.mxu1 %v8594_v54  ;;  %v8639_v53 = vld [vmem:[#allocation5 + $0x2a0] ss:$16 sps:$4 sm:$0xff]   ;;  %v8642_v54 = vld [vmem:[#allocation5 + $0x2a8] ss:$16 sps:$4 sm:$0xff]  }
 0x148   :  { %2117 = vmatprep.subr.bf16.mxu0 %v8599_v55  ;;  %2223 = vmatprep.subr.bf16.mxu1 %v8602_v56  ;;  %v8647_v55 = vld [vmem:[#allocation5 + $0x2c4] ss:$16 sps:$4 sm:$0xff]   ;;  %v8650_v56 = vld [vmem:[#allocation5 + $0x2cc] ss:$16 sps:$4 sm:$0xff]  }
 0x14b   :  { %2118 = vmatpush1.bf16.msra.mxu0 %v8597_v59  ;;  %2224 = vmatpush1.bf16.msra.mxu1 %v8600_v60  ;;  %v8648_v59 = vld [vmem:[#allocation5 + $0x2c8] ss:$16 sps:$4 sm:$0xff]   ;;  %v8653_v60 = vld [vmem:[#allocation5 + $0x2e4] ss:$16 sps:$4 sm:$0xff]  }
 0x14c   :  { %2119 = vmatprep.subr.bf16.mxu0 %v8605_v0  ;;  %2225 = vmatprep.subr.bf16.mxu1 %v8608_v1  ;;  %v8659_v0 = vld [vmem:[#allocation5 + $0x304] ss:$16 sps:$4 sm:$0xff]   ;;  %v8662_v1 = vld [vmem:[#allocation5 + $0x30c] ss:$16 sps:$4 sm:$0xff]  }
 0x14f   :  { %2120 = vmatpush1.bf16.msra.mxu0 %v8603_v5  ;;  %2226 = vmatpush1.bf16.msra.mxu1 %v8606_v6  ;;  %v8660_v5 = vld [vmem:[#allocation5 + $0x308] ss:$16 sps:$4 sm:$0xff]   ;;  %v8665_v6 = vld [vmem:[#allocation5 + $0x324] ss:$16 sps:$4 sm:$0xff]  }
 0x150   :  { %2142 = vmatprep.subr.bf16.mxu0 %v8611_v4  ;;  %2248 = vmatprep.subr.bf16.mxu1 %v8614_v36  ;;  %v8671_v4 = vld [vmem:[#allocation5 + $0x344] ss:$16 sps:$4 sm:$0xff]   ;;  %v8674_v36 = vld [vmem:[#allocation5 + $0x34c] ss:$16 sps:$4 sm:$0xff]  }
 0x152   :  { %7306 = vmatmul.mubr.msk.bf16.vlgmr.msra.gmra.mrb[0].mxu0 %vm9959_vm3, %v7305_v11  ;;  %7330 = vmatmul.mubr.msk.bf16.vlgmr.msra.gmra.mrb[0].mxu1 %vm9959_vm3, %v7305_v11  ;;  %v8677_v11 = vld [vmem:[#allocation5 + $0x364] ss:$16 sps:$4 sm:$0xff]  }
 0x153   :  { %2143 = vmatpush1.bf16.msra.mxu0 %v8609_v9  ;;  %2249 = vmatpush1.bf16.msra.mxu1 %v8612_v10  ;;  %v8669_v9 = vld [vmem:[#allocation5 + $0x340] ss:$16 sps:$4 sm:$0xff]   ;;  %v8672_v10 = vld [vmem:[#allocation5 + $0x348] ss:$16 sps:$4 sm:$0xff]  }
 0x154   :  { %2144 = vmatprep.subr.bf16.mxu0 %v8617_v14  ;;  %2250 = vmatprep.subr.bf16.mxu1 %v8620_v15  ;;  %v8683_v14 = vld [vmem:[#allocation5 + $0x384] ss:$16 sps:$4 sm:$0xff]   ;;  %v8686_v15 = vld [vmem:[#allocation5 + $0x38c] ss:$16 sps:$4 sm:$0xff]  }
 0x155   :  { %7309 = vmatprep.mubr.msk.bf16.mxu0 %vm9988_vm5, %v7308_v47  ;;  %7333 = vmatprep.mubr.msk.bf16.mxu1 %vm9988_vm5, %v7308_v47  ;;  %v8684_v47 = vld [vmem:[#allocation5 + $0x388] ss:$16 sps:$4 sm:$0xff]  }
 0x157   :  { %2145 = vmatpush1.bf16.msra.mxu0 %v8615_v35  ;;  %2251 = vmatpush1.bf16.msra.mxu1 %v8618_v17  ;;  %v8689_v35 = vld [vmem:[#allocation5 + $0x3a4] ss:$16 sps:$4 sm:$0xff]   ;;  %v8692_v17 = vld [vmem:[#allocation5 + $0x3ac] ss:$16 sps:$4 sm:$0xff]  }
 0x158   :  { %2146 = vmatprep.subr.bf16.mxu0 %v8623_v42  ;;  %2252 = vmatprep.subr.bf16.mxu1 %v8626_v22  ;;  %v8687_v42 = vld [vmem:[#allocation5 + $0x3a0] ss:$16 sps:$4 sm:$0xff]   ;;  %v8698_v22 = vld [vmem:[#allocation5 + $0x3cc] ss:$16 sps:$4 sm:$0xff]  }
 0x15a   :  { %7312 = vmatmul.mubr.msk.bf16.gmra.mrb[4].mxu0 %vm9988_vm5, %v7311_v26  ;;  %7336 = vmatmul.mubr.msk.bf16.gmra.mrb[4].mxu1 %vm9988_vm5, %v7311_v26  ;;  %v216_v26 = vrot.slane %v9927_v21, 7 }
 0x15b   :  { %2147 = vmatpush1.bf16.msra.mxu0 %v8621_v23  ;;  %2253 = vmatpush1.bf16.msra.mxu1 %v8624_v24  ;;  %v212_v23 = vrot.slane %v9925_v20, 7  ;;  %v8693_v24 = vld [vmem:[#allocation5 + $0x3c0] ss:$16 sps:$4 sm:$0xff]   ;;  %v8702_v20 = vld [vmem:[#allocation5 + $0x3e8] ss:$16 sps:$4 sm:$0xff]  }
 0x15c   :  { %2148 = vmatprep.subr.bf16.mxu0 %v8629_v31  ;;  %2254 = vmatprep.subr.bf16.mxu1 %v8632_v34  ;;  %v8701_v31 = vld [vmem:[#allocation5 + $0x3e4] ss:$16 sps:$4 sm:$0xff]   ;;  %v8704_v34 = vld [vmem:[#allocation5 + $0x3ec] ss:$16 sps:$4 sm:$0xff]  }
 0x15d   :  { %7315 = vmatprep.mubr.msk.bf16.mxu0 %vm9959_vm3, %v7314_v38  ;;  %7339 = vmatprep.mubr.msk.bf16.mxu1 %vm9959_vm3, %v7314_v38  ;;  %v221_v38 = vrot.slane %v9933_v32, 7  ;;  %v237_v21 = vsel %vm226_vm0, %v212_v23, %v216_v26 }
 0x15f   :  { %2149 = vmatpush1.bf16.msra.mxu0 %v8627_v39  ;;  %2255 = vmatpush1.bf16.msra.mxu1 %v8630_v41  ;;  %v8699_v39 = vld [vmem:[#allocation5 + $0x3e0] ss:$16 sps:$4 sm:$0xff]   ;;  %v241_v41 = vsel %vm226_vm0, %v224_v27, %v212_v23  ;;  %v230_v32 = vsel %vm226_vm0, %v221_v38, %v225_v37  ;;  %v8752_v23 = vld [vmem:[#allocation5 + $0x8ec] ss:$16 sps:$4 sm:$0xff]  }
 0x160   :  { %2150 = vmatprep.subr.bf16.mxu0 %v8635_v44  ;;  %2256 = vmatprep.subr.bf16.mxu1 %v8638_v45  ;;  %v8710_v44 = vld [vmem:[#allocation5 + $0x80c] ss:$16 sps:$4 sm:$0xff]   ;;  %v8705_v45 = vld [vmem:[#allocation5 + $0x800] ss:$16 sps:$4 sm:$0xff]  }
 0x163   :  { %2151 = vmatpush1.bf16.msra.mxu0 %v8633_v49  ;;  %2257 = vmatpush1.bf16.msra.mxu1 %v8636_v50  ;;  %v7317_v49 = vpack.c.bf16 %v237_v21, %v241_v41  ;;  %v234_v50 = vsel %vm226_vm0, %v217_v29, %v221_v38  ;;  %v10043_v29 = vld [vmem:[#allocation2 + $0x48] sm:$0xff]  ;;  %v8761_v38 = vld [vmem:[#allocation5 + $0x924] ss:$16 sps:$4 sm:$0xff]   ;;  %v8759_v41 = vld [vmem:[#allocation5 + $0x920] ss:$16 sps:$4 sm:$0xff]  }
 0x164   :  { %2152 = vmatprep.subr.bf16.mxu0 %v8641_v51  ;;  %2258 = vmatprep.subr.bf16.mxu1 %v8644_v52  ;;  %v220_v51 = vrot.slane %v9944_v48, 7  ;;  %v8708_v52 = vld [vmem:[#allocation5 + $0x808] ss:$16 sps:$4 sm:$0xff]   ;;  %v7320_v33 = vpack.c.bf16 %v230_v32, %v234_v50  ;;  %v276_v48 = vrot.slane %v10043_v29, 1  ;;  %v8767_v21 = vld [vmem:[#allocation5 + $0x944] ss:$16 sps:$4 sm:$0xff]  }
 0x165   :  { %v8776_v32 = vld [vmem:[#allocation5 + $0x96c] ss:$16 sps:$4 sm:$0xff]   ;;  %v8771_v50 = vld [vmem:[#allocation5 + $0x960] ss:$16 sps:$4 sm:$0xff]  }
 0x167   :  { %2153 = vmatpush1.bf16.msra.mxu0 %v8639_v53  ;;  %2259 = vmatpush1.bf16.msra.mxu1 %v8642_v54  ;;  %v150_v53 = vadd.s32 8, %v9929_v25  ;;  %v8713_v54 = vld [vmem:[#allocation5 + $0x824] ss:$16 sps:$4 sm:$0xff]  }
 0x168   :  { %2154 = vmatprep.subr.bf16.mxu0 %v8647_v55  ;;  %2260 = vmatprep.subr.bf16.mxu1 %v8650_v56  ;;  %v8716_v55 = vld [vmem:[#allocation5 + $0x82c] ss:$16 sps:$4 sm:$0xff]  }
 0x169   :  { %v10039_v56 = vld [vmem:[#allocation2 + $0x8] sm:$0xff] }
 0x16a   :  { %v268_v37 = vrot.slane %v10039_v56, 1 }
 0x16b   :  { %2155 = vmatpush1.bf16.msra.mxu0 %v8645_v58  ;;  %2261 = vmatpush1.bf16.msra.mxu1 %v8648_v59  ;;  %v272_v58 = vrot.slane %v9490_v43, 1  ;;  %v8711_v59 = vld [vmem:[#allocation5 + $0x820] ss:$16 sps:$4 sm:$0xff]   ;;  %v8785_v43 = vld [vmem:[#allocation5 + $0x9a4] ss:$16 sps:$4 sm:$0xff]  }
 0x16c   :  { %2156 = vmatprep.subr.bf16.mxu0 %v8653_v60  ;;  %2262 = vmatprep.subr.bf16.mxu1 %v8656_v61  ;;  %v8714_v60 = vld [vmem:[#allocation5 + $0x828] ss:$16 sps:$4 sm:$0xff]   ;;  %v229_v61 = vsel %vm226_vm0, %v220_v51, %v224_v27  ;;  %v8755_v27 = vld [vmem:[#allocation5 + $0x904] ss:$16 sps:$4 sm:$0xff]  }
 0x16f   :  { %2157 = vmatpush1.bf16.msra.mxu0 %v8651_v62  ;;  %2263 = vmatpush1.bf16.msra.mxu1 %v8654_v63  ;;  %v233_v62 = vsel %vm226_vm0, %v216_v26, %v220_v51  ;;  %v164_v63 = vand.u32 15, %v150_v53  ;;  %v8750_v26 = vld [vmem:[#allocation5 + $0x8e8] ss:$16 sps:$4 sm:$0xff]   ;;  %v8782_v53 = vld [vmem:[#allocation5 + $0x98c] ss:$16 sps:$4 sm:$0xff]  }
 0x170   :  { %2158 = vmatprep.subr.bf16.mxu0 %v8659_v0  ;;  %2264 = vmatprep.subr.bf16.mxu1 %v8662_v1  ;;  %v8719_v0 = vld [vmem:[#allocation5 + $0x844] ss:$16 sps:$4 sm:$0xff]   ;;  %v8722_v1 = vld [vmem:[#allocation5 + $0x84c] ss:$16 sps:$4 sm:$0xff]   ;;  %v8774_v51 = vld [vmem:[#allocation5 + $0x968] ss:$16 sps:$4 sm:$0xff]  }
 0x171   :  { %vm206_vm7 = vcmp.lt.s32.totalorder %v164_v63, 15  ;;  %v8794_v63 = vld [vmem:[#allocation5 + $0x9cc] ss:$16 sps:$4 sm:$0xff]  }
 0x172   :  { %vm10071_vm8 = vmpackc.low %vm206_vm7, %vm9743_vm2 }
 0x173   :  { %2159 = vmatpush1.bf16.msra.mxu0 %v8657_v2  ;;  %2265 = vmatpush1.bf16.msra.mxu1 %v8660_v5  ;;  %v8717_v2 = vld [vmem:[#allocation5 + $0x840] ss:$16 sps:$4 sm:$0xff]   ;;  %v8720_v5 = vld [vmem:[#allocation5 + $0x848] ss:$16 sps:$4 sm:$0xff]  }
 0x174   :  { %2160 = vmatprep.subr.bf16.mxu0 %v8665_v6  ;;  %2266 = vmatprep.subr.bf16.mxu1 %v8668_v7  ;;  %v7323_v6 = vpack.c.bf16 %v229_v61, %v233_v62  ;;  %v289_v7 = vsel %vm283_vm6, %v272_v58, %v276_v48  ;;  %v8791_v62 = vld [vmem:[#allocation5 + $0x9c4] ss:$16 sps:$4 sm:$0xff]  }
 0x177   :  { %2161 = vmatpush1.bf16.msra.mxu0 %v8663_v3  ;;  %2267 = vmatpush1.bf16.msra.mxu1 %v8666_v8  ;;  %v293_v3 = vsel %vm283_vm6, %v268_v37, %v272_v58  ;;  %v8725_v8 = vld [vmem:[#allocation5 + $0x864] ss:$16 sps:$4 sm:$0xff]   ;;  %v8788_v58 = vld [vmem:[#allocation5 + $0x9ac] ss:$16 sps:$4 sm:$0xff]  }
 0x178   :  { %2162 = vmatprep.subr.bf16.mxu0 %v8671_v4  ;;  %2268 = vmatprep.subr.bf16.mxu1 %v8674_v36  ;;  %v8728_v4 = vld [vmem:[#allocation5 + $0x86c] ss:$16 sps:$4 sm:$0xff]   ;;  %v7478_v36 = vpack.c.bf16 %v289_v7, %v293_v3  ;;  %v9493_v7 = vld [vmem:[#allocation2 + $0x20] sm:$0xff] }
 0x179   :  { %v271_v3 = vrot.slane %v9493_v7, 1  ;;  %v8843_v7 = vld [vmem:[#allocation5 + $0xae0] ss:$16 sps:$4 sm:$0xff]  }
 0x17b   :  { %2163 = vmatpush1.bf16.msra.mxu0 %v8669_v9  ;;  %2269 = vmatpush1.bf16.msra.mxu1 %v8672_v10  ;;  %v8723_v10 = vld [vmem:[#allocation5 + $0x860] ss:$16 sps:$4 sm:$0xff]  }
 0x17c   :  { %2164 = vmatprep.subr.bf16.mxu0 %v8677_v11  ;;  %2270 = vmatprep.subr.bf16.mxu1 %v8680_v28  ;;  %v8726_v11 = vld [vmem:[#allocation5 + $0x868] ss:$16 sps:$4 sm:$0xff]   ;;  %v8731_v28 = vld [vmem:[#allocation5 + $0x884] ss:$16 sps:$4 sm:$0xff]  }
 0x17d   :  { %v6554_v9 = vld [vmem:[%s10823_s5 + $0x90] sm:$0xff] }
 0x17f   :  { %2165 = vmatpush1.bf16.msra.mxu0 %v8675_v12  ;;  %2271 = vmatpush1.bf16.msra.mxu1 %v8678_v13  ;;  %v8734_v12 = vld [vmem:[#allocation5 + $0x88c] ss:$16 sps:$4 sm:$0xff]   ;;  %v8729_v13 = vld [vmem:[#allocation5 + $0x880] ss:$16 sps:$4 sm:$0xff]  }
 0x180   :  { %2166 = vmatprep.subr.bf16.mxu0 %v8683_v14  ;;  %2272 = vmatprep.subr.bf16.mxu1 %v8686_v15  ;;  %v8732_v14 = vld [vmem:[#allocation5 + $0x888] ss:$16 sps:$4 sm:$0xff]   ;;  %v8737_v15 = vld [vmem:[#allocation5 + $0x8a4] ss:$16 sps:$4 sm:$0xff]  }
 0x183   :  { %2167 = vmatpush1.bf16.msra.mxu0 %v8681_v16  ;;  %2273 = vmatpush1.bf16.msra.mxu1 %v8684_v47  ;;  %v8740_v16 = vld [vmem:[#allocation5 + $0x8ac] ss:$16 sps:$4 sm:$0xff]   ;;  %v8735_v47 = vld [vmem:[#allocation5 + $0x8a0] ss:$16 sps:$4 sm:$0xff]  }
 0x184   :  { %2168 = vmatprep.subr.bf16.mxu0 %v8689_v35  ;;  %2274 = vmatprep.subr.bf16.mxu1 %v8692_v17  ;;  %v8738_v35 = vld [vmem:[#allocation5 + $0x8a8] ss:$16 sps:$4 sm:$0xff]   ;;  %v8743_v17 = vld [vmem:[#allocation5 + $0x8c4] ss:$16 sps:$4 sm:$0xff]  }
 0x187   :  { %2169 = vmatpush1.bf16.msra.mxu0 %v8687_v42  ;;  %2275 = vmatpush1.bf16.msra.mxu1 %v8690_v18  ;;  %v8746_v42 = vld [vmem:[#allocation5 + $0x8cc] ss:$16 sps:$4 sm:$0xff]   ;;  %v8741_v18 = vld [vmem:[#allocation5 + $0x8c0] ss:$16 sps:$4 sm:$0xff]  }
 0x188   :  { %2170 = vmatprep.subr.bf16.mxu0 %v8695_v19  ;;  %2276 = vmatprep.subr.bf16.mxu1 %v8698_v22  ;;  %v8744_v19 = vld [vmem:[#allocation5 + $0x8c8] ss:$16 sps:$4 sm:$0xff]   ;;  %v8749_v22 = vld [vmem:[#allocation5 + $0x8e4] ss:$16 sps:$4 sm:$0xff]  }
 0x18b   :  { %2171 = vmatpush1.bf16.msra.mxu0 %v8693_v24  ;;  %2277 = vmatpush1.bf16.msra.mxu1 %v8696_v30  ;;  %v8747_v24 = vld [vmem:[#allocation5 + $0x8e0] ss:$16 sps:$4 sm:$0xff]   ;;  %v8758_v30 = vld [vmem:[#allocation5 + $0x90c] ss:$16 sps:$4 sm:$0xff]  }
 0x18c   :  { %2172 = vmatprep.subr.bf16.mxu0 %v8701_v31  ;;  %2278 = vmatprep.subr.bf16.mxu1 %v8704_v34  ;;  %v8753_v31 = vld [vmem:[#allocation5 + $0x900] ss:$16 sps:$4 sm:$0xff]   ;;  %v8756_v34 = vld [vmem:[#allocation5 + $0x908] ss:$16 sps:$4 sm:$0xff]  }
 0x18f   :  { %2173 = vmatpush1.bf16.msra.mxu0 %v8699_v39  ;;  %2279 = vmatpush1.bf16.msra.mxu1 %v8702_v20  ;;  %v8764_v39 = vld [vmem:[#allocation5 + $0x92c] ss:$16 sps:$4 sm:$0xff]   ;;  %v8762_v20 = vld [vmem:[#allocation5 + $0x928] ss:$16 sps:$4 sm:$0xff]  }
 0x190   :  { %3078 = vmatprep.subr.bf16.mxu0 %v8707_v46  ;;  %3184 = vmatprep.subr.bf16.mxu1 %v8710_v44  ;;  %v8770_v46 = vld [vmem:[#allocation5 + $0x94c] ss:$16 sps:$4 sm:$0xff]   ;;  %v8765_v44 = vld [vmem:[#allocation5 + $0x940] ss:$16 sps:$4 sm:$0xff]  }
 0x192   :  { %7318 = vmatmul.mubr.msk.bf16.vlgmr.msra.gmra.mrb[0].mxu0 %vm9959_vm3, %v7317_v49  ;;  %7342 = vmatmul.mubr.msk.bf16.vlgmr.msra.gmra.mrb[0].mxu1 %vm9959_vm3, %v7317_v49  ;;  %v8773_v49 = vld [vmem:[#allocation5 + $0x964] ss:$16 sps:$4 sm:$0xff]  }
 0x193   :  { %3079 = vmatpush1.bf16.msra.mxu0 %v8705_v45  ;;  %3185 = vmatpush1.bf16.msra.mxu1 %v8708_v52  ;;  %v8768_v45 = vld [vmem:[#allocation5 + $0x948] ss:$16 sps:$4 sm:$0xff]   ;;  %v8779_v52 = vld [vmem:[#allocation5 + $0x984] ss:$16 sps:$4 sm:$0xff]  }
 0x194   :  { %3080 = vmatprep.subr.bf16.mxu0 %v8713_v54  ;;  %3186 = vmatprep.subr.bf16.mxu1 %v8716_v55  ;;  %v8777_v54 = vld [vmem:[#allocation5 + $0x980] ss:$16 sps:$4 sm:$0xff]   ;;  %v8780_v55 = vld [vmem:[#allocation5 + $0x988] ss:$16 sps:$4 sm:$0xff]  }
 0x195   :  { %7321 = vmatprep.mubr.msk.bf16.mxu0 %vm9988_vm5, %v7320_v33  ;;  %7345 = vmatprep.mubr.msk.bf16.mxu1 %vm9988_vm5, %v7320_v33  ;;  %v152_v33 = vadd.s32 24, %v9929_v25 }
 0x197   :  { %3081 = vmatpush1.bf16.msra.mxu0 %v8711_v59  ;;  %3187 = vmatpush1.bf16.msra.mxu1 %v8714_v60  ;;  %v8783_v59 = vld [vmem:[#allocation5 + $0x9a0] ss:$16 sps:$4 sm:$0xff]   ;;  %v8786_v60 = vld [vmem:[#allocation5 + $0x9a8] ss:$16 sps:$4 sm:$0xff]   ;;  %v178_v61 = vand.u32 15, %v152_v33 }
 0x198   :  { %3082 = vmatprep.subr.bf16.mxu0 %v8719_v0  ;;  %3188 = vmatprep.subr.bf16.mxu1 %v8722_v1  ;;  %v8789_v0 = vld [vmem:[#allocation5 + $0x9c0] ss:$16 sps:$4 sm:$0xff]   ;;  %v8792_v1 = vld [vmem:[#allocation5 + $0x9c8] ss:$16 sps:$4 sm:$0xff]   ;;  %v8830_v33 = vld [vmem:[#allocation5 + $0xa8c] ss:$16 sps:$4 sm:$0xff]  }
 0x199   :  { %vm208_vm9 = vcmp.lt.s32.totalorder %v178_v61, 15  ;;  %v8831_v61 = vld [vmem:[#allocation5 + $0xaa0] ss:$16 sps:$4 sm:$0xff]  }
 0x19a   :  { %7324 = vmatmul.mubr.msk.bf16.gmra.mrb[4].mxu0 %vm9988_vm5, %v7323_v6  ;;  %7348 = vmatmul.mubr.msk.bf16.gmra.mrb[4].mxu1 %vm9988_vm5, %v7323_v6  ;;  %v8797_v6 = vld [vmem:[#allocation5 + $0x9e4] ss:$16 sps:$4 sm:$0xff]   ;;  %vm10081_vm10 = vmpackc.low %vm208_vm9, %vm9743_vm2 }
 0x19b   :  { %3083 = vmatpush1.bf16.msra.mxu0 %v8717_v2  ;;  %3189 = vmatpush1.bf16.msra.mxu1 %v8720_v5  ;;  %v9492_v2 = vld [vmem:[#allocation2] sm:$0xff] }
 0x19c   :  { %3084 = vmatprep.subr.bf16.mxu0 %v8725_v8  ;;  %3190 = vmatprep.subr.bf16.mxu1 %v8728_v4  ;;  %v267_v5 = vrot.slane %v9492_v2, 1  ;;  %v9494_v8 = vld [vmem:[#allocation2 + $0x40] sm:$0xff]  ;;  %v8840_v2 = vld [vmem:[#allocation5 + $0xac8] ss:$16 sps:$4 sm:$0xff]  }
 0x19d   :  { %7479 = vmatprep.mubr.msk.bf16.mxu0 %vm10071_vm8, %v7478_v36  ;;  %7503 = vmatprep.mubr.msk.bf16.mxu1 %vm10071_vm8, %v7478_v36  ;;  %v275_v4 = vrot.slane %v9494_v8, 1  ;;  %v8800_v36 = vld [vmem:[#allocation5 + $0x9ec] ss:$16 sps:$4 sm:$0xff]   ;;  %v8851_v8 = vld [vmem:[#allocation5 + $0xb04] ss:$16 sps:$4 sm:$0xff]  }
 0x19f   :  { %3085 = vmatpush1.bf16.msra.mxu0 %v8723_v10  ;;  %3191 = vmatpush1.bf16.msra.mxu1 %v8726_v11  ;;  %v8795_v10 = vld [vmem:[#allocation5 + $0x9e0] ss:$16 sps:$4 sm:$0xff]   ;;  %v8798_v11 = vld [vmem:[#allocation5 + $0x9e8] ss:$16 sps:$4 sm:$0xff]  }
 0x1a0   :  { %3086 = vmatprep.subr.bf16.mxu0 %v8731_v28  ;;  %3192 = vmatprep.subr.bf16.mxu1 %v8734_v12  ;;  %v9495_v28 = vld [vmem:[#allocation2 + $0x68] sm:$0xff] }
 0x1a1   :  { %v280_v12 = vrot.slane %v9495_v28, 1  ;;  %v8860_v28 = vld [vmem:[#allocation5 + $0xb2c] ss:$16 sps:$4 sm:$0xff]  }
 0x1a3   :  { %3087 = vmatpush1.bf16.msra.mxu0 %v8729_v13  ;;  %3193 = vmatpush1.bf16.msra.mxu1 %v8732_v14  ;;  %v8803_v13 = vld [vmem:[#allocation5 + $0xa04] ss:$16 sps:$4 sm:$0xff]   ;;  %v8806_v14 = vld [vmem:[#allocation5 + $0xa0c] ss:$16 sps:$4 sm:$0xff]  }
 0x1a4   :  { %3088 = vmatprep.subr.bf16.mxu0 %v8737_v15  ;;  %3194 = vmatprep.subr.bf16.mxu1 %v8740_v16  ;;  %v292_v16 = vsel %vm283_vm6, %v267_v5, %v271_v3  ;;  %v6538_v15 = vld [vmem:[%s10823_s5 + $0x10] sm:$0xff] }
 0x1a7   :  { %3089 = vmatpush1.bf16.msra.mxu0 %v8735_v47  ;;  %3195 = vmatpush1.bf16.msra.mxu1 %v8738_v35  ;;  %v288_v47 = vsel %vm283_vm6, %v271_v3, %v275_v4  ;;  %v8801_v35 = vld [vmem:[#allocation5 + $0xa00] ss:$16 sps:$4 sm:$0xff]   ;;  %v8846_v3 = vld [vmem:[#allocation5 + $0xae8] ss:$16 sps:$4 sm:$0xff]  }
 0x1a8   :  { %3090 = vmatprep.subr.bf16.mxu0 %v8743_v17  ;;  %3196 = vmatprep.subr.bf16.mxu1 %v8746_v42  ;;  %v8804_v17 = vld [vmem:[#allocation5 + $0xa08] ss:$16 sps:$4 sm:$0xff]   ;;  %v7481_v42 = vpack.c.bf16 %v288_v47, %v292_v16  ;;  %v8866_v16 = vld [vmem:[#allocation5 + $0xb4c] ss:$16 sps:$4 sm:$0xff]   ;;  %v8861_v47 = vld [vmem:[#allocation5 + $0xb40] ss:$16 sps:$4 sm:$0xff]  }
 0x1ab   :  { %3091 = vmatpush1.bf16.msra.mxu0 %v8741_v18  ;;  %3197 = vmatpush1.bf16.msra.mxu1 %v8744_v19  ;;  %v8809_v18 = vld [vmem:[#allocation5 + $0xa24] ss:$16 sps:$4 sm:$0xff]   ;;  %v8812_v19 = vld [vmem:[#allocation5 + $0xa2c] ss:$16 sps:$4 sm:$0xff]  }
 0x1ac   :  { %3092 = vmatprep.subr.bf16.mxu0 %v8749_v22  ;;  %3198 = vmatprep.subr.bf16.mxu1 %v8752_v23  ;;  %v285_v22 = vsel %vm283_vm6, %v276_v48, %v280_v12  ;;  %v297_v23 = vsel %vm283_vm6, %v280_v12, %v268_v37  ;;  %v8815_v37 = vld [vmem:[#allocation5 + $0xa44] ss:$16 sps:$4 sm:$0xff]   ;;  %v8855_v12 = vld [vmem:[#allocation5 + $0xb20] ss:$16 sps:$4 sm:$0xff]  }
 0x1af   :  { %3093 = vmatpush1.bf16.msra.mxu0 %v8747_v24  ;;  %3199 = vmatpush1.bf16.msra.mxu1 %v8750_v26  ;;  %v9496_v24 = vld [vmem:[#allocation2 + $0x60] sm:$0xff] }
 0x1b0   :  { %3094 = vmatprep.subr.bf16.mxu0 %v8755_v27  ;;  %3200 = vmatprep.subr.bf16.mxu1 %v8758_v30  ;;  %v279_v26 = vrot.slane %v9496_v24, 1  ;;  %v8807_v27 = vld [vmem:[#allocation5 + $0xa20] ss:$16 sps:$4 sm:$0xff]   ;;  %v8810_v30 = vld [vmem:[#allocation5 + $0xa28] ss:$16 sps:$4 sm:$0xff]  }
 0x1b1   :  { %v8873_v24 = vld [vmem:[#allocation5 + $0xb80] ss:$16 sps:$4 sm:$0xff]  }
 0x1b3   :  { %3095 = vmatpush1.bf16.msra.mxu0 %v8753_v31  ;;  %3201 = vmatpush1.bf16.msra.mxu1 %v8756_v34  ;;  %v7484_v31 = vpack.c.bf16 %v297_v23, %v285_v22  ;;  %v10097_v34 = vld [vmem:[#allocation2 + $0x18] sm:$0xff]  ;;  %v8875_v22 = vld [vmem:[#allocation5 + $0xb84] ss:$16 sps:$4 sm:$0xff]  }
 0x1b4   :  { %3096 = vmatprep.subr.bf16.mxu0 %v8761_v38  ;;  %3202 = vmatprep.subr.bf16.mxu1 %v8764_v39  ;;  %v270_v29 = vrot.slane %v10097_v34, 1  ;;  %v9498_v38 = vld [vmem:[#allocation2 + $0x38] sm:$0xff]  ;;  %v8903_v34 = vld [vmem:[#allocation8 + $0x420] ss:$16 sps:$4 sm:$0xff]  }
 0x1b5   :  { %v274_v48 = vrot.slane %v9498_v38, 1  ;;  %v10100_v39 = vld [vmem:[#allocation2 + $0x58] sm:$0xff] }
 0x1b6   :  { %v278_v56 = vrot.slane %v10100_v39, 1  ;;  %v8878_v23 = vld [vmem:[#allocation5 + $0xb8c] ss:$16 sps:$4 sm:$0xff]   ;;  %v8882_v38 = vld [vmem:[#allocation5 + $0xba8] ss:$16 sps:$4 sm:$0xff]  }
 0x1b7   :  { %3097 = vmatpush1.bf16.msra.mxu0 %v8759_v41  ;;  %3203 = vmatpush1.bf16.msra.mxu1 %v8762_v20  ;;  %v8818_v41 = vld [vmem:[#allocation5 + $0xa4c] ss:$16 sps:$4 sm:$0xff]   ;;  %v284_v20 = vsel %vm283_vm6, %v275_v4, %v279_v26 }
 0x1b8   :  { %3098 = vmatprep.subr.bf16.mxu0 %v8767_v21  ;;  %3204 = vmatprep.subr.bf16.mxu1 %v8770_v46  ;;  %v296_v21 = vsel %vm283_vm6, %v279_v26, %v267_v5  ;;  %v8813_v46 = vld [vmem:[#allocation5 + $0xa40] ss:$16 sps:$4 sm:$0xff]   ;;  %v8845_v5 = vld [vmem:[#allocation5 + $0xae4] ss:$16 sps:$4 sm:$0xff]   ;;  %v8854_v4 = vld [vmem:[#allocation5 + $0xb0c] ss:$16 sps:$4 sm:$0xff]  }
 0x1b9   :  { %v8876_v26 = vld [vmem:[#allocation5 + $0xb88] ss:$16 sps:$4 sm:$0xff]  }
 0x1bb   :  { %3099 = vmatpush1.bf16.msra.mxu0 %v8765_v44  ;;  %3205 = vmatpush1.bf16.msra.mxu1 %v8768_v45  ;;  %v8816_v44 = vld [vmem:[#allocation5 + $0xa48] ss:$16 sps:$4 sm:$0xff]   ;;  %v8821_v45 = vld [vmem:[#allocation5 + $0xa64] ss:$16 sps:$4 sm:$0xff]  }
 0x1bc   :  { %3100 = vmatprep.subr.bf16.mxu0 %v8773_v49  ;;  %3206 = vmatprep.subr.bf16.mxu1 %v8776_v32  ;;  %v8824_v49 = vld [vmem:[#allocation5 + $0xa6c] ss:$16 sps:$4 sm:$0xff]   ;;  %v7487_v32 = vpack.c.bf16 %v296_v21, %v284_v20  ;;  %v8888_v20 = vld [vmem:[#allocation5 + $0xbc8] ss:$16 sps:$4 sm:$0xff]   ;;  %v8893_v21 = vld [vmem:[#allocation5 + $0xbe4] ss:$16 sps:$4 sm:$0xff]  }
 0x1bf   :  { %3101 = vmatpush1.bf16.msra.mxu0 %v8771_v50  ;;  %3207 = vmatpush1.bf16.msra.mxu1 %v8774_v51  ;;  %v291_v50 = vsel %vm283_vm6, %v274_v48, %v278_v56  ;;  %v295_v51 = vsel %vm283_vm6, %v270_v29, %v274_v48  ;;  %v8887_v48 = vld [vmem:[#allocation5 + $0xbc4] ss:$16 sps:$4 sm:$0xff]  }
 0x1c0   :  { %3102 = vmatprep.subr.bf16.mxu0 %v8779_v52  ;;  %3208 = vmatprep.subr.bf16.mxu1 %v8782_v53  ;;  %v8819_v52 = vld [vmem:[#allocation5 + $0xa60] ss:$16 sps:$4 sm:$0xff]   ;;  %v8822_v53 = vld [vmem:[#allocation5 + $0xa68] ss:$16 sps:$4 sm:$0xff]  }
 0x1c3   :  { %3103 = vmatpush1.bf16.msra.mxu0 %v8777_v54  ;;  %3209 = vmatpush1.bf16.msra.mxu1 %v8780_v55  ;;  %v7490_v54 = vpack.c.bf16 %v291_v50, %v295_v51  ;;  %v8827_v55 = vld [vmem:[#allocation5 + $0xa84] ss:$16 sps:$4 sm:$0xff]  }
 0x1c4   :  { %3104 = vmatprep.subr.bf16.mxu0 %v8785_v43  ;;  %3210 = vmatprep.subr.bf16.mxu1 %v8788_v58  ;;  %v8825_v43 = vld [vmem:[#allocation5 + $0xa80] ss:$16 sps:$4 sm:$0xff]   ;;  %v8828_v58 = vld [vmem:[#allocation5 + $0xa88] ss:$16 sps:$4 sm:$0xff]  }
 0x1c5   :  { %v9502_v50 = vld [vmem:[#allocation2 + $0x50] sm:$0xff] }
 0x1c6   :  { %v277_v51 = vrot.slane %v9502_v50, 1  ;;  %v8957_v50 = vld [vmem:[#allocation8 + $0x540] ss:$16 sps:$4 sm:$0xff]  }
 0x1c7   :  { %3105 = vmatpush1.bf16.msra.mxu0 %v8783_v59  ;;  %3211 = vmatpush1.bf16.msra.mxu1 %v8786_v60  ;;  %v8833_v59 = vld [vmem:[#allocation5 + $0xaa4] ss:$16 sps:$4 sm:$0xff]   ;;  %v8836_v60 = vld [vmem:[#allocation5 + $0xaac] ss:$16 sps:$4 sm:$0xff]  }
 0x1c8   :  { %3106 = vmatprep.subr.bf16.mxu0 %v8791_v62  ;;  %3212 = vmatprep.subr.bf16.mxu1 %v8794_v63  ;;  %v8834_v62 = vld [vmem:[#allocation5 + $0xaa8] ss:$16 sps:$4 sm:$0xff]   ;;  %v8839_v63 = vld [vmem:[#allocation5 + $0xac4] ss:$16 sps:$4 sm:$0xff]  }
 0x1cb   :  { %3107 = vmatpush1.bf16.msra.mxu0 %v8789_v0  ;;  %3213 = vmatpush1.bf16.msra.mxu1 %v8792_v1  ;;  %v8842_v0 = vld [vmem:[#allocation5 + $0xacc] ss:$16 sps:$4 sm:$0xff]   ;;  %v8837_v1 = vld [vmem:[#allocation5 + $0xac0] ss:$16 sps:$4 sm:$0xff]  }
 0x1cc   :  { %3108 = vmatprep.subr.bf16.mxu0 %v8797_v6  ;;  %3214 = vmatprep.subr.bf16.mxu1 %v8800_v36  ;;  %v8848_v6 = vld [vmem:[#allocation5 + $0xaec] ss:$16 sps:$4 sm:$0xff]   ;;  %v8849_v36 = vld [vmem:[#allocation5 + $0xb00] ss:$16 sps:$4 sm:$0xff]  }
 0x1cf   :  { %3109 = vmatpush1.bf16.msra.mxu0 %v8795_v10  ;;  %3215 = vmatpush1.bf16.msra.mxu1 %v8798_v11  ;;  %v8852_v10 = vld [vmem:[#allocation5 + $0xb08] ss:$16 sps:$4 sm:$0xff]   ;;  %v8857_v11 = vld [vmem:[#allocation5 + $0xb24] ss:$16 sps:$4 sm:$0xff]  }
 0x1d0   :  { %3131 = vmatprep.subr.bf16.mxu0 %v8803_v13  ;;  %3237 = vmatprep.subr.bf16.mxu1 %v8806_v14  ;;  %v8858_v13 = vld [vmem:[#allocation5 + $0xb28] ss:$16 sps:$4 sm:$0xff]   ;;  %v8863_v14 = vld [vmem:[#allocation5 + $0xb44] ss:$16 sps:$4 sm:$0xff]  }
 0x1d2   :  { %7482 = vmatmul.mubr.msk.bf16.vlgmr.msra.gmra.mrb[0].mxu0 %vm10071_vm8, %v7481_v42  ;;  %7506 = vmatmul.mubr.msk.bf16.vlgmr.msra.gmra.mrb[0].mxu1 %vm10071_vm8, %v7481_v42  ;;  %v8872_v42 = vld [vmem:[#allocation5 + $0xb6c] ss:$16 sps:$4 sm:$0xff]  }
 0x1d3   :  { %3132 = vmatpush1.bf16.msra.mxu0 %v8801_v35  ;;  %3238 = vmatpush1.bf16.msra.mxu1 %v8804_v17  ;;  %v8864_v35 = vld [vmem:[#allocation5 + $0xb48] ss:$16 sps:$4 sm:$0xff]   ;;  %v8869_v17 = vld [vmem:[#allocation5 + $0xb64] ss:$16 sps:$4 sm:$0xff]  }
 0x1d4   :  { %3133 = vmatprep.subr.bf16.mxu0 %v8809_v18  ;;  %3239 = vmatprep.subr.bf16.mxu1 %v8812_v19  ;;  %v8867_v18 = vld [vmem:[#allocation5 + $0xb60] ss:$16 sps:$4 sm:$0xff]   ;;  %v8870_v19 = vld [vmem:[#allocation5 + $0xb68] ss:$16 sps:$4 sm:$0xff]  }
 0x1d5   :  { %7485 = vmatprep.mubr.msk.bf16.mxu0 %vm10081_vm10, %v7484_v31  ;;  %7509 = vmatprep.mubr.msk.bf16.mxu1 %vm10081_vm10, %v7484_v31  ;;  %v8879_v31 = vld [vmem:[#allocation5 + $0xba0] ss:$16 sps:$4 sm:$0xff]  }
 0x1d7   :  { %3134 = vmatpush1.bf16.msra.mxu0 %v8807_v27  ;;  %3240 = vmatpush1.bf16.msra.mxu1 %v8810_v30  ;;  %v8881_v27 = vld [vmem:[#allocation5 + $0xba4] ss:$16 sps:$4 sm:$0xff]   ;;  %v8884_v30 = vld [vmem:[#allocation5 + $0xbac] ss:$16 sps:$4 sm:$0xff]  }
 0x1d8   :  { %3135 = vmatprep.subr.bf16.mxu0 %v8815_v37  ;;  %3241 = vmatprep.subr.bf16.mxu1 %v8818_v41  ;;  %v8890_v37 = vld [vmem:[#allocation5 + $0xbcc] ss:$16 sps:$4 sm:$0xff]   ;;  %v8885_v41 = vld [vmem:[#allocation5 + $0xbc0] ss:$16 sps:$4 sm:$0xff]  }
 0x1da   :  { %7488 = vmatmul.mubr.msk.bf16.gmra.mrb[4].mxu0 %vm10081_vm10, %v7487_v32  ;;  %7512 = vmatmul.mubr.msk.bf16.gmra.mrb[4].mxu1 %vm10081_vm10, %v7487_v32 }
 0x1db   :  { %3136 = vmatpush1.bf16.msra.mxu0 %v8813_v46  ;;  %3242 = vmatpush1.bf16.msra.mxu1 %v8816_v44  ;;  %v8896_v46 = vld [vmem:[#allocation5 + $0xbec] ss:$16 sps:$4 sm:$0xff]   ;;  %v9500_v44 = vld [vmem:[#allocation2 + $0x10] sm:$0xff] }
 0x1dc   :  { %3137 = vmatprep.subr.bf16.mxu0 %v8821_v45  ;;  %3243 = vmatprep.subr.bf16.mxu1 %v8824_v49  ;;  %v269_v45 = vrot.slane %v9500_v44, 1  ;;  %v9501_v49 = vld [vmem:[#allocation2 + $0x30] sm:$0xff] }
 0x1dd   :  { %7491 = vmatprep.mubr.msk.bf16.mxu0 %vm10071_vm8, %v7490_v54  ;;  %7515 = vmatprep.mubr.msk.bf16.mxu1 %vm10071_vm8, %v7490_v54  ;;  %v273_v32 = vrot.slane %v9501_v49, 1  ;;  %v8891_v54 = vld [vmem:[#allocation5 + $0xbe0] ss:$16 sps:$4 sm:$0xff]   ;;  %v8951_v44 = vld [vmem:[#allocation8 + $0x520] ss:$16 sps:$4 sm:$0xff]  }
 0x1de   :  { %v8959_v49 = vld [vmem:[#allocation8 + $0x544] ss:$16 sps:$4 sm:$0xff]  }
 0x1df   :  { %3138 = vmatpush1.bf16.msra.mxu0 %v8819_v52  ;;  %3244 = vmatpush1.bf16.msra.mxu1 %v8822_v53  ;;  %v9503_v52 = vld [vmem:[#allocation2 + $0x78] sm:$0xff] }
 0x1e0   :  { %3139 = vmatprep.subr.bf16.mxu0 %v8827_v55  ;;  %3245 = vmatprep.subr.bf16.mxu1 %v8830_v33  ;;  %v282_v53 = vrot.slane %v9503_v52, 1  ;;  %v8894_v55 = vld [vmem:[#allocation5 + $0xbe8] ss:$16 sps:$4 sm:$0xff]  }
 0x1e1   :  { %v8899_v33 = vld [vmem:[#allocation8 + $0x404] ss:$16 sps:$4 sm:$0xff]  }
 0x1e2   :  { %v8965_v52 = vld [vmem:[#allocation8 + $0x564] ss:$16 sps:$4 sm:$0xff]  }
 0x1e3   :  { %3140 = vmatpush1.bf16.msra.mxu0 %v8825_v43  ;;  %3246 = vmatpush1.bf16.msra.mxu1 %v8828_v58  ;;  %v8902_v43 = vld [vmem:[#allocation8 + $0x40c] ss:$16 sps:$4 sm:$0xff]   ;;  %v290_v58 = vsel %vm283_vm6, %v273_v32, %v277_v51 }
 0x1e4   :  { %3141 = vmatprep.subr.bf16.mxu0 %v8833_v59  ;;  %3247 = vmatprep.subr.bf16.mxu1 %v8836_v60  ;;  %v294_v59 = vsel %vm283_vm6, %v269_v45, %v273_v32  ;;  %v287_v60 = vsel %vm283_vm6, %v278_v56, %v282_v53  ;;  %v8962_v32 = vld [vmem:[#allocation8 + $0x54c] ss:$16 sps:$4 sm:$0xff]  }
 0x1e7   :  { %3142 = vmatpush1.bf16.msra.mxu0 %v8831_v61  ;;  %3248 = vmatpush1.bf16.msra.mxu1 %v8834_v62  ;;  %v299_v61 = vsel %vm283_vm6, %v282_v53, %v270_v29  ;;  %v7493_v62 = vpack.c.bf16 %v290_v58, %v294_v59  ;;  %v8906_v29 = vld [vmem:[#allocation8 + $0x428] ss:$16 sps:$4 sm:$0xff]   ;;  %v8968_v53 = vld [vmem:[#allocation8 + $0x56c] ss:$16 sps:$4 sm:$0xff]   ;;  %v8969_v58 = vld [vmem:[#allocation8 + $0x580] ss:$16 sps:$4 sm:$0xff]  }
 0x1e8   :  { %3143 = vmatprep.subr.bf16.mxu0 %v8839_v63  ;;  %3249 = vmatprep.subr.bf16.mxu1 %v8842_v0  ;;  %v8897_v63 = vld [vmem:[#allocation8 + $0x400] ss:$16 sps:$4 sm:$0xff]   ;;  %v8900_v0 = vld [vmem:[#allocation8 + $0x408] ss:$16 sps:$4 sm:$0xff]  }
 0x1e9   :  { %v8972_v59 = vld [vmem:[#allocation8 + $0x588] ss:$16 sps:$4 sm:$0xff]  }
 0x1eb   :  { %3144 = vmatpush1.bf16.msra.mxu0 %v8837_v1  ;;  %3250 = vmatpush1.bf16.msra.mxu1 %v8840_v2  ;;  %v9504_v1 = vld [vmem:[#allocation2 + $0x70] sm:$0xff] }
 0x1ec   :  { %3145 = vmatprep.subr.bf16.mxu0 %v8845_v5  ;;  %3251 = vmatprep.subr.bf16.mxu1 %v8848_v6  ;;  %v281_v2 = vrot.slane %v9504_v1, 1  ;;  %v7496_v5 = vpack.c.bf16 %v299_v61, %v287_v60  ;;  %v8905_v6 = vld [vmem:[#allocation8 + $0x424] ss:$16 sps:$4 sm:$0xff]   ;;  %v8980_v61 = vld [vmem:[#allocation8 + $0x5ac] ss:$16 sps:$4 sm:$0xff]  }
 0x1ed   :  { %v8977_v60 = vld [vmem:[#allocation8 + $0x5a4] ss:$16 sps:$4 sm:$0xff]   ;;  %v8986_v1 = vld [vmem:[#allocation8 + $0x5cc] ss:$16 sps:$4 sm:$0xff]  }
 0x1ee   :  { %v286_v39 = vsel %vm283_vm6, %v277_v51, %v281_v2  ;;  %v298_v56 = vsel %vm283_vm6, %v281_v2, %v269_v45  ;;  %v8954_v45 = vld [vmem:[#allocation8 + $0x528] ss:$16 sps:$4 sm:$0xff]   ;;  %v8981_v2 = vld [vmem:[#allocation8 + $0x5c0] ss:$16 sps:$4 sm:$0xff]  }
 0x1ef   :  { %3146 = vmatpush1.bf16.msra.mxu0 %v8843_v7  ;;  %3252 = vmatpush1.bf16.msra.mxu1 %v8846_v3  ;;  %v8908_v7 = vld [vmem:[#allocation8 + $0x42c] ss:$16 sps:$4 sm:$0xff]   ;;  %v8911_v3 = vld [vmem:[#allocation8 + $0x444] ss:$16 sps:$4 sm:$0xff]   ;;  %v8960_v51 = vld [vmem:[#allocation8 + $0x548] ss:$16 sps:$4 sm:$0xff]  }
 0x1f0   :  { %3147 = vmatprep.subr.bf16.mxu0 %v8851_v8  ;;  %3253 = vmatprep.subr.bf16.mxu1 %v8854_v4  ;;  %v8914_v8 = vld [vmem:[#allocation8 + $0x44c] ss:$16 sps:$4 sm:$0xff]   ;;  %v7499_v4 = vpack.c.bf16 %v298_v56, %v286_v39  ;;  %v8995_v39 = vld [vmem:[#allocation8 + $0x604] ss:$16 sps:$4 sm:$0xff]  }
 0x1f1   :  { %v8998_v56 = vld [vmem:[#allocation8 + $0x60c] ss:$16 sps:$4 sm:$0xff]  }
 0x1f3   :  { %3148 = vmatpush1.bf16.msra.mxu0 %v8849_v36  ;;  %3254 = vmatpush1.bf16.msra.mxu1 %v8852_v10  ;;  %v8909_v36 = vld [vmem:[#allocation8 + $0x440] ss:$16 sps:$4 sm:$0xff]   ;;  %v8912_v10 = vld [vmem:[#allocation8 + $0x448] ss:$16 sps:$4 sm:$0xff]  }
 0x1f4   :  { %3149 = vmatprep.subr.bf16.mxu0 %v8857_v11  ;;  %3255 = vmatprep.subr.bf16.mxu1 %v8860_v28  ;;  %v8917_v11 = vld [vmem:[#allocation8 + $0x464] ss:$16 sps:$4 sm:$0xff]   ;;  %v8920_v28 = vld [vmem:[#allocation8 + $0x46c] ss:$16 sps:$4 sm:$0xff]  }
 0x1f7   :  { %3150 = vmatpush1.bf16.msra.mxu0 %v8855_v12  ;;  %3256 = vmatpush1.bf16.msra.mxu1 %v8858_v13  ;;  %v8915_v12 = vld [vmem:[#allocation8 + $0x460] ss:$16 sps:$4 sm:$0xff]   ;;  %v8918_v13 = vld [vmem:[#allocation8 + $0x468] ss:$16 sps:$4 sm:$0xff]  }
 0x1f8   :  { %3151 = vmatprep.subr.bf16.mxu0 %v8863_v14  ;;  %3257 = vmatprep.subr.bf16.mxu1 %v8866_v16  ;;  %v8923_v14 = vld [vmem:[#allocation8 + $0x484] ss:$16 sps:$4 sm:$0xff]   ;;  %v8926_v16 = vld [vmem:[#allocation8 + $0x48c] ss:$16 sps:$4 sm:$0xff]  }
 0x1fb   :  { %3152 = vmatpush1.bf16.msra.mxu0 %v8861_v47  ;;  %3258 = vmatpush1.bf16.msra.mxu1 %v8864_v35  ;;  %v8921_v47 = vld [vmem:[#allocation8 + $0x480] ss:$16 sps:$4 sm:$0xff]   ;;  %v8924_v35 = vld [vmem:[#allocation8 + $0x488] ss:$16 sps:$4 sm:$0xff]  }
 0x1fc   :  { %3153 = vmatprep.subr.bf16.mxu0 %v8869_v17  ;;  %3259 = vmatprep.subr.bf16.mxu1 %v8872_v42  ;;  %v8929_v17 = vld [vmem:[#allocation8 + $0x4a4] ss:$16 sps:$4 sm:$0xff]   ;;  %v8932_v42 = vld [vmem:[#allocation8 + $0x4ac] ss:$16 sps:$4 sm:$0xff]  }
 0x1ff   :  { %3154 = vmatpush1.bf16.msra.mxu0 %v8867_v18  ;;  %3260 = vmatpush1.bf16.msra.mxu1 %v8870_v19  ;;  %v8927_v18 = vld [vmem:[#allocation8 + $0x4a0] ss:$16 sps:$4 sm:$0xff]   ;;  %v8930_v19 = vld [vmem:[#allocation8 + $0x4a8] ss:$16 sps:$4 sm:$0xff]  }
 0x200   :  { %3155 = vmatprep.subr.bf16.mxu0 %v8875_v22  ;;  %3261 = vmatprep.subr.bf16.mxu1 %v8878_v23  ;;  %v8935_v22 = vld [vmem:[#allocation8 + $0x4c4] ss:$16 sps:$4 sm:$0xff]   ;;  %v8938_v23 = vld [vmem:[#allocation8 + $0x4cc] ss:$16 sps:$4 sm:$0xff]  }
 0x203   :  { %3156 = vmatpush1.bf16.msra.mxu0 %v8873_v24  ;;  %3262 = vmatpush1.bf16.msra.mxu1 %v8876_v26  ;;  %v8933_v24 = vld [vmem:[#allocation8 + $0x4c0] ss:$16 sps:$4 sm:$0xff]   ;;  %v8936_v26 = vld [vmem:[#allocation8 + $0x4c8] ss:$16 sps:$4 sm:$0xff]  }
 0x204   :  { %3157 = vmatprep.subr.bf16.mxu0 %v8881_v27  ;;  %3263 = vmatprep.subr.bf16.mxu1 %v8884_v30  ;;  %v8941_v27 = vld [vmem:[#allocation8 + $0x4e4] ss:$16 sps:$4 sm:$0xff]   ;;  %v8944_v30 = vld [vmem:[#allocation8 + $0x4ec] ss:$16 sps:$4 sm:$0xff]  }
 0x207   :  { %3158 = vmatpush1.bf16.msra.mxu0 %v8879_v31  ;;  %3264 = vmatpush1.bf16.msra.mxu1 %v8882_v38  ;;  %v8939_v31 = vld [vmem:[#allocation8 + $0x4e0] ss:$16 sps:$4 sm:$0xff]   ;;  %v8942_v38 = vld [vmem:[#allocation8 + $0x4e8] ss:$16 sps:$4 sm:$0xff]  }
 0x208   :  { %3159 = vmatprep.subr.bf16.mxu0 %v8887_v48  ;;  %3265 = vmatprep.subr.bf16.mxu1 %v8890_v37  ;;  %v8947_v48 = vld [vmem:[#allocation8 + $0x504] ss:$16 sps:$4 sm:$0xff]   ;;  %v8950_v37 = vld [vmem:[#allocation8 + $0x50c] ss:$16 sps:$4 sm:$0xff]  }
 0x20b   :  { %3160 = vmatpush1.bf16.msra.mxu0 %v8885_v41  ;;  %3266 = vmatpush1.bf16.msra.mxu1 %v8888_v20  ;;  %v8945_v41 = vld [vmem:[#allocation8 + $0x500] ss:$16 sps:$4 sm:$0xff]   ;;  %v8948_v20 = vld [vmem:[#allocation8 + $0x508] ss:$16 sps:$4 sm:$0xff]  }
 0x20c   :  { %3161 = vmatprep.subr.bf16.mxu0 %v8893_v21  ;;  %3267 = vmatprep.subr.bf16.mxu1 %v8896_v46  ;;  %v8953_v21 = vld [vmem:[#allocation8 + $0x524] ss:$16 sps:$4 sm:$0xff]   ;;  %v8956_v46 = vld [vmem:[#allocation8 + $0x52c] ss:$16 sps:$4 sm:$0xff]  }
 0x20f   :  { %3162 = vmatpush1.bf16.msra.mxu0 %v8891_v54  ;;  %3268 = vmatpush1.bf16.msra.mxu1 %v8894_v55  ;;  %v8963_v54 = vld [vmem:[#allocation8 + $0x560] ss:$16 sps:$4 sm:$0xff]   ;;  %v8966_v55 = vld [vmem:[#allocation8 + $0x568] ss:$16 sps:$4 sm:$0xff]  }
 0x210   :  { %4369 = vmatprep.subr.bf16.mxu0 %v8899_v33  ;;  %4475 = vmatprep.subr.bf16.mxu1 %v8902_v43  ;;  %v8971_v33 = vld [vmem:[#allocation8 + $0x584] ss:$16 sps:$4 sm:$0xff]   ;;  %v8974_v43 = vld [vmem:[#allocation8 + $0x58c] ss:$16 sps:$4 sm:$0xff]  }
 0x212   :  { %7494 = vmatmul.mubr.msk.bf16.vlgmr.msra.gmra.mrb[0].mxu0 %vm10071_vm8, %v7493_v62  ;;  %7518 = vmatmul.mubr.msk.bf16.vlgmr.msra.gmra.mrb[0].mxu1 %vm10071_vm8, %v7493_v62  ;;  %v8975_v62 = vld [vmem:[#allocation8 + $0x5a0] ss:$16 sps:$4 sm:$0xff]  }
 0x213   :  { %7497 = vmatprep.mubr.msk.bf16.mxu0 %vm10081_vm10, %v7496_v5  ;;  %7521 = vmatprep.mubr.msk.bf16.mxu1 %vm10081_vm10, %v7496_v5  ;;  %v8984_v5 = vld [vmem:[#allocation8 + $0x5c8] ss:$16 sps:$4 sm:$0xff]  }
 0x214   :  { %4370 = vmatpush1.bf16.msra.mxu0 %v8897_v63  ;;  %4476 = vmatpush1.bf16.msra.mxu1 %v8900_v0  ;;  %v8978_v63 = vld [vmem:[#allocation8 + $0x5a8] ss:$16 sps:$4 sm:$0xff]   ;;  %v8983_v0 = vld [vmem:[#allocation8 + $0x5c4] ss:$16 sps:$4 sm:$0xff]  }
 0x215   :  { %4371 = vmatprep.subr.bf16.mxu0 %v8905_v6  ;;  %4477 = vmatprep.subr.bf16.mxu1 %v8908_v7  ;;  %v8989_v6 = vld [vmem:[#allocation8 + $0x5e4] ss:$16 sps:$4 sm:$0xff]   ;;  %v8992_v7 = vld [vmem:[#allocation8 + $0x5ec] ss:$16 sps:$4 sm:$0xff]  }
 0x218   :  { %4372 = vmatpush1.bf16.msra.mxu0 %v8903_v34  ;;  %4478 = vmatpush1.bf16.msra.mxu1 %v8906_v29  ;;  %v8987_v34 = vld [vmem:[#allocation8 + $0x5e0] ss:$16 sps:$4 sm:$0xff]   ;;  %v8990_v29 = vld [vmem:[#allocation8 + $0x5e8] ss:$16 sps:$4 sm:$0xff]  }
 0x219   :  { %4373 = vmatprep.subr.bf16.mxu0 %v8911_v3  ;;  %4479 = vmatprep.subr.bf16.mxu1 %v8914_v8  ;;  %v10160_v3 = vsub.s32 0, %v9929_v25  ;;  %v10163_v8 = vsub.s32 2, %v9929_v25 }
 0x21a   :  { %7500 = vmatmul.mubr.msk.bf16.gmra.mrb[4].mxu0 %vm10081_vm10, %v7499_v4  ;;  %7524 = vmatmul.mubr.msk.bf16.gmra.mrb[4].mxu1 %vm10081_vm10, %v7499_v4  ;;  %v209_v4 = vld [vmem:[#allocation7] sm:$0xf] }
 0x21c   :  { %4374 = vmatpush1.bf16.msra.mxu0 %v8909_v36  ;;  %4480 = vmatpush1.bf16.msra.mxu1 %v8912_v10  ;;  %v10166_v36 = vsub.s32 1, %v9929_v25  ;;  %v10169_v10 = vsub.s32 3, %v9929_v25  ;;  %v9035_v25 = vld [vmem:[#allocation8 + $0x6e0] ss:$16 sps:$4 sm:$0xff]  }
 0x21d   :  { %4375 = vmatprep.subr.bf16.mxu0 %v8917_v11  ;;  %4481 = vmatprep.subr.bf16.mxu1 %v8920_v28  ;;  %v3310_v11 = vrot.slane %v209_v4, %v10160_v3  ;;  %v3318_v28 = vrot.slane %v209_v4, %v10163_v8 }
 0x220   :  { %4376 = vmatpush1.bf16.msra.mxu0 %v8915_v12  ;;  %4482 = vmatpush1.bf16.msra.mxu1 %v8918_v13  ;;  %v10174_v12 = vrot.slane %v209_v4, %v10166_v36  ;;  %v10177_v13 = vrot.slane %v209_v4, %v10169_v10 }
 0x221   :  { %4377 = vmatprep.subr.bf16.mxu0 %v8923_v14  ;;  %4483 = vmatprep.subr.bf16.mxu1 %v8926_v16 }
 0x224   :  { %4378 = vmatpush1.bf16.msra.mxu0 %v8921_v47  ;;  %4484 = vmatpush1.bf16.msra.mxu1 %v8924_v35 }
 0x225   :  { %4379 = vmatprep.subr.bf16.mxu0 %v8929_v17  ;;  %4485 = vmatprep.subr.bf16.mxu1 %v8932_v42 }
 0x228   :  { %4380 = vmatpush1.bf16.msra.mxu0 %v8927_v18  ;;  %4486 = vmatpush1.bf16.msra.mxu1 %v8930_v19 }
 0x229   :  { %4381 = vmatprep.subr.bf16.mxu0 %v8935_v22  ;;  %4487 = vmatprep.subr.bf16.mxu1 %v8938_v23 }
 0x22c   :  { %4382 = vmatpush1.bf16.msra.mxu0 %v8933_v24  ;;  %4488 = vmatpush1.bf16.msra.mxu1 %v8936_v26 }
 0x22d   :  { %4383 = vmatprep.subr.bf16.mxu0 %v8941_v27  ;;  %4489 = vmatprep.subr.bf16.mxu1 %v8944_v30 }
 0x230   :  { %4384 = vmatpush1.bf16.msra.mxu0 %v8939_v31  ;;  %4490 = vmatpush1.bf16.msra.mxu1 %v8942_v38 }
 0x231   :  { %4385 = vmatprep.subr.bf16.mxu0 %v8947_v48  ;;  %4491 = vmatprep.subr.bf16.mxu1 %v8950_v37 }
 0x234   :  { %4386 = vmatpush1.bf16.msra.mxu0 %v8945_v41  ;;  %4492 = vmatpush1.bf16.msra.mxu1 %v8948_v20 }
 0x235   :  { %4387 = vmatprep.subr.bf16.mxu0 %v8953_v21  ;;  %4493 = vmatprep.subr.bf16.mxu1 %v8956_v46 }
 0x238   :  { %4388 = vmatpush1.bf16.msra.mxu0 %v8951_v44  ;;  %4494 = vmatpush1.bf16.msra.mxu1 %v8954_v45 }
 0x239   :  { %4389 = vmatprep.subr.bf16.mxu0 %v8959_v49  ;;  %4495 = vmatprep.subr.bf16.mxu1 %v8962_v32 }
 0x23c   :  { %4390 = vmatpush1.bf16.msra.mxu0 %v8957_v50  ;;  %4496 = vmatpush1.bf16.msra.mxu1 %v8960_v51 }
 0x23d   :  { %4391 = vmatprep.subr.bf16.mxu0 %v8965_v52  ;;  %4497 = vmatprep.subr.bf16.mxu1 %v8968_v53 }
 0x240   :  { %4392 = vmatpush1.bf16.msra.mxu0 %v8963_v54  ;;  %4498 = vmatpush1.bf16.msra.mxu1 %v8966_v55 }
 0x241   :  { %4393 = vmatprep.subr.bf16.mxu0 %v8971_v33  ;;  %4499 = vmatprep.subr.bf16.mxu1 %v8974_v43 }
 0x244   :  { %4394 = vmatpush1.bf16.msra.mxu0 %v8969_v58  ;;  %4500 = vmatpush1.bf16.msra.mxu1 %v8972_v59 }
 0x245   :  { %4395 = vmatprep.subr.bf16.mxu0 %v8977_v60  ;;  %4501 = vmatprep.subr.bf16.mxu1 %v8980_v61 }
 0x248   :  { %4396 = vmatpush1.bf16.msra.mxu0 %v8975_v62  ;;  %4502 = vmatpush1.bf16.msra.mxu1 %v8978_v63 }
 0x249   :  { %4397 = vmatprep.subr.bf16.mxu0 %v8983_v0  ;;  %4503 = vmatprep.subr.bf16.mxu1 %v8986_v1 }
 0x24c   :  { %4398 = vmatpush1.bf16.msra.mxu0 %v8981_v2  ;;  %4504 = vmatpush1.bf16.msra.mxu1 %v8984_v5 }
 0x24d   :  { %4399 = vmatprep.subr.bf16.mxu0 %v8989_v6  ;;  %4505 = vmatprep.subr.bf16.mxu1 %v8992_v7 }
 0x250   :  { %4400 = vmatpush1.bf16.msra.mxu0 %v8987_v34  ;;  %4506 = vmatpush1.bf16.msra.mxu1 %v8990_v29 }
 0x251   :  { %4422 = vmatprep.subr.bf16.mxu0 %v8995_v39  ;;  %4528 = vmatprep.subr.bf16.mxu1 %v8998_v56 }
 0x2e5   :  { %v3165_v14 = vpop.f32.mrb[0].mxu0  ;;  %v3271_v16 = vpop.f32.mrb[0].mxu1 }
 0x2e6   :  { %v3327_v47 = vadd.f32 %v3310_v11, %v3165_v14  ;;  %v3329_v35 = vadd.f32 %v3318_v28, %v3271_v16  ;;  %v3167_v17 = vpop.f32.mrb[1].mxu0  ;;  %v3273_v42 = vpop.f32.mrb[1].mxu1 }
 0x2e7   :  { %v3328_v18 = vadd.f32 %v10174_v12, %v3167_v17  ;;  %v3169_v19 = vpop.f32.mrb[2].mxu0  ;;  %v3275_v22 = vpop.f32.mrb[2].mxu1  ;;  %v3330_v23 = vadd.f32 %v10177_v13, %v3273_v42  ;;  %v8996_v17 = vld [vmem:[#allocation8 + $0x608] ss:$16 sps:$4 sm:$0xff]  }
 0x2e8   :  { %v3331_v24 = vadd.f32 %v3310_v11, %v3169_v19  ;;  %v3333_v26 = vadd.f32 %v3318_v28, %v3275_v22  ;;  %v3171_v27 = vpop.f32.mrb[3].mxu0  ;;  %v3277_v30 = vpop.f32.mrb[3].mxu1  ;;  %v10181_v31 = vmax.f32 %v3327_v47, 0.0  ;;  %v10183_v38 = vmax.f32 %v3329_v35, 0.0  ;;  %v8993_v35 = vld [vmem:[#allocation8 + $0x600] ss:$16 sps:$4 sm:$0xff]  }
 0x2e9   :  { %v10185_v48 = vmax.f32 %v3328_v18, 0.0  ;;  %v3332_v37 = vadd.f32 %v10174_v12, %v3171_v27  ;;  %v10188_v41 = vmax.f32 %v3330_v23, 0.0  ;;  %v3334_v46 = vadd.f32 %v10177_v13, %v3277_v30  ;;  %v9001_v23 = vld [vmem:[#allocation8 + $0x624] ss:$16 sps:$4 sm:$0xff]  }
 0x2ea   :  { %v10190_v20 = vmax.f32 %v3331_v24, 0.0  ;;  %v10192_v21 = vmax.f32 %v3333_v26, 0.0  ;;  %v3360_v44 = vrot.slane %v10181_v31, 7  ;;  %v10830_v45 = vrot.slane %v10181_v31, 1 }
 0x2eb   :  { %v3362_v49 = vrot.slane %v10183_v38, 7  ;;  %v10828_v32 = vrot.slane %v10183_v38, 1  ;;  %v3361_v58 = vrot.slane %v10185_v48, 7  ;;  %v10210_v61 = vmax.f32 %v3332_v37, 0.0 }
 0x2ec   :  { %v3364_v52 = vrot.slane %v10190_v20, 7  ;;  %v3412_v53 = vrot.slane %v10190_v20, 1  ;;  %v3592_v54 = vpack.c.bf16 %v10190_v20, %v10181_v31  ;;  %v3366_v55 = vrot.slane %v10192_v21, 7 }
 0x2ed   :  { %v3175_v50 = vpop.f32.mrb[4].mxu0  ;;  %v3281_v51 = vpop.f32.mrb[4].mxu1  ;;  %v3414_v59 = vrot.slane %v10192_v21, 1  ;;  %v10208_v60 = vpack.c.bf16 %v10192_v21, %v10183_v38  ;;  %v3409_v0 = vrot.slane %v10185_v48, 1  ;;  %v10233_v29 = vmax.f32 %v3334_v46, 0.0 }
 0x2ee   :  { %v3177_v33 = vpop.f32.mrb[5].mxu0  ;;  %v3283_v43 = vpop.f32.mrb[5].mxu1  ;;  %v3384_v1 = vsel %vm226_vm0, %v3360_v44, %v3364_v52  ;;  %v3432_v2 = vsel %vm283_vm6, %v10830_v45, %v3412_v53  ;;  %v3386_v5 = vsel %vm226_vm0, %v3362_v49, %v3366_v55  ;;  %v3335_v39 = vadd.f32 %v3310_v11, %v3175_v50 }
 0x2ef   :  { %v3179_v62 = vpop.f32.mrb[6].mxu0  ;;  %v3285_v63 = vpop.f32.mrb[6].mxu1  ;;  %v3434_v34 = vsel %vm283_vm6, %v10828_v32, %v3414_v59  ;;  %v3337_v56 = vadd.f32 %v3318_v28, %v3281_v51  ;;  %v3336_v4 = vadd.f32 %v10174_v12, %v3177_v33  ;;  %v3338_v14 = vadd.f32 %v10177_v13, %v3283_v43  ;;  %v9016_v32 = vld [vmem:[#allocation8 + $0x66c] ss:$16 sps:$4 sm:$0xff]  }
 0x2f0   :  { %v3181_v6 = vpop.f32.mrb[7].mxu0  ;;  %v3287_v7 = vpop.f32.mrb[7].mxu1  ;;  %v3339_v16 = vadd.f32 %v3310_v11, %v3179_v62  ;;  %v3341_v47 = vadd.f32 %v3318_v28, %v3285_v63  ;;  %v3363_v42 = vrot.slane %v10188_v41, 7  ;;  %v10238_v18 = vmax.f32 %v3335_v39, 0.0  ;;  %v9004_v28 = vld [vmem:[#allocation8 + $0x62c] ss:$16 sps:$4 sm:$0xff]  }
 0x2f1   :  { %v10240_v19 = vmax.f32 %v3337_v56, 0.0  ;;  %v3593_v22 = vpack.c.bf16 %v10210_v61, %v10185_v48  ;;  %v10245_v26 = vmax.f32 %v3336_v4, 0.0  ;;  %v3365_v30 = vrot.slane %v10210_v61, 7  ;;  %v8999_v56 = vld [vmem:[#allocation8 + $0x620] ss:$16 sps:$4 sm:$0xff]  }
 0x2f2   :  { %v10247_v27 = vmax.f32 %v3339_v16, 0.0  ;;  %v10249_v11 = vmax.f32 %v3341_v47, 0.0  ;;  %v3416_v37 = vrot.slane %v10238_v18, 1  ;;  %v3340_v50 = vadd.f32 %v10174_v12, %v3181_v6  ;;  %v9002_v4 = vld [vmem:[#allocation8 + $0x628] ss:$16 sps:$4 sm:$0xff]  }
 0x2f3   :  { %v10829_v46 = vrot.slane %v10240_v19, 1  ;;  %4401 = vmatprep.mubr.bf16.mxu0 %v3593_v22  ;;  %4507 = vmatprep.mubr.bf16.mxu1 %v3593_v22  ;;  %v3413_v51 = vrot.slane %v10210_v61, 1  ;;  %v3367_v33 = vrot.slane %v10233_v29, 7  ;;  %v10258_v62 = vmax.f32 %v3338_v14, 0.0  ;;  %v9010_v22 = vld [vmem:[#allocation8 + $0x64c] ss:$16 sps:$4 sm:$0xff]  }
 0x2f4   :  { %4402 = vmatmul.mubr.bf16.vlgmr.msra.gmra.mrb[8].mxu0 %v3592_v54  ;;  %4508 = vmatmul.mubr.bf16.vlgmr.msra.gmra.mrb[8].mxu1 %v3592_v54  ;;  %v3368_v63 = vrot.slane %v10238_v18, 7  ;;  %v3428_v39 = vsel %vm283_vm6, %v3412_v53, %v3416_v37  ;;  %v3372_v6 = vrot.slane %v10247_v27, 7  ;;  %v3369_v16 = vrot.slane %v10245_v26, 7  ;;  %v9007_v53 = vld [vmem:[#allocation8 + $0x644] ss:$16 sps:$4 sm:$0xff]  }
 0x2f5   :  { %v3430_v12 = vsel %vm283_vm6, %v3414_v59, %v10829_v46  ;;  %4423 = vmatpush1.bf16.msra.mxu0 %v8993_v35  ;;  %4529 = vmatpush1.bf16.msra.mxu1 %v8996_v17  ;;  %v10270_v14 = vpack.c.bf16 %v3428_v39, %v3432_v2  ;;  %v3374_v47 = vrot.slane %v10249_v11, 7  ;;  %v10280_v35 = vmax.f32 %v3340_v50, 0.0  ;;  %v9028_v48 = vld [vmem:[#allocation8 + $0x6ac] ss:$16 sps:$4 sm:$0xff]  }
 0x2f6   :  { %v10272_v54 = vpack.c.bf16 %v3430_v12, %v3434_v34  ;;  %4424 = vmatprep.subr.bf16.mxu0 %v9001_v23  ;;  %4530 = vmatprep.subr.bf16.mxu1 %v9004_v28  ;;  %v3388_v59 = vsel %vm226_vm0, %v3372_v6, %v3360_v44  ;;  %v3342_v2 = vadd.f32 %v10177_v13, %v3287_v7  ;;  %v3370_v50 = vrot.slane %v10240_v19, 7  ;;  %v9005_v12 = vld [vmem:[#allocation8 + $0x640] ss:$16 sps:$4 sm:$0xff]  }
 0x2f7   :  { %v3596_v34 = vpack.c.bf16 %v10247_v27, %v10238_v18  ;;  %v10285_v17 = vpack.c.bf16 %v3384_v1, %v3388_v59  ;;  %v3390_v23 = vsel %vm226_vm0, %v3374_v47, %v3362_v49  ;;  %v3595_v28 = vpack.c.bf16 %v10233_v29, %v10188_v41  ;;  %v9008_v59 = vld [vmem:[#allocation8 + $0x648] ss:$16 sps:$4 sm:$0xff]  }
 0x2f8   :  { %v10295_v44 = vpack.c.bf16 %v10249_v11, %v10240_v19  ;;  %v10298_v13 = vpack.c.bf16 %v3386_v5, %v3390_v23  ;;  %v3373_v7 = vrot.slane %v10280_v35, 7  ;;  %v10301_v1 = vmax.f32 %v3342_v2, 0.0 }
 0x2f9   :  { %4425 = vmatpush1.bf16.msra.mxu0 %v8999_v56  ;;  %4531 = vmatpush1.bf16.msra.mxu1 %v9002_v4  ;;  %v3417_v39 = vrot.slane %v10245_v26, 1  ;;  %v3597_v49 = vpack.c.bf16 %v10280_v35, %v10245_v26  ;;  %v3385_v5 = vsel %vm226_vm0, %v3361_v58, %v3365_v30  ;;  %v3381_v2 = vsel %vm226_vm0, %v3365_v30, %v3369_v16 }
 0x2fa   :  { %4426 = vmatprep.subr.bf16.mxu0 %v9007_v53  ;;  %4532 = vmatprep.subr.bf16.mxu1 %v9010_v22  ;;  %v3371_v56 = vrot.slane %v10258_v62, 7  ;;  %v3375_v4 = vrot.slane %v10301_v1, 7  ;;  %v10316_v23 = vpack.c.bf16 %v10301_v1, %v10258_v62  ;;  %v3389_v26 = vsel %vm226_vm0, %v3373_v7, %v3361_v58  ;;  %v9013_v22 = vld [vmem:[#allocation8 + $0x664] ss:$16 sps:$4 sm:$0xff]  }
 0x2fb   :  { %v3419_v53 = vrot.slane %v10258_v62, 1  ;;  %4411 = vmatprep.mubr.bf16.mxu0 %v3597_v49  ;;  %4517 = vmatprep.mubr.bf16.mxu1 %v3597_v49  ;;  %v10323_v30 = vpack.c.bf16 %v3385_v5, %v3389_v26  ;;  %v3377_v46 = vsel %vm226_vm0, %v3369_v16, %v3373_v7  ;;  %v3376_v24 = vsel %vm226_vm0, %v3368_v63, %v3372_v6  ;;  %v9011_v16 = vld [vmem:[#allocation8 + $0x660] ss:$16 sps:$4 sm:$0xff]  }
 0x2fc   :  { %v3421_v43 = vrot.slane %v10280_v35, 1  ;;  %4412 = vmatmul.mubr.bf16.gmra.mrb[12].mxu0 %v3596_v34  ;;  %4518 = vmatmul.mubr.bf16.gmra.mrb[12].mxu1 %v3596_v34  ;;  %v10330_v45 = vpack.c.bf16 %v3377_v46, %v3381_v2  ;;  %v3380_v58 = vsel %vm226_vm0, %v3364_v52, %v3368_v63  ;;  %v3387_v62 = vsel %vm226_vm0, %v3363_v42, %v3367_v33  ;;  %v9014_v35 = vld [vmem:[#allocation8 + $0x668] ss:$16 sps:$4 sm:$0xff]   ;;  %v9019_v34 = vld [vmem:[#allocation8 + $0x684] ss:$16 sps:$4 sm:$0xff]  }
 0x2fd   :  { %v3420_v6 = vrot.slane %v10247_v27, 1  ;;  %4427 = vmatpush1.bf16.msra.mxu0 %v9005_v12  ;;  %4533 = vmatpush1.bf16.msra.mxu1 %v9008_v59  ;;  %v10343_v46 = vpack.c.bf16 %v3376_v24, %v3380_v58  ;;  %v3391_v20 = vsel %vm226_vm0, %v3375_v4, %v3363_v42  ;;  %v3379_v52 = vsel %vm226_vm0, %v3371_v56, %v3375_v4  ;;  %v9022_v27 = vld [vmem:[#allocation8 + $0x68c] ss:$16 sps:$4 sm:$0xff]  }
 0x2fe   :  { %v3422_v63 = vrot.slane %v10249_v11, 1  ;;  %4454 = vmatprep.mubr.bf16.mxu0 %v3595_v28  ;;  %4560 = vmatprep.mubr.bf16.mxu1 %v3595_v28  ;;  %v10352_v7 = vpack.c.bf16 %v3387_v62, %v3391_v20  ;;  %v3383_v24 = vsel %vm226_vm0, %v3367_v33, %v3371_v56  ;;  %v3378_v49 = vsel %vm226_vm0, %v3370_v50, %v3374_v47  ;;  %v9017_v47 = vld [vmem:[#allocation8 + $0x680] ss:$16 sps:$4 sm:$0xff]   ;;  %v9031_v20 = vld [vmem:[#allocation8 + $0x6c4] ss:$16 sps:$4 sm:$0xff]  }
 0x2ff   :  { %v3423_v42 = vrot.slane %v10301_v1, 1  ;;  %4428 = vmatprep.subr.bf16.mxu0 %v9013_v22  ;;  %4534 = vmatprep.subr.bf16.mxu1 %v9016_v32  ;;  %v10361_v12 = vpack.c.bf16 %v3379_v52, %v3383_v24  ;;  %v3382_v11 = vsel %vm226_vm0, %v3366_v55, %v3370_v50  ;;  %v3429_v28 = vsel %vm283_vm6, %v3413_v51, %v3417_v39  ;;  %v9020_v50 = vld [vmem:[#allocation8 + $0x688] ss:$16 sps:$4 sm:$0xff]   ;;  %v9034_v52 = vld [vmem:[#allocation8 + $0x6cc] ss:$16 sps:$4 sm:$0xff]  }
 0x300   :  { %v10371_v33 = vpack.c.bf16 %v3378_v49, %v3382_v11  ;;  %v3433_v32 = vsel %vm283_vm6, %v3409_v0, %v3413_v51  ;;  %v3425_v21 = vsel %vm283_vm6, %v3417_v39, %v3421_v43  ;;  %v3437_v55 = vsel %vm283_vm6, %v3421_v43, %v3409_v0  ;;  %v9025_v39 = vld [vmem:[#allocation8 + $0x6a4] ss:$16 sps:$4 sm:$0xff]   ;;  %v9046_v49 = vld [vmem:[#allocation8 + $0x70c] ss:$16 sps:$4 sm:$0xff]   ;;  %v9044_v11 = vld [vmem:[#allocation8 + $0x708] ss:$16 sps:$4 sm:$0xff]  }
 0x301   :  { %4429 = vmatpush1.bf16.msra.mxu0 %v9011_v16  ;;  %4535 = vmatpush1.bf16.msra.mxu1 %v9014_v35  ;;  %v10385_v1 = vpack.c.bf16 %v3429_v28, %v3433_v32  ;;  %v10387_v61 = vpack.c.bf16 %v3437_v55, %v3425_v21  ;;  %v3424_v51 = vsel %vm283_vm6, %v3416_v37, %v3420_v6  ;;  %v10839_v59 = vrot.slane %v10181_v31, 1  ;;  %v9026_v35 = vld [vmem:[#allocation8 + $0x6a8] ss:$16 sps:$4 sm:$0xff]   ;;  %v9043_v24 = vld [vmem:[#allocation8 + $0x704] ss:$16 sps:$4 sm:$0xff]  }
 0x302   :  { %4430 = vmatprep.subr.bf16.mxu0 %v9019_v34  ;;  %4536 = vmatprep.subr.bf16.mxu1 %v9022_v27  ;;  %v10840_v43 = vrot.slane %v10233_v29, 1  ;;  %v10842_v18 = vrot.slane %v10188_v41, 1  ;;  %v3427_v31 = vsel %vm283_vm6, %v3419_v53, %v3423_v42  ;;  %v10844_v29 = vrot.slane %v10240_v19, 1  ;;  %v9029_v19 = vld [vmem:[#allocation8 + $0x6c0] ss:$16 sps:$4 sm:$0xff]  }
 0x303   :  { %v3436_v0 = vsel %vm283_vm6, %v3420_v6, %v10839_v59  ;;  %v10845_v6 = vrot.slane %v10183_v38, 1  ;;  %v9032_v34 = vld [vmem:[#allocation8 + $0x6c8] ss:$16 sps:$4 sm:$0xff]   ;;  %v9037_v38 = vld [vmem:[#allocation8 + $0x6e4] ss:$16 sps:$4 sm:$0xff]  }
 0x304   :  { %v3431_v5 = vsel %vm283_vm6, %v10840_v43, %v3419_v53  ;;  %v10841_v2 = vmov %v10840_v43  ;;  %v10407_v56 = vpack.c.bf16 %v3436_v0, %v3424_v51  ;;  %v10843_v26 = vmov %v10842_v18  ;;  %v9023_v53 = vld [vmem:[#allocation8 + $0x6a0] ss:$16 sps:$4 sm:$0xff]   ;;  %v9040_v27 = vld [vmem:[#allocation8 + $0x6ec] ss:$16 sps:$4 sm:$0xff]   ;;  %v9049_v28 = vld [vmem:[#allocation8 + $0x724] ss:$16 sps:$4 sm:$0xff]  }
 0x305   :  { %v3435_v37 = vsel %vm283_vm6, %v10842_v18, %v10841_v2  ;;  %v3439_v22 = vsel %vm283_vm6, %v3423_v42, %v10843_v26  ;;  %v3426_v62 = vsel %vm283_vm6, %v10844_v29, %v3422_v63  ;;  %v3438_v16 = vsel %vm283_vm6, %v3422_v63, %v10845_v6  ;;  %4431 = vmatpush1.bf16.msra.mxu0 %v9017_v47  ;;  %v9038_v63 = vld [vmem:[#allocation8 + $0x6e8] ss:$16 sps:$4 sm:$0xff]   ;;  %v9041_v42 = vld [vmem:[#allocation8 + $0x700] ss:$16 sps:$4 sm:$0xff]   ;;  %v9052_v32 = vld [vmem:[#allocation8 + $0x72c] ss:$16 sps:$4 sm:$0xff]  }
 0x306   :  { %v10409_v4 = vpack.c.bf16 %v3431_v5, %v3435_v37  ;;  %v10417_v58 = vpack.c.bf16 %v3439_v22, %v3427_v31  ;;  %4537 = vmatpush1.bf16.msra.mxu1 %v9020_v50  ;;  %v10427_v41 = vpack.c.bf16 %v3438_v16, %v3426_v62  ;;  %4432 = vmatprep.subr.bf16.mxu0 %v9025_v39  ;;  %v9047_v21 = vld [vmem:[#allocation8 + $0x720] ss:$16 sps:$4 sm:$0xff]   ;;  %v9050_v55 = vld [vmem:[#allocation8 + $0x728] ss:$16 sps:$4 sm:$0xff]   ;;  %v9055_v47 = vld [vmem:[#allocation8 + $0x744] ss:$16 sps:$4 sm:$0xff]  }
 0x307   :  { %4538 = vmatprep.subr.bf16.mxu1 %v9028_v48  ;;  %v9058_v50 = vld [vmem:[#allocation8 + $0x74c] ss:$16 sps:$4 sm:$0xff]   ;;  %v9053_v51 = vld [vmem:[#allocation8 + $0x740] ss:$16 sps:$4 sm:$0xff]   ;;  %v9056_v39 = vld [vmem:[#allocation8 + $0x748] ss:$16 sps:$4 sm:$0xff]  }
 0x308   :  { %v9061_v48 = vld [vmem:[#allocation8 + $0x764] ss:$16 sps:$4 sm:$0xff]   ;;  %v9064_v59 = vld [vmem:[#allocation8 + $0x76c] ss:$16 sps:$4 sm:$0xff]   ;;  %v9059_v0 = vld [vmem:[#allocation8 + $0x760] ss:$16 sps:$4 sm:$0xff]  }
 0x309   :  { %4433 = vmatpush1.bf16.msra.mxu0 %v9023_v53  ;;  %v9062_v43 = vld [vmem:[#allocation8 + $0x768] ss:$16 sps:$4 sm:$0xff]   ;;  %v9067_v5 = vld [vmem:[#allocation8 + $0x784] ss:$16 sps:$4 sm:$0xff]   ;;  %v9070_v2 = vld [vmem:[#allocation8 + $0x78c] ss:$16 sps:$4 sm:$0xff]  }
 0x30a   :  { %4539 = vmatpush1.bf16.msra.mxu1 %v9026_v35  ;;  %4434 = vmatprep.subr.bf16.mxu0 %v9031_v20  ;;  %v9065_v18 = vld [vmem:[#allocation8 + $0x780] ss:$16 sps:$4 sm:$0xff]   ;;  %v9068_v37 = vld [vmem:[#allocation8 + $0x788] ss:$16 sps:$4 sm:$0xff]   ;;  %v9073_v31 = vld [vmem:[#allocation8 + $0x7a4] ss:$16 sps:$4 sm:$0xff]  }
 0x30b   :  { %4540 = vmatprep.subr.bf16.mxu1 %v9034_v52  ;;  %v9076_v26 = vld [vmem:[#allocation8 + $0x7ac] ss:$16 sps:$4 sm:$0xff]   ;;  %v9071_v22 = vld [vmem:[#allocation8 + $0x7a0] ss:$16 sps:$4 sm:$0xff]   ;;  %v9074_v29 = vld [vmem:[#allocation8 + $0x7a8] ss:$16 sps:$4 sm:$0xff]  }
 0x30c   :  { %v9079_v62 = vld [vmem:[#allocation8 + $0x7c4] ss:$16 sps:$4 sm:$0xff]   ;;  %v9082_v6 = vld [vmem:[#allocation8 + $0x7cc] ss:$16 sps:$4 sm:$0xff]   ;;  %v9077_v16 = vld [vmem:[#allocation8 + $0x7c0] ss:$16 sps:$4 sm:$0xff]  }
 0x30d   :  { %4435 = vmatpush1.bf16.msra.mxu0 %v9029_v19  ;;  %v9080_v53 = vld [vmem:[#allocation8 + $0x7c8] ss:$16 sps:$4 sm:$0xff]   ;;  %v9085_v35 = vld [vmem:[#allocation8 + $0x7e4] ss:$16 sps:$4 sm:$0xff]   ;;  %v9088_v20 = vld [vmem:[#allocation8 + $0x7ec] ss:$16 sps:$4 sm:$0xff]  }
 0x30e   :  { %4541 = vmatpush1.bf16.msra.mxu1 %v9032_v34  ;;  %4436 = vmatprep.subr.bf16.mxu0 %v9037_v38  ;;  %v9083_v52 = vld [vmem:[#allocation8 + $0x7e0] ss:$16 sps:$4 sm:$0xff]   ;;  %v9086_v19 = vld [vmem:[#allocation8 + $0x7e8] ss:$16 sps:$4 sm:$0xff]   ;;  %v9091_v34 = vld [vmem:[#allocation8 + $0x4] ss:$16 sps:$4 sm:$0xff]  }
 0x30f   :  { %4542 = vmatprep.subr.bf16.mxu1 %v9040_v27  ;;  %v9094_v38 = vld [vmem:[#allocation8 + $0xc] ss:$16 sps:$4 sm:$0xff]   ;;  %v9089_v27 = vld [vmem:[#allocation8] ss:$16 sps:$4 sm:$0xff]  }
 0x311   :  { %4437 = vmatpush1.bf16.msra.mxu0 %v9035_v25  ;;  %v9092_v25 = vld [vmem:[#allocation8 + $0x8] ss:$16 sps:$4 sm:$0xff]  }
 0x312   :  { %4543 = vmatpush1.bf16.msra.mxu1 %v9038_v63  ;;  %4438 = vmatprep.subr.bf16.mxu0 %v9043_v24  ;;  %v9097_v63 = vld [vmem:[#allocation8 + $0x24] ss:$16 sps:$4 sm:$0xff]   ;;  %v9100_v24 = vld [vmem:[#allocation8 + $0x2c] ss:$16 sps:$4 sm:$0xff]  }
 0x313   :  { %4544 = vmatprep.subr.bf16.mxu1 %v9046_v49  ;;  %v9095_v49 = vld [vmem:[#allocation8 + $0x20] ss:$16 sps:$4 sm:$0xff]  }
 0x315   :  { %4439 = vmatpush1.bf16.msra.mxu0 %v9041_v42  ;;  %v9098_v42 = vld [vmem:[#allocation8 + $0x28] ss:$16 sps:$4 sm:$0xff]  }
 0x316   :  { %4545 = vmatpush1.bf16.msra.mxu1 %v9044_v11  ;;  %4440 = vmatprep.subr.bf16.mxu0 %v9049_v28  ;;  %v9103_v11 = vld [vmem:[#allocation8 + $0x44] ss:$16 sps:$4 sm:$0xff]   ;;  %v9106_v28 = vld [vmem:[#allocation8 + $0x4c] ss:$16 sps:$4 sm:$0xff]  }
 0x317   :  { %4546 = vmatprep.subr.bf16.mxu1 %v9052_v32  ;;  %v9101_v32 = vld [vmem:[#allocation8 + $0x40] ss:$16 sps:$4 sm:$0xff]  }
 0x319   :  { %4441 = vmatpush1.bf16.msra.mxu0 %v9047_v21  ;;  %v9104_v21 = vld [vmem:[#allocation8 + $0x48] ss:$16 sps:$4 sm:$0xff]  }
 0x31a   :  { %4547 = vmatpush1.bf16.msra.mxu1 %v9050_v55  ;;  %4442 = vmatprep.subr.bf16.mxu0 %v9055_v47  ;;  %v9109_v55 = vld [vmem:[#allocation8 + $0x64] ss:$16 sps:$4 sm:$0xff]   ;;  %v9110_v47 = vld [vmem:[#allocation8 + $0x68] ss:$16 sps:$4 sm:$0xff]  }
 0x31b   :  { %4548 = vmatprep.subr.bf16.mxu1 %v9058_v50  ;;  %v9115_v50 = vld [vmem:[#allocation8 + $0x84] ss:$16 sps:$4 sm:$0xff]  }
 0x31d   :  { %4443 = vmatpush1.bf16.msra.mxu0 %v9053_v51  ;;  %v9118_v51 = vld [vmem:[#allocation8 + $0x8c] ss:$16 sps:$4 sm:$0xff]  }
 0x31e   :  { %4549 = vmatpush1.bf16.msra.mxu1 %v9056_v39  ;;  %4444 = vmatprep.subr.bf16.mxu0 %v9061_v48  ;;  %v9113_v39 = vld [vmem:[#allocation8 + $0x80] ss:$16 sps:$4 sm:$0xff]   ;;  %v9121_v48 = vld [vmem:[#allocation8 + $0xa4] ss:$16 sps:$4 sm:$0xff]  }
 0x31f   :  { %4550 = vmatprep.subr.bf16.mxu1 %v9064_v59  ;;  %v9124_v59 = vld [vmem:[#allocation8 + $0xac] ss:$16 sps:$4 sm:$0xff]  }
 0x321   :  { %4445 = vmatpush1.bf16.msra.mxu0 %v9059_v0  ;;  %v9119_v0 = vld [vmem:[#allocation8 + $0xa0] ss:$16 sps:$4 sm:$0xff]  }
 0x322   :  { %4551 = vmatpush1.bf16.msra.mxu1 %v9062_v43  ;;  %4446 = vmatprep.subr.bf16.mxu0 %v9067_v5  ;;  %v9127_v43 = vld [vmem:[#allocation8 + $0xc4] ss:$16 sps:$4 sm:$0xff]   ;;  %v9130_v5 = vld [vmem:[#allocation8 + $0xcc] ss:$16 sps:$4 sm:$0xff]  }
 0x323   :  { %4552 = vmatprep.subr.bf16.mxu1 %v9070_v2  ;;  %v9125_v2 = vld [vmem:[#allocation8 + $0xc0] ss:$16 sps:$4 sm:$0xff]  }
 0x325   :  { %4447 = vmatpush1.bf16.msra.mxu0 %v9065_v18  ;;  %v9128_v18 = vld [vmem:[#allocation8 + $0xc8] ss:$16 sps:$4 sm:$0xff]  }
 0x326   :  { %4553 = vmatpush1.bf16.msra.mxu1 %v9068_v37  ;;  %4448 = vmatprep.subr.bf16.mxu0 %v9073_v31  ;;  %v9133_v37 = vld [vmem:[#allocation8 + $0xe4] ss:$16 sps:$4 sm:$0xff]   ;;  %v9136_v31 = vld [vmem:[#allocation8 + $0xec] ss:$16 sps:$4 sm:$0xff]  }
 0x327   :  { %4554 = vmatprep.subr.bf16.mxu1 %v9076_v26  ;;  %v9131_v26 = vld [vmem:[#allocation8 + $0xe0] ss:$16 sps:$4 sm:$0xff]  }
 0x329   :  { %4449 = vmatpush1.bf16.msra.mxu0 %v9071_v22  ;;  %v9134_v22 = vld [vmem:[#allocation8 + $0xe8] ss:$16 sps:$4 sm:$0xff]  }
 0x32a   :  { %4555 = vmatpush1.bf16.msra.mxu1 %v9074_v29  ;;  %4450 = vmatprep.subr.bf16.mxu0 %v9079_v62  ;;  %v9139_v29 = vld [vmem:[#allocation8 + $0x104] ss:$16 sps:$4 sm:$0xff]   ;;  %v9142_v62 = vld [vmem:[#allocation8 + $0x10c] ss:$16 sps:$4 sm:$0xff]  }
 0x32b   :  { %4556 = vmatprep.subr.bf16.mxu1 %v9082_v6  ;;  %v9137_v6 = vld [vmem:[#allocation8 + $0x100] ss:$16 sps:$4 sm:$0xff]  }
 0x32d   :  { %4451 = vmatpush1.bf16.msra.mxu0 %v9077_v16  ;;  %v9140_v16 = vld [vmem:[#allocation8 + $0x108] ss:$16 sps:$4 sm:$0xff]  }
 0x32e   :  { %4557 = vmatpush1.bf16.msra.mxu1 %v9080_v53  ;;  %4452 = vmatprep.subr.bf16.mxu0 %v9085_v35  ;;  %v9145_v53 = vld [vmem:[#allocation8 + $0x124] ss:$16 sps:$4 sm:$0xff]   ;;  %v9148_v35 = vld [vmem:[#allocation8 + $0x12c] ss:$16 sps:$4 sm:$0xff]  }
 0x32f   :  { %4558 = vmatprep.subr.bf16.mxu1 %v9088_v20  ;;  %v9143_v20 = vld [vmem:[#allocation8 + $0x120] ss:$16 sps:$4 sm:$0xff]  }
 0x331   :  { %4453 = vmatpush1.bf16.msra.mxu0 %v9083_v52  ;;  %v9146_v52 = vld [vmem:[#allocation8 + $0x128] ss:$16 sps:$4 sm:$0xff]  }
 0x332   :  { %4559 = vmatpush1.bf16.msra.mxu1 %v9086_v19  ;;  %5221 = vmatprep.subr.bf16.mxu0 %v9091_v34  ;;  %v9151_v19 = vld [vmem:[#allocation8 + $0x144] ss:$16 sps:$4 sm:$0xff]   ;;  %v9154_v34 = vld [vmem:[#allocation8 + $0x14c] ss:$16 sps:$4 sm:$0xff]  }
 0x333   :  { %5327 = vmatprep.subr.bf16.mxu1 %v9094_v38  ;;  %v9149_v38 = vld [vmem:[#allocation8 + $0x140] ss:$16 sps:$4 sm:$0xff]  }
 0x334   :  { %4455 = vmatmul.mubr.bf16.vlgmr.msra.gmra.mrb[8].mxu0 %v10208_v60 }
 0x335   :  { %4561 = vmatmul.mubr.bf16.vlgmr.msra.gmra.mrb[8].mxu1 %v10208_v60  ;;  %4464 = vmatprep.mubr.bf16.mxu0 %v10316_v23  ;;  %v9112_v60 = vld [vmem:[#allocation8 + $0x6c] ss:$16 sps:$4 sm:$0xff]  }
 0x336   :  { %4570 = vmatprep.mubr.bf16.mxu1 %v10316_v23  ;;  %5222 = vmatpush1.bf16.msra.mxu0 %v9089_v27  ;;  %v9107_v23 = vld [vmem:[#allocation8 + $0x60] ss:$16 sps:$4 sm:$0xff]   ;;  %v9152_v27 = vld [vmem:[#allocation8 + $0x148] ss:$16 sps:$4 sm:$0xff]  }
 0x337   :  { %5328 = vmatpush1.bf16.msra.mxu1 %v9092_v25  ;;  %5223 = vmatprep.subr.bf16.mxu0 %v9097_v63  ;;  %v9157_v25 = vld [vmem:[#allocation8 + $0x164] ss:$16 sps:$4 sm:$0xff]   ;;  %v9160_v63 = vld [vmem:[#allocation8 + $0x16c] ss:$16 sps:$4 sm:$0xff]  }
 0x338   :  { %5329 = vmatprep.subr.bf16.mxu1 %v9100_v24  ;;  %v9155_v24 = vld [vmem:[#allocation8 + $0x160] ss:$16 sps:$4 sm:$0xff]  }
 0x33a   :  { %5224 = vmatpush1.bf16.msra.mxu0 %v9095_v49  ;;  %v9158_v49 = vld [vmem:[#allocation8 + $0x168] ss:$16 sps:$4 sm:$0xff]  }
 0x33b   :  { %5330 = vmatpush1.bf16.msra.mxu1 %v9098_v42  ;;  %5225 = vmatprep.subr.bf16.mxu0 %v9103_v11  ;;  %v9163_v42 = vld [vmem:[#allocation8 + $0x184] ss:$16 sps:$4 sm:$0xff]   ;;  %v9166_v11 = vld [vmem:[#allocation8 + $0x18c] ss:$16 sps:$4 sm:$0xff]  }
 0x33c   :  { %5331 = vmatprep.subr.bf16.mxu1 %v9106_v28  ;;  %4465 = vmatmul.mubr.bf16.gmra.mrb[12].mxu0 %v10295_v44  ;;  %v9161_v28 = vld [vmem:[#allocation8 + $0x180] ss:$16 sps:$4 sm:$0xff]  }
 0x33d   :  { %4571 = vmatmul.mubr.bf16.gmra.mrb[12].mxu1 %v10295_v44  ;;  %7783 = vmatprep.mubr.msk.bf16.mxu0 %vm9959_vm3, %v10323_v30  ;;  %v9116_v44 = vld [vmem:[#allocation8 + $0x88] ss:$16 sps:$4 sm:$0xff]  }
 0x33e   :  { %7807 = vmatprep.mubr.msk.bf16.mxu1 %vm9959_vm3, %v10323_v30  ;;  %5226 = vmatpush1.bf16.msra.mxu0 %v9101_v32  ;;  %v9122_v30 = vld [vmem:[#allocation8 + $0xa8] ss:$16 sps:$4 sm:$0xff]  }
 0x33f   :  { %5332 = vmatpush1.bf16.msra.mxu1 %v9104_v21  ;;  %5227 = vmatprep.subr.bf16.mxu0 %v9109_v55  ;;  %v9164_v32 = vld [vmem:[#allocation8 + $0x188] ss:$16 sps:$4 sm:$0xff]   ;;  %v9169_v21 = vld [vmem:[#allocation8 + $0x1a4] ss:$16 sps:$4 sm:$0xff]   ;;  %v9172_v55 = vld [vmem:[#allocation8 + $0x1ac] ss:$16 sps:$4 sm:$0xff]  }
 0x340   :  { %5333 = vmatprep.subr.bf16.mxu1 %v9112_v60  ;;  %v9167_v60 = vld [vmem:[#allocation8 + $0x1a0] ss:$16 sps:$4 sm:$0xff]  }
 0x342   :  { %5228 = vmatpush1.bf16.msra.mxu0 %v9107_v23  ;;  %v9170_v23 = vld [vmem:[#allocation8 + $0x1a8] ss:$16 sps:$4 sm:$0xff]  }
 0x343   :  { %5334 = vmatpush1.bf16.msra.mxu1 %v9110_v47  ;;  %5229 = vmatprep.subr.bf16.mxu0 %v9115_v50  ;;  %v9175_v47 = vld [vmem:[#allocation8 + $0x1c4] ss:$16 sps:$4 sm:$0xff]   ;;  %v9178_v50 = vld [vmem:[#allocation8 + $0x1cc] ss:$16 sps:$4 sm:$0xff]  }
 0x344   :  { %5335 = vmatprep.subr.bf16.mxu1 %v9118_v51  ;;  %v9173_v51 = vld [vmem:[#allocation8 + $0x1c0] ss:$16 sps:$4 sm:$0xff]  }
 0x346   :  { %5230 = vmatpush1.bf16.msra.mxu0 %v9113_v39  ;;  %v9176_v39 = vld [vmem:[#allocation8 + $0x1c8] ss:$16 sps:$4 sm:$0xff]  }
 0x347   :  { %5336 = vmatpush1.bf16.msra.mxu1 %v9116_v44  ;;  %5231 = vmatprep.subr.bf16.mxu0 %v9121_v48  ;;  %v9181_v44 = vld [vmem:[#allocation8 + $0x1e4] ss:$16 sps:$4 sm:$0xff]   ;;  %v9184_v48 = vld [vmem:[#allocation8 + $0x1ec] ss:$16 sps:$4 sm:$0xff]  }
 0x348   :  { %5337 = vmatprep.subr.bf16.mxu1 %v9124_v59  ;;  %v9179_v59 = vld [vmem:[#allocation8 + $0x1e0] ss:$16 sps:$4 sm:$0xff]  }
 0x34a   :  { %5232 = vmatpush1.bf16.msra.mxu0 %v9119_v0  ;;  %v9182_v0 = vld [vmem:[#allocation8 + $0x1e8] ss:$16 sps:$4 sm:$0xff]  }
 0x34b   :  { %5338 = vmatpush1.bf16.msra.mxu1 %v9122_v30  ;;  %5233 = vmatprep.subr.bf16.mxu0 %v9127_v43  ;;  %v9187_v30 = vld [vmem:[#allocation8 + $0x204] ss:$16 sps:$4 sm:$0xff]   ;;  %v9190_v43 = vld [vmem:[#allocation8 + $0x20c] ss:$16 sps:$4 sm:$0xff]  }
 0x34c   :  { %5339 = vmatprep.subr.bf16.mxu1 %v9130_v5  ;;  %v9185_v5 = vld [vmem:[#allocation8 + $0x200] ss:$16 sps:$4 sm:$0xff]  }
 0x34e   :  { %5234 = vmatpush1.bf16.msra.mxu0 %v9125_v2  ;;  %v9188_v2 = vld [vmem:[#allocation8 + $0x208] ss:$16 sps:$4 sm:$0xff]  }
 0x34f   :  { %5340 = vmatpush1.bf16.msra.mxu1 %v9128_v18  ;;  %5235 = vmatprep.subr.bf16.mxu0 %v9133_v37  ;;  %v9193_v18 = vld [vmem:[#allocation8 + $0x224] ss:$16 sps:$4 sm:$0xff]   ;;  %v9196_v37 = vld [vmem:[#allocation8 + $0x22c] ss:$16 sps:$4 sm:$0xff]  }
 0x350   :  { %5341 = vmatprep.subr.bf16.mxu1 %v9136_v31  ;;  %v9191_v31 = vld [vmem:[#allocation8 + $0x220] ss:$16 sps:$4 sm:$0xff]  }
 0x352   :  { %5236 = vmatpush1.bf16.msra.mxu0 %v9131_v26  ;;  %v9194_v26 = vld [vmem:[#allocation8 + $0x228] ss:$16 sps:$4 sm:$0xff]  }
 0x353   :  { %5342 = vmatpush1.bf16.msra.mxu1 %v9134_v22  ;;  %5237 = vmatprep.subr.bf16.mxu0 %v9139_v29  ;;  %v9199_v22 = vld [vmem:[#allocation8 + $0x244] ss:$16 sps:$4 sm:$0xff]   ;;  %v9202_v29 = vld [vmem:[#allocation8 + $0x24c] ss:$16 sps:$4 sm:$0xff]  }
 0x354   :  { %5343 = vmatprep.subr.bf16.mxu1 %v9142_v62  ;;  %v9197_v62 = vld [vmem:[#allocation8 + $0x240] ss:$16 sps:$4 sm:$0xff]  }
 0x356   :  { %5238 = vmatpush1.bf16.msra.mxu0 %v9137_v6  ;;  %v9205_v6 = vld [vmem:[#allocation8 + $0x264] ss:$16 sps:$4 sm:$0xff]  }
 0x357   :  { %5344 = vmatpush1.bf16.msra.mxu1 %v9140_v16  ;;  %5239 = vmatprep.subr.bf16.mxu0 %v9145_v53  ;;  %v9208_v16 = vld [vmem:[#allocation8 + $0x26c] ss:$16 sps:$4 sm:$0xff]   ;;  %v9206_v53 = vld [vmem:[#allocation8 + $0x268] ss:$16 sps:$4 sm:$0xff]  }
 0x358   :  { %5345 = vmatprep.subr.bf16.mxu1 %v9148_v35  ;;  %v9211_v35 = vld [vmem:[#allocation8 + $0x284] ss:$16 sps:$4 sm:$0xff]  }
 0x35a   :  { %5240 = vmatpush1.bf16.msra.mxu0 %v9143_v20  ;;  %v9214_v20 = vld [vmem:[#allocation8 + $0x28c] ss:$16 sps:$4 sm:$0xff]  }
 0x35b   :  { %5346 = vmatpush1.bf16.msra.mxu1 %v9146_v52  ;;  %5241 = vmatprep.subr.bf16.mxu0 %v9151_v19  ;;  %v9209_v52 = vld [vmem:[#allocation8 + $0x280] ss:$16 sps:$4 sm:$0xff]   ;;  %v9217_v19 = vld [vmem:[#allocation8 + $0x2a4] ss:$16 sps:$4 sm:$0xff]  }
 0x35c   :  { %5347 = vmatprep.subr.bf16.mxu1 %v9154_v34  ;;  %v9220_v34 = vld [vmem:[#allocation8 + $0x2ac] ss:$16 sps:$4 sm:$0xff]  }
 0x35e   :  { %5242 = vmatpush1.bf16.msra.mxu0 %v9149_v38  ;;  %v9215_v38 = vld [vmem:[#allocation8 + $0x2a0] ss:$16 sps:$4 sm:$0xff]  }
 0x35f   :  { %5348 = vmatpush1.bf16.msra.mxu1 %v9152_v27  ;;  %5243 = vmatprep.subr.bf16.mxu0 %v9157_v25  ;;  %v9218_v27 = vld [vmem:[#allocation8 + $0x2a8] ss:$16 sps:$4 sm:$0xff]   ;;  %v9223_v25 = vld [vmem:[#allocation8 + $0x2c4] ss:$16 sps:$4 sm:$0xff]  }
 0x360   :  { %5349 = vmatprep.subr.bf16.mxu1 %v9160_v63  ;;  %v9221_v63 = vld [vmem:[#allocation8 + $0x2c0] ss:$16 sps:$4 sm:$0xff]  }
 0x362   :  { %5244 = vmatpush1.bf16.msra.mxu0 %v9155_v24  ;;  %v9224_v24 = vld [vmem:[#allocation8 + $0x2c8] ss:$16 sps:$4 sm:$0xff]  }
 0x363   :  { %5350 = vmatpush1.bf16.msra.mxu1 %v9158_v49  ;;  %5245 = vmatprep.subr.bf16.mxu0 %v9163_v42  ;;  %v9229_v49 = vld [vmem:[#allocation8 + $0x2e4] ss:$16 sps:$4 sm:$0xff]   ;;  %v9232_v42 = vld [vmem:[#allocation8 + $0x2ec] ss:$16 sps:$4 sm:$0xff]  }
 0x364   :  { %5351 = vmatprep.subr.bf16.mxu1 %v9166_v11  ;;  %v9227_v11 = vld [vmem:[#allocation8 + $0x2e0] ss:$16 sps:$4 sm:$0xff]  }
 0x366   :  { %5246 = vmatpush1.bf16.msra.mxu0 %v9161_v28  ;;  %v9230_v28 = vld [vmem:[#allocation8 + $0x2e8] ss:$16 sps:$4 sm:$0xff]  }
 0x367   :  { %5352 = vmatpush1.bf16.msra.mxu1 %v9164_v32  ;;  %5247 = vmatprep.subr.bf16.mxu0 %v9169_v21  ;;  %v9235_v32 = vld [vmem:[#allocation8 + $0x304] ss:$16 sps:$4 sm:$0xff]   ;;  %v9238_v21 = vld [vmem:[#allocation8 + $0x30c] ss:$16 sps:$4 sm:$0xff]  }
 0x368   :  { %5353 = vmatprep.subr.bf16.mxu1 %v9172_v55  ;;  %v9233_v55 = vld [vmem:[#allocation8 + $0x300] ss:$16 sps:$4 sm:$0xff]  }
 0x36a   :  { %5248 = vmatpush1.bf16.msra.mxu0 %v9167_v60  ;;  %v9236_v60 = vld [vmem:[#allocation8 + $0x308] ss:$16 sps:$4 sm:$0xff]  }
 0x36b   :  { %5354 = vmatpush1.bf16.msra.mxu1 %v9170_v23  ;;  %5249 = vmatprep.subr.bf16.mxu0 %v9175_v47  ;;  %v9241_v23 = vld [vmem:[#allocation8 + $0x324] ss:$16 sps:$4 sm:$0xff]   ;;  %v9244_v47 = vld [vmem:[#allocation8 + $0x32c] ss:$16 sps:$4 sm:$0xff]  }
 0x36c   :  { %5355 = vmatprep.subr.bf16.mxu1 %v9178_v50  ;;  %v9239_v50 = vld [vmem:[#allocation8 + $0x320] ss:$16 sps:$4 sm:$0xff]  }
 0x36e   :  { %5250 = vmatpush1.bf16.msra.mxu0 %v9173_v51  ;;  %v9242_v51 = vld [vmem:[#allocation8 + $0x328] ss:$16 sps:$4 sm:$0xff]  }
 0x36f   :  { %5356 = vmatpush1.bf16.msra.mxu1 %v9176_v39  ;;  %5251 = vmatprep.subr.bf16.mxu0 %v9181_v44  ;;  %v9247_v39 = vld [vmem:[#allocation8 + $0x344] ss:$16 sps:$4 sm:$0xff]   ;;  %v9250_v44 = vld [vmem:[#allocation8 + $0x34c] ss:$16 sps:$4 sm:$0xff]  }
 0x370   :  { %5357 = vmatprep.subr.bf16.mxu1 %v9184_v48  ;;  %v9245_v48 = vld [vmem:[#allocation8 + $0x340] ss:$16 sps:$4 sm:$0xff]  }
 0x372   :  { %5252 = vmatpush1.bf16.msra.mxu0 %v9179_v59  ;;  %v9248_v59 = vld [vmem:[#allocation8 + $0x348] ss:$16 sps:$4 sm:$0xff]  }
 0x373   :  { %5358 = vmatpush1.bf16.msra.mxu1 %v9182_v0  ;;  %5274 = vmatprep.subr.bf16.mxu0 %v9187_v30  ;;  %v9253_v0 = vld [vmem:[#allocation8 + $0x364] ss:$16 sps:$4 sm:$0xff]   ;;  %v9256_v30 = vld [vmem:[#allocation8 + $0x36c] ss:$16 sps:$4 sm:$0xff]  }
 0x374   :  { %5380 = vmatprep.subr.bf16.mxu1 %v9190_v43  ;;  %v9251_v43 = vld [vmem:[#allocation8 + $0x360] ss:$16 sps:$4 sm:$0xff]  }
 0x375   :  { %7786 = vmatmul.mubr.msk.bf16.vlgmr.msra.gmra.mrb[8].mxu0 %vm9959_vm3, %v10285_v17 }
 0x376   :  { %7810 = vmatmul.mubr.msk.bf16.vlgmr.msra.gmra.mrb[8].mxu1 %vm9959_vm3, %v10285_v17  ;;  %7789 = vmatprep.mubr.msk.bf16.mxu0 %vm9988_vm5, %v10330_v45  ;;  %v9200_v17 = vld [vmem:[#allocation8 + $0x248] ss:$16 sps:$4 sm:$0xff]  }
 0x377   :  { %5275 = vmatpush1.bf16.msra.mxu0 %v9185_v5  ;;  %7813 = vmatprep.mubr.msk.bf16.mxu1 %vm9988_vm5, %v10330_v45  ;;  %v9203_v45 = vld [vmem:[#allocation8 + $0x260] ss:$16 sps:$4 sm:$0xff]   ;;  %v9254_v5 = vld [vmem:[#allocation8 + $0x368] ss:$16 sps:$4 sm:$0xff]  }
 0x378   :  { %5381 = vmatpush1.bf16.msra.mxu1 %v9188_v2  ;;  %5276 = vmatprep.subr.bf16.mxu0 %v9193_v18  ;;  %v9259_v2 = vld [vmem:[#allocation8 + $0x384] ss:$16 sps:$4 sm:$0xff]   ;;  %v9262_v18 = vld [vmem:[#allocation8 + $0x38c] ss:$16 sps:$4 sm:$0xff]  }
 0x379   :  { %5382 = vmatprep.subr.bf16.mxu1 %v9196_v37  ;;  %v9257_v37 = vld [vmem:[#allocation8 + $0x380] ss:$16 sps:$4 sm:$0xff]  }
 0x37b   :  { %5277 = vmatpush1.bf16.msra.mxu0 %v9191_v31  ;;  %v9260_v31 = vld [vmem:[#allocation8 + $0x388] ss:$16 sps:$4 sm:$0xff]  }
 0x37c   :  { %5383 = vmatpush1.bf16.msra.mxu1 %v9194_v26  ;;  %5278 = vmatprep.subr.bf16.mxu0 %v9199_v22  ;;  %v9265_v26 = vld [vmem:[#allocation8 + $0x3a4] ss:$16 sps:$4 sm:$0xff]   ;;  %v9268_v22 = vld [vmem:[#allocation8 + $0x3ac] ss:$16 sps:$4 sm:$0xff]  }
 0x37d   :  { %5384 = vmatprep.subr.bf16.mxu1 %v9202_v29  ;;  %7792 = vmatmul.mubr.msk.bf16.gmra.mrb[12].mxu0 %vm9988_vm5, %v10343_v46  ;;  %v9263_v29 = vld [vmem:[#allocation8 + $0x3a0] ss:$16 sps:$4 sm:$0xff]  }
 0x37e   :  { %7816 = vmatmul.mubr.msk.bf16.gmra.mrb[12].mxu1 %vm9988_vm5, %v10343_v46  ;;  %7795 = vmatprep.mubr.msk.bf16.mxu0 %vm9959_vm3, %v10352_v7  ;;  %v9212_v46 = vld [vmem:[#allocation8 + $0x288] ss:$16 sps:$4 sm:$0xff]  }
 0x37f   :  { %5279 = vmatpush1.bf16.msra.mxu0 %v9197_v62  ;;  %7819 = vmatprep.mubr.msk.bf16.mxu1 %vm9959_vm3, %v10352_v7  ;;  %v9226_v7 = vld [vmem:[#allocation8 + $0x2cc] ss:$16 sps:$4 sm:$0xff]   ;;  %v9266_v62 = vld [vmem:[#allocation8 + $0x3a8] ss:$16 sps:$4 sm:$0xff]  }
 0x380   :  { %5385 = vmatpush1.bf16.msra.mxu1 %v9200_v17  ;;  %5280 = vmatprep.subr.bf16.mxu0 %v9205_v6  ;;  %v9271_v17 = vld [vmem:[#allocation8 + $0x3c4] ss:$16 sps:$4 sm:$0xff]   ;;  %v9274_v6 = vld [vmem:[#allocation8 + $0x3cc] ss:$16 sps:$4 sm:$0xff]  }
 0x381   :  { %5386 = vmatprep.subr.bf16.mxu1 %v9208_v16  ;;  %v9269_v16 = vld [vmem:[#allocation8 + $0x3c0] ss:$16 sps:$4 sm:$0xff]  }
 0x383   :  { %5281 = vmatpush1.bf16.msra.mxu0 %v9203_v45  ;;  %v9272_v45 = vld [vmem:[#allocation8 + $0x3c8] ss:$16 sps:$4 sm:$0xff]  }
 0x384   :  { %5387 = vmatpush1.bf16.msra.mxu1 %v9206_v53  ;;  %5282 = vmatprep.subr.bf16.mxu0 %v9211_v35  ;;  %v9277_v53 = vld [vmem:[#allocation8 + $0x3e4] ss:$16 sps:$4 sm:$0xff]   ;;  %v9280_v35 = vld [vmem:[#allocation8 + $0x3ec] ss:$16 sps:$4 sm:$0xff]  }
 0x385   :  { %5388 = vmatprep.subr.bf16.mxu1 %v9214_v20  ;;  %v9275_v20 = vld [vmem:[#allocation8 + $0x3e0] ss:$16 sps:$4 sm:$0xff]  }
 0x387   :  { %5283 = vmatpush1.bf16.msra.mxu0 %v9209_v52  ;;  %v9278_v52 = vld [vmem:[#allocation8 + $0x3e8] ss:$16 sps:$4 sm:$0xff]  }
 0x388   :  { %5389 = vmatpush1.bf16.msra.mxu1 %v9212_v46  ;;  %5284 = vmatprep.subr.bf16.mxu0 %v9217_v19  ;;  %v9283_v46 = vld [vmem:[#allocation8 + $0x804] ss:$16 sps:$4 sm:$0xff]   ;;  %v9286_v19 = vld [vmem:[#allocation8 + $0x80c] ss:$16 sps:$4 sm:$0xff]  }
 0x389   :  { %5390 = vmatprep.subr.bf16.mxu1 %v9220_v34  ;;  %v9281_v34 = vld [vmem:[#allocation8 + $0x800] ss:$16 sps:$4 sm:$0xff]  }
 0x38b   :  { %5285 = vmatpush1.bf16.msra.mxu0 %v9215_v38  ;;  %v9284_v38 = vld [vmem:[#allocation8 + $0x808] ss:$16 sps:$4 sm:$0xff]  }
 0x38c   :  { %5391 = vmatpush1.bf16.msra.mxu1 %v9218_v27  ;;  %5286 = vmatprep.subr.bf16.mxu0 %v9223_v25  ;;  %v9289_v27 = vld [vmem:[#allocation8 + $0x824] ss:$16 sps:$4 sm:$0xff]   ;;  %v9292_v25 = vld [vmem:[#allocation8 + $0x82c] ss:$16 sps:$4 sm:$0xff]  }
 0x38d   :  { %5392 = vmatprep.subr.bf16.mxu1 %v9226_v7  ;;  %v9287_v7 = vld [vmem:[#allocation8 + $0x820] ss:$16 sps:$4 sm:$0xff]  }
 0x38f   :  { %5287 = vmatpush1.bf16.msra.mxu0 %v9221_v63  ;;  %v9290_v63 = vld [vmem:[#allocation8 + $0x828] ss:$16 sps:$4 sm:$0xff]  }
 0x390   :  { %5393 = vmatpush1.bf16.msra.mxu1 %v9224_v24  ;;  %5288 = vmatprep.subr.bf16.mxu0 %v9229_v49  ;;  %v9295_v24 = vld [vmem:[#allocation8 + $0x844] ss:$16 sps:$4 sm:$0xff]   ;;  %v9298_v49 = vld [vmem:[#allocation8 + $0x84c] ss:$16 sps:$4 sm:$0xff]  }
 0x391   :  { %5394 = vmatprep.subr.bf16.mxu1 %v9232_v42  ;;  %v9293_v42 = vld [vmem:[#allocation8 + $0x840] ss:$16 sps:$4 sm:$0xff]  }
 0x393   :  { %5289 = vmatpush1.bf16.msra.mxu0 %v9227_v11  ;;  %v9299_v11 = vld [vmem:[#allocation8 + $0x860] ss:$16 sps:$4 sm:$0xff]  }
 0x394   :  { %5395 = vmatpush1.bf16.msra.mxu1 %v9230_v28  ;;  %5290 = vmatprep.subr.bf16.mxu0 %v9235_v32  ;;  %v9302_v28 = vld [vmem:[#allocation8 + $0x868] ss:$16 sps:$4 sm:$0xff]   ;;  %v9307_v32 = vld [vmem:[#allocation8 + $0x884] ss:$16 sps:$4 sm:$0xff]  }
 0x395   :  { %5396 = vmatprep.subr.bf16.mxu1 %v9238_v21  ;;  %v9310_v21 = vld [vmem:[#allocation8 + $0x88c] ss:$16 sps:$4 sm:$0xff]  }
 0x397   :  { %5291 = vmatpush1.bf16.msra.mxu0 %v9233_v55  ;;  %v9305_v55 = vld [vmem:[#allocation8 + $0x880] ss:$16 sps:$4 sm:$0xff]  }
 0x398   :  { %5397 = vmatpush1.bf16.msra.mxu1 %v9236_v60  ;;  %5292 = vmatprep.subr.bf16.mxu0 %v9241_v23  ;;  %v9316_v60 = vld [vmem:[#allocation8 + $0x8ac] ss:$16 sps:$4 sm:$0xff]   ;;  %v9311_v23 = vld [vmem:[#allocation8 + $0x8a0] ss:$16 sps:$4 sm:$0xff]  }
 0x399   :  { %5398 = vmatprep.subr.bf16.mxu1 %v9244_v47  ;;  %v9319_v47 = vld [vmem:[#allocation8 + $0x8c4] ss:$16 sps:$4 sm:$0xff]  }
 0x39b   :  { %5293 = vmatpush1.bf16.msra.mxu0 %v9239_v50  ;;  %v9322_v50 = vld [vmem:[#allocation8 + $0x8cc] ss:$16 sps:$4 sm:$0xff]  }
 0x39c   :  { %5399 = vmatpush1.bf16.msra.mxu1 %v9242_v51  ;;  %5294 = vmatprep.subr.bf16.mxu0 %v9247_v39  ;;  %v9317_v51 = vld [vmem:[#allocation8 + $0x8c0] ss:$16 sps:$4 sm:$0xff]   ;;  %v9320_v39 = vld [vmem:[#allocation8 + $0x8c8] ss:$16 sps:$4 sm:$0xff]  }
 0x39d   :  { %5400 = vmatprep.subr.bf16.mxu1 %v9250_v44  ;;  %v9325_v44 = vld [vmem:[#allocation8 + $0x8e4] ss:$16 sps:$4 sm:$0xff]  }
 0x39f   :  { %5295 = vmatpush1.bf16.msra.mxu0 %v9245_v48  ;;  %v9328_v48 = vld [vmem:[#allocation8 + $0x8ec] ss:$16 sps:$4 sm:$0xff]  }
 0x3a0   :  { %5401 = vmatpush1.bf16.msra.mxu1 %v9248_v59  ;;  %5296 = vmatprep.subr.bf16.mxu0 %v9253_v0  ;;  %v9323_v59 = vld [vmem:[#allocation8 + $0x8e0] ss:$16 sps:$4 sm:$0xff]   ;;  %v9326_v0 = vld [vmem:[#allocation8 + $0x8e8] ss:$16 sps:$4 sm:$0xff]  }
 0x3a1   :  { %5402 = vmatprep.subr.bf16.mxu1 %v9256_v30  ;;  %v9331_v30 = vld [vmem:[#allocation8 + $0x904] ss:$16 sps:$4 sm:$0xff]  }
 0x3a3   :  { %5297 = vmatpush1.bf16.msra.mxu0 %v9251_v43  ;;  %v9334_v43 = vld [vmem:[#allocation8 + $0x90c] ss:$16 sps:$4 sm:$0xff]  }
 0x3a4   :  { %5403 = vmatpush1.bf16.msra.mxu1 %v9254_v5  ;;  %5298 = vmatprep.subr.bf16.mxu0 %v9259_v2  ;;  %v9329_v5 = vld [vmem:[#allocation8 + $0x900] ss:$16 sps:$4 sm:$0xff]   ;;  %v9332_v2 = vld [vmem:[#allocation8 + $0x908] ss:$16 sps:$4 sm:$0xff]  }
 0x3a5   :  { %5404 = vmatprep.subr.bf16.mxu1 %v9262_v18  ;;  %v9337_v18 = vld [vmem:[#allocation8 + $0x924] ss:$16 sps:$4 sm:$0xff]  }
 0x3a7   :  { %5299 = vmatpush1.bf16.msra.mxu0 %v9257_v37  ;;  %v9340_v37 = vld [vmem:[#allocation8 + $0x92c] ss:$16 sps:$4 sm:$0xff]  }
 0x3a8   :  { %5405 = vmatpush1.bf16.msra.mxu1 %v9260_v31  ;;  %5300 = vmatprep.subr.bf16.mxu0 %v9265_v26  ;;  %v9335_v31 = vld [vmem:[#allocation8 + $0x920] ss:$16 sps:$4 sm:$0xff]   ;;  %v9338_v26 = vld [vmem:[#allocation8 + $0x928] ss:$16 sps:$4 sm:$0xff]  }
 0x3a9   :  { %5406 = vmatprep.subr.bf16.mxu1 %v9268_v22  ;;  %v9343_v22 = vld [vmem:[#allocation8 + $0x944] ss:$16 sps:$4 sm:$0xff]  }
 0x3ab   :  { %5301 = vmatpush1.bf16.msra.mxu0 %v9263_v29  ;;  %v9346_v29 = vld [vmem:[#allocation8 + $0x94c] ss:$16 sps:$4 sm:$0xff]  }
 0x3ac   :  { %5407 = vmatpush1.bf16.msra.mxu1 %v9266_v62  ;;  %5302 = vmatprep.subr.bf16.mxu0 %v9271_v17  ;;  %v9341_v62 = vld [vmem:[#allocation8 + $0x940] ss:$16 sps:$4 sm:$0xff]   ;;  %v9344_v17 = vld [vmem:[#allocation8 + $0x948] ss:$16 sps:$4 sm:$0xff]  }
 0x3ad   :  { %5408 = vmatprep.subr.bf16.mxu1 %v9274_v6  ;;  %v9349_v6 = vld [vmem:[#allocation8 + $0x964] ss:$16 sps:$4 sm:$0xff]  }
 0x3af   :  { %5303 = vmatpush1.bf16.msra.mxu0 %v9269_v16  ;;  %v9352_v16 = vld [vmem:[#allocation8 + $0x96c] ss:$16 sps:$4 sm:$0xff]  }
 0x3b0   :  { %5409 = vmatpush1.bf16.msra.mxu1 %v9272_v45  ;;  %5304 = vmatprep.subr.bf16.mxu0 %v9277_v53  ;;  %v9347_v45 = vld [vmem:[#allocation8 + $0x960] ss:$16 sps:$4 sm:$0xff]   ;;  %v9350_v53 = vld [vmem:[#allocation8 + $0x968] ss:$16 sps:$4 sm:$0xff]  }
 0x3b1   :  { %5410 = vmatprep.subr.bf16.mxu1 %v9280_v35  ;;  %v9355_v35 = vld [vmem:[#allocation8 + $0x984] ss:$16 sps:$4 sm:$0xff]  }
 0x3b3   :  { %5305 = vmatpush1.bf16.msra.mxu0 %v9275_v20  ;;  %v9358_v20 = vld [vmem:[#allocation8 + $0x98c] ss:$16 sps:$4 sm:$0xff]  }
 0x3b4   :  { %5411 = vmatpush1.bf16.msra.mxu1 %v9278_v52  ;;  %6210 = vmatprep.subr.bf16.mxu0 %v9283_v46  ;;  %v9353_v52 = vld [vmem:[#allocation8 + $0x980] ss:$16 sps:$4 sm:$0xff]   ;;  %v9356_v46 = vld [vmem:[#allocation8 + $0x988] ss:$16 sps:$4 sm:$0xff]  }
 0x3b5   :  { %6316 = vmatprep.subr.bf16.mxu1 %v9286_v19  ;;  %v9361_v19 = vld [vmem:[#allocation8 + $0x9a4] ss:$16 sps:$4 sm:$0xff]  }
 0x3b6   :  { %7798 = vmatmul.mubr.msk.bf16.vlgmr.msra.gmra.mrb[8].mxu0 %vm9959_vm3, %v10298_v13 }
 0x3b7   :  { %7822 = vmatmul.mubr.msk.bf16.vlgmr.msra.gmra.mrb[8].mxu1 %vm9959_vm3, %v10298_v13  ;;  %7801 = vmatprep.mubr.msk.bf16.mxu0 %vm9988_vm5, %v10361_v12  ;;  %v9301_v13 = vld [vmem:[#allocation8 + $0x864] ss:$16 sps:$4 sm:$0xff]  }
 0x3b8   :  { %7825 = vmatprep.mubr.msk.bf16.mxu1 %vm9988_vm5, %v10361_v12  ;;  %6211 = vmatpush1.bf16.msra.mxu0 %v9281_v34  ;;  %v9304_v12 = vld [vmem:[#allocation8 + $0x86c] ss:$16 sps:$4 sm:$0xff]  }
 0x3b9   :  { %6317 = vmatpush1.bf16.msra.mxu1 %v9284_v38  ;;  %6212 = vmatprep.subr.bf16.mxu0 %v9289_v27  ;;  %v9364_v34 = vld [vmem:[#allocation8 + $0x9ac] ss:$16 sps:$4 sm:$0xff]   ;;  %v9359_v38 = vld [vmem:[#allocation8 + $0x9a0] ss:$16 sps:$4 sm:$0xff]   ;;  %v9362_v27 = vld [vmem:[#allocation8 + $0x9a8] ss:$16 sps:$4 sm:$0xff]  }
 0x3ba   :  { %6318 = vmatprep.subr.bf16.mxu1 %v9292_v25  ;;  %v9367_v25 = vld [vmem:[#allocation8 + $0x9c4] ss:$16 sps:$4 sm:$0xff]  }
 0x3bc   :  { %6213 = vmatpush1.bf16.msra.mxu0 %v9287_v7  ;;  %v9370_v7 = vld [vmem:[#allocation8 + $0x9cc] ss:$16 sps:$4 sm:$0xff]  }
 0x3bd   :  { %6319 = vmatpush1.bf16.msra.mxu1 %v9290_v63  ;;  %6214 = vmatprep.subr.bf16.mxu0 %v9295_v24  ;;  %v9365_v63 = vld [vmem:[#allocation8 + $0x9c0] ss:$16 sps:$4 sm:$0xff]   ;;  %v9368_v24 = vld [vmem:[#allocation8 + $0x9c8] ss:$16 sps:$4 sm:$0xff]  }
 0x3be   :  { %7804 = vmatmul.mubr.msk.bf16.gmra.mrb[12].mxu0 %vm9988_vm5, %v10371_v33  ;;  %6320 = vmatprep.subr.bf16.mxu1 %v9298_v49  ;;  %v9373_v49 = vld [vmem:[#allocation8 + $0x9e4] ss:$16 sps:$4 sm:$0xff]  }
 0x3bf   :  { %7828 = vmatmul.mubr.msk.bf16.gmra.mrb[12].mxu1 %vm9988_vm5, %v10371_v33  ;;  %7959 = vmatprep.mubr.msk.bf16.mxu0 %vm10071_vm8, %v10385_v1  ;;  %v9313_v33 = vld [vmem:[#allocation8 + $0x8a4] ss:$16 sps:$4 sm:$0xff]  }
 0x3c0   :  { %6215 = vmatpush1.bf16.msra.mxu0 %v9293_v42  ;;  %7983 = vmatprep.mubr.msk.bf16.mxu1 %vm10071_vm8, %v10385_v1  ;;  %v9314_v1 = vld [vmem:[#allocation8 + $0x8a8] ss:$16 sps:$4 sm:$0xff]   ;;  %v9376_v42 = vld [vmem:[#allocation8 + $0x9ec] ss:$16 sps:$4 sm:$0xff]  }
 0x3c1   :  { %6321 = vmatpush1.bf16.msra.mxu1 %v9296_v57  ;;  %6216 = vmatprep.subr.bf16.mxu0 %v9301_v13  ;;  %v9371_v57 = vld [vmem:[#allocation8 + $0x9e0] ss:$16 sps:$4 sm:$0xff]   ;;  %v9374_v13 = vld [vmem:[#allocation8 + $0x9e8] ss:$16 sps:$4 sm:$0xff]  }
 0x3c2   :  { %6322 = vmatprep.subr.bf16.mxu1 %v9304_v12  ;;  %v9379_v12 = vld [vmem:[#allocation8 + $0xa04] ss:$16 sps:$4 sm:$0xff]  }
 0x3c4   :  { %6217 = vmatpush1.bf16.msra.mxu0 %v9299_v11  ;;  %v9382_v11 = vld [vmem:[#allocation8 + $0xa0c] ss:$16 sps:$4 sm:$0xff]  }
 0x3c5   :  { %6323 = vmatpush1.bf16.msra.mxu1 %v9302_v28  ;;  %6218 = vmatprep.subr.bf16.mxu0 %v9307_v32  ;;  %v9377_v28 = vld [vmem:[#allocation8 + $0xa00] ss:$16 sps:$4 sm:$0xff]   ;;  %v9380_v32 = vld [vmem:[#allocation8 + $0xa08] ss:$16 sps:$4 sm:$0xff]  }
 0x3c6   :  { %6324 = vmatprep.subr.bf16.mxu1 %v9310_v21  ;;  %v9385_v21 = vld [vmem:[#allocation8 + $0xa24] ss:$16 sps:$4 sm:$0xff]  }
 0x3c8   :  { %6219 = vmatpush1.bf16.msra.mxu0 %v9305_v55  ;;  %v9388_v55 = vld [vmem:[#allocation8 + $0xa2c] ss:$16 sps:$4 sm:$0xff]  }
 0x3c9   :  { %6325 = vmatpush1.bf16.msra.mxu1 %v9308_v40  ;;  %6220 = vmatprep.subr.bf16.mxu0 %v9313_v33  ;;  %v9383_v40 = vld [vmem:[#allocation8 + $0xa20] ss:$16 sps:$4 sm:$0xff]   ;;  %v9386_v33 = vld [vmem:[#allocation8 + $0xa28] ss:$16 sps:$4 sm:$0xff]  }
 0x3ca   :  { %6326 = vmatprep.subr.bf16.mxu1 %v9316_v60  ;;  %v9391_v60 = vld [vmem:[#allocation8 + $0xa44] ss:$16 sps:$4 sm:$0xff]  }
 0x3cc   :  { %6221 = vmatpush1.bf16.msra.mxu0 %v9311_v23  ;;  %v9394_v23 = vld [vmem:[#allocation8 + $0xa4c] ss:$16 sps:$4 sm:$0xff]  }
 0x3cd   :  { %6327 = vmatpush1.bf16.msra.mxu1 %v9314_v1  ;;  %6222 = vmatprep.subr.bf16.mxu0 %v9319_v47  ;;  %v9389_v1 = vld [vmem:[#allocation8 + $0xa40] ss:$16 sps:$4 sm:$0xff]   ;;  %v9397_v47 = vld [vmem:[#allocation8 + $0xa64] ss:$16 sps:$4 sm:$0xff]  }
 0x3ce   :  { %6328 = vmatprep.subr.bf16.mxu1 %v9322_v50  ;;  %v9400_v50 = vld [vmem:[#allocation8 + $0xa6c] ss:$16 sps:$4 sm:$0xff]  }
 0x3d0   :  { %6223 = vmatpush1.bf16.msra.mxu0 %v9317_v51  ;;  %v9398_v51 = vld [vmem:[#allocation8 + $0xa68] ss:$16 sps:$4 sm:$0xff]  }
 0x3d1   :  { %6329 = vmatpush1.bf16.msra.mxu1 %v9320_v39  ;;  %6224 = vmatprep.subr.bf16.mxu0 %v9325_v44  ;;  %v9403_v39 = vld [vmem:[#allocation8 + $0xa84] ss:$16 sps:$4 sm:$0xff]   ;;  %v9406_v44 = vld [vmem:[#allocation8 + $0xa8c] ss:$16 sps:$4 sm:$0xff]  }
 0x3d2   :  { %6330 = vmatprep.subr.bf16.mxu1 %v9328_v48  ;;  %v9401_v48 = vld [vmem:[#allocation8 + $0xa80] ss:$16 sps:$4 sm:$0xff]  }
 0x3d4   :  { %6225 = vmatpush1.bf16.msra.mxu0 %v9323_v59  ;;  %v9409_v59 = vld [vmem:[#allocation8 + $0xaa4] ss:$16 sps:$4 sm:$0xff]  }
 0x3d5   :  { %6331 = vmatpush1.bf16.msra.mxu1 %v9326_v0  ;;  %6226 = vmatprep.subr.bf16.mxu0 %v9331_v30  ;;  %v9412_v0 = vld [vmem:[#allocation8 + $0xaac] ss:$16 sps:$4 sm:$0xff]   ;;  %v9407_v30 = vld [vmem:[#allocation8 + $0xaa0] ss:$16 sps:$4 sm:$0xff]  }
 0x3d6   :  { %6332 = vmatprep.subr.bf16.mxu1 %v9334_v43  ;;  %v9415_v43 = vld [vmem:[#allocation8 + $0xac4] ss:$16 sps:$4 sm:$0xff]  }
 0x3d8   :  { %6227 = vmatpush1.bf16.msra.mxu0 %v9329_v5  ;;  %v9418_v5 = vld [vmem:[#allocation8 + $0xacc] ss:$16 sps:$4 sm:$0xff]  }
 0x3d9   :  { %6333 = vmatpush1.bf16.msra.mxu1 %v9332_v2  ;;  %6228 = vmatprep.subr.bf16.mxu0 %v9337_v18  ;;  %v9413_v2 = vld [vmem:[#allocation8 + $0xac0] ss:$16 sps:$4 sm:$0xff]   ;;  %v9416_v18 = vld [vmem:[#allocation8 + $0xac8] ss:$16 sps:$4 sm:$0xff]  }
 0x3da   :  { %6334 = vmatprep.subr.bf16.mxu1 %v9340_v37  ;;  %v9421_v37 = vld [vmem:[#allocation8 + $0xae4] ss:$16 sps:$4 sm:$0xff]  }
 0x3dc   :  { %6229 = vmatpush1.bf16.msra.mxu0 %v9335_v31  ;;  %v9424_v31 = vld [vmem:[#allocation8 + $0xaec] ss:$16 sps:$4 sm:$0xff]  }
 0x3dd   :  { %6335 = vmatpush1.bf16.msra.mxu1 %v9338_v26  ;;  %6230 = vmatprep.subr.bf16.mxu0 %v9343_v22  ;;  %v9419_v26 = vld [vmem:[#allocation8 + $0xae0] ss:$16 sps:$4 sm:$0xff]   ;;  %v9422_v22 = vld [vmem:[#allocation8 + $0xae8] ss:$16 sps:$4 sm:$0xff]  }
 0x3de   :  { %6336 = vmatprep.subr.bf16.mxu1 %v9346_v29  ;;  %v9427_v29 = vld [vmem:[#allocation8 + $0xb04] ss:$16 sps:$4 sm:$0xff]  }
 0x3e0   :  { %6231 = vmatpush1.bf16.msra.mxu0 %v9341_v62  ;;  %v9430_v62 = vld [vmem:[#allocation8 + $0xb0c] ss:$16 sps:$4 sm:$0xff]  }
 0x3e1   :  { %6337 = vmatpush1.bf16.msra.mxu1 %v9344_v17  ;;  %6232 = vmatprep.subr.bf16.mxu0 %v9349_v6  ;;  %v9425_v17 = vld [vmem:[#allocation8 + $0xb00] ss:$16 sps:$4 sm:$0xff]   ;;  %v9428_v6 = vld [vmem:[#allocation8 + $0xb08] ss:$16 sps:$4 sm:$0xff]  }
 0x3e2   :  { %6338 = vmatprep.subr.bf16.mxu1 %v9352_v16  ;;  %v9433_v16 = vld [vmem:[#allocation8 + $0xb24] ss:$16 sps:$4 sm:$0xff]  }
 0x3e4   :  { %6233 = vmatpush1.bf16.msra.mxu0 %v9347_v45  ;;  %v9436_v45 = vld [vmem:[#allocation8 + $0xb2c] ss:$16 sps:$4 sm:$0xff]  }
 0x3e5   :  { %6339 = vmatpush1.bf16.msra.mxu1 %v9350_v53  ;;  %6234 = vmatprep.subr.bf16.mxu0 %v9355_v35  ;;  %v9431_v53 = vld [vmem:[#allocation8 + $0xb20] ss:$16 sps:$4 sm:$0xff]   ;;  %v9434_v35 = vld [vmem:[#allocation8 + $0xb28] ss:$16 sps:$4 sm:$0xff]  }
 0x3e6   :  { %6340 = vmatprep.subr.bf16.mxu1 %v9358_v20  ;;  %v9439_v20 = vld [vmem:[#allocation8 + $0xb44] ss:$16 sps:$4 sm:$0xff]  }
 0x3e8   :  { %6235 = vmatpush1.bf16.msra.mxu0 %v9353_v52  ;;  %v9442_v52 = vld [vmem:[#allocation8 + $0xb4c] ss:$16 sps:$4 sm:$0xff]  }
 0x3e9   :  { %6341 = vmatpush1.bf16.msra.mxu1 %v9356_v46  ;;  %6236 = vmatprep.subr.bf16.mxu0 %v9361_v19  ;;  %v9437_v46 = vld [vmem:[#allocation8 + $0xb40] ss:$16 sps:$4 sm:$0xff]   ;;  %v9440_v19 = vld [vmem:[#allocation8 + $0xb48] ss:$16 sps:$4 sm:$0xff]  }
 0x3ea   :  { %6342 = vmatprep.subr.bf16.mxu1 %v9364_v34  ;;  %v9445_v34 = vld [vmem:[#allocation8 + $0xb64] ss:$16 sps:$4 sm:$0xff]  }
 0x3ec   :  { %6237 = vmatpush1.bf16.msra.mxu0 %v9359_v38  ;;  %v9448_v38 = vld [vmem:[#allocation8 + $0xb6c] ss:$16 sps:$4 sm:$0xff]  }
 0x3ed   :  { %6343 = vmatpush1.bf16.msra.mxu1 %v9362_v27  ;;  %6238 = vmatprep.subr.bf16.mxu0 %v9367_v25  ;;  %v9443_v27 = vld [vmem:[#allocation8 + $0xb60] ss:$16 sps:$4 sm:$0xff]   ;;  %v9446_v25 = vld [vmem:[#allocation8 + $0xb68] ss:$16 sps:$4 sm:$0xff]  }
 0x3ee   :  { %6344 = vmatprep.subr.bf16.mxu1 %v9370_v7  ;;  %v9451_v7 = vld [vmem:[#allocation8 + $0xb84] ss:$16 sps:$4 sm:$0xff]  }
 0x3f0   :  { %6239 = vmatpush1.bf16.msra.mxu0 %v9365_v63  ;;  %v9454_v63 = vld [vmem:[#allocation8 + $0xb8c] ss:$16 sps:$4 sm:$0xff]  }
 0x3f1   :  { %6345 = vmatpush1.bf16.msra.mxu1 %v9368_v24  ;;  %6240 = vmatprep.subr.bf16.mxu0 %v9373_v49  ;;  %v9449_v24 = vld [vmem:[#allocation8 + $0xb80] ss:$16 sps:$4 sm:$0xff]   ;;  %v9452_v49 = vld [vmem:[#allocation8 + $0xb88] ss:$16 sps:$4 sm:$0xff]  }
 0x3f2   :  { %6346 = vmatprep.subr.bf16.mxu1 %v9376_v42  ;;  %v9457_v42 = vld [vmem:[#allocation8 + $0xba4] ss:$16 sps:$4 sm:$0xff]  }
 0x3f4   :  { %6241 = vmatpush1.bf16.msra.mxu0 %v9371_v57  ;;  %v9460_v57 = vld [vmem:[#allocation8 + $0xbac] ss:$16 sps:$4 sm:$0xff]  }
 0x3f5   :  { %6347 = vmatpush1.bf16.msra.mxu1 %v9374_v13  ;;  %6263 = vmatprep.subr.bf16.mxu0 %v9379_v12  ;;  %v9455_v13 = vld [vmem:[#allocation8 + $0xba0] ss:$16 sps:$4 sm:$0xff]   ;;  %v9458_v12 = vld [vmem:[#allocation8 + $0xba8] ss:$16 sps:$4 sm:$0xff]  }
 0x3f6   :  { %6369 = vmatprep.subr.bf16.mxu1 %v9382_v11  ;;  %v9463_v11 = vld [vmem:[#allocation8 + $0xbc4] ss:$16 sps:$4 sm:$0xff]  }
 0x3f7   :  { %7962 = vmatmul.mubr.msk.bf16.vlgmr.msra.gmra.mrb[8].mxu0 %vm10071_vm8, %v10270_v14 }
 0x3f8   :  { %7986 = vmatmul.mubr.msk.bf16.vlgmr.msra.gmra.mrb[8].mxu1 %vm10071_vm8, %v10270_v14  ;;  %7965 = vmatprep.mubr.msk.bf16.mxu0 %vm10081_vm10, %v10387_v61  ;;  %v9392_v14 = vld [vmem:[#allocation8 + $0xa48] ss:$16 sps:$4 sm:$0xff]  }
 0x3f9   :  { %6264 = vmatpush1.bf16.msra.mxu0 %v9377_v28  ;;  %7989 = vmatprep.mubr.msk.bf16.mxu1 %vm10081_vm10, %v10387_v61  ;;  %v9395_v61 = vld [vmem:[#allocation8 + $0xa60] ss:$16 sps:$4 sm:$0xff]   ;;  %v9466_v28 = vld [vmem:[#allocation8 + $0xbcc] ss:$16 sps:$4 sm:$0xff]  }
 0x3fa   :  { %6370 = vmatpush1.bf16.msra.mxu1 %v9380_v32  ;;  %6265 = vmatprep.subr.bf16.mxu0 %v9385_v21  ;;  %v9461_v32 = vld [vmem:[#allocation8 + $0xbc0] ss:$16 sps:$4 sm:$0xff]   ;;  %v9464_v21 = vld [vmem:[#allocation8 + $0xbc8] ss:$16 sps:$4 sm:$0xff]  }
 0x3fb   :  { %6371 = vmatprep.subr.bf16.mxu1 %v9388_v55  ;;  %v9469_v55 = vld [vmem:[#allocation8 + $0xbe4] ss:$16 sps:$4 sm:$0xff]  }
 0x3fd   :  { %6266 = vmatpush1.bf16.msra.mxu0 %v9383_v40  ;;  %v9472_v40 = vld [vmem:[#allocation8 + $0xbec] ss:$16 sps:$4 sm:$0xff]  }
 0x3fe   :  { %6372 = vmatpush1.bf16.msra.mxu1 %v9386_v33  ;;  %6267 = vmatprep.subr.bf16.mxu0 %v9391_v60  ;;  %v6552_v33 = vld [vmem:[%s10823_s5 + $0x80] sm:$0xff]  ;;  %v6553_v60 = vld [vmem:[%s10823_s5 + $0x88] sm:$0xff] }
 0x3ff   :  { %7968 = vmatmul.mubr.msk.bf16.gmra.mrb[12].mxu0 %vm10081_vm10, %v10407_v56  ;;  %6373 = vmatprep.subr.bf16.mxu1 %v9394_v23  ;;  %v6584_v23 = vld [vmem:[%s10823_s5 + $0x180] sm:$0xff] }
 0x400   :  { %7992 = vmatmul.mubr.msk.bf16.gmra.mrb[12].mxu1 %vm10081_vm10, %v10407_v56  ;;  %7971 = vmatprep.mubr.msk.bf16.mxu0 %vm10071_vm8, %v10409_v4  ;;  %v9404_v56 = vld [vmem:[#allocation8 + $0xa88] ss:$16 sps:$4 sm:$0xff]  }
 0x401   :  { %6268 = vmatpush1.bf16.msra.mxu0 %v9389_v1  ;;  %7995 = vmatprep.mubr.msk.bf16.mxu1 %vm10071_vm8, %v10409_v4  ;;  %v9410_v4 = vld [vmem:[#allocation8 + $0xaa8] ss:$16 sps:$4 sm:$0xff]  }
 0x402   :  { %6374 = vmatpush1.bf16.msra.mxu1 %v9392_v14  ;;  %6269 = vmatprep.subr.bf16.mxu0 %v9397_v47  ;;  %v6585_v1 = vld [vmem:[%s10823_s5 + $0x188] sm:$0xff]  ;;  %v9467_v14 = vld [vmem:[#allocation8 + $0xbe0] ss:$16 sps:$4 sm:$0xff]  }
 0x403   :  { %6375 = vmatprep.subr.bf16.mxu1 %v9400_v50  ;;  %v9470_v47 = vld [vmem:[#allocation8 + $0xbe8] ss:$16 sps:$4 sm:$0xff]   ;;  %v8082_v50 = vpack.c.bf16 %v6553_v60, %v6552_v33 }
 0x404   :  { %v6577_v33 = vld [vmem:[%s10823_s5 + $0x148] sm:$0xff] }
 0x405   :  { %6270 = vmatpush1.bf16.msra.mxu0 %v9395_v61  ;;  %v8114_v61 = vpack.c.bf16 %v6585_v1, %v6584_v23  ;;  %v6562_v23 = vld [vmem:[%s10823_s5 + $0xd0] sm:$0xff]  ;;  %v6563_v1 = vld [vmem:[%s10823_s5 + $0xd8] sm:$0xff] }
 0x406   :  { %6376 = vmatpush1.bf16.msra.mxu1 %v9398_v51  ;;  %6271 = vmatprep.subr.bf16.mxu0 %v9403_v39  ;;  %v6536_v51 = vld [vmem:[%s10823_s5] sm:$0xff]  ;;  %v6537_v39 = vld [vmem:[%s10823_s5 + $0x8] sm:$0xff] }
 0x407   :  { %6377 = vmatprep.subr.bf16.mxu1 %v9406_v44  ;;  %v6568_v44 = vld [vmem:[%s10823_s5 + $0x100] sm:$0xff] }
 0x409   :  { %6272 = vmatpush1.bf16.msra.mxu0 %v9401_v48  ;;  %v6569_v48 = vld [vmem:[%s10823_s5 + $0x108] sm:$0xff] }
 0x40a   :  { %6378 = vmatpush1.bf16.msra.mxu1 %v9404_v56  ;;  %6273 = vmatprep.subr.bf16.mxu0 %v9409_v59  ;;  %v8084_v56 = vpack.c.bf16 %v6537_v39, %v6536_v51  ;;  %v8116_v59 = vpack.c.bf16 %v6569_v48, %v6568_v44  ;;  %v6547_v51 = vld [vmem:[%s10823_s5 + $0x58] sm:$0xff]  ;;  %v6578_v48 = vld [vmem:[%s10823_s5 + $0x150] sm:$0xff] }
 0x40b   :  { %6379 = vmatprep.subr.bf16.mxu1 %v9412_v0 }
 0x40d   :  { %6274 = vmatpush1.bf16.msra.mxu0 %v9407_v30  ;;  %v6587_v30 = vld [vmem:[%s10823_s5 + $0x198] sm:$0xff] }
 0x40e   :  { %6380 = vmatpush1.bf16.msra.mxu1 %v9410_v4  ;;  %6275 = vmatprep.subr.bf16.mxu0 %v9415_v43 }
 0x40f   :  { %6381 = vmatprep.subr.bf16.mxu1 %v9418_v5  ;;  %v6570_v5 = vld [vmem:[%s10823_s5 + $0x110] sm:$0xff] }
 0x411   :  { %6276 = vmatpush1.bf16.msra.mxu0 %v9413_v2  ;;  %v6571_v2 = vld [vmem:[%s10823_s5 + $0x118] sm:$0xff] }
 0x412   :  { %6382 = vmatpush1.bf16.msra.mxu1 %v9416_v18  ;;  %6277 = vmatprep.subr.bf16.mxu0 %v9421_v37  ;;  %v8120_v18 = vpack.c.bf16 %v6571_v2, %v6570_v5  ;;  %v6556_v37 = vld [vmem:[%s10823_s5 + $0xa0] sm:$0xff]  ;;  %v6581_v2 = vld [vmem:[%s10823_s5 + $0x168] sm:$0xff] }
 0x413   :  { %6383 = vmatprep.subr.bf16.mxu1 %v9424_v31  ;;  %v6557_v31 = vld [vmem:[%s10823_s5 + $0xa8] sm:$0xff] }
 0x415   :  { %6278 = vmatpush1.bf16.msra.mxu0 %v9419_v26  ;;  %v6588_v26 = vld [vmem:[%s10823_s5 + $0x1a0] sm:$0xff] }
 0x416   :  { %6384 = vmatpush1.bf16.msra.mxu1 %v9422_v22  ;;  %6279 = vmatprep.subr.bf16.mxu0 %v9427_v29  ;;  %v8090_v22 = vpack.c.bf16 %v6557_v31, %v6556_v37  ;;  %v6589_v29 = vld [vmem:[%s10823_s5 + $0x1a8] sm:$0xff]  ;;  %v6567_v37 = vld [vmem:[%s10823_s5 + $0xf8] sm:$0xff] }
 0x417   :  { %6385 = vmatprep.subr.bf16.mxu1 %v9430_v62  ;;  %v6540_v62 = vld [vmem:[%s10823_s5 + $0x20] sm:$0xff] }
 0x419   :  { %6280 = vmatpush1.bf16.msra.mxu0 %v9425_v17  ;;  %v6541_v17 = vld [vmem:[%s10823_s5 + $0x28] sm:$0xff] }
 0x41a   :  { %6386 = vmatpush1.bf16.msra.mxu1 %v9428_v6  ;;  %6281 = vmatprep.subr.bf16.mxu0 %v9433_v16  ;;  %v8122_v6 = vpack.c.bf16 %v6589_v29, %v6588_v26  ;;  %v8092_v16 = vpack.c.bf16 %v6541_v17, %v6540_v62  ;;  %v6599_v29 = vld [vmem:[%s10823_s5 + $0x1f8] sm:$0xff]  ;;  %v6550_v62 = vld [vmem:[%s10823_s5 + $0x70] sm:$0xff] }
 0x41b   :  { %6387 = vmatprep.subr.bf16.mxu1 %v9436_v45  ;;  %v6572_v45 = vld [vmem:[%s10823_s5 + $0x120] sm:$0xff] }
 0x41d   :  { %6282 = vmatpush1.bf16.msra.mxu0 %v9431_v53  ;;  %v6573_v53 = vld [vmem:[%s10823_s5 + $0x128] sm:$0xff] }
 0x41e   :  { %6388 = vmatpush1.bf16.msra.mxu1 %v9434_v35  ;;  %6283 = vmatprep.subr.bf16.mxu0 %v9439_v20  ;;  %v8124_v35 = vpack.c.bf16 %v6573_v53, %v6572_v45  ;;  %v6558_v20 = vld [vmem:[%s10823_s5 + $0xb0] sm:$0xff]  ;;  %v6583_v45 = vld [vmem:[%s10823_s5 + $0x178] sm:$0xff] }
 0x41f   :  { %6389 = vmatprep.subr.bf16.mxu1 %v9442_v52  ;;  %v6559_v52 = vld [vmem:[%s10823_s5 + $0xb8] sm:$0xff] }
 0x421   :  { %6284 = vmatpush1.bf16.msra.mxu0 %v9437_v46  ;;  %v6590_v46 = vld [vmem:[%s10823_s5 + $0x1b0] sm:$0xff] }
 0x422   :  { %6390 = vmatpush1.bf16.msra.mxu1 %v9440_v19  ;;  %6285 = vmatprep.subr.bf16.mxu0 %v9445_v34  ;;  %v8094_v19 = vpack.c.bf16 %v6559_v52, %v6558_v20  ;;  %v6591_v34 = vld [vmem:[%s10823_s5 + $0x1b8] sm:$0xff]  ;;  %v3359_v20 = vld [vmem:[#allocation10] sm:$0xf] }
 0x423   :  { %6391 = vmatprep.subr.bf16.mxu1 %v9448_v38  ;;  %v6542_v38 = vld [vmem:[%s10823_s5 + $0x30] sm:$0xff]  ;;  %v6442_v52 = vrot.slane %v3359_v20, %v10160_v3 }
 0x425   :  { %6286 = vmatpush1.bf16.msra.mxu0 %v9443_v27  ;;  %v6543_v27 = vld [vmem:[%s10823_s5 + $0x38] sm:$0xff] }
 0x426   :  { %6392 = vmatpush1.bf16.msra.mxu1 %v9446_v25  ;;  %6287 = vmatprep.subr.bf16.mxu0 %v9451_v7  ;;  %v8126_v25 = vpack.c.bf16 %v6591_v34, %v6590_v46  ;;  %v8096_v7 = vpack.c.bf16 %v6543_v27, %v6542_v38  ;;  %v6446_v34 = vrot.slane %v3359_v20, %v10166_v36 }
 0x427   :  { %6393 = vmatprep.subr.bf16.mxu1 %v9454_v63  ;;  %v6574_v63 = vld [vmem:[%s10823_s5 + $0x130] sm:$0xff] }
 0x429   :  { %6288 = vmatpush1.bf16.msra.mxu0 %v9449_v24  ;;  %v6575_v24 = vld [vmem:[%s10823_s5 + $0x138] sm:$0xff] }
 0x42a   :  { %6394 = vmatpush1.bf16.msra.mxu1 %v9452_v49  ;;  %6289 = vmatprep.subr.bf16.mxu0 %v9457_v42  ;;  %v8128_v49 = vpack.c.bf16 %v6575_v24, %v6574_v63  ;;  %v6560_v42 = vld [vmem:[%s10823_s5 + $0xc0] sm:$0xff] }
 0x42b   :  { %6395 = vmatprep.subr.bf16.mxu1 %v9460_v57  ;;  %v6561_v57 = vld [vmem:[%s10823_s5 + $0xc8] sm:$0xff] }
 0x42d   :  { %6290 = vmatpush1.bf16.msra.mxu0 %v9455_v13  ;;  %v6592_v13 = vld [vmem:[%s10823_s5 + $0x1c0] sm:$0xff] }
 0x42e   :  { %6396 = vmatpush1.bf16.msra.mxu1 %v9458_v12  ;;  %6291 = vmatprep.subr.bf16.mxu0 %v9463_v11  ;;  %v8098_v12 = vpack.c.bf16 %v6561_v57, %v6560_v42  ;;  %v6593_v11 = vld [vmem:[%s10823_s5 + $0x1c8] sm:$0xff] }
 0x42f   :  { %6397 = vmatprep.subr.bf16.mxu1 %v9466_v28  ;;  %v6544_v28 = vld [vmem:[%s10823_s5 + $0x40] sm:$0xff] }
 0x431   :  { %6292 = vmatpush1.bf16.msra.mxu0 %v9461_v32  ;;  %v6545_v32 = vld [vmem:[%s10823_s5 + $0x48] sm:$0xff] }
 0x432   :  { %6398 = vmatpush1.bf16.msra.mxu1 %v9464_v21  ;;  %6293 = vmatprep.subr.bf16.mxu0 %v9469_v55  ;;  %v8130_v21 = vpack.c.bf16 %v6593_v11, %v6592_v13  ;;  %v8100_v55 = vpack.c.bf16 %v6545_v32, %v6544_v28 }
 0x433   :  { %6399 = vmatprep.subr.bf16.mxu1 %v9472_v40  ;;  %v6576_v40 = vld [vmem:[%s10823_s5 + $0x140] sm:$0xff] }
 0x434   :  { %v8132_v60 = vpack.c.bf16 %v6577_v33, %v6576_v40 }
 0x435   :  { %6294 = vmatpush1.bf16.msra.mxu0 %v9467_v14  ;;  %v6594_v14 = vld [vmem:[%s10823_s5 + $0x1d0] sm:$0xff] }
 0x436   :  { %6400 = vmatpush1.bf16.msra.mxu1 %v9470_v47  ;;  %8083 = vmatprep.subr.bf16.mxu0 %v8082_v50  ;;  %v8102_v47 = vpack.c.bf16 %v6563_v1, %v6562_v23  ;;  %v6595_v50 = vld [vmem:[%s10823_s5 + $0x1d8] sm:$0xff] }
 0x437   :  { %8115 = vmatprep.subr.bf16.mxu1 %v8114_v61  ;;  %v6546_v61 = vld [vmem:[%s10823_s5 + $0x50] sm:$0xff]  ;;  %v8134_v39 = vpack.c.bf16 %v6595_v50, %v6594_v14 }
 0x438   :  { %7974 = vmatmul.mubr.msk.bf16.vlgmr.msra.gmra.mrb[8].mxu0 %vm10071_vm8, %v10272_v54  ;;  %v8104_v44 = vpack.c.bf16 %v6547_v51, %v6546_v61 }
 0x439   :  { %7998 = vmatmul.mubr.msk.bf16.vlgmr.msra.gmra.mrb[8].mxu1 %vm10071_vm8, %v10272_v54  ;;  %7977 = vmatprep.mubr.msk.bf16.mxu0 %vm10081_vm10, %v10417_v58  ;;  %v6555_v54 = vld [vmem:[%s10823_s5 + $0x98] sm:$0xff] }
 0x43a   :  { %8001 = vmatprep.mubr.msk.bf16.mxu1 %vm10081_vm10, %v10417_v58  ;;  %8085 = vmatpush3.bf16.msra.mxu0 %v8084_v56  ;;  %v6586_v58 = vld [vmem:[%s10823_s5 + $0x190] sm:$0xff]  ;;  %v8086_v0 = vpack.c.bf16 %v6555_v54, %v6554_v9  ;;  %v6579_v56 = vld [vmem:[%s10823_s5 + $0x158] sm:$0xff]  ;;  %v6565_v54 = vld [vmem:[%s10823_s5 + $0xe8] sm:$0xff] }
 0x43b   :  { %8117 = vmatpush3.bf16.msra.mxu1 %v8116_v59  ;;  %v8118_v4 = vpack.c.bf16 %v6587_v30, %v6586_v58  ;;  %v6564_v59 = vld [vmem:[%s10823_s5 + $0xe0] sm:$0xff]  ;;  %v8136_v9 = vpack.c.bf16 %v6579_v56, %v6578_v48 }
 0x43c   :  { %8087 = vmatprep.subr.bf16.mxu0 %v8086_v0  ;;  %v6596_v58 = vld [vmem:[%s10823_s5 + $0x1e0] sm:$0xff]  ;;  %v6597_v0 = vld [vmem:[%s10823_s5 + $0x1e8] sm:$0xff]  ;;  %v8106_v30 = vpack.c.bf16 %v6565_v54, %v6564_v59 }
 0x43d   :  { %8119 = vmatprep.subr.bf16.mxu1 %v8118_v4  ;;  %v6549_v4 = vld [vmem:[%s10823_s5 + $0x68] sm:$0xff] }
 0x43f   :  { %8121 = vmatpush3.bf16.msra.mxu1 %v8120_v18  ;;  %v6566_v18 = vld [vmem:[%s10823_s5 + $0xf0] sm:$0xff] }
 0x440   :  { %7980 = vmatmul.mubr.msk.bf16.gmra.mrb[12].mxu0 %vm10081_vm10, %v10427_v41  ;;  %8123 = vmatprep.subr.bf16.mxu1 %v8122_v6  ;;  %v8110_v26 = vpack.c.bf16 %v6567_v37, %v6566_v18  ;;  %v6551_v6 = vld [vmem:[%s10823_s5 + $0x78] sm:$0xff] }
 0x441   :  { %8004 = vmatmul.mubr.msk.bf16.gmra.mrb[12].mxu1 %vm10081_vm10, %v10427_v41  ;;  %v6539_v41 = vld [vmem:[%s10823_s5 + $0x18] sm:$0xff]  ;;  %v8112_v53 = vpack.c.bf16 %v6551_v6, %v6550_v62 }
 0x442   :  { %v8088_v43 = vpack.c.bf16 %v6539_v41, %v6538_v15  ;;  %v8138_v15 = vpack.c.bf16 %v6597_v0, %v6596_v58  ;;  %v6548_v41 = vld [vmem:[%s10823_s5 + $0x60] sm:$0xff] }
 0x443   :  { %8125 = vmatpush3.bf16.msra.mxu1 %v8124_v35  ;;  %v8108_v5 = vpack.c.bf16 %v6549_v4, %v6548_v41 }
 0x444   :  { %8089 = vmatpush3.bf16.msra.mxu0 %v8088_v43  ;;  %8127 = vmatprep.subr.bf16.mxu1 %v8126_v25  ;;  %v6580_v43 = vld [vmem:[%s10823_s5 + $0x160] sm:$0xff]  ;;  %v6454_v25 = vrot.slane %v3359_v20, %v10169_v10 }
 0x445   :  { %8091 = vmatprep.subr.bf16.mxu0 %v8090_v22  ;;  %v8140_v31 = vpack.c.bf16 %v6581_v2, %v6580_v43  ;;  %v6598_v22 = vld [vmem:[%s10823_s5 + $0x1f0] sm:$0xff] }
 0x446   :  { %v8142_v17 = vpack.c.bf16 %v6599_v29, %v6598_v22 }
 0x447   :  { %8129 = vmatpush3.bf16.msra.mxu1 %v8128_v49 }
 0x448   :  { %8093 = vmatpush3.bf16.msra.mxu0 %v8092_v16  ;;  %8131 = vmatprep.subr.bf16.mxu1 %v8130_v21  ;;  %v6582_v16 = vld [vmem:[%s10823_s5 + $0x170] sm:$0xff]  ;;  %s9745_s5 = smov [#allocation16]  }
 0x449   :  { %8095 = vmatprep.subr.bf16.mxu0 %v8094_v19  ;;  %v8144_v35 = vpack.c.bf16 %v6583_v45, %v6582_v16  ;;  %v6450_v19 = vrot.slane %v3359_v20, %v10163_v8  ;;  %s7029_s11 = sshll.u32 %s9745_s5, 4  ;;  %s7030_s11 = int_to_ptr.vmem [resolvable:$true] %s7029_s11 }
 0x44a   :  { %s9697_s12 = scalar_lea.vmem %s7030_s11, 2048  ;;  %p9702_p9 = scmp.lt.s32.totalorder %s7030_s11, %s7030_s11 }
 0x44b   :  { %8133 = vmatpush3.bf16.msra.mxu1 %v8132_v60  ;;  %p9698_p8 = scmp.ne.s32.totalorder %s7030_s11, %s9697_s12  ;;  %p9703_p10 = scmp.lt.s32.totalorder %s9697_s12, %s9697_s12 }
 0x44c   :  { %8097 = vmatpush3.bf16.msra.mxu0 %v8096_v7  ;;  %8135 = vmatprep.subr.bf16.mxu1 %v8134_v39 }
 0x44d   :  { %8099 = vmatprep.subr.bf16.mxu0 %v8098_v12  ;;  %p9704_p11 = por %p9703_p10, %p9702_p9 }
 0x44f   :  { %8137 = vmatpush3.bf16.msra.mxu1 %v8136_v9  ;;  %p9705_p12 = pnand %p9704_p11, %p9698_p8 }
 0x450   :  { %8101 = vmatpush3.bf16.msra.mxu0 %v8100_v55  ;;  %8139 = vmatprep.subr.bf16.mxu1 %v8138_v15 }
 0x451   :  { %8103 = vmatprep.subr.bf16.mxu0 %v8102_v47 }
 0x453   :  { %8141 = vmatpush3.bf16.msra.mxu1 %v8140_v31 }
 0x454   :  { %8105 = vmatpush3.bf16.msra.mxu0 %v8104_v44  ;;  %8143 = vmatprep.subr.bf16.mxu1 %v8142_v17 }
 0x455   :  { %8107 = vmatprep.subr.bf16.mxu0 %v8106_v30 }
 0x457   :  { %8145 = vmatpush3.bf16.msra.mxu1 %v8144_v35 }
 0x458   :  { %8109 = vmatpush3.bf16.msra.mxu0 %v8108_v5 }
 0x459   :  { %8111 = vmatprep.subr.bf16.mxu0 %v8110_v26 }
 0x45c   :  { %8113 = vmatpush3.bf16.msra.mxu0 %v8112_v53 }
 0x50b   :  { %v6297_v46 = vpop.f32.mrb[8].mxu0 }
 0x50c   :  { %v6403_v38 = vpop.f32.mrb[8].mxu1  ;;  %v6299_v27 = vpop.f32.mrb[9].mxu0  ;;  %v10727_v24 = vadd.f32 %v6442_v52, %v6297_v46 }
 0x50d   :  { %v6405_v7 = vpop.f32.mrb[9].mxu1  ;;  %v6301_v63 = vpop.f32.mrb[10].mxu0  ;;  %v10731_v13 = vadd.f32 %v6450_v19, %v6403_v38  ;;  %v10733_v12 = vadd.f32 %v6446_v34, %v6299_v27 }
 0x50e   :  { %v10729_v49 = vadd.f32 %v6442_v52, %v6301_v63  ;;  %v6407_v42 = vpop.f32.mrb[10].mxu1  ;;  %v6303_v57 = vpop.f32.mrb[11].mxu0  ;;  %v10739_v21 = vadd.f32 %v6454_v25, %v6405_v7 }
 0x50f   :  { %v10735_v11 = vadd.f32 %v6450_v19, %v6407_v42  ;;  %v10737_v28 = vadd.f32 %v6446_v34, %v6303_v57  ;;  %v6409_v32 = vpop.f32.mrb[11].mxu1 }
 0x510   :  { %v6475_v55 = vadd.f32 %v10729_v49, %v10727_v24  ;;  %v10743_v40 = vadd.f32 %v6454_v25, %v6409_v32 }
 0x511   :  { %v6489_v33 = vadd.f32 %v10735_v11, %v10731_v13  ;;  %v6482_v60 = vadd.f32 %v10737_v28, %v10733_v12 }
 0x512   :  { %v6476_v23 = vrot.slane %v6475_v55, 4  ;;  %v6496_v1 = vadd.f32 %v10743_v40, %v10739_v21 }
 0x513   :  { %v6490_v14 = vrot.slane %v6489_v33, 4  ;;  %v6483_v47 = vrot.slane %v6482_v60, 4  ;;  %v6307_v50 = vpop.f32.mrb[12].mxu0 }
 0x514   :  { %v6497_v61 = vrot.slane %v6496_v1, 4  ;;  %v6413_v51 = vpop.f32.mrb[12].mxu1  ;;  %v6309_v39 = vpop.f32.mrb[13].mxu0  ;;  %v6477_v44 = vadd.f32 %v6476_v23, %v6475_v55  ;;  %v10751_v58 = vadd.f32 %v6442_v52, %v6307_v50 }
 0x515   :  { %v6484_v48 = vadd.f32 %v6483_v47, %v6482_v60  ;;  %v6415_v56 = vpop.f32.mrb[13].mxu1  ;;  %v6311_v59 = vpop.f32.mrb[14].mxu0  ;;  %v6491_v9 = vadd.f32 %v6490_v14, %v6489_v33  ;;  %v10755_v41 = vadd.f32 %v6450_v19, %v6413_v51  ;;  %v10757_v4 = vadd.f32 %v6446_v34, %v6309_v39 }
 0x516   :  { %v6498_v54 = vadd.f32 %v6497_v61, %v6496_v1  ;;  %v10753_v0 = vadd.f32 %v6442_v52, %v6311_v59  ;;  %v6417_v30 = vpop.f32.mrb[14].mxu1  ;;  %v6313_v15 = vpop.f32.mrb[15].mxu0  ;;  %v10763_v18 = vadd.f32 %v6454_v25, %v6415_v56  ;;  %v6478_v62 = vrot.slane %v6477_v44, 2 }
 0x517   :  { %v10759_v43 = vadd.f32 %v6450_v19, %v6417_v30  ;;  %v10761_v5 = vadd.f32 %v6446_v34, %v6313_v15  ;;  %v6419_v2 = vpop.f32.mrb[15].mxu1  ;;  %v6485_v26 = vrot.slane %v6484_v48, 2  ;;  %v6492_v45 = vrot.slane %v6491_v9, 2 }
 0x518   :  { %v6503_v37 = vadd.f32 %v10753_v0, %v10751_v58  ;;  %v10767_v31 = vadd.f32 %v6454_v25, %v6419_v2  ;;  %v6499_v17 = vrot.slane %v6498_v54, 2  ;;  %v6479_v38 = vadd.f32 %v6478_v62, %v6477_v44  ;;  %v6749_v62 = vld [vmem:[#allocation13 + $0x8] sm:$0xff] }
 0x519   :  { %v6517_v22 = vadd.f32 %v10759_v43, %v10755_v41  ;;  %v6510_v29 = vadd.f32 %v10761_v5, %v10757_v4  ;;  %v6486_v46 = vadd.f32 %v6485_v26, %v6484_v48  ;;  %v6493_v63 = vadd.f32 %v6492_v45, %v6491_v9  ;;  %6778 = vmatprep.subr.mxu0 %v6749_v62 }
 0x51a   :  { %v6504_v6 = vrot.slane %v6503_v37, 4  ;;  %v6524_v16 = vadd.f32 %v10767_v31, %v10763_v18  ;;  %v6500_v27 = vadd.f32 %v6499_v17, %v6498_v54  ;;  %v6480_v1 = vrot.slane %v6479_v38, 1  ;;  %v6751_v17 = vld [vmem:[#allocation13 + $0x18] sm:$0xff] }
 0x51b   :  { %v6518_v53 = vrot.slane %v6517_v22, 4  ;;  %v6511_v35 = vrot.slane %v6510_v29, 4  ;;  %v6487_v23 = vrot.slane %v6486_v46, 1  ;;  %v6494_v61 = vrot.slane %v6493_v63, 1  ;;  %6849 = vmatprep.subr.mxu1 %v6751_v17 }
 0x51c   :  { %v6505_v20 = vadd.f32 %v6504_v6, %v6503_v37  ;;  %v6525_v52 = vrot.slane %v6524_v16, 4  ;;  %v6501_v50 = vrot.slane %v6500_v27, 1  ;;  %v6481_v54 = vadd.f32 %v6480_v1, %v6479_v38  ;;  %v6748_v6 = vld [vmem:[#allocation13] sm:$0xff] }
 0x51d   :  { %v6519_v19 = vadd.f32 %v6518_v53, %v6517_v22  ;;  %v6512_v34 = vadd.f32 %v6511_v35, %v6510_v29  ;;  %v6488_v59 = vadd.f32 %v6487_v23, %v6486_v46  ;;  %v6495_v2 = vadd.f32 %v6494_v61, %v6493_v63 }
 0x51e   :  { %v6506_v25 = vrot.slane %v6505_v20, 2  ;;  %v6526_v7 = vadd.f32 %v6525_v52, %v6524_v16  ;;  %v6502_v30 = vadd.f32 %v6501_v50, %v6500_v27  ;;  %v6750_v16 = vld [vmem:[#allocation13 + $0x10] sm:$0xff]  ;;  %v9744_v45 = vmov 0.0  }
 0x51f   :  { %v6520_v42 = vrot.slane %v6519_v19, 2  ;;  %v6513_v57 = vrot.slane %v6512_v34, 2 }
 0x520   :  { %v6507_v32 = vadd.f32 %v6506_v25, %v6505_v20  ;;  %v6527_v55 = vrot.slane %v6526_v7, 2  ;;  %v8005_v20 = vld [vmem:[#allocation11] ss:$0 sm:$0xff] }
 0x521   :  { %v6521_v33 = vadd.f32 %v6520_v42, %v6519_v19  ;;  %v6514_v60 = vadd.f32 %v6513_v57, %v6512_v34 }
 0x522   :  { %v6508_v14 = vrot.slane %v6507_v32, 1  ;;  %v6528_v47 = vadd.f32 %v6527_v55, %v6526_v7  ;;  %v6752_v7 = vld [vmem:[#allocation14] sm:$0xf] }
 0x523   :  { %v6522_v51 = vrot.slane %v6521_v33, 1  ;;  %v6515_v39 = vrot.slane %v6514_v60, 1  ;;  %v6757_v63 = vrot.slane %v6752_v7, %v10160_v3  ;;  %v6765_v42 = vrot.slane %v6752_v7, %v10163_v8 }
 0x524   :  { %v6509_v48 = vadd.f32 %v6508_v14, %v6507_v32  ;;  %v6529_v44 = vrot.slane %v6528_v47, 1  ;;  %v6761_v57 = vrot.slane %v6752_v7, %v10166_v36  ;;  %v6769_v32 = vrot.slane %v6752_v7, %v10169_v10 }
 0x525   :  { %v6523_v56 = vadd.f32 %v6522_v51, %v6521_v33  ;;  %v6516_v9 = vadd.f32 %v6515_v39, %v6514_v60 }
 0x526   :  { %v6530_v15 = vadd.f32 %v6529_v44, %v6528_v47  ;;  %v6532_v22 = vsel %vm6531_vm11, %v6481_v54, %v6509_v48 }
 0x527   :  { %v6533_v37 = vsel %vm6531_vm11, %v6488_v59, %v6516_v9  ;;  %v6534_v29 = vsel %vm6531_vm11, %v6495_v2, %v6523_v56 }
 0x528   :  { %6671 = vmatprep.mubr.f32.mxu0 %v6533_v37  ;;  %v6535_v26 = vsel %vm6531_vm11, %v6502_v30, %v6530_v15 }
 0x529   :  { %6741 = vmatprep.mubr.f32.mxu1 %v6535_v26  ;;  %6672 = vmatmul.mubr.f32.vlgmr.msra.gmra.mrb[16].mxu0 %v6532_v22 }
 0x52a   :  { %6742 = vmatmul.mubr.f32.vlgmr.msra.gmra.mrb[16].mxu1 %v6534_v29  ;;  %6779 = vmatpush1.msra.mxu0 %v6748_v6 }
 0x52b   :  { %6850 = vmatpush1.msra.mxu1 %v6750_v16  ;;  %6842 = vmatprep.mubr.f32.mxu0 %v9744_v45 }
 0x52c   :  { %6913 = vmatprep.mubr.f32.mxu1 %v9744_v45 }
 0x5fc   :  { %v8044_v53 = vpop.f32.mrb[16].mxu0 }
 0x5fd   :  { %v8079_v35 = vpop.f32.mrb[16].mxu1  ;;  %v8045_v52 = vpop.f32.mrb[17].mxu0 }
 0x5fe   :  { %v8046_v46 = vadd.f32 %v8045_v52, %v8044_v53  ;;  %v8080_v19 = vpop.f32.mrb[17].mxu1 }
 0x5ff   :  { %v8081_v34 = vadd.f32 %v8080_v19, %v8079_v35  ;;  %v9505_v19 = vld [vmem:[#allocation2] sm:$0xff] }
 0x600   :  { %v6674_v38 = vadd.f32 %v8046_v46, %v8005_v20 }
 0x602   :  { %v6744_v27 = vadd.f32 %v8081_v34, %v6674_v38  ;;  %v9506_v38 = vld [vmem:[#allocation2 + $0x20] sm:$0xff] }
 0x604   :  { %v6747_v25 = vmax.f32 %v6744_v27, 0.0 }
 0x606   :  { %8006 = vmatmul.mubr.msk.f32.vlgmr.msra.gmra.mrb[18].mxu0 %vm6774_vm12, %v6747_v25  ;;  %8007 = vmatmul.mubr.msk.f32.vlgmr.msra.gmra.mrb[18].mxu1 %vm6774_vm12, %v6747_v25 }
 0x6d9   :  { %v6844_v55 = vpop.f32.mrb[18].mxu0  ;;  %v6915_v33 = vpop.f32.mrb[18].mxu1 }
 0x6da   :  { %v6845_v60 = vadd.f32 %v6844_v55, %v6757_v63  ;;  %v6916_v23 = vadd.f32 %v6915_v33, %v6765_v42  ;;  %v6846_v1 = vpop.f32.mrb[19].mxu0  ;;  %v6917_v14 = vpop.f32.mrb[19].mxu1 }
 0x6db   :  { %v6847_v47 = vadd.f32 %v6846_v1, %v6761_v57  ;;  %v6918_v50 = vadd.f32 %v6917_v14, %v6769_v32  ;;  %v9511_v57 = vld [vmem:[#allocation2 + $0x50] sm:$0xff] }
 0x6dc   :  { %v8008_v61 = vmul.f32 -1.442695, %v6845_v60  ;;  %v8010_v51 = vmul.f32 -1.442695, %v6916_v23  ;;  %v9512_v32 = vld [vmem:[#allocation2 + $0x70] sm:$0xff] }
 0x6dd   :  { %v8009_v39 = vmul.f32 -1.442695, %v6847_v47  ;;  %v8011_v48 = vmul.f32 -1.442695, %v6918_v50 }
 0x6de   :  { %9473 = vpow2.f32 %v8008_v61  ;;  %v9513_v61 = vld [vmem:[#allocation2 + $0x8] sm:$0xff] }
 0x6df   :  { %9475 = vpow2.f32 %v8010_v51 }
 0x6e0   :  { %9477 = vpow2.f32 %v8009_v39  ;;  %v9514_v39 = vld [vmem:[#allocation2 + $0x28] sm:$0xff] }
 0x6e1   :  { %9479 = vpow2.f32 %v8011_v48  ;;  %v9515_v48 = vld [vmem:[#allocation2 + $0x48] sm:$0xff] }
 0x6e8   :  { %v9474_v8 = vpop.eup %9473 }
 0x6e9   :  { %v9476_v44 = vpop.eup %9475  ;;  %v6932_v56 = vadd.f32 1.0, %v9474_v8  ;;  %v9516_v8 = vld [vmem:[#allocation2 + $0x68] sm:$0xff] }
 0x6ea   :  { %v9478_v10 = vpop.eup %9477  ;;  %v6934_v59 = vadd.f32 1.0, %v9476_v44  ;;  %v9517_v44 = vld [vmem:[#allocation2 + $0x18] sm:$0xff] }
 0x6eb   :  { %v9480_v9 = vpop.eup %9479  ;;  %9481 = vrcp.f32 %v6932_v56  ;;  %v6933_v54 = vadd.f32 1.0, %v9478_v10  ;;  %v9518_v56 = vld [vmem:[#allocation2 + $0x38] sm:$0xff] }
 0x6ec   :  { %9483 = vrcp.f32 %v6934_v59  ;;  %v6935_v30 = vadd.f32 1.0, %v9480_v9  ;;  %v9519_v59 = vld [vmem:[#allocation2 + $0x58] sm:$0xff] }
 0x6ed   :  { %9485 = vrcp.f32 %v6933_v54  ;;  %v9520_v9 = vld [vmem:[#allocation2 + $0x78] sm:$0xff] }
 0x6ee   :  { %9487 = vrcp.f32 %v6935_v30 }
 0x6f5   :  { %v9482_v15 = vpop.eup %9481 }
 0x6f6   :  { %v9484_v2 = vpop.eup %9483  ;;  %v6947_v37 = vrot.slane %v9482_v15, %v10160_v3  ;;  %v6987_v26 = vrot.slane %v9482_v15, %v10166_v36 }
 0x6f7   :  { %v6955_v22 = vrot.slane %v9484_v2, %v10160_v3  ;;  %v6995_v29 = vrot.slane %v9484_v2, %v10166_v36  ;;  %v9486_v62 = vpop.eup %9485 }
 0x6f8   :  { %v6960_v17 = vmul.f32 %v6947_v37, %v10727_v24  ;;  %v6964_v6 = vmul.f32 %v6947_v37, %v10729_v49  ;;  %v7000_v16 = vmul.f32 %v6987_v26, %v10751_v58  ;;  %v7004_v45 = vmul.f32 %v6987_v26, %v10753_v0  ;;  %v9488_v53 = vpop.eup %9487  ;;  %v9507_v24 = vld [vmem:[#allocation2 + $0x40] sm:$0xff]  ;;  %v9509_v58 = vld [vmem:[#allocation2 + $0x10] sm:$0xff] }
 0x6f9   :  { %v6962_v35 = vmul.f32 %v6955_v22, %v10731_v13  ;;  %v6966_v20 = vmul.f32 %v6955_v22, %v10735_v11  ;;  %v7002_v52 = vmul.f32 %v6995_v29, %v10755_v41  ;;  %v7006_v46 = vmul.f32 %v6995_v29, %v10759_v43  ;;  %v9508_v49 = vld [vmem:[#allocation2 + $0x60] sm:$0xff]  ;;  %v9510_v0 = vld [vmem:[#allocation2 + $0x30] sm:$0xff] }
 0x6fa   :  { %v6968_v34 = vadd.f32 %v9505_v19, %v6960_v17  ;;  %v6972_v27 = vadd.f32 %v9506_v38, %v6964_v6  ;;  %v7008_v25 = vadd.f32 %v9507_v24, %v7000_v16  ;;  %v7012_v7 = vadd.f32 %v9508_v49, %v7004_v45 }
 0x6fb   :  { %v6970_v63 = vadd.f32 %v9509_v58, %v6962_v35  ;;  %v6974_v42 = vadd.f32 %v9510_v0, %v6966_v20  ;;  %v7010_v13 = vadd.f32 %v9511_v57, %v7002_v52  ;;  %v7014_v11 = vadd.f32 %v9512_v32, %v7006_v46 }
 0x6fc   :  { %6976 = vst [vmem:[#allocation16] sm:$0xff] %v6968_v34  ;;  %6980 = vst [vmem:[#allocation16 + $0x20] sm:$0xff] %v6972_v27  ;;  %v6951_v41 = vrot.slane %v9486_v62, %v10160_v3  ;;  %v6991_v43 = vrot.slane %v9486_v62, %v10166_v36  ;;  %v6959_v55 = vrot.slane %v9488_v53, %v10160_v3 }
 0x6fd   :  { %7016 = vst [vmem:[#allocation16 + $0x40] sm:$0xff] %v7008_v25  ;;  %7020 = vst [vmem:[#allocation16 + $0x60] sm:$0xff] %v7012_v7  ;;  %v6999_v33 = vrot.slane %v9488_v53, %v10166_v36 }
 0x6fe   :  { %6978 = vst [vmem:[#allocation16 + $0x10] sm:$0xff] %v6970_v63  ;;  %6982 = vst [vmem:[#allocation16 + $0x30] sm:$0xff] %v6974_v42  ;;  %v6961_v60 = vmul.f32 %v6951_v41, %v10733_v12  ;;  %v6965_v23 = vmul.f32 %v6951_v41, %v10737_v28  ;;  %v7001_v1 = vmul.f32 %v6991_v43, %v10757_v4 }
 0x6ff   :  { %7018 = vst [vmem:[#allocation16 + $0x50] sm:$0xff] %v7010_v13  ;;  %7022 = vst [vmem:[#allocation16 + $0x70] sm:$0xff] %v7014_v11  ;;  %v7005_v14 = vmul.f32 %v6991_v43, %v10761_v5  ;;  %v6963_v47 = vmul.f32 %v6959_v55, %v10739_v21  ;;  %v6967_v3 = vmul.f32 %v6959_v55, %v10743_v40 }
 0x700   :  { %v7003_v36 = vmul.f32 %v6999_v33, %v10763_v18  ;;  %v7007_v50 = vmul.f32 %v6999_v33, %v10767_v31  ;;  %v6969_v51 = vadd.f32 %v9513_v61, %v6961_v60  ;;  %v6973_v12 = vadd.f32 %v9514_v39, %v6965_v23 }
 0x701   :  { %v7009_v28 = vadd.f32 %v9515_v48, %v7001_v1  ;;  %v7013_v4 = vadd.f32 %v9516_v8, %v7005_v14  ;;  %v6971_v5 = vadd.f32 %v9517_v44, %v6963_v47  ;;  %v6975_v10 = vadd.f32 %v9518_v56, %v6967_v3 }
 0x702   :  { %v7011_v21 = vadd.f32 %v9519_v59, %v7003_v36  ;;  %v7015_v40 = vadd.f32 %v9520_v9, %v7007_v50  ;;  %6977 = vst [vmem:[#allocation16 + $0x8] sm:$0xff] %v6969_v51  ;;  %6981 = vst [vmem:[#allocation16 + $0x28] sm:$0xff] %v6973_v12 }
 0x703   :  { %7017 = vst [vmem:[#allocation16 + $0x48] sm:$0xff] %v7009_v28  ;;  %7021 = vst [vmem:[#allocation16 + $0x68] sm:$0xff] %v7013_v4 }
 0x704   :  { %6979 = vst [vmem:[#allocation16 + $0x18] sm:$0xff] %v6971_v5  ;;  %6983 = vst [vmem:[#allocation16 + $0x38] sm:$0xff] %v6975_v10 }
 0x705   :  { %7019 = vst [vmem:[#allocation16 + $0x58] sm:$0xff] %v7011_v21  ;;  %7023 = vst [vmem:[#allocation16 + $0x78] sm:$0xff] %v7015_v40 }
 0x706   :  { %9708 = shalt.err (!%p9705_p12)
}
 0x707   :  { %s9709_s10 = scalar_lea.hbm %s10827_s9, 2048 }
 0x708   :  { %p9710_p13 = scmp.ne.s32.totalorder %s10827_s9, %s9709_s10  ;;  %p9713_p0 = scmp.lt.u32.totalorder %s9709_s10, %s10827_s9 }
 0x70a   :  { %p9715_p1 = pnand %p9713_p0, %p9710_p13 }
 0x70c   :  { %9718 = shalt.err (!%p9715_p1)
}
 0x70d   :  { %7035 = dma.vmem_to_hbm [thread:$0]  %s7030_s11, 2048, %s10827_s9, [#allocation4], %s9737_s6, %s9737_s6, %s9738_s26  }
 0x70e   :  { %9729 = dma.done.wait [#allocation4], 2048  }
 0x70f   :  { %9730 = vsyncadd [#allocation4], 4294965248 }
 0x710   :  { %7039 = vsyncpa [#allocation3], 1 }
 0x711   :  { %7040 = vsyncpa [#allocation6], 1 }
 0x712   :  { %7041 = vsyncpa [#allocation9], 1 }
 0x713   :  { %7042 = vsyncpa [#allocation12], 1 }
 0x714   :  { %7043 = vsyncpa [#allocation15], 1 }
 0x715   :  { %7044 = vsyncpa [#allocation4], 1 }

// kernel: tpu_custom_call.1
= control target key start
LH: loop header
LB: loop body
LE: loop exit
PB: predicated region body
PF: predicated region fallthrough
CT: control target
= control target key end

     0   :  { %14 = vsyncpa [#allocation3], 0  ;;  %s10818_s0 = inlined_call_operand.hbm [shape: f32[1,32,512], index: 0, kind: input, shape index: {}]   ;;  %s10819_s1 = inlined_call_operand.hbm [shape: bf16[3,512,512], index: 1, kind: input, shape index: {}]   ;;  %s10820_s2 = inlined_call_operand.hbm [shape: f32[1,512], index: 2, kind: input, shape index: {}]   ;;  %s10821_s3 = inlined_call_operand.hbm [shape: bf16[3,512,512], index: 3, kind: input, shape index: {}]   ;;  %s10822_s4 = inlined_call_operand.hbm [shape: f32[1,512], index: 4, kind: input, shape index: {}]   ;;  %s10823_s5 = inlined_call_operand.vmem [shape: f32[512,8], index: 5, kind: input, shape index: {}]   ;;  %s10824_s6 = inlined_call_operand.hbm [shape: f32[1,8], index: 6, kind: input, shape index: {}]   ;;  %s10825_s7 = inlined_call_operand.hbm [shape: f32[8,512], index: 7, kind: input, shape index: {}]   ;;  %s10826_s8 = inlined_call_operand.hbm [shape: f32[1,512], index: 8, kind: input, shape index: {}]   ;;  %s10827_s9 = inlined_call_operand.hbm [shape: f32[1,32,512], index: 9, kind: output, shape index: {}]  }
   0x1   :  { %15 = vsyncpa [#allocation6], 0 }
   0x2   :  { %16 = vsyncpa [#allocation9], 0 }
   0x3   :  { %17 = vsyncpa [#allocation12], 0 }
   0x4   :  { %18 = vsyncpa [#allocation15], 0 }
   0x5   :  { %19 = vsyncpa [#allocation4], 0  ;;  %s9731_s30 = smov [#allocation5]   ;;  %s9521_s13 = scalar_lea.hbm %s10819_s1, 49152 }
   0x6   :  { %s37_s10 = sshll.u32 %s9731_s30, 4  ;;  %p9522_p0 = scmp.ne.s32.totalorder %s10819_s1, %s9521_s13  ;;  %s38_s10 = int_to_ptr.vmem [resolvable:$true] %s37_s10 }
   0x7   :  { %p9525_p1 = scmp.lt.u32.totalorder %s9521_s13, %s10819_s1 }
   0x9   :  { %p9527_p2 = pnand %p9525_p1, %p9522_p0 }
   0xb   :  { %9530 = shalt.err (!%p9527_p2)
}
   0xc   :  { %s9531_s18 = scalar_lea.vmem %s38_s10, 49152  ;;  %p9536_p4 = scmp.lt.s32.totalorder %s38_s10, %s38_s10 }
   0xd   :  { %p9532_p3 = scmp.ne.s32.totalorder %s38_s10, %s9531_s18  ;;  %p9537_p5 = scmp.lt.s32.totalorder %s9531_s18, %s9531_s18 }
   0xf   :  { %p9538_p6 = por %p9537_p5, %p9536_p4 }
  0x11   :  { %p9539_p7 = pnand %p9538_p6, %p9532_p3 }
  0x13   :  { %9542 = shalt.err (!%p9539_p7)
}
  0x14   :  { %s9732_s19 = smov 256   ;;  %s9733_s20 = smov 16  }
  0x15   :  { %43 = dma.hbm_to_vmem [thread:$0]  %s10819_s1, 49152, %s38_s10, [#allocation6], %s9732_s19, %s9732_s19, %s9733_s20  }
  0x16   :  { %s9734_s23 = smov [#allocation8]   ;;  %s9735_s25 = smov [#allocation11]  }
  0x17   :  { %s59_s24 = sshll.u32 %s9734_s23, 4  ;;  %s84_s26 = sshll.u32 %s9735_s25, 4  ;;  %s60_s24 = int_to_ptr.vmem [resolvable:$true] %s59_s24  ;;  %s85_s26 = int_to_ptr.vmem [resolvable:$true] %s84_s26 }
  0x18   :  { %s9543_s29 = scalar_lea.hbm %s10821_s3, 49152 }
  0x19   :  { %p9544_p8 = scmp.ne.s32.totalorder %s10821_s3, %s9543_s29  ;;  %p9547_p9 = scmp.lt.u32.totalorder %s9543_s29, %s10821_s3 }
  0x1b   :  { %p9549_p10 = pnand %p9547_p9, %p9544_p8 }
  0x1d   :  { %9552 = shalt.err (!%p9549_p10)
}
  0x1e   :  { %s9553_s1 = scalar_lea.vmem %s60_s24, 49152  ;;  %p9558_p12 = scmp.lt.s32.totalorder %s60_s24, %s60_s24 }
  0x1f   :  { %p9554_p11 = scmp.ne.s32.totalorder %s60_s24, %s9553_s1  ;;  %p9559_p13 = scmp.lt.s32.totalorder %s9553_s1, %s9553_s1 }
  0x21   :  { %p9560_p0 = por %p9559_p13, %p9558_p12 }
  0x23   :  { %p9561_p1 = pnand %p9560_p0, %p9554_p11 }
  0x25   :  { %9564 = shalt.err (!%p9561_p1)
}
  0x26   :  { %65 = dma.hbm_to_vmem [thread:$0]  %s10821_s3, 49152, %s60_s24, [#allocation9], %s9732_s19, %s9732_s19, %s9733_s20  }
  0x27   :  { %s9565_s17 = scalar_lea.hbm %s10824_s6, 16 }
  0x28   :  { %p9566_p2 = scmp.ne.s32.totalorder %s10824_s6, %s9565_s17  ;;  %p9569_p3 = scmp.lt.u32.totalorder %s9565_s17, %s10824_s6 }
  0x2a   :  { %p9571_p4 = pnand %p9569_p3, %p9566_p2 }
  0x2c   :  { %9574 = shalt.err (!%p9571_p4)
}
  0x2d   :  { %s9575_s25 = scalar_lea.vmem %s85_s26, 16  ;;  %s9579_s27 = scalar_lea.vmem %s85_s26, 32 }
  0x2e   :  { %p9576_p5 = scmp.ne.s32.totalorder %s85_s26, %s9575_s25  ;;  %p9580_p6 = scmp.lt.s32.totalorder %s85_s26, %s85_s26 }
  0x2f   :  { %p9581_p7 = scmp.lt.s32.totalorder %s9579_s27, %s9575_s25 }
  0x31   :  { %p9582_p8 = por %p9581_p7, %p9580_p6 }
  0x33   :  { %p9583_p9 = pnand %p9582_p8, %p9576_p5 }
  0x35   :  { %9586 = shalt.err (!%p9583_p9)
}
  0x36   :  { %87 = dma.hbm_to_vmem [thread:$0]  %s10824_s6, 16, %s85_s26, [#allocation12]  }
  0x37   :  { %s9736_s20 = smov [#allocation2]   ;;  %s9587_s30 = scalar_lea.hbm %s10818_s0, 2048 }
  0x38   :  { %s25_s24 = sshll.u32 %s9736_s20, 4  ;;  %p9588_p10 = scmp.ne.s32.totalorder %s10818_s0, %s9587_s30  ;;  %s26_s24 = int_to_ptr.vmem [resolvable:$true] %s25_s24 }
  0x39   :  { %p9591_p11 = scmp.lt.u32.totalorder %s9587_s30, %s10818_s0 }
  0x3b   :  { %p9593_p12 = pnand %p9591_p11, %p9588_p10 }
  0x3d   :  { %9596 = shalt.err (!%p9593_p12)
}
  0x3e   :  { %s9597_s10 = scalar_lea.vmem %s26_s24, 2048  ;;  %p9602_p0 = scmp.lt.s32.totalorder %s26_s24, %s26_s24 }
  0x3f   :  { %p9598_p13 = scmp.ne.s32.totalorder %s26_s24, %s9597_s10  ;;  %p9603_p1 = scmp.lt.s32.totalorder %s9597_s10, %s9597_s10 }
  0x41   :  { %p9604_p2 = por %p9603_p1, %p9602_p0 }
  0x43   :  { %p9605_p3 = pnand %p9604_p2, %p9598_p13 }
  0x45   :  { %9608 = shalt.err (!%p9605_p3)
}
  0x46   :  { %s9737_s6 = smov 512   ;;  %s9738_s26 = smov 32  }
  0x47   :  { %31 = dma.hbm_to_vmem [thread:$0]  %s10818_s0, 2048, %s26_s24, [#allocation3], %s9737_s6, %s9737_s6, %s9738_s26  }
  0x48   :  { %s9739_s16 = smov [#allocation7]   ;;  %s9740_s18 = smov [#allocation10]  }
  0x49   :  { %s50_s17 = sshll.u32 %s9739_s16, 4  ;;  %s72_s21 = sshll.u32 %s9740_s18, 4  ;;  %s51_s17 = int_to_ptr.vmem [resolvable:$true] %s50_s17  ;;  %s73_s21 = int_to_ptr.vmem [resolvable:$true] %s72_s21 }
  0x4a   :  { %s9609_s25 = scalar_lea.hbm %s10820_s2, 64 }
  0x4b   :  { %p9610_p4 = scmp.ne.s32.totalorder %s10820_s2, %s9609_s25  ;;  %p9613_p5 = scmp.lt.u32.totalorder %s9609_s25, %s10820_s2 }
  0x4d   :  { %p9615_p6 = pnand %p9613_p5, %p9610_p4 }
  0x4f   :  { %9618 = shalt.err (!%p9615_p6)
}
  0x50   :  { %s9619_s0 = scalar_lea.vmem %s51_s17, 64  ;;  %p9624_p8 = scmp.lt.s32.totalorder %s51_s17, %s51_s17 }
  0x51   :  { %p9620_p7 = scmp.ne.s32.totalorder %s51_s17, %s9619_s0  ;;  %p9625_p9 = scmp.lt.s32.totalorder %s9619_s0, %s9619_s0 }
  0x53   :  { %p9626_p10 = por %p9625_p9, %p9624_p8 }
  0x55   :  { %p9627_p11 = pnand %p9626_p10, %p9620_p7 }
  0x57   :  { %9630 = shalt.err (!%p9627_p11)
}
  0x58   :  { %53 = dma.hbm_to_vmem [thread:$0]  %s10820_s2, 64, %s51_s17, [#allocation6]  }
  0x59   :  { %s9631_s11 = scalar_lea.hbm %s10822_s4, 64 }
  0x5a   :  { %p9632_p12 = scmp.ne.s32.totalorder %s10822_s4, %s9631_s11  ;;  %p9635_p13 = scmp.lt.u32.totalorder %s9631_s11, %s10822_s4 }
  0x5c   :  { %p9637_p0 = pnand %p9635_p13, %p9632_p12 }
  0x5e   :  { %9640 = shalt.err (!%p9637_p0)
}
  0x5f   :  { %s9641_s14 = scalar_lea.vmem %s73_s21, 64  ;;  %p9646_p2 = scmp.lt.s32.totalorder %s73_s21, %s73_s21 }
  0x60   :  { %p9642_p1 = scmp.ne.s32.totalorder %s73_s21, %s9641_s14  ;;  %p9647_p3 = scmp.lt.s32.totalorder %s9641_s14, %s9641_s14 }
  0x62   :  { %p9648_p4 = por %p9647_p3, %p9646_p2 }
  0x64   :  { %p9649_p5 = pnand %p9648_p4, %p9642_p1 }
  0x66   :  { %9652 = shalt.err (!%p9649_p5)
}
  0x67   :  { %75 = dma.hbm_to_vmem [thread:$0]  %s10822_s4, 64, %s73_s21, [#allocation9]  }
  0x68   :  { %s9741_s16 = smov [#allocation13]   ;;  %s9742_s18 = smov [#allocation14]  }
  0x69   :  { %s94_s17 = sshll.u32 %s9741_s16, 4  ;;  %s104_s22 = sshll.u32 %s9742_s18, 4  ;;  %s95_s17 = int_to_ptr.vmem [resolvable:$true] %s94_s17  ;;  %s105_s22 = int_to_ptr.vmem [resolvable:$true] %s104_s22 }
  0x6a   :  { %s9653_s27 = scalar_lea.hbm %s10825_s7, 512 }
  0x6b   :  { %p9654_p6 = scmp.ne.s32.totalorder %s10825_s7, %s9653_s27  ;;  %p9657_p7 = scmp.lt.u32.totalorder %s9653_s27, %s10825_s7 }
  0x6d   :  { %p9659_p8 = pnand %p9657_p7, %p9654_p6 }
  0x6f   :  { %9662 = shalt.err (!%p9659_p8)
}
  0x70   :  { %s9663_s4 = scalar_lea.vmem %s95_s17, 512  ;;  %p9668_p10 = scmp.lt.s32.totalorder %s95_s17, %s95_s17 }
  0x71   :  { %p9664_p9 = scmp.ne.s32.totalorder %s95_s17, %s9663_s4  ;;  %p9669_p11 = scmp.lt.s32.totalorder %s9663_s4, %s9663_s4 }
  0x73   :  { %p9670_p12 = por %p9669_p11, %p9668_p10 }
  0x75   :  { %p9671_p13 = pnand %p9670_p12, %p9664_p9 }
  0x77   :  { %9674 = shalt.err (!%p9671_p13)
}
  0x78   :  { %97 = dma.hbm_to_vmem [thread:$0]  %s10825_s7, 512, %s95_s17, [#allocation12]  }
  0x79   :  { %s9675_s30 = scalar_lea.hbm %s10826_s8, 64 }
  0x7a   :  { %p9676_p0 = scmp.ne.s32.totalorder %s10826_s8, %s9675_s30  ;;  %p9679_p1 = scmp.lt.u32.totalorder %s9675_s30, %s10826_s8 }
  0x7c   :  { %p9681_p2 = pnand %p9679_p1, %p9676_p0 }
  0x7e   :  { %9684 = shalt.err (!%p9681_p2)
}
  0x7f   :  { %s9685_s10 = scalar_lea.vmem %s105_s22, 64  ;;  %p9690_p4 = scmp.lt.s32.totalorder %s105_s22, %s105_s22 }
  0x80   :  { %p9686_p3 = scmp.ne.s32.totalorder %s105_s22, %s9685_s10  ;;  %p9691_p5 = scmp.lt.s32.totalorder %s9685_s10, %s9685_s10 }
  0x82   :  { %p9692_p6 = por %p9691_p5, %p9690_p4 }
  0x84   :  { %p9693_p7 = pnand %p9692_p6, %p9686_p3 }
  0x86   :  { %9696 = shalt.err (!%p9693_p7)
}
  0x87   :  { %107 = dma.hbm_to_vmem [thread:$0]  %s10826_s8, 64, %s105_s22, [#allocation15]  }
  0x88   :  { %9719 = dma.done.wait [#allocation3], 2048  }
  0x89   :  { %9720 = vsyncadd [#allocation3], 4294965248 }
  0x8a   :  { %9721 = dma.done.wait [#allocation6], 49216  }
  0x8b   :  { %9722 = vsyncadd [#allocation6], 4294918080 }
  0x8c   :  { %9723 = dma.done.wait [#allocation9], 49216  }
  0x8d   :  { %9724 = vsyncadd [#allocation9], 4294918080 }
  0x8e   :  { %9725 = dma.done.wait [#allocation12], 528  }
  0x8f   :  { %9726 = vsyncadd [#allocation12], 4294966768 }
  0x90   :  { %9727 = dma.done.wait [#allocation15], 64  }
  0x91   :  { %9728 = vsyncadd [#allocation15], 4294967232  ;;  %v8321_v0 = vld [vmem:[#allocation5 + $0x404] ss:$16 sps:$4 sm:$0xff]   ;;  %v8323_v1 = vld [vmem:[#allocation5 + $0x40c] ss:$16 sps:$4 sm:$0xff]  }
  0x92   :  { %1237 = vmatprep.subr.bf16.mxu0 %v8321_v0  ;;  %v8325_v2 = vld [vmem:[#allocation5 + $0x400] ss:$16 sps:$4 sm:$0xff]   ;;  %v8326_v3 = vld [vmem:[#allocation5 + $0x408] ss:$16 sps:$4 sm:$0xff]   ;;  %1343 = vmatprep.subr.bf16.mxu1 %v8323_v1  ;;  %v8327_v4 = vld [vmem:[#allocation5 + $0x424] ss:$16 sps:$4 sm:$0xff]  }
  0x93   :  { %1238 = vmatpush1.bf16.msra.mxu0 %v8325_v2  ;;  %1344 = vmatpush1.bf16.msra.mxu1 %v8326_v3  ;;  %v8329_v5 = vld [vmem:[#allocation5 + $0x42c] ss:$16 sps:$4 sm:$0xff]   ;;  %v8331_v6 = vld [vmem:[#allocation5 + $0x420] ss:$16 sps:$4 sm:$0xff]   ;;  %v8332_v7 = vld [vmem:[#allocation5 + $0x428] ss:$16 sps:$4 sm:$0xff]  }
  0x94   :  { %1239 = vmatprep.subr.bf16.mxu0 %v8327_v4  ;;  %1345 = vmatprep.subr.bf16.mxu1 %v8329_v5  ;;  %v8333_v8 = vld [vmem:[#allocation5 + $0x444] ss:$16 sps:$4 sm:$0xff]   ;;  %v8335_v9 = vld [vmem:[#allocation5 + $0x44c] ss:$16 sps:$4 sm:$0xff]   ;;  %v8337_v10 = vld [vmem:[#allocation5 + $0x440] ss:$16 sps:$4 sm:$0xff]  }
  0x95   :  { %v8338_v11 = vld [vmem:[#allocation5 + $0x448] ss:$16 sps:$4 sm:$0xff]   ;;  %v8339_v12 = vld [vmem:[#allocation5 + $0x464] ss:$16 sps:$4 sm:$0xff]   ;;  %v8341_v13 = vld [vmem:[#allocation5 + $0x46c] ss:$16 sps:$4 sm:$0xff]  }
  0x96   :  { %v8343_v14 = vld [vmem:[#allocation5 + $0x460] ss:$16 sps:$4 sm:$0xff]   ;;  %v8344_v15 = vld [vmem:[#allocation5 + $0x468] ss:$16 sps:$4 sm:$0xff]   ;;  %v8345_v16 = vld [vmem:[#allocation5 + $0x484] ss:$16 sps:$4 sm:$0xff]  }
  0x97   :  { %1240 = vmatpush1.bf16.msra.mxu0 %v8331_v6  ;;  %1346 = vmatpush1.bf16.msra.mxu1 %v8332_v7  ;;  %v8347_v17 = vld [vmem:[#allocation5 + $0x48c] ss:$16 sps:$4 sm:$0xff]   ;;  %v8349_v18 = vld [vmem:[#allocation5 + $0x480] ss:$16 sps:$4 sm:$0xff]   ;;  %v8350_v19 = vld [vmem:[#allocation5 + $0x488] ss:$16 sps:$4 sm:$0xff]  }
  0x98   :  { %1241 = vmatprep.subr.bf16.mxu0 %v8333_v8  ;;  %1347 = vmatprep.subr.bf16.mxu1 %v8335_v9  ;;  %v8351_v20 = vld [vmem:[#allocation5 + $0x4a4] ss:$16 sps:$4 sm:$0xff]   ;;  %v8353_v21 = vld [vmem:[#allocation5 + $0x4ac] ss:$16 sps:$4 sm:$0xff]   ;;  %v8355_v22 = vld [vmem:[#allocation5 + $0x4a0] ss:$16 sps:$4 sm:$0xff]  }
  0x99   :  { %v8356_v23 = vld [vmem:[#allocation5 + $0x4a8] ss:$16 sps:$4 sm:$0xff]   ;;  %v8357_v24 = vld [vmem:[#allocation5 + $0x4c4] ss:$16 sps:$4 sm:$0xff]   ;;  %v8359_v25 = vld [vmem:[#allocation5 + $0x4cc] ss:$16 sps:$4 sm:$0xff]  }
  0x9a   :  { %v8361_v26 = vld [vmem:[#allocation5 + $0x4c0] ss:$16 sps:$4 sm:$0xff]   ;;  %v8362_v27 = vld [vmem:[#allocation5 + $0x4c8] ss:$16 sps:$4 sm:$0xff]   ;;  %v8363_v28 = vld [vmem:[#allocation5 + $0x4e4] ss:$16 sps:$4 sm:$0xff]  }
  0x9b   :  { %1242 = vmatpush1.bf16.msra.mxu0 %v8337_v10  ;;  %1348 = vmatpush1.bf16.msra.mxu1 %v8338_v11  ;;  %v8365_v29 = vld [vmem:[#allocation5 + $0x4ec] ss:$16 sps:$4 sm:$0xff]   ;;  %v8367_v30 = vld [vmem:[#allocation5 + $0x4e0] ss:$16 sps:$4 sm:$0xff]   ;;  %v8368_v31 = vld [vmem:[#allocation5 + $0x4e8] ss:$16 sps:$4 sm:$0xff]  }
  0x9c   :  { %1243 = vmatprep.subr.bf16.mxu0 %v8339_v12  ;;  %1349 = vmatprep.subr.bf16.mxu1 %v8341_v13  ;;  %v8369_v32 = vld [vmem:[#allocation5 + $0x504] ss:$16 sps:$4 sm:$0xff]   ;;  %v8371_v33 = vld [vmem:[#allocation5 + $0x50c] ss:$16 sps:$4 sm:$0xff]   ;;  %v8373_v34 = vld [vmem:[#allocation5 + $0x500] ss:$16 sps:$4 sm:$0xff]  }
  0x9d   :  { %v8374_v35 = vld [vmem:[#allocation5 + $0x508] ss:$16 sps:$4 sm:$0xff]   ;;  %v8375_v36 = vld [vmem:[#allocation5 + $0x524] ss:$16 sps:$4 sm:$0xff]   ;;  %v8377_v37 = vld [vmem:[#allocation5 + $0x52c] ss:$16 sps:$4 sm:$0xff]  }
  0x9e   :  { %v8379_v38 = vld [vmem:[#allocation5 + $0x520] ss:$16 sps:$4 sm:$0xff]   ;;  %v8380_v39 = vld [vmem:[#allocation5 + $0x528] ss:$16 sps:$4 sm:$0xff]   ;;  %v8381_v40 = vld [vmem:[#allocation5 + $0x544] ss:$16 sps:$4 sm:$0xff]  }
  0x9f   :  { %1244 = vmatpush1.bf16.msra.mxu0 %v8343_v14  ;;  %1350 = vmatpush1.bf16.msra.mxu1 %v8344_v15  ;;  %v8383_v41 = vld [vmem:[#allocation5 + $0x54c] ss:$16 sps:$4 sm:$0xff]   ;;  %v8385_v42 = vld [vmem:[#allocation5 + $0x540] ss:$16 sps:$4 sm:$0xff]   ;;  %v8386_v43 = vld [vmem:[#allocation5 + $0x548] ss:$16 sps:$4 sm:$0xff]  }
  0xa0   :  { %1245 = vmatprep.subr.bf16.mxu0 %v8345_v16  ;;  %1351 = vmatprep.subr.bf16.mxu1 %v8347_v17  ;;  %v8387_v44 = vld [vmem:[#allocation5 + $0x564] ss:$16 sps:$4 sm:$0xff]   ;;  %v8389_v45 = vld [vmem:[#allocation5 + $0x56c] ss:$16 sps:$4 sm:$0xff]   ;;  %v8391_v48 = vld [vmem:[#allocation5 + $0x560] ss:$16 sps:$4 sm:$0xff]  }
  0xa1   :  { %v9895_v46 = vld [vmem:[#allocation2 + $0x8] sm:$0xff]  ;;  %v8393_v50 = vld [vmem:[#allocation5 + $0x584] ss:$16 sps:$4 sm:$0xff]   ;;  %v8397_v53 = vld [vmem:[#allocation5 + $0x580] ss:$16 sps:$4 sm:$0xff]   ;;  %vm9743_vm2 = vmmov 1  }
  0xa2   :  { %v9897_v47 = vld [vmem:[#allocation2 + $0x28] sm:$0xff]  ;;  %v8399_v55 = vld [vmem:[#allocation5 + $0x5a4] ss:$16 sps:$4 sm:$0xff]   ;;  %v8403_v57 = vld [vmem:[#allocation5 + $0x5a0] ss:$16 sps:$4 sm:$0xff]   ;;  %vm6531_vm11 = vcmask 1040384  }
  0xa3   :  { %1246 = vmatpush1.bf16.msra.mxu0 %v8349_v18  ;;  %1352 = vmatpush1.bf16.msra.mxu1 %v8350_v19  ;;  %v8392_v49 = vld [vmem:[#allocation5 + $0x568] ss:$16 sps:$4 sm:$0xff]   ;;  %v461_v51 = vpack.c.bf16 %v9897_v47, %v9895_v46  ;;  %v8395_v52 = vld [vmem:[#allocation5 + $0x58c] ss:$16 sps:$4 sm:$0xff]   ;;  %v8405_v59 = vld [vmem:[#allocation5 + $0x5c4] ss:$16 sps:$4 sm:$0xff]  }
  0xa4   :  { %1247 = vmatprep.subr.bf16.mxu0 %v8351_v20  ;;  %1353 = vmatprep.subr.bf16.mxu1 %v8353_v21  ;;  %v8398_v54 = vld [vmem:[#allocation5 + $0x588] ss:$16 sps:$4 sm:$0xff]   ;;  %v8401_v56 = vld [vmem:[#allocation5 + $0x5ac] ss:$16 sps:$4 sm:$0xff]   ;;  %v8409_v61 = vld [vmem:[#allocation5 + $0x5c0] ss:$16 sps:$4 sm:$0xff]  }
  0xa5   :  { %1269 = vmatprep.mubr.bf16.mxu0 %v461_v51  ;;  %1375 = vmatprep.mubr.bf16.mxu1 %v461_v51  ;;  %v8404_v58 = vld [vmem:[#allocation5 + $0x5a8] ss:$16 sps:$4 sm:$0xff]   ;;  %v8407_v60 = vld [vmem:[#allocation5 + $0x5cc] ss:$16 sps:$4 sm:$0xff]   ;;  %v8411_v63 = vld [vmem:[#allocation5 + $0x5e4] ss:$16 sps:$4 sm:$0xff]  }
  0xa6   :  { %v8410_v62 = vld [vmem:[#allocation5 + $0x5c8] ss:$16 sps:$4 sm:$0xff]   ;;  %v8413_v0 = vld [vmem:[#allocation5 + $0x5ec] ss:$16 sps:$4 sm:$0xff]   ;;  %v8415_v1 = vld [vmem:[#allocation5 + $0x5e0] ss:$16 sps:$4 sm:$0xff]  }
  0xa7   :  { %1248 = vmatpush1.bf16.msra.mxu0 %v8355_v22  ;;  %1354 = vmatpush1.bf16.msra.mxu1 %v8356_v23  ;;  %v8416_v2 = vld [vmem:[#allocation5 + $0x5e8] ss:$16 sps:$4 sm:$0xff]   ;;  %v9901_v3 = vld [vmem:[#allocation2] sm:$0xff]  ;;  %v8422_v6 = vld [vmem:[#allocation5 + $0x60c] ss:$16 sps:$4 sm:$0xff]   ;;  %vm6774_vm12 = vcmask 64512  }
  0xa8   :  { %1249 = vmatprep.subr.bf16.mxu0 %v8357_v24  ;;  %1355 = vmatprep.subr.bf16.mxu1 %v8359_v25  ;;  %v9903_v4 = vld [vmem:[#allocation2 + $0x20] sm:$0xff]  ;;  %v8420_v9 = vld [vmem:[#allocation5 + $0x608] ss:$16 sps:$4 sm:$0xff]   ;;  %v8428_v11 = vld [vmem:[#allocation5 + $0x62c] ss:$16 sps:$4 sm:$0xff]  }
  0xa9   :  { %v8419_v5 = vld [vmem:[#allocation5 + $0x604] ss:$16 sps:$4 sm:$0xff]   ;;  %v460_v7 = vpack.c.bf16 %v9903_v4, %v9901_v3  ;;  %v8417_v8 = vld [vmem:[#allocation5 + $0x600] ss:$16 sps:$4 sm:$0xff]   ;;  %v8426_v13 = vld [vmem:[#allocation5 + $0x628] ss:$16 sps:$4 sm:$0xff]  }
  0xaa   :  { %v8425_v10 = vld [vmem:[#allocation5 + $0x624] ss:$16 sps:$4 sm:$0xff]   ;;  %v8423_v12 = vld [vmem:[#allocation5 + $0x620] ss:$16 sps:$4 sm:$0xff]   ;;  %v8434_v15 = vld [vmem:[#allocation5 + $0x64c] ss:$16 sps:$4 sm:$0xff]  }
  0xab   :  { %1250 = vmatpush1.bf16.msra.mxu0 %v8361_v26  ;;  %1356 = vmatpush1.bf16.msra.mxu1 %v8362_v27  ;;  %v8431_v14 = vld [vmem:[#allocation5 + $0x644] ss:$16 sps:$4 sm:$0xff]   ;;  %v8429_v16 = vld [vmem:[#allocation5 + $0x640] ss:$16 sps:$4 sm:$0xff]   ;;  %v8432_v17 = vld [vmem:[#allocation5 + $0x648] ss:$16 sps:$4 sm:$0xff]  }
  0xac   :  { %1251 = vmatprep.subr.bf16.mxu0 %v8363_v28  ;;  %1357 = vmatprep.subr.bf16.mxu1 %v8365_v29  ;;  %v8437_v18 = vld [vmem:[#allocation5 + $0x664] ss:$16 sps:$4 sm:$0xff]   ;;  %v8440_v19 = vld [vmem:[#allocation5 + $0x66c] ss:$16 sps:$4 sm:$0xff]   ;;  %v8435_v20 = vld [vmem:[#allocation5 + $0x660] ss:$16 sps:$4 sm:$0xff]  }
  0xad   :  { %v8438_v21 = vld [vmem:[#allocation5 + $0x668] ss:$16 sps:$4 sm:$0xff]   ;;  %v8443_v22 = vld [vmem:[#allocation5 + $0x684] ss:$16 sps:$4 sm:$0xff]   ;;  %v8446_v23 = vld [vmem:[#allocation5 + $0x68c] ss:$16 sps:$4 sm:$0xff]  }
  0xae   :  { %v8441_v24 = vld [vmem:[#allocation5 + $0x680] ss:$16 sps:$4 sm:$0xff]   ;;  %v8444_v25 = vld [vmem:[#allocation5 + $0x688] ss:$16 sps:$4 sm:$0xff]   ;;  %v8449_v26 = vld [vmem:[#allocation5 + $0x6a4] ss:$16 sps:$4 sm:$0xff]  }
  0xaf   :  { %1252 = vmatpush1.bf16.msra.mxu0 %v8367_v30  ;;  %1358 = vmatpush1.bf16.msra.mxu1 %v8368_v31  ;;  %v8452_v27 = vld [vmem:[#allocation5 + $0x6ac] ss:$16 sps:$4 sm:$0xff]   ;;  %v8447_v30 = vld [vmem:[#allocation5 + $0x6a0] ss:$16 sps:$4 sm:$0xff]   ;;  %v8450_v31 = vld [vmem:[#allocation5 + $0x6a8] ss:$16 sps:$4 sm:$0xff]  }
  0xb0   :  { %1253 = vmatprep.subr.bf16.mxu0 %v8369_v32  ;;  %1359 = vmatprep.subr.bf16.mxu1 %v8371_v33  ;;  %v9907_v28 = vld [vmem:[#allocation2 + $0x48] sm:$0xff]  ;;  %v8455_v33 = vld [vmem:[#allocation5 + $0x6c4] ss:$16 sps:$4 sm:$0xff]   ;;  %v8465_v51 = vld [vmem:[#allocation5 + $0x700] ss:$16 sps:$4 sm:$0xff]  }
  0xb1   :  { %v9909_v29 = vld [vmem:[#allocation2 + $0x68] sm:$0xff] }
  0xb2   :  { %v465_v32 = vpack.c.bf16 %v9909_v29, %v9907_v28 }
  0xb3   :  { %1254 = vmatpush1.bf16.msra.mxu0 %v8373_v34  ;;  %1360 = vmatpush1.bf16.msra.mxu1 %v8374_v35  ;;  %v8458_v34 = vld [vmem:[#allocation5 + $0x6cc] ss:$16 sps:$4 sm:$0xff]   ;;  %v9913_v35 = vld [vmem:[#allocation2 + $0x40] sm:$0xff] }
  0xb4   :  { %1255 = vmatprep.subr.bf16.mxu0 %v8375_v36  ;;  %1361 = vmatprep.subr.bf16.mxu1 %v8377_v37  ;;  %v9915_v36 = vld [vmem:[#allocation2 + $0x60] sm:$0xff] }
  0xb5   :  { %v8453_v37 = vld [vmem:[#allocation5 + $0x6c0] ss:$16 sps:$4 sm:$0xff]  }
  0xb7   :  { %1256 = vmatpush1.bf16.msra.mxu0 %v8379_v38  ;;  %1362 = vmatpush1.bf16.msra.mxu1 %v8380_v39  ;;  %v8456_v38 = vld [vmem:[#allocation5 + $0x6c8] ss:$16 sps:$4 sm:$0xff]   ;;  %v464_v39 = vpack.c.bf16 %v9915_v36, %v9913_v35 }
  0xb8   :  { %1257 = vmatprep.subr.bf16.mxu0 %v8381_v40  ;;  %1363 = vmatprep.subr.bf16.mxu1 %v8383_v41  ;;  %v8461_v40 = vld [vmem:[#allocation5 + $0x6e4] ss:$16 sps:$4 sm:$0xff]   ;;  %v8464_v41 = vld [vmem:[#allocation5 + $0x6ec] ss:$16 sps:$4 sm:$0xff]  }
  0xbb   :  { %1258 = vmatpush1.bf16.msra.mxu0 %v8385_v42  ;;  %1364 = vmatpush1.bf16.msra.mxu1 %v8386_v43  ;;  %v9919_v42 = vld [vmem:[#allocation2 + $0x18] sm:$0xff] }
  0xbc   :  { %1259 = vmatprep.subr.bf16.mxu0 %v8387_v44  ;;  %1365 = vmatprep.subr.bf16.mxu1 %v8389_v45  ;;  %v9921_v43 = vld [vmem:[#allocation2 + $0x38] sm:$0xff]  ;;  %v8459_v45 = vld [vmem:[#allocation5 + $0x6e0] ss:$16 sps:$4 sm:$0xff]  }
  0xbd   :  { %v463_v44 = vpack.c.bf16 %v9921_v43, %v9919_v42 }
  0xbf   :  { %1260 = vmatpush1.bf16.msra.mxu0 %v8391_v48  ;;  %1366 = vmatpush1.bf16.msra.mxu1 %v8392_v49  ;;  %v8462_v48 = vld [vmem:[#allocation5 + $0x6e8] ss:$16 sps:$4 sm:$0xff]   ;;  %v8467_v49 = vld [vmem:[#allocation5 + $0x704] ss:$16 sps:$4 sm:$0xff]  }
  0xc0   :  { %1261 = vmatprep.subr.bf16.mxu0 %v8393_v50  ;;  %1367 = vmatprep.subr.bf16.mxu1 %v8395_v52  ;;  %v8470_v50 = vld [vmem:[#allocation5 + $0x70c] ss:$16 sps:$4 sm:$0xff]   ;;  %v8468_v52 = vld [vmem:[#allocation5 + $0x708] ss:$16 sps:$4 sm:$0xff]  }
  0xc3   :  { %1262 = vmatpush1.bf16.msra.mxu0 %v8397_v53  ;;  %1368 = vmatpush1.bf16.msra.mxu1 %v8398_v54  ;;  %v8473_v53 = vld [vmem:[#allocation5 + $0x724] ss:$16 sps:$4 sm:$0xff]   ;;  %v8476_v54 = vld [vmem:[#allocation5 + $0x72c] ss:$16 sps:$4 sm:$0xff]  }
  0xc4   :  { %1263 = vmatprep.subr.bf16.mxu0 %v8399_v55  ;;  %1369 = vmatprep.subr.bf16.mxu1 %v8401_v56  ;;  %v8471_v55 = vld [vmem:[#allocation5 + $0x720] ss:$16 sps:$4 sm:$0xff]   ;;  %v8474_v56 = vld [vmem:[#allocation5 + $0x728] ss:$16 sps:$4 sm:$0xff]  }
  0xc7   :  { %1264 = vmatpush1.bf16.msra.mxu0 %v8403_v57  ;;  %1370 = vmatpush1.bf16.msra.mxu1 %v8404_v58  ;;  %v8479_v57 = vld [vmem:[#allocation5 + $0x744] ss:$16 sps:$4 sm:$0xff]   ;;  %v8482_v58 = vld [vmem:[#allocation5 + $0x74c] ss:$16 sps:$4 sm:$0xff]  }
  0xc8   :  { %1265 = vmatprep.subr.bf16.mxu0 %v8405_v59  ;;  %1371 = vmatprep.subr.bf16.mxu1 %v8407_v60  ;;  %v8477_v59 = vld [vmem:[#allocation5 + $0x740] ss:$16 sps:$4 sm:$0xff]   ;;  %v8480_v60 = vld [vmem:[#allocation5 + $0x748] ss:$16 sps:$4 sm:$0xff]  }
  0xcb   :  { %1266 = vmatpush1.bf16.msra.mxu0 %v8409_v61  ;;  %1372 = vmatpush1.bf16.msra.mxu1 %v8410_v62  ;;  %v8485_v61 = vld [vmem:[#allocation5 + $0x764] ss:$16 sps:$4 sm:$0xff]   ;;  %v8488_v62 = vld [vmem:[#allocation5 + $0x76c] ss:$16 sps:$4 sm:$0xff]  }
  0xcc   :  { %1267 = vmatprep.subr.bf16.mxu0 %v8411_v63  ;;  %1373 = vmatprep.subr.bf16.mxu1 %v8413_v0  ;;  %v8483_v63 = vld [vmem:[#allocation5 + $0x760] ss:$16 sps:$4 sm:$0xff]   ;;  %v8486_v0 = vld [vmem:[#allocation5 + $0x768] ss:$16 sps:$4 sm:$0xff]  }
  0xcf   :  { %1268 = vmatpush1.bf16.msra.mxu0 %v8415_v1  ;;  %1374 = vmatpush1.bf16.msra.mxu1 %v8416_v2  ;;  %v8491_v1 = vld [vmem:[#allocation5 + $0x784] ss:$16 sps:$4 sm:$0xff]   ;;  %v8494_v2 = vld [vmem:[#allocation5 + $0x78c] ss:$16 sps:$4 sm:$0xff]  }
  0xd0   :  { %1290 = vmatprep.subr.bf16.mxu0 %v8419_v5  ;;  %1396 = vmatprep.subr.bf16.mxu1 %v8422_v6  ;;  %v8489_v5 = vld [vmem:[#allocation5 + $0x780] ss:$16 sps:$4 sm:$0xff]   ;;  %v8492_v6 = vld [vmem:[#allocation5 + $0x788] ss:$16 sps:$4 sm:$0xff]  }
  0xd2   :  { %1270 = vmatmul.mubr.bf16.vlgmr.msra.gmra.mrb[0].mxu0 %v460_v7  ;;  %1376 = vmatmul.mubr.bf16.vlgmr.msra.gmra.mrb[0].mxu1 %v460_v7  ;;  %v8497_v7 = vld [vmem:[#allocation5 + $0x7a4] ss:$16 sps:$4 sm:$0xff]  }
  0xd3   :  { %1291 = vmatpush1.bf16.msra.mxu0 %v8417_v8  ;;  %1397 = vmatpush1.bf16.msra.mxu1 %v8420_v9  ;;  %v8500_v8 = vld [vmem:[#allocation5 + $0x7ac] ss:$16 sps:$4 sm:$0xff]   ;;  %v8495_v9 = vld [vmem:[#allocation5 + $0x7a0] ss:$16 sps:$4 sm:$0xff]  }
  0xd4   :  { %1292 = vmatprep.subr.bf16.mxu0 %v8425_v10  ;;  %1398 = vmatprep.subr.bf16.mxu1 %v8428_v11  ;;  %v8498_v10 = vld [vmem:[#allocation5 + $0x7a8] ss:$16 sps:$4 sm:$0xff]   ;;  %v8503_v11 = vld [vmem:[#allocation5 + $0x7c4] ss:$16 sps:$4 sm:$0xff]  }
  0xd5   :  { %1279 = vmatprep.mubr.bf16.mxu0 %v465_v32  ;;  %1385 = vmatprep.mubr.bf16.mxu1 %v465_v32  ;;  %v9933_v32 = vld [vmem:[#allocation2 + $0x58] sm:$0xff] }
  0xd7   :  { %1293 = vmatpush1.bf16.msra.mxu0 %v8423_v12  ;;  %1399 = vmatpush1.bf16.msra.mxu1 %v8426_v13  ;;  %v8506_v12 = vld [vmem:[#allocation5 + $0x7cc] ss:$16 sps:$4 sm:$0xff]   ;;  %v8501_v13 = vld [vmem:[#allocation5 + $0x7c0] ss:$16 sps:$4 sm:$0xff]  }
  0xd8   :  { %1294 = vmatprep.subr.bf16.mxu0 %v8431_v14  ;;  %1400 = vmatprep.subr.bf16.mxu1 %v8434_v15  ;;  %v8504_v14 = vld [vmem:[#allocation5 + $0x7c8] ss:$16 sps:$4 sm:$0xff]   ;;  %v8509_v15 = vld [vmem:[#allocation5 + $0x7e4] ss:$16 sps:$4 sm:$0xff]  }
  0xda   :  { %1280 = vmatmul.mubr.bf16.gmra.mrb[4].mxu0 %v464_v39  ;;  %1386 = vmatmul.mubr.bf16.gmra.mrb[4].mxu1 %v464_v39 }
  0xdb   :  { %1295 = vmatpush1.bf16.msra.mxu0 %v8429_v16  ;;  %1401 = vmatpush1.bf16.msra.mxu1 %v8432_v17  ;;  %v8512_v16 = vld [vmem:[#allocation5 + $0x7ec] ss:$16 sps:$4 sm:$0xff]   ;;  %v8507_v17 = vld [vmem:[#allocation5 + $0x7e0] ss:$16 sps:$4 sm:$0xff]  }
  0xdc   :  { %1296 = vmatprep.subr.bf16.mxu0 %v8437_v18  ;;  %1402 = vmatprep.subr.bf16.mxu1 %v8440_v19  ;;  %v148_v18 = vlaneseq  ;;  %v8510_v19 = vld [vmem:[#allocation5 + $0x7e8] ss:$16 sps:$4 sm:$0xff]  }
  0xdd   :  { %1322 = vmatprep.mubr.bf16.mxu0 %v463_v44  ;;  %1428 = vmatprep.mubr.bf16.mxu1 %v463_v44 }
  0xdf   :  { %1297 = vmatpush1.bf16.msra.mxu0 %v8435_v20  ;;  %1403 = vmatpush1.bf16.msra.mxu1 %v8438_v21  ;;  %v9925_v20 = vld [vmem:[#allocation2 + $0x10] sm:$0xff] }
  0xe0   :  { %1298 = vmatprep.subr.bf16.mxu0 %v8443_v22  ;;  %1404 = vmatprep.subr.bf16.mxu1 %v8446_v23  ;;  %v9927_v21 = vld [vmem:[#allocation2 + $0x30] sm:$0xff]  ;;  %v8518_v23 = vld [vmem:[#allocation5 + $0xc] ss:$16 sps:$4 sm:$0xff]  }
  0xe1   :  { %v8515_v22 = vld [vmem:[#allocation5 + $0x4] ss:$16 sps:$4 sm:$0xff]  }
  0xe3   :  { %1299 = vmatpush1.bf16.msra.mxu0 %v8441_v24  ;;  %1405 = vmatpush1.bf16.msra.mxu1 %v8444_v25  ;;  %v8513_v24 = vld [vmem:[#allocation5] ss:$16 sps:$4 sm:$0xff]   ;;  %v9929_v25 = vshrl.u32 %v148_v18, 7  ;;  %v8564_v18 = vld [vmem:[#allocation5 + $0x108] ss:$16 sps:$4 sm:$0xff]  }
  0xe4   :  { %1300 = vmatprep.subr.bf16.mxu0 %v8449_v26  ;;  %1406 = vmatprep.subr.bf16.mxu1 %v8452_v27  ;;  %v8516_v26 = vld [vmem:[#allocation5 + $0x8] ss:$16 sps:$4 sm:$0xff]   ;;  %v462_v27 = vpack.c.bf16 %v9927_v21, %v9925_v20 }
  0xe5   :  { %v157_v44 = vand.u32 15, %v9929_v25  ;;  %vm226_vm0 = vcmp.lt.s32.totalorder %v9929_v25, 1  ;;  %vm283_vm6 = vcmp.lt.s32.totalorder %v9929_v25, 7 }
  0xe7   :  { %1301 = vmatpush1.bf16.msra.mxu0 %v8447_v30  ;;  %1407 = vmatpush1.bf16.msra.mxu1 %v8450_v31  ;;  %v8521_v30 = vld [vmem:[#allocation5 + $0x24] ss:$16 sps:$4 sm:$0xff]   ;;  %v8524_v31 = vld [vmem:[#allocation5 + $0x2c] ss:$16 sps:$4 sm:$0xff]   ;;  %vm201_vm1 = vcmp.gt.s32.totalorder %v157_v44, 0 }
  0xe8   :  { %1302 = vmatprep.subr.bf16.mxu0 %v8455_v33  ;;  %1408 = vmatprep.subr.bf16.mxu1 %v8458_v34  ;;  %v9935_v33 = vld [vmem:[#allocation2 + $0x78] sm:$0xff]  ;;  %v211_v34 = vrot.slane %v9895_v46, 7  ;;  %v9946_v46 = vld [vmem:[#allocation2 + $0x70] sm:$0xff]  ;;  %vm9959_vm3 = vmpackc.low %vm9743_vm2, %vm201_vm1 }
  0xe9   :  { %v467_v39 = vpack.c.bf16 %v9935_v33, %v9933_v32  ;;  %v8587_v44 = vld [vmem:[#allocation5 + $0x184] ss:$16 sps:$4 sm:$0xff]  }
  0xeb   :  { %1303 = vmatpush1.bf16.msra.mxu0 %v8453_v37  ;;  %1409 = vmatpush1.bf16.msra.mxu1 %v8456_v38  ;;  %v215_v37 = vrot.slane %v9897_v47, 7  ;;  %v8519_v38 = vld [vmem:[#allocation5 + $0x20] ss:$16 sps:$4 sm:$0xff]  }
  0xec   :  { %1304 = vmatprep.subr.bf16.mxu0 %v8461_v40  ;;  %1410 = vmatprep.subr.bf16.mxu1 %v8464_v41  ;;  %v223_v40 = vrot.slane %v9909_v29, 7  ;;  %v8522_v41 = vld [vmem:[#allocation5 + $0x28] ss:$16 sps:$4 sm:$0xff]   ;;  %v217_v29 = vrot.slane %v9921_v43, 7 }
  0xed   :  { %v9490_v43 = vld [vmem:[#allocation2 + $0x28] sm:$0xff] }
  0xef   :  { %1305 = vmatpush1.bf16.msra.mxu0 %v8459_v45  ;;  %1411 = vmatpush1.bf16.msra.mxu1 %v8462_v48  ;;  %v8527_v45 = vld [vmem:[#allocation5 + $0x44] ss:$16 sps:$4 sm:$0xff]  }
  0xf0   :  { %1306 = vmatprep.subr.bf16.mxu0 %v8467_v49  ;;  %1412 = vmatprep.subr.bf16.mxu1 %v8470_v50  ;;  %v9944_v48 = vld [vmem:[#allocation2 + $0x50] sm:$0xff]  ;;  %v8530_v49 = vld [vmem:[#allocation5 + $0x4c] ss:$16 sps:$4 sm:$0xff]  }
  0xf1   :  { %v8525_v50 = vld [vmem:[#allocation5 + $0x40] ss:$16 sps:$4 sm:$0xff]  }
  0xf3   :  { %1307 = vmatpush1.bf16.msra.mxu0 %v8465_v51  ;;  %1413 = vmatpush1.bf16.msra.mxu1 %v8468_v52  ;;  %v8528_v51 = vld [vmem:[#allocation5 + $0x48] ss:$16 sps:$4 sm:$0xff]   ;;  %v466_v52 = vpack.c.bf16 %v9946_v46, %v9944_v48 }
  0xf4   :  { %1308 = vmatprep.subr.bf16.mxu0 %v8473_v53  ;;  %1414 = vmatprep.subr.bf16.mxu1 %v8476_v54  ;;  %v236_v53 = vsel %vm226_vm0, %v211_v34, %v215_v37  ;;  %v240_v54 = vsel %vm226_vm0, %v223_v40, %v211_v34  ;;  %v8581_v34 = vld [vmem:[#allocation5 + $0x164] ss:$16 sps:$4 sm:$0xff]  }
  0xf7   :  { %1309 = vmatpush1.bf16.msra.mxu0 %v8471_v55  ;;  %1415 = vmatpush1.bf16.msra.mxu1 %v8474_v56  ;;  %v8533_v55 = vld [vmem:[#allocation5 + $0x64] ss:$16 sps:$4 sm:$0xff]   ;;  %v8536_v56 = vld [vmem:[#allocation5 + $0x6c] ss:$16 sps:$4 sm:$0xff]  }
  0xf8   :  { %1310 = vmatprep.subr.bf16.mxu0 %v8479_v57  ;;  %1416 = vmatprep.subr.bf16.mxu1 %v8482_v58  ;;  %v7302_v58 = vpack.c.bf16 %v236_v53, %v240_v54  ;;  %v8591_v53 = vld [vmem:[#allocation5 + $0x1a0] ss:$16 sps:$4 sm:$0xff]   ;;  %v8594_v54 = vld [vmem:[#allocation5 + $0x1a8] ss:$16 sps:$4 sm:$0xff]   ;;  %v9296_v57 = vld [vmem:[#allocation8 + $0x848] ss:$16 sps:$4 sm:$0xff]  }
  0xfb   :  { %1311 = vmatpush1.bf16.msra.mxu0 %v8477_v59  ;;  %1417 = vmatpush1.bf16.msra.mxu1 %v8480_v60  ;;  %v8531_v59 = vld [vmem:[#allocation5 + $0x60] ss:$16 sps:$4 sm:$0xff]   ;;  %v8534_v60 = vld [vmem:[#allocation5 + $0x68] ss:$16 sps:$4 sm:$0xff]  }
  0xfc   :  { %1312 = vmatprep.subr.bf16.mxu0 %v8485_v61  ;;  %1418 = vmatprep.subr.bf16.mxu1 %v8488_v62  ;;  %v8539_v61 = vld [vmem:[#allocation5 + $0x84] ss:$16 sps:$4 sm:$0xff]   ;;  %v8542_v62 = vld [vmem:[#allocation5 + $0x8c] ss:$16 sps:$4 sm:$0xff]  }
  0xff   :  { %1313 = vmatpush1.bf16.msra.mxu0 %v8483_v63  ;;  %1419 = vmatpush1.bf16.msra.mxu1 %v8486_v0  ;;  %v8537_v63 = vld [vmem:[#allocation5 + $0x80] ss:$16 sps:$4 sm:$0xff]   ;;  %v8540_v0 = vld [vmem:[#allocation5 + $0x88] ss:$16 sps:$4 sm:$0xff]  }
 0x100   :  { %1314 = vmatprep.subr.bf16.mxu0 %v8491_v1  ;;  %1420 = vmatprep.subr.bf16.mxu1 %v8494_v2  ;;  %v8545_v1 = vld [vmem:[#allocation5 + $0xa4] ss:$16 sps:$4 sm:$0xff]   ;;  %v8548_v2 = vld [vmem:[#allocation5 + $0xac] ss:$16 sps:$4 sm:$0xff]  }
 0x103   :  { %1315 = vmatpush1.bf16.msra.mxu0 %v8489_v5  ;;  %1421 = vmatpush1.bf16.msra.mxu1 %v8492_v6  ;;  %v8543_v5 = vld [vmem:[#allocation5 + $0xa0] ss:$16 sps:$4 sm:$0xff]   ;;  %v8546_v6 = vld [vmem:[#allocation5 + $0xa8] ss:$16 sps:$4 sm:$0xff]  }
 0x104   :  { %1316 = vmatprep.subr.bf16.mxu0 %v8497_v7  ;;  %1422 = vmatprep.subr.bf16.mxu1 %v8500_v8  ;;  %v8551_v7 = vld [vmem:[#allocation5 + $0xc4] ss:$16 sps:$4 sm:$0xff]   ;;  %v8554_v8 = vld [vmem:[#allocation5 + $0xcc] ss:$16 sps:$4 sm:$0xff]  }
 0x107   :  { %1317 = vmatpush1.bf16.msra.mxu0 %v8495_v9  ;;  %1423 = vmatpush1.bf16.msra.mxu1 %v8498_v10  ;;  %v8549_v9 = vld [vmem:[#allocation5 + $0xc0] ss:$16 sps:$4 sm:$0xff]   ;;  %v8552_v10 = vld [vmem:[#allocation5 + $0xc8] ss:$16 sps:$4 sm:$0xff]  }
 0x108   :  { %1318 = vmatprep.subr.bf16.mxu0 %v8503_v11  ;;  %1424 = vmatprep.subr.bf16.mxu1 %v8506_v12  ;;  %v8557_v11 = vld [vmem:[#allocation5 + $0xe4] ss:$16 sps:$4 sm:$0xff]   ;;  %v8560_v12 = vld [vmem:[#allocation5 + $0xec] ss:$16 sps:$4 sm:$0xff]  }
 0x10b   :  { %1319 = vmatpush1.bf16.msra.mxu0 %v8501_v13  ;;  %1425 = vmatpush1.bf16.msra.mxu1 %v8504_v14  ;;  %v8555_v13 = vld [vmem:[#allocation5 + $0xe0] ss:$16 sps:$4 sm:$0xff]   ;;  %v8558_v14 = vld [vmem:[#allocation5 + $0xe8] ss:$16 sps:$4 sm:$0xff]  }
 0x10c   :  { %1320 = vmatprep.subr.bf16.mxu0 %v8509_v15  ;;  %1426 = vmatprep.subr.bf16.mxu1 %v8512_v16  ;;  %v8563_v15 = vld [vmem:[#allocation5 + $0x104] ss:$16 sps:$4 sm:$0xff]   ;;  %v8566_v16 = vld [vmem:[#allocation5 + $0x10c] ss:$16 sps:$4 sm:$0xff]  }
 0x10f   :  { %1321 = vmatpush1.bf16.msra.mxu0 %v8507_v17  ;;  %1427 = vmatpush1.bf16.msra.mxu1 %v8510_v19  ;;  %v8561_v17 = vld [vmem:[#allocation5 + $0x100] ss:$16 sps:$4 sm:$0xff]   ;;  %v8569_v19 = vld [vmem:[#allocation5 + $0x124] ss:$16 sps:$4 sm:$0xff]  }
 0x110   :  { %2089 = vmatprep.subr.bf16.mxu0 %v8515_v22  ;;  %2195 = vmatprep.subr.bf16.mxu1 %v8518_v23  ;;  %v8572_v22 = vld [vmem:[#allocation5 + $0x12c] ss:$16 sps:$4 sm:$0xff]   ;;  %v8567_v23 = vld [vmem:[#allocation5 + $0x120] ss:$16 sps:$4 sm:$0xff]  }
 0x112   :  { %1323 = vmatmul.mubr.bf16.vlgmr.msra.gmra.mrb[0].mxu0 %v462_v27  ;;  %1429 = vmatmul.mubr.bf16.vlgmr.msra.gmra.mrb[0].mxu1 %v462_v27  ;;  %v8578_v27 = vld [vmem:[#allocation5 + $0x14c] ss:$16 sps:$4 sm:$0xff]  }
 0x113   :  { %2090 = vmatpush1.bf16.msra.mxu0 %v8513_v24  ;;  %2196 = vmatpush1.bf16.msra.mxu1 %v8516_v26  ;;  %v8570_v24 = vld [vmem:[#allocation5 + $0x128] ss:$16 sps:$4 sm:$0xff]   ;;  %v8575_v26 = vld [vmem:[#allocation5 + $0x144] ss:$16 sps:$4 sm:$0xff]  }
 0x114   :  { %2091 = vmatprep.subr.bf16.mxu0 %v8521_v30  ;;  %2197 = vmatprep.subr.bf16.mxu1 %v8524_v31  ;;  %v8573_v30 = vld [vmem:[#allocation5 + $0x140] ss:$16 sps:$4 sm:$0xff]   ;;  %v8576_v31 = vld [vmem:[#allocation5 + $0x148] ss:$16 sps:$4 sm:$0xff]  }
 0x115   :  { %1332 = vmatprep.mubr.bf16.mxu0 %v467_v39  ;;  %1438 = vmatprep.mubr.bf16.mxu1 %v467_v39  ;;  %v8579_v39 = vld [vmem:[#allocation5 + $0x160] ss:$16 sps:$4 sm:$0xff]  }
 0x117   :  { %2092 = vmatpush1.bf16.msra.mxu0 %v8519_v38  ;;  %2198 = vmatpush1.bf16.msra.mxu1 %v8522_v41  ;;  %v8584_v38 = vld [vmem:[#allocation5 + $0x16c] ss:$16 sps:$4 sm:$0xff]   ;;  %v8582_v41 = vld [vmem:[#allocation5 + $0x168] ss:$16 sps:$4 sm:$0xff]  }
 0x118   :  { %2093 = vmatprep.subr.bf16.mxu0 %v8527_v45  ;;  %2199 = vmatprep.subr.bf16.mxu1 %v8530_v49  ;;  %v8590_v45 = vld [vmem:[#allocation5 + $0x18c] ss:$16 sps:$4 sm:$0xff]   ;;  %v8585_v49 = vld [vmem:[#allocation5 + $0x180] ss:$16 sps:$4 sm:$0xff]  }
 0x11a   :  { %1333 = vmatmul.mubr.bf16.gmra.mrb[4].mxu0 %v466_v52  ;;  %1439 = vmatmul.mubr.bf16.gmra.mrb[4].mxu1 %v466_v52  ;;  %v8596_v52 = vld [vmem:[#allocation5 + $0x1ac] ss:$16 sps:$4 sm:$0xff]  }
 0x11b   :  { %2094 = vmatpush1.bf16.msra.mxu0 %v8525_v50  ;;  %2200 = vmatpush1.bf16.msra.mxu1 %v8528_v51  ;;  %v8588_v50 = vld [vmem:[#allocation5 + $0x188] ss:$16 sps:$4 sm:$0xff]   ;;  %v8593_v51 = vld [vmem:[#allocation5 + $0x1a4] ss:$16 sps:$4 sm:$0xff]  }
 0x11c   :  { %2095 = vmatprep.subr.bf16.mxu0 %v8533_v55  ;;  %2201 = vmatprep.subr.bf16.mxu1 %v8536_v56  ;;  %v8599_v55 = vld [vmem:[#allocation5 + $0x1c4] ss:$16 sps:$4 sm:$0xff]   ;;  %v8602_v56 = vld [vmem:[#allocation5 + $0x1cc] ss:$16 sps:$4 sm:$0xff]  }
 0x11d   :  { %7303 = vmatprep.mubr.msk.bf16.mxu0 %vm9959_vm3, %v7302_v58  ;;  %7327 = vmatprep.mubr.msk.bf16.mxu1 %vm9959_vm3, %v7302_v58  ;;  %v210_v58 = vrot.slane %v9901_v3, 7 }
 0x11f   :  { %2096 = vmatpush1.bf16.msra.mxu0 %v8531_v59  ;;  %2202 = vmatpush1.bf16.msra.mxu1 %v8534_v60  ;;  %v8597_v59 = vld [vmem:[#allocation5 + $0x1c0] ss:$16 sps:$4 sm:$0xff]   ;;  %v8600_v60 = vld [vmem:[#allocation5 + $0x1c8] ss:$16 sps:$4 sm:$0xff]  }
 0x120   :  { %2097 = vmatprep.subr.bf16.mxu0 %v8539_v61  ;;  %2203 = vmatprep.subr.bf16.mxu1 %v8542_v62  ;;  %v151_v61 = vadd.s32 16, %v9929_v25  ;;  %v214_v62 = vrot.slane %v9903_v4, 7  ;;  %v8611_v4 = vld [vmem:[#allocation5 + $0x204] ss:$16 sps:$4 sm:$0xff]  }
 0x122   :  { %v235_v3 = vsel %vm226_vm0, %v210_v58, %v214_v62 }
 0x123   :  { %2098 = vmatpush1.bf16.msra.mxu0 %v8537_v63  ;;  %2204 = vmatpush1.bf16.msra.mxu1 %v8540_v0  ;;  %v222_v63 = vrot.slane %v9915_v36, 7  ;;  %v8605_v0 = vld [vmem:[#allocation5 + $0x1e4] ss:$16 sps:$4 sm:$0xff]   ;;  %v8614_v36 = vld [vmem:[#allocation5 + $0x20c] ss:$16 sps:$4 sm:$0xff]  }
 0x124   :  { %2099 = vmatprep.subr.bf16.mxu0 %v8545_v1  ;;  %2205 = vmatprep.subr.bf16.mxu1 %v8548_v2  ;;  %v8608_v1 = vld [vmem:[#allocation5 + $0x1ec] ss:$16 sps:$4 sm:$0xff]   ;;  %v219_v2 = vrot.slane %v9907_v28, 7 }
 0x126   :  { %v228_v28 = vsel %vm226_vm0, %v219_v2, %v223_v40  ;;  %v9308_v40 = vld [vmem:[#allocation8 + $0x888] ss:$16 sps:$4 sm:$0xff]  }
 0x127   :  { %2100 = vmatpush1.bf16.msra.mxu0 %v8543_v5  ;;  %2206 = vmatpush1.bf16.msra.mxu1 %v8546_v6  ;;  %v8603_v5 = vld [vmem:[#allocation5 + $0x1e0] ss:$16 sps:$4 sm:$0xff]   ;;  %v8606_v6 = vld [vmem:[#allocation5 + $0x1e8] ss:$16 sps:$4 sm:$0xff]  }
 0x128   :  { %2101 = vmatprep.subr.bf16.mxu0 %v8551_v7  ;;  %2207 = vmatprep.subr.bf16.mxu1 %v8554_v8  ;;  %v171_v7 = vand.u32 15, %v151_v61  ;;  %v239_v8 = vsel %vm226_vm0, %v222_v63, %v210_v58  ;;  %v8645_v58 = vld [vmem:[#allocation5 + $0x2c0] ss:$16 sps:$4 sm:$0xff]   ;;  %v8656_v61 = vld [vmem:[#allocation5 + $0x2ec] ss:$16 sps:$4 sm:$0xff]  }
 0x12a   :  { %vm203_vm4 = vcmp.gt.s32.totalorder %v171_v7, 0  ;;  %v8668_v7 = vld [vmem:[#allocation5 + $0x32c] ss:$16 sps:$4 sm:$0xff]  }
 0x12b   :  { %2102 = vmatpush1.bf16.msra.mxu0 %v8549_v9  ;;  %2208 = vmatpush1.bf16.msra.mxu1 %v8552_v10  ;;  %v8609_v9 = vld [vmem:[#allocation5 + $0x200] ss:$16 sps:$4 sm:$0xff]   ;;  %v8612_v10 = vld [vmem:[#allocation5 + $0x208] ss:$16 sps:$4 sm:$0xff]   ;;  %vm9988_vm5 = vmpackc.low %vm9743_vm2, %vm203_vm4 }
 0x12c   :  { %2103 = vmatprep.subr.bf16.mxu0 %v8557_v11  ;;  %2209 = vmatprep.subr.bf16.mxu1 %v8560_v12  ;;  %v7305_v11 = vpack.c.bf16 %v235_v3, %v239_v8  ;;  %v232_v12 = vsel %vm226_vm0, %v215_v37, %v219_v2  ;;  %v225_v37 = vrot.slane %v9935_v33, 7  ;;  %v8657_v2 = vld [vmem:[#allocation5 + $0x300] ss:$16 sps:$4 sm:$0xff]   ;;  %v8666_v8 = vld [vmem:[#allocation5 + $0x328] ss:$16 sps:$4 sm:$0xff]  }
 0x12d   :  { %v7308_v47 = vpack.c.bf16 %v228_v28, %v232_v12  ;;  %v8663_v3 = vld [vmem:[#allocation5 + $0x320] ss:$16 sps:$4 sm:$0xff]   ;;  %v8680_v28 = vld [vmem:[#allocation5 + $0x36c] ss:$16 sps:$4 sm:$0xff]  }
 0x12e   :  { %v8675_v12 = vld [vmem:[#allocation5 + $0x360] ss:$16 sps:$4 sm:$0xff]  }
 0x12f   :  { %2104 = vmatpush1.bf16.msra.mxu0 %v8555_v13  ;;  %2210 = vmatpush1.bf16.msra.mxu1 %v8558_v14  ;;  %v218_v13 = vrot.slane %v9913_v35, 7  ;;  %v8617_v14 = vld [vmem:[#allocation5 + $0x224] ss:$16 sps:$4 sm:$0xff]   ;;  %v8615_v35 = vld [vmem:[#allocation5 + $0x220] ss:$16 sps:$4 sm:$0xff]  }
 0x130   :  { %2105 = vmatprep.subr.bf16.mxu0 %v8563_v15  ;;  %2211 = vmatprep.subr.bf16.mxu1 %v8566_v16  ;;  %v8620_v15 = vld [vmem:[#allocation5 + $0x22c] ss:$16 sps:$4 sm:$0xff]   ;;  %v213_v16 = vrot.slane %v9919_v42, 7  ;;  %v8623_v42 = vld [vmem:[#allocation5 + $0x244] ss:$16 sps:$4 sm:$0xff]  }
 0x133   :  { %2106 = vmatpush1.bf16.msra.mxu0 %v8561_v17  ;;  %2212 = vmatpush1.bf16.msra.mxu1 %v8564_v18  ;;  %v8618_v17 = vld [vmem:[#allocation5 + $0x228] ss:$16 sps:$4 sm:$0xff]   ;;  %v227_v18 = vsel %vm226_vm0, %v218_v13, %v222_v63 }
 0x134   :  { %2107 = vmatprep.subr.bf16.mxu0 %v8569_v19  ;;  %2213 = vmatprep.subr.bf16.mxu1 %v8572_v22  ;;  %v231_v19 = vsel %vm226_vm0, %v214_v62, %v218_v13  ;;  %v8626_v22 = vld [vmem:[#allocation5 + $0x24c] ss:$16 sps:$4 sm:$0xff]   ;;  %v8651_v62 = vld [vmem:[#allocation5 + $0x2e0] ss:$16 sps:$4 sm:$0xff]   ;;  %v8654_v63 = vld [vmem:[#allocation5 + $0x2e8] ss:$16 sps:$4 sm:$0xff]  }
 0x135   :  { %v8678_v13 = vld [vmem:[#allocation5 + $0x368] ss:$16 sps:$4 sm:$0xff]  }
 0x137   :  { %2108 = vmatpush1.bf16.msra.mxu0 %v8567_v23  ;;  %2214 = vmatpush1.bf16.msra.mxu1 %v8570_v24  ;;  %v8621_v23 = vld [vmem:[#allocation5 + $0x240] ss:$16 sps:$4 sm:$0xff]   ;;  %v8624_v24 = vld [vmem:[#allocation5 + $0x248] ss:$16 sps:$4 sm:$0xff]  }
 0x138   :  { %2109 = vmatprep.subr.bf16.mxu0 %v8575_v26  ;;  %2215 = vmatprep.subr.bf16.mxu1 %v8578_v27  ;;  %v7311_v26 = vpack.c.bf16 %v227_v18, %v231_v19  ;;  %v238_v27 = vsel %vm226_vm0, %v213_v16, %v217_v29  ;;  %v8690_v18 = vld [vmem:[#allocation5 + $0x3a8] ss:$16 sps:$4 sm:$0xff]   ;;  %v8695_v19 = vld [vmem:[#allocation5 + $0x3c4] ss:$16 sps:$4 sm:$0xff]  }
 0x13b   :  { %2110 = vmatpush1.bf16.msra.mxu0 %v8573_v30  ;;  %2216 = vmatpush1.bf16.msra.mxu1 %v8576_v31  ;;  %v242_v30 = vsel %vm226_vm0, %v225_v37, %v213_v16  ;;  %v8629_v31 = vld [vmem:[#allocation5 + $0x264] ss:$16 sps:$4 sm:$0xff]   ;;  %v8681_v16 = vld [vmem:[#allocation5 + $0x380] ss:$16 sps:$4 sm:$0xff]  }
 0x13c   :  { %2111 = vmatprep.subr.bf16.mxu0 %v8581_v34  ;;  %2217 = vmatprep.subr.bf16.mxu1 %v8584_v38  ;;  %v8632_v34 = vld [vmem:[#allocation5 + $0x26c] ss:$16 sps:$4 sm:$0xff]   ;;  %v7314_v38 = vpack.c.bf16 %v238_v27, %v242_v30  ;;  %v224_v27 = vrot.slane %v9946_v46, 7  ;;  %v8696_v30 = vld [vmem:[#allocation5 + $0x3c8] ss:$16 sps:$4 sm:$0xff]  }
 0x13d   :  { %v8707_v46 = vld [vmem:[#allocation5 + $0x804] ss:$16 sps:$4 sm:$0xff]  }
 0x13f   :  { %2112 = vmatpush1.bf16.msra.mxu0 %v8579_v39  ;;  %2218 = vmatpush1.bf16.msra.mxu1 %v8582_v41  ;;  %v8627_v39 = vld [vmem:[#allocation5 + $0x260] ss:$16 sps:$4 sm:$0xff]   ;;  %v8630_v41 = vld [vmem:[#allocation5 + $0x268] ss:$16 sps:$4 sm:$0xff]  }
 0x140   :  { %2113 = vmatprep.subr.bf16.mxu0 %v8587_v44  ;;  %2219 = vmatprep.subr.bf16.mxu1 %v8590_v45  ;;  %v8635_v44 = vld [vmem:[#allocation5 + $0x284] ss:$16 sps:$4 sm:$0xff]   ;;  %v8638_v45 = vld [vmem:[#allocation5 + $0x28c] ss:$16 sps:$4 sm:$0xff]  }
 0x143   :  { %2114 = vmatpush1.bf16.msra.mxu0 %v8585_v49  ;;  %2220 = vmatpush1.bf16.msra.mxu1 %v8588_v50  ;;  %v8633_v49 = vld [vmem:[#allocation5 + $0x280] ss:$16 sps:$4 sm:$0xff]   ;;  %v8636_v50 = vld [vmem:[#allocation5 + $0x288] ss:$16 sps:$4 sm:$0xff]  }
 0x144   :  { %2115 = vmatprep.subr.bf16.mxu0 %v8593_v51  ;;  %2221 = vmatprep.subr.bf16.mxu1 %v8596_v52  ;;  %v8641_v51 = vld [vmem:[#allocation5 + $0x2a4] ss:$16 sps:$4 sm:$0xff]   ;;  %v8644_v52 = vld [vmem:[#allocation5 + $0x2ac] ss:$16 sps:$4 sm:$0xff]  }
 0x147   :  { %2116 = vmatpush1.bf16.msra.mxu0 %v8591_v53  ;;  %2222 = vmatpush1.bf16.msra.mxu1 %v8594_v54  ;;  %v8639_v53 = vld [vmem:[#allocation5 + $0x2a0] ss:$16 sps:$4 sm:$0xff]   ;;  %v8642_v54 = vld [vmem:[#allocation5 + $0x2a8] ss:$16 sps:$4 sm:$0xff]  }
 0x148   :  { %2117 = vmatprep.subr.bf16.mxu0 %v8599_v55  ;;  %2223 = vmatprep.subr.bf16.mxu1 %v8602_v56  ;;  %v8647_v55 = vld [vmem:[#allocation5 + $0x2c4] ss:$16 sps:$4 sm:$0xff]   ;;  %v8650_v56 = vld [vmem:[#allocation5 + $0x2cc] ss:$16 sps:$4 sm:$0xff]  }
 0x14b   :  { %2118 = vmatpush1.bf16.msra.mxu0 %v8597_v59  ;;  %2224 = vmatpush1.bf16.msra.mxu1 %v8600_v60  ;;  %v8648_v59 = vld [vmem:[#allocation5 + $0x2c8] ss:$16 sps:$4 sm:$0xff]   ;;  %v8653_v60 = vld [vmem:[#allocation5 + $0x2e4] ss:$16 sps:$4 sm:$0xff]  }
 0x14c   :  { %2119 = vmatprep.subr.bf16.mxu0 %v8605_v0  ;;  %2225 = vmatprep.subr.bf16.mxu1 %v8608_v1  ;;  %v8659_v0 = vld [vmem:[#allocation5 + $0x304] ss:$16 sps:$4 sm:$0xff]   ;;  %v8662_v1 = vld [vmem:[#allocation5 + $0x30c] ss:$16 sps:$4 sm:$0xff]  }
 0x14f   :  { %2120 = vmatpush1.bf16.msra.mxu0 %v8603_v5  ;;  %2226 = vmatpush1.bf16.msra.mxu1 %v8606_v6  ;;  %v8660_v5 = vld [vmem:[#allocation5 + $0x308] ss:$16 sps:$4 sm:$0xff]   ;;  %v8665_v6 = vld [vmem:[#allocation5 + $0x324] ss:$16 sps:$4 sm:$0xff]  }
 0x150   :  { %2142 = vmatprep.subr.bf16.mxu0 %v8611_v4  ;;  %2248 = vmatprep.subr.bf16.mxu1 %v8614_v36  ;;  %v8671_v4 = vld [vmem:[#allocation5 + $0x344] ss:$16 sps:$4 sm:$0xff]   ;;  %v8674_v36 = vld [vmem:[#allocation5 + $0x34c] ss:$16 sps:$4 sm:$0xff]  }
 0x152   :  { %7306 = vmatmul.mubr.msk.bf16.vlgmr.msra.gmra.mrb[0].mxu0 %vm9959_vm3, %v7305_v11  ;;  %7330 = vmatmul.mubr.msk.bf16.vlgmr.msra.gmra.mrb[0].mxu1 %vm9959_vm3, %v7305_v11  ;;  %v8677_v11 = vld [vmem:[#allocation5 + $0x364] ss:$16 sps:$4 sm:$0xff]  }
 0x153   :  { %2143 = vmatpush1.bf16.msra.mxu0 %v8609_v9  ;;  %2249 = vmatpush1.bf16.msra.mxu1 %v8612_v10  ;;  %v8669_v9 = vld [vmem:[#allocation5 + $0x340] ss:$16 sps:$4 sm:$0xff]   ;;  %v8672_v10 = vld [vmem:[#allocation5 + $0x348] ss:$16 sps:$4 sm:$0xff]  }
 0x154   :  { %2144 = vmatprep.subr.bf16.mxu0 %v8617_v14  ;;  %2250 = vmatprep.subr.bf16.mxu1 %v8620_v15  ;;  %v8683_v14 = vld [vmem:[#allocation5 + $0x384] ss:$16 sps:$4 sm:$0xff]   ;;  %v8686_v15 = vld [vmem:[#allocation5 + $0x38c] ss:$16 sps:$4 sm:$0xff]  }
 0x155   :  { %7309 = vmatprep.mubr.msk.bf16.mxu0 %vm9988_vm5, %v7308_v47  ;;  %7333 = vmatprep.mubr.msk.bf16.mxu1 %vm9988_vm5, %v7308_v47  ;;  %v8684_v47 = vld [vmem:[#allocation5 + $0x388] ss:$16 sps:$4 sm:$0xff]  }
 0x157   :  { %2145 = vmatpush1.bf16.msra.mxu0 %v8615_v35  ;;  %2251 = vmatpush1.bf16.msra.mxu1 %v8618_v17  ;;  %v8689_v35 = vld [vmem:[#allocation5 + $0x3a4] ss:$16 sps:$4 sm:$0xff]   ;;  %v8692_v17 = vld [vmem:[#allocation5 + $0x3ac] ss:$16 sps:$4 sm:$0xff]  }
 0x158   :  { %2146 = vmatprep.subr.bf16.mxu0 %v8623_v42  ;;  %2252 = vmatprep.subr.bf16.mxu1 %v8626_v22  ;;  %v8687_v42 = vld [vmem:[#allocation5 + $0x3a0] ss:$16 sps:$4 sm:$0xff]   ;;  %v8698_v22 = vld [vmem:[#allocation5 + $0x3cc] ss:$16 sps:$4 sm:$0xff]  }
 0x15a   :  { %7312 = vmatmul.mubr.msk.bf16.gmra.mrb[4].mxu0 %vm9988_vm5, %v7311_v26  ;;  %7336 = vmatmul.mubr.msk.bf16.gmra.mrb[4].mxu1 %vm9988_vm5, %v7311_v26  ;;  %v216_v26 = vrot.slane %v9927_v21, 7 }
 0x15b   :  { %2147 = vmatpush1.bf16.msra.mxu0 %v8621_v23  ;;  %2253 = vmatpush1.bf16.msra.mxu1 %v8624_v24  ;;  %v212_v23 = vrot.slane %v9925_v20, 7  ;;  %v8693_v24 = vld [vmem:[#allocation5 + $0x3c0] ss:$16 sps:$4 sm:$0xff]   ;;  %v8702_v20 = vld [vmem:[#allocation5 + $0x3e8] ss:$16 sps:$4 sm:$0xff]  }
 0x15c   :  { %2148 = vmatprep.subr.bf16.mxu0 %v8629_v31  ;;  %2254 = vmatprep.subr.bf16.mxu1 %v8632_v34  ;;  %v8701_v31 = vld [vmem:[#allocation5 + $0x3e4] ss:$16 sps:$4 sm:$0xff]   ;;  %v8704_v34 = vld [vmem:[#allocation5 + $0x3ec] ss:$16 sps:$4 sm:$0xff]  }
 0x15d   :  { %7315 = vmatprep.mubr.msk.bf16.mxu0 %vm9959_vm3, %v7314_v38  ;;  %7339 = vmatprep.mubr.msk.bf16.mxu1 %vm9959_vm3, %v7314_v38  ;;  %v221_v38 = vrot.slane %v9933_v32, 7  ;;  %v237_v21 = vsel %vm226_vm0, %v212_v23, %v216_v26 }
 0x15f   :  { %2149 = vmatpush1.bf16.msra.mxu0 %v8627_v39  ;;  %2255 = vmatpush1.bf16.msra.mxu1 %v8630_v41  ;;  %v8699_v39 = vld [vmem:[#allocation5 + $0x3e0] ss:$16 sps:$4 sm:$0xff]   ;;  %v241_v41 = vsel %vm226_vm0, %v224_v27, %v212_v23  ;;  %v230_v32 = vsel %vm226_vm0, %v221_v38, %v225_v37  ;;  %v8752_v23 = vld [vmem:[#allocation5 + $0x8ec] ss:$16 sps:$4 sm:$0xff]  }
 0x160   :  { %2150 = vmatprep.subr.bf16.mxu0 %v8635_v44  ;;  %2256 = vmatprep.subr.bf16.mxu1 %v8638_v45  ;;  %v8710_v44 = vld [vmem:[#allocation5 + $0x80c] ss:$16 sps:$4 sm:$0xff]   ;;  %v8705_v45 = vld [vmem:[#allocation5 + $0x800] ss:$16 sps:$4 sm:$0xff]  }
 0x163   :  { %2151 = vmatpush1.bf16.msra.mxu0 %v8633_v49  ;;  %2257 = vmatpush1.bf16.msra.mxu1 %v8636_v50  ;;  %v7317_v49 = vpack.c.bf16 %v237_v21, %v241_v41  ;;  %v234_v50 = vsel %vm226_vm0, %v217_v29, %v221_v38  ;;  %v10043_v29 = vld [vmem:[#allocation2 + $0x48] sm:$0xff]  ;;  %v8761_v38 = vld [vmem:[#allocation5 + $0x924] ss:$16 sps:$4 sm:$0xff]   ;;  %v8759_v41 = vld [vmem:[#allocation5 + $0x920] ss:$16 sps:$4 sm:$0xff]  }
 0x164   :  { %2152 = vmatprep.subr.bf16.mxu0 %v8641_v51  ;;  %2258 = vmatprep.subr.bf16.mxu1 %v8644_v52  ;;  %v220_v51 = vrot.slane %v9944_v48, 7  ;;  %v8708_v52 = vld [vmem:[#allocation5 + $0x808] ss:$16 sps:$4 sm:$0xff]   ;;  %v7320_v33 = vpack.c.bf16 %v230_v32, %v234_v50  ;;  %v276_v48 = vrot.slane %v10043_v29, 1  ;;  %v8767_v21 = vld [vmem:[#allocation5 + $0x944] ss:$16 sps:$4 sm:$0xff]  }
 0x165   :  { %v8776_v32 = vld [vmem:[#allocation5 + $0x96c] ss:$16 sps:$4 sm:$0xff]   ;;  %v8771_v50 = vld [vmem:[#allocation5 + $0x960] ss:$16 sps:$4 sm:$0xff]  }
 0x167   :  { %2153 = vmatpush1.bf16.msra.mxu0 %v8639_v53  ;;  %2259 = vmatpush1.bf16.msra.mxu1 %v8642_v54  ;;  %v150_v53 = vadd.s32 8, %v9929_v25  ;;  %v8713_v54 = vld [vmem:[#allocation5 + $0x824] ss:$16 sps:$4 sm:$0xff]  }
 0x168   :  { %2154 = vmatprep.subr.bf16.mxu0 %v8647_v55  ;;  %2260 = vmatprep.subr.bf16.mxu1 %v8650_v56  ;;  %v8716_v55 = vld [vmem:[#allocation5 + $0x82c] ss:$16 sps:$4 sm:$0xff]  }
 0x169   :  { %v10039_v56 = vld [vmem:[#allocation2 + $0x8] sm:$0xff] }
 0x16a   :  { %v268_v37 = vrot.slane %v10039_v56, 1 }
 0x16b   :  { %2155 = vmatpush1.bf16.msra.mxu0 %v8645_v58  ;;  %2261 = vmatpush1.bf16.msra.mxu1 %v8648_v59  ;;  %v272_v58 = vrot.slane %v9490_v43, 1  ;;  %v8711_v59 = vld [vmem:[#allocation5 + $0x820] ss:$16 sps:$4 sm:$0xff]   ;;  %v8785_v43 = vld [vmem:[#allocation5 + $0x9a4] ss:$16 sps:$4 sm:$0xff]  }
 0x16c   :  { %2156 = vmatprep.subr.bf16.mxu0 %v8653_v60  ;;  %2262 = vmatprep.subr.bf16.mxu1 %v8656_v61  ;;  %v8714_v60 = vld [vmem:[#allocation5 + $0x828] ss:$16 sps:$4 sm:$0xff]   ;;  %v229_v61 = vsel %vm226_vm0, %v220_v51, %v224_v27  ;;  %v8755_v27 = vld [vmem:[#allocation5 + $0x904] ss:$16 sps:$4 sm:$0xff]  }
 0x16f   :  { %2157 = vmatpush1.bf16.msra.mxu0 %v8651_v62  ;;  %2263 = vmatpush1.bf16.msra.mxu1 %v8654_v63  ;;  %v233_v62 = vsel %vm226_vm0, %v216_v26, %v220_v51  ;;  %v164_v63 = vand.u32 15, %v150_v53  ;;  %v8750_v26 = vld [vmem:[#allocation5 + $0x8e8] ss:$16 sps:$4 sm:$0xff]   ;;  %v8782_v53 = vld [vmem:[#allocation5 + $0x98c] ss:$16 sps:$4 sm:$0xff]  }
 0x170   :  { %2158 = vmatprep.subr.bf16.mxu0 %v8659_v0  ;;  %2264 = vmatprep.subr.bf16.mxu1 %v8662_v1  ;;  %v8719_v0 = vld [vmem:[#allocation5 + $0x844] ss:$16 sps:$4 sm:$0xff]   ;;  %v8722_v1 = vld [vmem:[#allocation5 + $0x84c] ss:$16 sps:$4 sm:$0xff]   ;;  %v8774_v51 = vld [vmem:[#allocation5 + $0x968] ss:$16 sps:$4 sm:$0xff]  }
 0x171   :  { %vm206_vm7 = vcmp.lt.s32.totalorder %v164_v63, 15  ;;  %v8794_v63 = vld [vmem:[#allocation5 + $0x9cc] ss:$16 sps:$4 sm:$0xff]  }
 0x172   :  { %vm10071_vm8 = vmpackc.low %vm206_vm7, %vm9743_vm2 }
 0x173   :  { %2159 = vmatpush1.bf16.msra.mxu0 %v8657_v2  ;;  %2265 = vmatpush1.bf16.msra.mxu1 %v8660_v5  ;;  %v8717_v2 = vld [vmem:[#allocation5 + $0x840] ss:$16 sps:$4 sm:$0xff]   ;;  %v8720_v5 = vld [vmem:[#allocation5 + $0x848] ss:$16 sps:$4 sm:$0xff]  }
 0x174   :  { %2160 = vmatprep.subr.bf16.mxu0 %v8665_v6  ;;  %2266 = vmatprep.subr.bf16.mxu1 %v8668_v7  ;;  %v7323_v6 = vpack.c.bf16 %v229_v61, %v233_v62  ;;  %v289_v7 = vsel %vm283_vm6, %v272_v58, %v276_v48  ;;  %v8791_v62 = vld [vmem:[#allocation5 + $0x9c4] ss:$16 sps:$4 sm:$0xff]  }
 0x177   :  { %2161 = vmatpush1.bf16.msra.mxu0 %v8663_v3  ;;  %2267 = vmatpush1.bf16.msra.mxu1 %v8666_v8  ;;  %v293_v3 = vsel %vm283_vm6, %v268_v37, %v272_v58  ;;  %v8725_v8 = vld [vmem:[#allocation5 + $0x864] ss:$16 sps:$4 sm:$0xff]   ;;  %v8788_v58 = vld [vmem:[#allocation5 + $0x9ac] ss:$16 sps:$4 sm:$0xff]  }
 0x178   :  { %2162 = vmatprep.subr.bf16.mxu0 %v8671_v4  ;;  %2268 = vmatprep.subr.bf16.mxu1 %v8674_v36  ;;  %v8728_v4 = vld [vmem:[#allocation5 + $0x86c] ss:$16 sps:$4 sm:$0xff]   ;;  %v7478_v36 = vpack.c.bf16 %v289_v7, %v293_v3  ;;  %v9493_v7 = vld [vmem:[#allocation2 + $0x20] sm:$0xff] }
 0x179   :  { %v271_v3 = vrot.slane %v9493_v7, 1  ;;  %v8843_v7 = vld [vmem:[#allocation5 + $0xae0] ss:$16 sps:$4 sm:$0xff]  }
 0x17b   :  { %2163 = vmatpush1.bf16.msra.mxu0 %v8669_v9  ;;  %2269 = vmatpush1.bf16.msra.mxu1 %v8672_v10  ;;  %v8723_v10 = vld [vmem:[#allocation5 + $0x860] ss:$16 sps:$4 sm:$0xff]  }
 0x17c   :  { %2164 = vmatprep.subr.bf16.mxu0 %v8677_v11  ;;  %2270 = vmatprep.subr.bf16.mxu1 %v8680_v28  ;;  %v8726_v11 = vld [vmem:[#allocation5 + $0x868] ss:$16 sps:$4 sm:$0xff]   ;;  %v8731_v28 = vld [vmem:[#allocation5 + $0x884] ss:$16 sps:$4 sm:$0xff]  }
 0x17d   :  { %v6554_v9 = vld [vmem:[%s10823_s5 + $0x90] sm:$0xff] }
 0x17f   :  { %2165 = vmatpush1.bf16.msra.mxu0 %v8675_v12  ;;  %2271 = vmatpush1.bf16.msra.mxu1 %v8678_v13  ;;  %v8734_v12 = vld [vmem:[#allocation5 + $0x88c] ss:$16 sps:$4 sm:$0xff]   ;;  %v8729_v13 = vld [vmem:[#allocation5 + $0x880] ss:$16 sps:$4 sm:$0xff]  }
 0x180   :  { %2166 = vmatprep.subr.bf16.mxu0 %v8683_v14  ;;  %2272 = vmatprep.subr.bf16.mxu1 %v8686_v15  ;;  %v8732_v14 = vld [vmem:[#allocation5 + $0x888] ss:$16 sps:$4 sm:$0xff]   ;;  %v8737_v15 = vld [vmem:[#allocation5 + $0x8a4] ss:$16 sps:$4 sm:$0xff]  }
 0x183   :  { %2167 = vmatpush1.bf16.msra.mxu0 %v8681_v16  ;;  %2273 = vmatpush1.bf16.msra.mxu1 %v8684_v47  ;;  %v8740_v16 = vld [vmem:[#allocation5 + $0x8ac] ss:$16 sps:$4 sm:$0xff]   ;;  %v8735_v47 = vld [vmem:[#allocation5 + $0x8a0] ss:$16 sps:$4 sm:$0xff]  }
 0x184   :  { %2168 = vmatprep.subr.bf16.mxu0 %v8689_v35  ;;  %2274 = vmatprep.subr.bf16.mxu1 %v8692_v17  ;;  %v8738_v35 = vld [vmem:[#allocation5 + $0x8a8] ss:$16 sps:$4 sm:$0xff]   ;;  %v8743_v17 = vld [vmem:[#allocation5 + $0x8c4] ss:$16 sps:$4 sm:$0xff]  }
 0x187   :  { %2169 = vmatpush1.bf16.msra.mxu0 %v8687_v42  ;;  %2275 = vmatpush1.bf16.msra.mxu1 %v8690_v18  ;;  %v8746_v42 = vld [vmem:[#allocation5 + $0x8cc] ss:$16 sps:$4 sm:$0xff]   ;;  %v8741_v18 = vld [vmem:[#allocation5 + $0x8c0] ss:$16 sps:$4 sm:$0xff]  }
 0x188   :  { %2170 = vmatprep.subr.bf16.mxu0 %v8695_v19  ;;  %2276 = vmatprep.subr.bf16.mxu1 %v8698_v22  ;;  %v8744_v19 = vld [vmem:[#allocation5 + $0x8c8] ss:$16 sps:$4 sm:$0xff]   ;;  %v8749_v22 = vld [vmem:[#allocation5 + $0x8e4] ss:$16 sps:$4 sm:$0xff]  }
 0x18b   :  { %2171 = vmatpush1.bf16.msra.mxu0 %v8693_v24  ;;  %2277 = vmatpush1.bf16.msra.mxu1 %v8696_v30  ;;  %v8747_v24 = vld [vmem:[#allocation5 + $0x8e0] ss:$16 sps:$4 sm:$0xff]   ;;  %v8758_v30 = vld [vmem:[#allocation5 + $0x90c] ss:$16 sps:$4 sm:$0xff]  }
 0x18c   :  { %2172 = vmatprep.subr.bf16.mxu0 %v8701_v31  ;;  %2278 = vmatprep.subr.bf16.mxu1 %v8704_v34  ;;  %v8753_v31 = vld [vmem:[#allocation5 + $0x900] ss:$16 sps:$4 sm:$0xff]   ;;  %v8756_v34 = vld [vmem:[#allocation5 + $0x908] ss:$16 sps:$4 sm:$0xff]  }
 0x18f   :  { %2173 = vmatpush1.bf16.msra.mxu0 %v8699_v39  ;;  %2279 = vmatpush1.bf16.msra.mxu1 %v8702_v20  ;;  %v8764_v39 = vld [vmem:[#allocation5 + $0x92c] ss:$16 sps:$4 sm:$0xff]   ;;  %v8762_v20 = vld [vmem:[#allocation5 + $0x928] ss:$16 sps:$4 sm:$0xff]  }
 0x190   :  { %3078 = vmatprep.subr.bf16.mxu0 %v8707_v46  ;;  %3184 = vmatprep.subr.bf16.mxu1 %v8710_v44  ;;  %v8770_v46 = vld [vmem:[#allocation5 + $0x94c] ss:$16 sps:$4 sm:$0xff]   ;;  %v8765_v44 = vld [vmem:[#allocation5 + $0x940] ss:$16 sps:$4 sm:$0xff]  }
 0x192   :  { %7318 = vmatmul.mubr.msk.bf16.vlgmr.msra.gmra.mrb[0].mxu0 %vm9959_vm3, %v7317_v49  ;;  %7342 = vmatmul.mubr.msk.bf16.vlgmr.msra.gmra.mrb[0].mxu1 %vm9959_vm3, %v7317_v49  ;;  %v8773_v49 = vld [vmem:[#allocation5 + $0x964] ss:$16 sps:$4 sm:$0xff]  }
 0x193   :  { %3079 = vmatpush1.bf16.msra.mxu0 %v8705_v45  ;;  %3185 = vmatpush1.bf16.msra.mxu1 %v8708_v52  ;;  %v8768_v45 = vld [vmem:[#allocation5 + $0x948] ss:$16 sps:$4 sm:$0xff]   ;;  %v8779_v52 = vld [vmem:[#allocation5 + $0x984] ss:$16 sps:$4 sm:$0xff]  }
 0x194   :  { %3080 = vmatprep.subr.bf16.mxu0 %v8713_v54  ;;  %3186 = vmatprep.subr.bf16.mxu1 %v8716_v55  ;;  %v8777_v54 = vld [vmem:[#allocation5 + $0x980] ss:$16 sps:$4 sm:$0xff]   ;;  %v8780_v55 = vld [vmem:[#allocation5 + $0x988] ss:$16 sps:$4 sm:$0xff]  }
 0x195   :  { %7321 = vmatprep.mubr.msk.bf16.mxu0 %vm9988_vm5, %v7320_v33  ;;  %7345 = vmatprep.mubr.msk.bf16.mxu1 %vm9988_vm5, %v7320_v33  ;;  %v152_v33 = vadd.s32 24, %v9929_v25 }
 0x197   :  { %3081 = vmatpush1.bf16.msra.mxu0 %v8711_v59  ;;  %3187 = vmatpush1.bf16.msra.mxu1 %v8714_v60  ;;  %v8783_v59 = vld [vmem:[#allocation5 + $0x9a0] ss:$16 sps:$4 sm:$0xff]   ;;  %v8786_v60 = vld [vmem:[#allocation5 + $0x9a8] ss:$16 sps:$4 sm:$0xff]   ;;  %v178_v61 = vand.u32 15, %v152_v33 }
 0x198   :  { %3082 = vmatprep.subr.bf16.mxu0 %v8719_v0  ;;  %3188 = vmatprep.subr.bf16.mxu1 %v8722_v1  ;;  %v8789_v0 = vld [vmem:[#allocation5 + $0x9c0] ss:$16 sps:$4 sm:$0xff]   ;;  %v8792_v1 = vld [vmem:[#allocation5 + $0x9c8] ss:$16 sps:$4 sm:$0xff]   ;;  %v8830_v33 = vld [vmem:[#allocation5 + $0xa8c] ss:$16 sps:$4 sm:$0xff]  }
 0x199   :  { %vm208_vm9 = vcmp.lt.s32.totalorder %v178_v61, 15  ;;  %v8831_v61 = vld [vmem:[#allocation5 + $0xaa0] ss:$16 sps:$4 sm:$0xff]  }
 0x19a   :  { %7324 = vmatmul.mubr.msk.bf16.gmra.mrb[4].mxu0 %vm9988_vm5, %v7323_v6  ;;  %7348 = vmatmul.mubr.msk.bf16.gmra.mrb[4].mxu1 %vm9988_vm5, %v7323_v6  ;;  %v8797_v6 = vld [vmem:[#allocation5 + $0x9e4] ss:$16 sps:$4 sm:$0xff]   ;;  %vm10081_vm10 = vmpackc.low %vm208_vm9, %vm9743_vm2 }
 0x19b   :  { %3083 = vmatpush1.bf16.msra.mxu0 %v8717_v2  ;;  %3189 = vmatpush1.bf16.msra.mxu1 %v8720_v5  ;;  %v9492_v2 = vld [vmem:[#allocation2] sm:$0xff] }
 0x19c   :  { %3084 = vmatprep.subr.bf16.mxu0 %v8725_v8  ;;  %3190 = vmatprep.subr.bf16.mxu1 %v8728_v4  ;;  %v267_v5 = vrot.slane %v9492_v2, 1  ;;  %v9494_v8 = vld [vmem:[#allocation2 + $0x40] sm:$0xff]  ;;  %v8840_v2 = vld [vmem:[#allocation5 + $0xac8] ss:$16 sps:$4 sm:$0xff]  }
 0x19d   :  { %7479 = vmatprep.mubr.msk.bf16.mxu0 %vm10071_vm8, %v7478_v36  ;;  %7503 = vmatprep.mubr.msk.bf16.mxu1 %vm10071_vm8, %v7478_v36  ;;  %v275_v4 = vrot.slane %v9494_v8, 1  ;;  %v8800_v36 = vld [vmem:[#allocation5 + $0x9ec] ss:$16 sps:$4 sm:$0xff]   ;;  %v8851_v8 = vld [vmem:[#allocation5 + $0xb04] ss:$16 sps:$4 sm:$0xff]  }
 0x19f   :  { %3085 = vmatpush1.bf16.msra.mxu0 %v8723_v10  ;;  %3191 = vmatpush1.bf16.msra.mxu1 %v8726_v11  ;;  %v8795_v10 = vld [vmem:[#allocation5 + $0x9e0] ss:$16 sps:$4 sm:$0xff]   ;;  %v8798_v11 = vld [vmem:[#allocation5 + $0x9e8] ss:$16 sps:$4 sm:$0xff]  }
 0x1a0   :  { %3086 = vmatprep.subr.bf16.mxu0 %v8731_v28  ;;  %3192 = vmatprep.subr.bf16.mxu1 %v8734_v12  ;;  %v9495_v28 = vld [vmem:[#allocation2 + $0x68] sm:$0xff] }
 0x1a1   :  { %v280_v12 = vrot.slane %v9495_v28, 1  ;;  %v8860_v28 = vld [vmem:[#allocation5 + $0xb2c] ss:$16 sps:$4 sm:$0xff]  }
 0x1a3   :  { %3087 = vmatpush1.bf16.msra.mxu0 %v8729_v13  ;;  %3193 = vmatpush1.bf16.msra.mxu1 %v8732_v14  ;;  %v8803_v13 = vld [vmem:[#allocation5 + $0xa04] ss:$16 sps:$4 sm:$0xff]   ;;  %v8806_v14 = vld [vmem:[#allocation5 + $0xa0c] ss:$16 sps:$4 sm:$0xff]  }
 0x1a4   :  { %3088 = vmatprep.subr.bf16.mxu0 %v8737_v15  ;;  %3194 = vmatprep.subr.bf16.mxu1 %v8740_v16  ;;  %v292_v16 = vsel %vm283_vm6, %v267_v5, %v271_v3  ;;  %v6538_v15 = vld [vmem:[%s10823_s5 + $0x10] sm:$0xff] }
 0x1a7   :  { %3089 = vmatpush1.bf16.msra.mxu0 %v8735_v47  ;;  %3195 = vmatpush1.bf16.msra.mxu1 %v8738_v35  ;;  %v288_v47 = vsel %vm283_vm6, %v271_v3, %v275_v4  ;;  %v8801_v35 = vld [vmem:[#allocation5 + $0xa00] ss:$16 sps:$4 sm:$0xff]   ;;  %v8846_v3 = vld [vmem:[#allocation5 + $0xae8] ss:$16 sps:$4 sm:$0xff]  }
 0x1a8   :  { %3090 = vmatprep.subr.bf16.mxu0 %v8743_v17  ;;  %3196 = vmatprep.subr.bf16.mxu1 %v8746_v42  ;;  %v8804_v17 = vld [vmem:[#allocation5 + $0xa08] ss:$16 sps:$4 sm:$0xff]   ;;  %v7481_v42 = vpack.c.bf16 %v288_v47, %v292_v16  ;;  %v8866_v16 = vld [vmem:[#allocation5 + $0xb4c] ss:$16 sps:$4 sm:$0xff]   ;;  %v8861_v47 = vld [vmem:[#allocation5 + $0xb40] ss:$16 sps:$4 sm:$0xff]  }
 0x1ab   :  { %3091 = vmatpush1.bf16.msra.mxu0 %v8741_v18  ;;  %3197 = vmatpush1.bf16.msra.mxu1 %v8744_v19  ;;  %v8809_v18 = vld [vmem:[#allocation5 + $0xa24] ss:$16 sps:$4 sm:$0xff]   ;;  %v8812_v19 = vld [vmem:[#allocation5 + $0xa2c] ss:$16 sps:$4 sm:$0xff]  }
 0x1ac   :  { %3092 = vmatprep.subr.bf16.mxu0 %v8749_v22  ;;  %3198 = vmatprep.subr.bf16.mxu1 %v8752_v23  ;;  %v285_v22 = vsel %vm283_vm6, %v276_v48, %v280_v12  ;;  %v297_v23 = vsel %vm283_vm6, %v280_v12, %v268_v37  ;;  %v8815_v37 = vld [vmem:[#allocation5 + $0xa44] ss:$16 sps:$4 sm:$0xff]   ;;  %v8855_v12 = vld [vmem:[#allocation5 + $0xb20] ss:$16 sps:$4 sm:$0xff]  }
 0x1af   :  { %3093 = vmatpush1.bf16.msra.mxu0 %v8747_v24  ;;  %3199 = vmatpush1.bf16.msra.mxu1 %v8750_v26  ;;  %v9496_v24 = vld [vmem:[#allocation2 + $0x60] sm:$0xff] }
 0x1b0   :  { %3094 = vmatprep.subr.bf16.mxu0 %v8755_v27  ;;  %3200 = vmatprep.subr.bf16.mxu1 %v8758_v30  ;;  %v279_v26 = vrot.slane %v9496_v24, 1  ;;  %v8807_v27 = vld [vmem:[#allocation5 + $0xa20] ss:$16 sps:$4 sm:$0xff]   ;;  %v8810_v30 = vld [vmem:[#allocation5 + $0xa28] ss:$16 sps:$4 sm:$0xff]  }
 0x1b1   :  { %v8873_v24 = vld [vmem:[#allocation5 + $0xb80] ss:$16 sps:$4 sm:$0xff]  }
 0x1b3   :  { %3095 = vmatpush1.bf16.msra.mxu0 %v8753_v31  ;;  %3201 = vmatpush1.bf16.msra.mxu1 %v8756_v34  ;;  %v7484_v31 = vpack.c.bf16 %v297_v23, %v285_v22  ;;  %v10097_v34 = vld [vmem:[#allocation2 + $0x18] sm:$0xff]  ;;  %v8875_v22 = vld [vmem:[#allocation5 + $0xb84] ss:$16 sps:$4 sm:$0xff]  }
 0x1b4   :  { %3096 = vmatprep.subr.bf16.mxu0 %v8761_v38  ;;  %3202 = vmatprep.subr.bf16.mxu1 %v8764_v39  ;;  %v270_v29 = vrot.slane %v10097_v34, 1  ;;  %v9498_v38 = vld [vmem:[#allocation2 + $0x38] sm:$0xff]  ;;  %v8903_v34 = vld [vmem:[#allocation8 + $0x420] ss:$16 sps:$4 sm:$0xff]  }
 0x1b5   :  { %v274_v48 = vrot.slane %v9498_v38, 1  ;;  %v10100_v39 = vld [vmem:[#allocation2 + $0x58] sm:$0xff] }
 0x1b6   :  { %v278_v56 = vrot.slane %v10100_v39, 1  ;;  %v8878_v23 = vld [vmem:[#allocation5 + $0xb8c] ss:$16 sps:$4 sm:$0xff]   ;;  %v8882_v38 = vld [vmem:[#allocation5 + $0xba8] ss:$16 sps:$4 sm:$0xff]  }
 0x1b7   :  { %3097 = vmatpush1.bf16.msra.mxu0 %v8759_v41  ;;  %3203 = vmatpush1.bf16.msra.mxu1 %v8762_v20  ;;  %v8818_v41 = vld [vmem:[#allocation5 + $0xa4c] ss:$16 sps:$4 sm:$0xff]   ;;  %v284_v20 = vsel %vm283_vm6, %v275_v4, %v279_v26 }
 0x1b8   :  { %3098 = vmatprep.subr.bf16.mxu0 %v8767_v21  ;;  %3204 = vmatprep.subr.bf16.mxu1 %v8770_v46  ;;  %v296_v21 = vsel %vm283_vm6, %v279_v26, %v267_v5  ;;  %v8813_v46 = vld [vmem:[#allocation5 + $0xa40] ss:$16 sps:$4 sm:$0xff]   ;;  %v8845_v5 = vld [vmem:[#allocation5 + $0xae4] ss:$16 sps:$4 sm:$0xff]   ;;  %v8854_v4 = vld [vmem:[#allocation5 + $0xb0c] ss:$16 sps:$4 sm:$0xff]  }
 0x1b9   :  { %v8876_v26 = vld [vmem:[#allocation5 + $0xb88] ss:$16 sps:$4 sm:$0xff]  }
 0x1bb   :  { %3099 = vmatpush1.bf16.msra.mxu0 %v8765_v44  ;;  %3205 = vmatpush1.bf16.msra.mxu1 %v8768_v45  ;;  %v8816_v44 = vld [vmem:[#allocation5 + $0xa48] ss:$16 sps:$4 sm:$0xff]   ;;  %v8821_v45 = vld [vmem:[#allocation5 + $0xa64] ss:$16 sps:$4 sm:$0xff]  }
 0x1bc   :  { %3100 = vmatprep.subr.bf16.mxu0 %v8773_v49  ;;  %3206 = vmatprep.subr.bf16.mxu1 %v8776_v32  ;;  %v8824_v49 = vld [vmem:[#allocation5 + $0xa6c] ss:$16 sps:$4 sm:$0xff]   ;;  %v7487_v32 = vpack.c.bf16 %v296_v21, %v284_v20  ;;  %v8888_v20 = vld [vmem:[#allocation5 + $0xbc8] ss:$16 sps:$4 sm:$0xff]   ;;  %v8893_v21 = vld [vmem:[#allocation5 + $0xbe4] ss:$16 sps:$4 sm:$0xff]  }
 0x1bf   :  { %3101 = vmatpush1.bf16.msra.mxu0 %v8771_v50  ;;  %3207 = vmatpush1.bf16.msra.mxu1 %v8774_v51  ;;  %v291_v50 = vsel %vm283_vm6, %v274_v48, %v278_v56  ;;  %v295_v51 = vsel %vm283_vm6, %v270_v29, %v274_v48  ;;  %v8887_v48 = vld [vmem:[#allocation5 + $0xbc4] ss:$16 sps:$4 sm:$0xff]  }
 0x1c0   :  { %3102 = vmatprep.subr.bf16.mxu0 %v8779_v52  ;;  %3208 = vmatprep.subr.bf16.mxu1 %v8782_v53  ;;  %v8819_v52 = vld [vmem:[#allocation5 + $0xa60] ss:$16 sps:$4 sm:$0xff]   ;;  %v8822_v53 = vld [vmem:[#allocation5 + $0xa68] ss:$16 sps:$4 sm:$0xff]  }
 0x1c3   :  { %3103 = vmatpush1.bf16.msra.mxu0 %v8777_v54  ;;  %3209 = vmatpush1.bf16.msra.mxu1 %v8780_v55  ;;  %v7490_v54 = vpack.c.bf16 %v291_v50, %v295_v51  ;;  %v8827_v55 = vld [vmem:[#allocation5 + $0xa84] ss:$16 sps:$4 sm:$0xff]  }
 0x1c4   :  { %3104 = vmatprep.subr.bf16.mxu0 %v8785_v43  ;;  %3210 = vmatprep.subr.bf16.mxu1 %v8788_v58  ;;  %v8825_v43 = vld [vmem:[#allocation5 + $0xa80] ss:$16 sps:$4 sm:$0xff]   ;;  %v8828_v58 = vld [vmem:[#allocation5 + $0xa88] ss:$16 sps:$4 sm:$0xff]  }
 0x1c5   :  { %v9502_v50 = vld [vmem:[#allocation2 + $0x50] sm:$0xff] }
 0x1c6   :  { %v277_v51 = vrot.slane %v9502_v50, 1  ;;  %v8957_v50 = vld [vmem:[#allocation8 + $0x540] ss:$16 sps:$4 sm:$0xff]  }
 0x1c7   :  { %3105 = vmatpush1.bf16.msra.mxu0 %v8783_v59  ;;  %3211 = vmatpush1.bf16.msra.mxu1 %v8786_v60  ;;  %v8833_v59 = vld [vmem:[#allocation5 + $0xaa4] ss:$16 sps:$4 sm:$0xff]   ;;  %v8836_v60 = vld [vmem:[#allocation5 + $0xaac] ss:$16 sps:$4 sm:$0xff]  }
 0x1c8   :  { %3106 = vmatprep.subr.bf16.mxu0 %v8791_v62  ;;  %3212 = vmatprep.subr.bf16.mxu1 %v8794_v63  ;;  %v8834_v62 = vld [vmem:[#allocation5 + $0xaa8] ss:$16 sps:$4 sm:$0xff]   ;;  %v8839_v63 = vld [vmem:[#allocation5 + $0xac4] ss:$16 sps:$4 sm:$0xff]  }
 0x1cb   :  { %3107 = vmatpush1.bf16.msra.mxu0 %v8789_v0  ;;  %3213 = vmatpush1.bf16.msra.mxu1 %v8792_v1  ;;  %v8842_v0 = vld [vmem:[#allocation5 + $0xacc] ss:$16 sps:$4 sm:$0xff]   ;;  %v8837_v1 = vld [vmem:[#allocation5 + $0xac0] ss:$16 sps:$4 sm:$0xff]  }
 0x1cc   :  { %3108 = vmatprep.subr.bf16.mxu0 %v8797_v6  ;;  %3214 = vmatprep.subr.bf16.mxu1 %v8800_v36  ;;  %v8848_v6 = vld [vmem:[#allocation5 + $0xaec] ss:$16 sps:$4 sm:$0xff]   ;;  %v8849_v36 = vld [vmem:[#allocation5 + $0xb00] ss:$16 sps:$4 sm:$0xff]  }
 0x1cf   :  { %3109 = vmatpush1.bf16.msra.mxu0 %v8795_v10  ;;  %3215 = vmatpush1.bf16.msra.mxu1 %v8798_v11  ;;  %v8852_v10 = vld [vmem:[#allocation5 + $0xb08] ss:$16 sps:$4 sm:$0xff]   ;;  %v8857_v11 = vld [vmem:[#allocation5 + $0xb24] ss:$16 sps:$4 sm:$0xff]  }
 0x1d0   :  { %3131 = vmatprep.subr.bf16.mxu0 %v8803_v13  ;;  %3237 = vmatprep.subr.bf16.mxu1 %v8806_v14  ;;  %v8858_v13 = vld [vmem:[#allocation5 + $0xb28] ss:$16 sps:$4 sm:$0xff]   ;;  %v8863_v14 = vld [vmem:[#allocation5 + $0xb44] ss:$16 sps:$4 sm:$0xff]  }
 0x1d2   :  { %7482 = vmatmul.mubr.msk.bf16.vlgmr.msra.gmra.mrb[0].mxu0 %vm10071_vm8, %v7481_v42  ;;  %7506 = vmatmul.mubr.msk.bf16.vlgmr.msra.gmra.mrb[0].mxu1 %vm10071_vm8, %v7481_v42  ;;  %v8872_v42 = vld [vmem:[#allocation5 + $0xb6c] ss:$16 sps:$4 sm:$0xff]  }
 0x1d3   :  { %3132 = vmatpush1.bf16.msra.mxu0 %v8801_v35  ;;  %3238 = vmatpush1.bf16.msra.mxu1 %v8804_v17  ;;  %v8864_v35 = vld [vmem:[#allocation5 + $0xb48] ss:$16 sps:$4 sm:$0xff]   ;;  %v8869_v17 = vld [vmem:[#allocation5 + $0xb64] ss:$16 sps:$4 sm:$0xff]  }
 0x1d4   :  { %3133 = vmatprep.subr.bf16.mxu0 %v8809_v18  ;;  %3239 = vmatprep.subr.bf16.mxu1 %v8812_v19  ;;  %v8867_v18 = vld [vmem:[#allocation5 + $0xb60] ss:$16 sps:$4 sm:$0xff]   ;;  %v8870_v19 = vld [vmem:[#allocation5 + $0xb68] ss:$16 sps:$4 sm:$0xff]  }
 0x1d5   :  { %7485 = vmatprep.mubr.msk.bf16.mxu0 %vm10081_vm10, %v7484_v31  ;;  %7509 = vmatprep.mubr.msk.bf16.mxu1 %vm10081_vm10, %v7484_v31  ;;  %v8879_v31 = vld [vmem:[#allocation5 + $0xba0] ss:$16 sps:$4 sm:$0xff]  }
 0x1d7   :  { %3134 = vmatpush1.bf16.msra.mxu0 %v8807_v27  ;;  %3240 = vmatpush1.bf16.msra.mxu1 %v8810_v30  ;;  %v8881_v27 = vld [vmem:[#allocation5 + $0xba4] ss:$16 sps:$4 sm:$0xff]   ;;  %v8884_v30 = vld [vmem:[#allocation5 + $0xbac] ss:$16 sps:$4 sm:$0xff]  }
 0x1d8   :  { %3135 = vmatprep.subr.bf16.mxu0 %v8815_v37  ;;  %3241 = vmatprep.subr.bf16.mxu1 %v8818_v41  ;;  %v8890_v37 = vld [vmem:[#allocation5 + $0xbcc] ss:$16 sps:$4 sm:$0xff]   ;;  %v8885_v41 = vld [vmem:[#allocation5 + $0xbc0] ss:$16 sps:$4 sm:$0xff]  }
 0x1da   :  { %7488 = vmatmul.mubr.msk.bf16.gmra.mrb[4].mxu0 %vm10081_vm10, %v7487_v32  ;;  %7512 = vmatmul.mubr.msk.bf16.gmra.mrb[4].mxu1 %vm10081_vm10, %v7487_v32 }
 0x1db   :  { %3136 = vmatpush1.bf16.msra.mxu0 %v8813_v46  ;;  %3242 = vmatpush1.bf16.msra.mxu1 %v8816_v44  ;;  %v8896_v46 = vld [vmem:[#allocation5 + $0xbec] ss:$16 sps:$4 sm:$0xff]   ;;  %v9500_v44 = vld [vmem:[#allocation2 + $0x10] sm:$0xff] }
 0x1dc   :  { %3137 = vmatprep.subr.bf16.mxu0 %v8821_v45  ;;  %3243 = vmatprep.subr.bf16.mxu1 %v8824_v49  ;;  %v269_v45 = vrot.slane %v9500_v44, 1  ;;  %v9501_v49 = vld [vmem:[#allocation2 + $0x30] sm:$0xff] }
 0x1dd   :  { %7491 = vmatprep.mubr.msk.bf16.mxu0 %vm10071_vm8, %v7490_v54  ;;  %7515 = vmatprep.mubr.msk.bf16.mxu1 %vm10071_vm8, %v7490_v54  ;;  %v273_v32 = vrot.slane %v9501_v49, 1  ;;  %v8891_v54 = vld [vmem:[#allocation5 + $0xbe0] ss:$16 sps:$4 sm:$0xff]   ;;  %v8951_v44 = vld [vmem:[#allocation8 + $0x520] ss:$16 sps:$4 sm:$0xff]  }
 0x1de   :  { %v8959_v49 = vld [vmem:[#allocation8 + $0x544] ss:$16 sps:$4 sm:$0xff]  }
 0x1df   :  { %3138 = vmatpush1.bf16.msra.mxu0 %v8819_v52  ;;  %3244 = vmatpush1.bf16.msra.mxu1 %v8822_v53  ;;  %v9503_v52 = vld [vmem:[#allocation2 + $0x78] sm:$0xff] }
 0x1e0   :  { %3139 = vmatprep.subr.bf16.mxu0 %v8827_v55  ;;  %3245 = vmatprep.subr.bf16.mxu1 %v8830_v33  ;;  %v282_v53 = vrot.slane %v9503_v52, 1  ;;  %v8894_v55 = vld [vmem:[#allocation5 + $0xbe8] ss:$16 sps:$4 sm:$0xff]  }
 0x1e1   :  { %v8899_v33 = vld [vmem:[#allocation8 + $0x404] ss:$16 sps:$4 sm:$0xff]  }
 0x1e2   :  { %v8965_v52 = vld [vmem:[#allocation8 + $0x564] ss:$16 sps:$4 sm:$0xff]  }
 0x1e3   :  { %3140 = vmatpush1.bf16.msra.mxu0 %v8825_v43  ;;  %3246 = vmatpush1.bf16.msra.mxu1 %v8828_v58  ;;  %v8902_v43 = vld [vmem:[#allocation8 + $0x40c] ss:$16 sps:$4 sm:$0xff]   ;;  %v290_v58 = vsel %vm283_vm6, %v273_v32, %v277_v51 }
 0x1e4   :  { %3141 = vmatprep.subr.bf16.mxu0 %v8833_v59  ;;  %3247 = vmatprep.subr.bf16.mxu1 %v8836_v60  ;;  %v294_v59 = vsel %vm283_vm6, %v269_v45, %v273_v32  ;;  %v287_v60 = vsel %vm283_vm6, %v278_v56, %v282_v53  ;;  %v8962_v32 = vld [vmem:[#allocation8 + $0x54c] ss:$16 sps:$4 sm:$0xff]  }
 0x1e7   :  { %3142 = vmatpush1.bf16.msra.mxu0 %v8831_v61  ;;  %3248 = vmatpush1.bf16.msra.mxu1 %v8834_v62  ;;  %v299_v61 = vsel %vm283_vm6, %v282_v53, %v270_v29  ;;  %v7493_v62 = vpack.c.bf16 %v290_v58, %v294_v59  ;;  %v8906_v29 = vld [vmem:[#allocation8 + $0x428] ss:$16 sps:$4 sm:$0xff]   ;;  %v8968_v53 = vld [vmem:[#allocation8 + $0x56c] ss:$16 sps:$4 sm:$0xff]   ;;  %v8969_v58 = vld [vmem:[#allocation8 + $0x580] ss:$16 sps:$4 sm:$0xff]  }
 0x1e8   :  { %3143 = vmatprep.subr.bf16.mxu0 %v8839_v63  ;;  %3249 = vmatprep.subr.bf16.mxu1 %v8842_v0  ;;  %v8897_v63 = vld [vmem:[#allocation8 + $0x400] ss:$16 sps:$4 sm:$0xff]   ;;  %v8900_v0 = vld [vmem:[#allocation8 + $0x408] ss:$16 sps:$4 sm:$0xff]  }
 0x1e9   :  { %v8972_v59 = vld [vmem:[#allocation8 + $0x588] ss:$16 sps:$4 sm:$0xff]  }
 0x1eb   :  { %3144 = vmatpush1.bf16.msra.mxu0 %v8837_v1  ;;  %3250 = vmatpush1.bf16.msra.mxu1 %v8840_v2  ;;  %v9504_v1 = vld [vmem:[#allocation2 + $0x70] sm:$0xff] }
 0x1ec   :  { %3145 = vmatprep.subr.bf16.mxu0 %v8845_v5  ;;  %3251 = vmatprep.subr.bf16.mxu1 %v8848_v6  ;;  %v281_v2 = vrot.slane %v9504_v1, 1  ;;  %v7496_v5 = vpack.c.bf16 %v299_v61, %v287_v60  ;;  %v8905_v6 = vld [vmem:[#allocation8 + $0x424] ss:$16 sps:$4 sm:$0xff]   ;;  %v8980_v61 = vld [vmem:[#allocation8 + $0x5ac] ss:$16 sps:$4 sm:$0xff]  }
 0x1ed   :  { %v8977_v60 = vld [vmem:[#allocation8 + $0x5a4] ss:$16 sps:$4 sm:$0xff]   ;;  %v8986_v1 = vld [vmem:[#allocation8 + $0x5cc] ss:$16 sps:$4 sm:$0xff]  }
 0x1ee   :  { %v286_v39 = vsel %vm283_vm6, %v277_v51, %v281_v2  ;;  %v298_v56 = vsel %vm283_vm6, %v281_v2, %v269_v45  ;;  %v8954_v45 = vld [vmem:[#allocation8 + $0x528] ss:$16 sps:$4 sm:$0xff]   ;;  %v8981_v2 = vld [vmem:[#allocation8 + $0x5c0] ss:$16 sps:$4 sm:$0xff]  }
 0x1ef   :  { %3146 = vmatpush1.bf16.msra.mxu0 %v8843_v7  ;;  %3252 = vmatpush1.bf16.msra.mxu1 %v8846_v3  ;;  %v8908_v7 = vld [vmem:[#allocation8 + $0x42c] ss:$16 sps:$4 sm:$0xff]   ;;  %v8911_v3 = vld [vmem:[#allocation8 + $0x444] ss:$16 sps:$4 sm:$0xff]   ;;  %v8960_v51 = vld [vmem:[#allocation8 + $0x548] ss:$16 sps:$4 sm:$0xff]  }
 0x1f0   :  { %3147 = vmatprep.subr.bf16.mxu0 %v8851_v8  ;;  %3253 = vmatprep.subr.bf16.mxu1 %v8854_v4  ;;  %v8914_v8 = vld [vmem:[#allocation8 + $0x44c] ss:$16 sps:$4 sm:$0xff]   ;;  %v7499_v4 = vpack.c.bf16 %v298_v56, %v286_v39  ;;  %v8995_v39 = vld [vmem:[#allocation8 + $0x604] ss:$16 sps:$4 sm:$0xff]  }
 0x1f1   :  { %v8998_v56 = vld [vmem:[#allocation8 + $0x60c] ss:$16 sps:$4 sm:$0xff]  }
 0x1f3   :  { %3148 = vmatpush1.bf16.msra.mxu0 %v8849_v36  ;;  %3254 = vmatpush1.bf16.msra.mxu1 %v8852_v10  ;;  %v8909_v36 = vld [vmem:[#allocation8 + $0x440] ss:$16 sps:$4 sm:$0xff]   ;;  %v8912_v10 = vld [vmem:[#allocation8 + $0x448] ss:$16 sps:$4 sm:$0xff]  }
 0x1f4   :  { %3149 = vmatprep.subr.bf16.mxu0 %v8857_v11  ;;  %3255 = vmatprep.subr.bf16.mxu1 %v8860_v28  ;;  %v8917_v11 = vld [vmem:[#allocation8 + $0x464] ss:$16 sps:$4 sm:$0xff]   ;;  %v8920_v28 = vld [vmem:[#allocation8 + $0x46c] ss:$16 sps:$4 sm:$0xff]  }
 0x1f7   :  { %3150 = vmatpush1.bf16.msra.mxu0 %v8855_v12  ;;  %3256 = vmatpush1.bf16.msra.mxu1 %v8858_v13  ;;  %v8915_v12 = vld [vmem:[#allocation8 + $0x460] ss:$16 sps:$4 sm:$0xff]   ;;  %v8918_v13 = vld [vmem:[#allocation8 + $0x468] ss:$16 sps:$4 sm:$0xff]  }
 0x1f8   :  { %3151 = vmatprep.subr.bf16.mxu0 %v8863_v14  ;;  %3257 = vmatprep.subr.bf16.mxu1 %v8866_v16  ;;  %v8923_v14 = vld [vmem:[#allocation8 + $0x484] ss:$16 sps:$4 sm:$0xff]   ;;  %v8926_v16 = vld [vmem:[#allocation8 + $0x48c] ss:$16 sps:$4 sm:$0xff]  }
 0x1fb   :  { %3152 = vmatpush1.bf16.msra.mxu0 %v8861_v47  ;;  %3258 = vmatpush1.bf16.msra.mxu1 %v8864_v35  ;;  %v8921_v47 = vld [vmem:[#allocation8 + $0x480] ss:$16 sps:$4 sm:$0xff]   ;;  %v8924_v35 = vld [vmem:[#allocation8 + $0x488] ss:$16 sps:$4 sm:$0xff]  }
 0x1fc   :  { %3153 = vmatprep.subr.bf16.mxu0 %v8869_v17  ;;  %3259 = vmatprep.subr.bf16.mxu1 %v8872_v42  ;;  %v8929_v17 = vld [vmem:[#allocation8 + $0x4a4] ss:$16 sps:$4 sm:$0xff]   ;;  %v8932_v42 = vld [vmem:[#allocation8 + $0x4ac] ss:$16 sps:$4 sm:$0xff]  }
 0x1ff   :  { %3154 = vmatpush1.bf16.msra.mxu0 %v8867_v18  ;;  %3260 = vmatpush1.bf16.msra.mxu1 %v8870_v19  ;;  %v8927_v18 = vld [vmem:[#allocation8 + $0x4a0] ss:$16 sps:$4 sm:$0xff]   ;;  %v8930_v19 = vld [vmem:[#allocation8 + $0x4a8] ss:$16 sps:$4 sm:$0xff]  }
 0x200   :  { %3155 = vmatprep.subr.bf16.mxu0 %v8875_v22  ;;  %3261 = vmatprep.subr.bf16.mxu1 %v8878_v23  ;;  %v8935_v22 = vld [vmem:[#allocation8 + $0x4c4] ss:$16 sps:$4 sm:$0xff]   ;;  %v8938_v23 = vld [vmem:[#allocation8 + $0x4cc] ss:$16 sps:$4 sm:$0xff]  }
 0x203   :  { %3156 = vmatpush1.bf16.msra.mxu0 %v8873_v24  ;;  %3262 = vmatpush1.bf16.msra.mxu1 %v8876_v26  ;;  %v8933_v24 = vld [vmem:[#allocation8 + $0x4c0] ss:$16 sps:$4 sm:$0xff]   ;;  %v8936_v26 = vld [vmem:[#allocation8 + $0x4c8] ss:$16 sps:$4 sm:$0xff]  }
 0x204   :  { %3157 = vmatprep.subr.bf16.mxu0 %v8881_v27  ;;  %3263 = vmatprep.subr.bf16.mxu1 %v8884_v30  ;;  %v8941_v27 = vld [vmem:[#allocation8 + $0x4e4] ss:$16 sps:$4 sm:$0xff]   ;;  %v8944_v30 = vld [vmem:[#allocation8 + $0x4ec] ss:$16 sps:$4 sm:$0xff]  }
 0x207   :  { %3158 = vmatpush1.bf16.msra.mxu0 %v8879_v31  ;;  %3264 = vmatpush1.bf16.msra.mxu1 %v8882_v38  ;;  %v8939_v31 = vld [vmem:[#allocation8 + $0x4e0] ss:$16 sps:$4 sm:$0xff]   ;;  %v8942_v38 = vld [vmem:[#allocation8 + $0x4e8] ss:$16 sps:$4 sm:$0xff]  }
 0x208   :  { %3159 = vmatprep.subr.bf16.mxu0 %v8887_v48  ;;  %3265 = vmatprep.subr.bf16.mxu1 %v8890_v37  ;;  %v8947_v48 = vld [vmem:[#allocation8 + $0x504] ss:$16 sps:$4 sm:$0xff]   ;;  %v8950_v37 = vld [vmem:[#allocation8 + $0x50c] ss:$16 sps:$4 sm:$0xff]  }
 0x20b   :  { %3160 = vmatpush1.bf16.msra.mxu0 %v8885_v41  ;;  %3266 = vmatpush1.bf16.msra.mxu1 %v8888_v20  ;;  %v8945_v41 = vld [vmem:[#allocation8 + $0x500] ss:$16 sps:$4 sm:$0xff]   ;;  %v8948_v20 = vld [vmem:[#allocation8 + $0x508] ss:$16 sps:$4 sm:$0xff]  }
 0x20c   :  { %3161 = vmatprep.subr.bf16.mxu0 %v8893_v21  ;;  %3267 = vmatprep.subr.bf16.mxu1 %v8896_v46  ;;  %v8953_v21 = vld [vmem:[#allocation8 + $0x524] ss:$16 sps:$4 sm:$0xff]   ;;  %v8956_v46 = vld [vmem:[#allocation8 + $0x52c] ss:$16 sps:$4 sm:$0xff]  }
 0x20f   :  { %3162 = vmatpush1.bf16.msra.mxu0 %v8891_v54  ;;  %3268 = vmatpush1.bf16.msra.mxu1 %v8894_v55  ;;  %v8963_v54 = vld [vmem:[#allocation8 + $0x560] ss:$16 sps:$4 sm:$0xff]   ;;  %v8966_v55 = vld [vmem:[#allocation8 + $0x568] ss:$16 sps:$4 sm:$0xff]  }
 0x210   :  { %4369 = vmatprep.subr.bf16.mxu0 %v8899_v33  ;;  %4475 = vmatprep.subr.bf16.mxu1 %v8902_v43  ;;  %v8971_v33 = vld [vmem:[#allocation8 + $0x584] ss:$16 sps:$4 sm:$0xff]   ;;  %v8974_v43 = vld [vmem:[#allocation8 + $0x58c] ss:$16 sps:$4 sm:$0xff]  }
 0x212   :  { %7494 = vmatmul.mubr.msk.bf16.vlgmr.msra.gmra.mrb[0].mxu0 %vm10071_vm8, %v7493_v62  ;;  %7518 = vmatmul.mubr.msk.bf16.vlgmr.msra.gmra.mrb[0].mxu1 %vm10071_vm8, %v7493_v62  ;;  %v8975_v62 = vld [vmem:[#allocation8 + $0x5a0] ss:$16 sps:$4 sm:$0xff]  }
 0x213   :  { %7497 = vmatprep.mubr.msk.bf16.mxu0 %vm10081_vm10, %v7496_v5  ;;  %7521 = vmatprep.mubr.msk.bf16.mxu1 %vm10081_vm10, %v7496_v5  ;;  %v8984_v5 = vld [vmem:[#allocation8 + $0x5c8] ss:$16 sps:$4 sm:$0xff]  }
 0x214   :  { %4370 = vmatpush1.bf16.msra.mxu0 %v8897_v63  ;;  %4476 = vmatpush1.bf16.msra.mxu1 %v8900_v0  ;;  %v8978_v63 = vld [vmem:[#allocation8 + $0x5a8] ss:$16 sps:$4 sm:$0xff]   ;;  %v8983_v0 = vld [vmem:[#allocation8 + $0x5c4] ss:$16 sps:$4 sm:$0xff]  }
 0x215   :  { %4371 = vmatprep.subr.bf16.mxu0 %v8905_v6  ;;  %4477 = vmatprep.subr.bf16.mxu1 %v8908_v7  ;;  %v8989_v6 = vld [vmem:[#allocation8 + $0x5e4] ss:$16 sps:$4 sm:$0xff]   ;;  %v8992_v7 = vld [vmem:[#allocation8 + $0x5ec] ss:$16 sps:$4 sm:$0xff]  }
 0x218   :  { %4372 = vmatpush1.bf16.msra.mxu0 %v8903_v34  ;;  %4478 = vmatpush1.bf16.msra.mxu1 %v8906_v29  ;;  %v8987_v34 = vld [vmem:[#allocation8 + $0x5e0] ss:$16 sps:$4 sm:$0xff]   ;;  %v8990_v29 = vld [vmem:[#allocation8 + $0x5e8] ss:$16 sps:$4 sm:$0xff]  }
 0x219   :  { %4373 = vmatprep.subr.bf16.mxu0 %v8911_v3  ;;  %4479 = vmatprep.subr.bf16.mxu1 %v8914_v8  ;;  %v10160_v3 = vsub.s32 0, %v9929_v25  ;;  %v10163_v8 = vsub.s32 2, %v9929_v25 }
 0x21a   :  { %7500 = vmatmul.mubr.msk.bf16.gmra.mrb[4].mxu0 %vm10081_vm10, %v7499_v4  ;;  %7524 = vmatmul.mubr.msk.bf16.gmra.mrb[4].mxu1 %vm10081_vm10, %v7499_v4  ;;  %v209_v4 = vld [vmem:[#allocation7] sm:$0xf] }
 0x21c   :  { %4374 = vmatpush1.bf16.msra.mxu0 %v8909_v36  ;;  %4480 = vmatpush1.bf16.msra.mxu1 %v8912_v10  ;;  %v10166_v36 = vsub.s32 1, %v9929_v25  ;;  %v10169_v10 = vsub.s32 3, %v9929_v25  ;;  %v9035_v25 = vld [vmem:[#allocation8 + $0x6e0] ss:$16 sps:$4 sm:$0xff]  }
 0x21d   :  { %4375 = vmatprep.subr.bf16.mxu0 %v8917_v11  ;;  %4481 = vmatprep.subr.bf16.mxu1 %v8920_v28  ;;  %v3310_v11 = vrot.slane %v209_v4, %v10160_v3  ;;  %v3318_v28 = vrot.slane %v209_v4, %v10163_v8 }
 0x220   :  { %4376 = vmatpush1.bf16.msra.mxu0 %v8915_v12  ;;  %4482 = vmatpush1.bf16.msra.mxu1 %v8918_v13  ;;  %v10174_v12 = vrot.slane %v209_v4, %v10166_v36  ;;  %v10177_v13 = vrot.slane %v209_v4, %v10169_v10 }
 0x221   :  { %4377 = vmatprep.subr.bf16.mxu0 %v8923_v14  ;;  %4483 = vmatprep.subr.bf16.mxu1 %v8926_v16 }
 0x224   :  { %4378 = vmatpush1.bf16.msra.mxu0 %v8921_v47  ;;  %4484 = vmatpush1.bf16.msra.mxu1 %v8924_v35 }
 0x225   :  { %4379 = vmatprep.subr.bf16.mxu0 %v8929_v17  ;;  %4485 = vmatprep.subr.bf16.mxu1 %v8932_v42 }
 0x228   :  { %4380 = vmatpush1.bf16.msra.mxu0 %v8927_v18  ;;  %4486 = vmatpush1.bf16.msra.mxu1 %v8930_v19 }
 0x229   :  { %4381 = vmatprep.subr.bf16.mxu0 %v8935_v22  ;;  %4487 = vmatprep.subr.bf16.mxu1 %v8938_v23 }
 0x22c   :  { %4382 = vmatpush1.bf16.msra.mxu0 %v8933_v24  ;;  %4488 = vmatpush1.bf16.msra.mxu1 %v8936_v26 }
 0x22d   :  { %4383 = vmatprep.subr.bf16.mxu0 %v8941_v27  ;;  %4489 = vmatprep.subr.bf16.mxu1 %v8944_v30 }
 0x230   :  { %4384 = vmatpush1.bf16.msra.mxu0 %v8939_v31  ;;  %4490 = vmatpush1.bf16.msra.mxu1 %v8942_v38 }
 0x231   :  { %4385 = vmatprep.subr.bf16.mxu0 %v8947_v48  ;;  %4491 = vmatprep.subr.bf16.mxu1 %v8950_v37 }
 0x234   :  { %4386 = vmatpush1.bf16.msra.mxu0 %v8945_v41  ;;  %4492 = vmatpush1.bf16.msra.mxu1 %v8948_v20 }
 0x235   :  { %4387 = vmatprep.subr.bf16.mxu0 %v8953_v21  ;;  %4493 = vmatprep.subr.bf16.mxu1 %v8956_v46 }
 0x238   :  { %4388 = vmatpush1.bf16.msra.mxu0 %v8951_v44  ;;  %4494 = vmatpush1.bf16.msra.mxu1 %v8954_v45 }
 0x239   :  { %4389 = vmatprep.subr.bf16.mxu0 %v8959_v49  ;;  %4495 = vmatprep.subr.bf16.mxu1 %v8962_v32 }
 0x23c   :  { %4390 = vmatpush1.bf16.msra.mxu0 %v8957_v50  ;;  %4496 = vmatpush1.bf16.msra.mxu1 %v8960_v51 }
 0x23d   :  { %4391 = vmatprep.subr.bf16.mxu0 %v8965_v52  ;;  %4497 = vmatprep.subr.bf16.mxu1 %v8968_v53 }
 0x240   :  { %4392 = vmatpush1.bf16.msra.mxu0 %v8963_v54  ;;  %4498 = vmatpush1.bf16.msra.mxu1 %v8966_v55 }
 0x241   :  { %4393 = vmatprep.subr.bf16.mxu0 %v8971_v33  ;;  %4499 = vmatprep.subr.bf16.mxu1 %v8974_v43 }
 0x244   :  { %4394 = vmatpush1.bf16.msra.mxu0 %v8969_v58  ;;  %4500 = vmatpush1.bf16.msra.mxu1 %v8972_v59 }
 0x245   :  { %4395 = vmatprep.subr.bf16.mxu0 %v8977_v60  ;;  %4501 = vmatprep.subr.bf16.mxu1 %v8980_v61 }
 0x248   :  { %4396 = vmatpush1.bf16.msra.mxu0 %v8975_v62  ;;  %4502 = vmatpush1.bf16.msra.mxu1 %v8978_v63 }
 0x249   :  { %4397 = vmatprep.subr.bf16.mxu0 %v8983_v0  ;;  %4503 = vmatprep.subr.bf16.mxu1 %v8986_v1 }
 0x24c   :  { %4398 = vmatpush1.bf16.msra.mxu0 %v8981_v2  ;;  %4504 = vmatpush1.bf16.msra.mxu1 %v8984_v5 }
 0x24d   :  { %4399 = vmatprep.subr.bf16.mxu0 %v8989_v6  ;;  %4505 = vmatprep.subr.bf16.mxu1 %v8992_v7 }
 0x250   :  { %4400 = vmatpush1.bf16.msra.mxu0 %v8987_v34  ;;  %4506 = vmatpush1.bf16.msra.mxu1 %v8990_v29 }
 0x251   :  { %4422 = vmatprep.subr.bf16.mxu0 %v8995_v39  ;;  %4528 = vmatprep.subr.bf16.mxu1 %v8998_v56 }
 0x2e5   :  { %v3165_v14 = vpop.f32.mrb[0].mxu0  ;;  %v3271_v16 = vpop.f32.mrb[0].mxu1 }
 0x2e6   :  { %v3327_v47 = vadd.f32 %v3310_v11, %v3165_v14  ;;  %v3329_v35 = vadd.f32 %v3318_v28, %v3271_v16  ;;  %v3167_v17 = vpop.f32.mrb[1].mxu0  ;;  %v3273_v42 = vpop.f32.mrb[1].mxu1 }
 0x2e7   :  { %v3328_v18 = vadd.f32 %v10174_v12, %v3167_v17  ;;  %v3169_v19 = vpop.f32.mrb[2].mxu0  ;;  %v3275_v22 = vpop.f32.mrb[2].mxu1  ;;  %v3330_v23 = vadd.f32 %v10177_v13, %v3273_v42  ;;  %v8996_v17 = vld [vmem:[#allocation8 + $0x608] ss:$16 sps:$4 sm:$0xff]  }
 0x2e8   :  { %v3331_v24 = vadd.f32 %v3310_v11, %v3169_v19  ;;  %v3333_v26 = vadd.f32 %v3318_v28, %v3275_v22  ;;  %v3171_v27 = vpop.f32.mrb[3].mxu0  ;;  %v3277_v30 = vpop.f32.mrb[3].mxu1  ;;  %v10181_v31 = vmax.f32 %v3327_v47, 0.0  ;;  %v10183_v38 = vmax.f32 %v3329_v35, 0.0  ;;  %v8993_v35 = vld [vmem:[#allocation8 + $0x600] ss:$16 sps:$4 sm:$0xff]  }
 0x2e9   :  { %v10185_v48 = vmax.f32 %v3328_v18, 0.0  ;;  %v3332_v37 = vadd.f32 %v10174_v12, %v3171_v27  ;;  %v10188_v41 = vmax.f32 %v3330_v23, 0.0  ;;  %v3334_v46 = vadd.f32 %v10177_v13, %v3277_v30  ;;  %v9001_v23 = vld [vmem:[#allocation8 + $0x624] ss:$16 sps:$4 sm:$0xff]  }
 0x2ea   :  { %v10190_v20 = vmax.f32 %v3331_v24, 0.0  ;;  %v10192_v21 = vmax.f32 %v3333_v26, 0.0  ;;  %v3360_v44 = vrot.slane %v10181_v31, 7  ;;  %v10830_v45 = vrot.slane %v10181_v31, 1 }
 0x2eb   :  { %v3362_v49 = vrot.slane %v10183_v38, 7  ;;  %v10828_v32 = vrot.slane %v10183_v38, 1  ;;  %v3361_v58 = vrot.slane %v10185_v48, 7  ;;  %v10210_v61 = vmax.f32 %v3332_v37, 0.0 }
 0x2ec   :  { %v3364_v52 = vrot.slane %v10190_v20, 7  ;;  %v3412_v53 = vrot.slane %v10190_v20, 1  ;;  %v3592_v54 = vpack.c.bf16 %v10190_v20, %v10181_v31  ;;  %v3366_v55 = vrot.slane %v10192_v21, 7 }
 0x2ed   :  { %v3175_v50 = vpop.f32.mrb[4].mxu0  ;;  %v3281_v51 = vpop.f32.mrb[4].mxu1  ;;  %v3414_v59 = vrot.slane %v10192_v21, 1  ;;  %v10208_v60 = vpack.c.bf16 %v10192_v21, %v10183_v38  ;;  %v3409_v0 = vrot.slane %v10185_v48, 1  ;;  %v10233_v29 = vmax.f32 %v3334_v46, 0.0 }
 0x2ee   :  { %v3177_v33 = vpop.f32.mrb[5].mxu0  ;;  %v3283_v43 = vpop.f32.mrb[5].mxu1  ;;  %v3384_v1 = vsel %vm226_vm0, %v3360_v44, %v3364_v52  ;;  %v3432_v2 = vsel %vm283_vm6, %v10830_v45, %v3412_v53  ;;  %v3386_v5 = vsel %vm226_vm0, %v3362_v49, %v3366_v55  ;;  %v3335_v39 = vadd.f32 %v3310_v11, %v3175_v50 }
 0x2ef   :  { %v3179_v62 = vpop.f32.mrb[6].mxu0  ;;  %v3285_v63 = vpop.f32.mrb[6].mxu1  ;;  %v3434_v34 = vsel %vm283_vm6, %v10828_v32, %v3414_v59  ;;  %v3337_v56 = vadd.f32 %v3318_v28, %v3281_v51  ;;  %v3336_v4 = vadd.f32 %v10174_v12, %v3177_v33  ;;  %v3338_v14 = vadd.f32 %v10177_v13, %v3283_v43  ;;  %v9016_v32 = vld [vmem:[#allocation8 + $0x66c] ss:$16 sps:$4 sm:$0xff]  }
 0x2f0   :  { %v3181_v6 = vpop.f32.mrb[7].mxu0  ;;  %v3287_v7 = vpop.f32.mrb[7].mxu1  ;;  %v3339_v16 = vadd.f32 %v3310_v11, %v3179_v62  ;;  %v3341_v47 = vadd.f32 %v3318_v28, %v3285_v63  ;;  %v3363_v42 = vrot.slane %v10188_v41, 7  ;;  %v10238_v18 = vmax.f32 %v3335_v39, 0.0  ;;  %v9004_v28 = vld [vmem:[#allocation8 + $0x62c] ss:$16 sps:$4 sm:$0xff]  }
 0x2f1   :  { %v10240_v19 = vmax.f32 %v3337_v56, 0.0  ;;  %v3593_v22 = vpack.c.bf16 %v10210_v61, %v10185_v48  ;;  %v10245_v26 = vmax.f32 %v3336_v4, 0.0  ;;  %v3365_v30 = vrot.slane %v10210_v61, 7  ;;  %v8999_v56 = vld [vmem:[#allocation8 + $0x620] ss:$16 sps:$4 sm:$0xff]  }
 0x2f2   :  { %v10247_v27 = vmax.f32 %v3339_v16, 0.0  ;;  %v10249_v11 = vmax.f32 %v3341_v47, 0.0  ;;  %v3416_v37 = vrot.slane %v10238_v18, 1  ;;  %v3340_v50 = vadd.f32 %v10174_v12, %v3181_v6  ;;  %v9002_v4 = vld [vmem:[#allocation8 + $0x628] ss:$16 sps:$4 sm:$0xff]  }
 0x2f3   :  { %v10829_v46 = vrot.slane %v10240_v19, 1  ;;  %4401 = vmatprep.mubr.bf16.mxu0 %v3593_v22  ;;  %4507 = vmatprep.mubr.bf16.mxu1 %v3593_v22  ;;  %v3413_v51 = vrot.slane %v10210_v61, 1  ;;  %v3367_v33 = vrot.slane %v10233_v29, 7  ;;  %v10258_v62 = vmax.f32 %v3338_v14, 0.0  ;;  %v9010_v22 = vld [vmem:[#allocation8 + $0x64c] ss:$16 sps:$4 sm:$0xff]  }
 0x2f4   :  { %4402 = vmatmul.mubr.bf16.vlgmr.msra.gmra.mrb[8].mxu0 %v3592_v54  ;;  %4508 = vmatmul.mubr.bf16.vlgmr.msra.gmra.mrb[8].mxu1 %v3592_v54  ;;  %v3368_v63 = vrot.slane %v10238_v18, 7  ;;  %v3428_v39 = vsel %vm283_vm6, %v3412_v53, %v3416_v37  ;;  %v3372_v6 = vrot.slane %v10247_v27, 7  ;;  %v3369_v16 = vrot.slane %v10245_v26, 7  ;;  %v9007_v53 = vld [vmem:[#allocation8 + $0x644] ss:$16 sps:$4 sm:$0xff]  }
 0x2f5   :  { %v3430_v12 = vsel %vm283_vm6, %v3414_v59, %v10829_v46  ;;  %4423 = vmatpush1.bf16.msra.mxu0 %v8993_v35  ;;  %4529 = vmatpush1.bf16.msra.mxu1 %v8996_v17  ;;  %v10270_v14 = vpack.c.bf16 %v3428_v39, %v3432_v2  ;;  %v3374_v47 = vrot.slane %v10249_v11, 7  ;;  %v10280_v35 = vmax.f32 %v3340_v50, 0.0  ;;  %v9028_v48 = vld [vmem:[#allocation8 + $0x6ac] ss:$16 sps:$4 sm:$0xff]  }
 0x2f6   :  { %v10272_v54 = vpack.c.bf16 %v3430_v12, %v3434_v34  ;;  %4424 = vmatprep.subr.bf16.mxu0 %v9001_v23  ;;  %4530 = vmatprep.subr.bf16.mxu1 %v9004_v28  ;;  %v3388_v59 = vsel %vm226_vm0, %v3372_v6, %v3360_v44  ;;  %v3342_v2 = vadd.f32 %v10177_v13, %v3287_v7  ;;  %v3370_v50 = vrot.slane %v10240_v19, 7  ;;  %v9005_v12 = vld [vmem:[#allocation8 + $0x640] ss:$16 sps:$4 sm:$0xff]  }
 0x2f7   :  { %v3596_v34 = vpack.c.bf16 %v10247_v27, %v10238_v18  ;;  %v10285_v17 = vpack.c.bf16 %v3384_v1, %v3388_v59  ;;  %v3390_v23 = vsel %vm226_vm0, %v3374_v47, %v3362_v49  ;;  %v3595_v28 = vpack.c.bf16 %v10233_v29, %v10188_v41  ;;  %v9008_v59 = vld [vmem:[#allocation8 + $0x648] ss:$16 sps:$4 sm:$0xff]  }
 0x2f8   :  { %v10295_v44 = vpack.c.bf16 %v10249_v11, %v10240_v19  ;;  %v10298_v13 = vpack.c.bf16 %v3386_v5, %v3390_v23  ;;  %v3373_v7 = vrot.slane %v10280_v35, 7  ;;  %v10301_v1 = vmax.f32 %v3342_v2, 0.0 }
 0x2f9   :  { %4425 = vmatpush1.bf16.msra.mxu0 %v8999_v56  ;;  %4531 = vmatpush1.bf16.msra.mxu1 %v9002_v4  ;;  %v3417_v39 = vrot.slane %v10245_v26, 1  ;;  %v3597_v49 = vpack.c.bf16 %v10280_v35, %v10245_v26  ;;  %v3385_v5 = vsel %vm226_vm0, %v3361_v58, %v3365_v30  ;;  %v3381_v2 = vsel %vm226_vm0, %v3365_v30, %v3369_v16 }
 0x2fa   :  { %4426 = vmatprep.subr.bf16.mxu0 %v9007_v53  ;;  %4532 = vmatprep.subr.bf16.mxu1 %v9010_v22  ;;  %v3371_v56 = vrot.slane %v10258_v62, 7  ;;  %v3375_v4 = vrot.slane %v10301_v1, 7  ;;  %v10316_v23 = vpack.c.bf16 %v10301_v1, %v10258_v62  ;;  %v3389_v26 = vsel %vm226_vm0, %v3373_v7, %v3361_v58  ;;  %v9013_v22 = vld [vmem:[#allocation8 + $0x664] ss:$16 sps:$4 sm:$0xff]  }
 0x2fb   :  { %v3419_v53 = vrot.slane %v10258_v62, 1  ;;  %4411 = vmatprep.mubr.bf16.mxu0 %v3597_v49  ;;  %4517 = vmatprep.mubr.bf16.mxu1 %v3597_v49  ;;  %v10323_v30 = vpack.c.bf16 %v3385_v5, %v3389_v26  ;;  %v3377_v46 = vsel %vm226_vm0, %v3369_v16, %v3373_v7  ;;  %v3376_v24 = vsel %vm226_vm0, %v3368_v63, %v3372_v6  ;;  %v9011_v16 = vld [vmem:[#allocation8 + $0x660] ss:$16 sps:$4 sm:$0xff]  }
 0x2fc   :  { %v3421_v43 = vrot.slane %v10280_v35, 1  ;;  %4412 = vmatmul.mubr.bf16.gmra.mrb[12].mxu0 %v3596_v34  ;;  %4518 = vmatmul.mubr.bf16.gmra.mrb[12].mxu1 %v3596_v34  ;;  %v10330_v45 = vpack.c.bf16 %v3377_v46, %v3381_v2  ;;  %v3380_v58 = vsel %vm226_vm0, %v3364_v52, %v3368_v63  ;;  %v3387_v62 = vsel %vm226_vm0, %v3363_v42, %v3367_v33  ;;  %v9014_v35 = vld [vmem:[#allocation8 + $0x668] ss:$16 sps:$4 sm:$0xff]   ;;  %v9019_v34 = vld [vmem:[#allocation8 + $0x684] ss:$16 sps:$4 sm:$0xff]  }
 0x2fd   :  { %v3420_v6 = vrot.slane %v10247_v27, 1  ;;  %4427 = vmatpush1.bf16.msra.mxu0 %v9005_v12  ;;  %4533 = vmatpush1.bf16.msra.mxu1 %v9008_v59  ;;  %v10343_v46 = vpack.c.bf16 %v3376_v24, %v3380_v58  ;;  %v3391_v20 = vsel %vm226_vm0, %v3375_v4, %v3363_v42  ;;  %v3379_v52 = vsel %vm226_vm0, %v3371_v56, %v3375_v4  ;;  %v9022_v27 = vld [vmem:[#allocation8 + $0x68c] ss:$16 sps:$4 sm:$0xff]  }
 0x2fe   :  { %v3422_v63 = vrot.slane %v10249_v11, 1  ;;  %4454 = vmatprep.mubr.bf16.mxu0 %v3595_v28  ;;  %4560 = vmatprep.mubr.bf16.mxu1 %v3595_v28  ;;  %v10352_v7 = vpack.c.bf16 %v3387_v62, %v3391_v20  ;;  %v3383_v24 = vsel %vm226_vm0, %v3367_v33, %v3371_v56  ;;  %v3378_v49 = vsel %vm226_vm0, %v3370_v50, %v3374_v47  ;;  %v9017_v47 = vld [vmem:[#allocation8 + $0x680] ss:$16 sps:$4 sm:$0xff]   ;;  %v9031_v20 = vld [vmem:[#allocation8 + $0x6c4] ss:$16 sps:$4 sm:$0xff]  }
 0x2ff   :  { %v3423_v42 = vrot.slane %v10301_v1, 1  ;;  %4428 = vmatprep.subr.bf16.mxu0 %v9013_v22  ;;  %4534 = vmatprep.subr.bf16.mxu1 %v9016_v32  ;;  %v10361_v12 = vpack.c.bf16 %v3379_v52, %v3383_v24  ;;  %v3382_v11 = vsel %vm226_vm0, %v3366_v55, %v3370_v50  ;;  %v3429_v28 = vsel %vm283_vm6, %v3413_v51, %v3417_v39  ;;  %v9020_v50 = vld [vmem:[#allocation8 + $0x688] ss:$16 sps:$4 sm:$0xff]   ;;  %v9034_v52 = vld [vmem:[#allocation8 + $0x6cc] ss:$16 sps:$4 sm:$0xff]  }
 0x300   :  { %v10371_v33 = vpack.c.bf16 %v3378_v49, %v3382_v11  ;;  %v3433_v32 = vsel %vm283_vm6, %v3409_v0, %v3413_v51  ;;  %v3425_v21 = vsel %vm283_vm6, %v3417_v39, %v3421_v43  ;;  %v3437_v55 = vsel %vm283_vm6, %v3421_v43, %v3409_v0  ;;  %v9025_v39 = vld [vmem:[#allocation8 + $0x6a4] ss:$16 sps:$4 sm:$0xff]   ;;  %v9046_v49 = vld [vmem:[#allocation8 + $0x70c] ss:$16 sps:$4 sm:$0xff]   ;;  %v9044_v11 = vld [vmem:[#allocation8 + $0x708] ss:$16 sps:$4 sm:$0xff]  }
 0x301   :  { %4429 = vmatpush1.bf16.msra.mxu0 %v9011_v16  ;;  %4535 = vmatpush1.bf16.msra.mxu1 %v9014_v35  ;;  %v10385_v1 = vpack.c.bf16 %v3429_v28, %v3433_v32  ;;  %v10387_v61 = vpack.c.bf16 %v3437_v55, %v3425_v21  ;;  %v3424_v51 = vsel %vm283_vm6, %v3416_v37, %v3420_v6  ;;  %v10839_v59 = vrot.slane %v10181_v31, 1  ;;  %v9026_v35 = vld [vmem:[#allocation8 + $0x6a8] ss:$16 sps:$4 sm:$0xff]   ;;  %v9043_v24 = vld [vmem:[#allocation8 + $0x704] ss:$16 sps:$4 sm:$0xff]  }
 0x302   :  { %4430 = vmatprep.subr.bf16.mxu0 %v9019_v34  ;;  %4536 = vmatprep.subr.bf16.mxu1 %v9022_v27  ;;  %v10840_v43 = vrot.slane %v10233_v29, 1  ;;  %v10842_v18 = vrot.slane %v10188_v41, 1  ;;  %v3427_v31 = vsel %vm283_vm6, %v3419_v53, %v3423_v42  ;;  %v10844_v29 = vrot.slane %v10240_v19, 1  ;;  %v9029_v19 = vld [vmem:[#allocation8 + $0x6c0] ss:$16 sps:$4 sm:$0xff]  }
 0x303   :  { %v3436_v0 = vsel %vm283_vm6, %v3420_v6, %v10839_v59  ;;  %v10845_v6 = vrot.slane %v10183_v38, 1  ;;  %v9032_v34 = vld [vmem:[#allocation8 + $0x6c8] ss:$16 sps:$4 sm:$0xff]   ;;  %v9037_v38 = vld [vmem:[#allocation8 + $0x6e4] ss:$16 sps:$4 sm:$0xff]  }
 0x304   :  { %v3431_v5 = vsel %vm283_vm6, %v10840_v43, %v3419_v53  ;;  %v10841_v2 = vmov %v10840_v43  ;;  %v10407_v56 = vpack.c.bf16 %v3436_v0, %v3424_v51  ;;  %v10843_v26 = vmov %v10842_v18  ;;  %v9023_v53 = vld [vmem:[#allocation8 + $0x6a0] ss:$16 sps:$4 sm:$0xff]   ;;  %v9040_v27 = vld [vmem:[#allocation8 + $0x6ec] ss:$16 sps:$4 sm:$0xff]   ;;  %v9049_v28 = vld [vmem:[#allocation8 + $0x724] ss:$16 sps:$4 sm:$0xff]  }
 0x305   :  { %v3435_v37 = vsel %vm283_vm6, %v10842_v18, %v10841_v2  ;;  %v3439_v22 = vsel %vm283_vm6, %v3423_v42, %v10843_v26  ;;  %v3426_v62 = vsel %vm283_vm6, %v10844_v29, %v3422_v63  ;;  %v3438_v16 = vsel %vm283_vm6, %v3422_v63, %v10845_v6  ;;  %4431 = vmatpush1.bf16.msra.mxu0 %v9017_v47  ;;  %v9038_v63 = vld [vmem:[#allocation8 + $0x6e8] ss:$16 sps:$4 sm:$0xff]   ;;  %v9041_v42 = vld [vmem:[#allocation8 + $0x700] ss:$16 sps:$4 sm:$0xff]   ;;  %v9052_v32 = vld [vmem:[#allocation8 + $0x72c] ss:$16 sps:$4 sm:$0xff]  }
 0x306   :  { %v10409_v4 = vpack.c.bf16 %v3431_v5, %v3435_v37  ;;  %v10417_v58 = vpack.c.bf16 %v3439_v22, %v3427_v31  ;;  %4537 = vmatpush1.bf16.msra.mxu1 %v9020_v50  ;;  %v10427_v41 = vpack.c.bf16 %v3438_v16, %v3426_v62  ;;  %4432 = vmatprep.subr.bf16.mxu0 %v9025_v39  ;;  %v9047_v21 = vld [vmem:[#allocation8 + $0x720] ss:$16 sps:$4 sm:$0xff]   ;;  %v9050_v55 = vld [vmem:[#allocation8 + $0x728] ss:$16 sps:$4 sm:$0xff]   ;;  %v9055_v47 = vld [vmem:[#allocation8 + $0x744] ss:$16 sps:$4 sm:$0xff]  }
 0x307   :  { %4538 = vmatprep.subr.bf16.mxu1 %v9028_v48  ;;  %v9058_v50 = vld [vmem:[#allocation8 + $0x74c] ss:$16 sps:$4 sm:$0xff]   ;;  %v9053_v51 = vld [vmem:[#allocation8 + $0x740] ss:$16 sps:$4 sm:$0xff]   ;;  %v9056_v39 = vld [vmem:[#allocation8 + $0x748] ss:$16 sps:$4 sm:$0xff]  }
 0x308   :  { %v9061_v48 = vld [vmem:[#allocation8 + $0x764] ss:$16 sps:$4 sm:$0xff]   ;;  %v9064_v59 = vld [vmem:[#allocation8 + $0x76c] ss:$16 sps:$4 sm:$0xff]   ;;  %v9059_v0 = vld [vmem:[#allocation8 + $0x760] ss:$16 sps:$4 sm:$0xff]  }
 0x309   :  { %4433 = vmatpush1.bf16.msra.mxu0 %v9023_v53  ;;  %v9062_v43 = vld [vmem:[#allocation8 + $0x768] ss:$16 sps:$4 sm:$0xff]   ;;  %v9067_v5 = vld [vmem:[#allocation8 + $0x784] ss:$16 sps:$4 sm:$0xff]   ;;  %v9070_v2 = vld [vmem:[#allocation8 + $0x78c] ss:$16 sps:$4 sm:$0xff]  }
 0x30a   :  { %4539 = vmatpush1.bf16.msra.mxu1 %v9026_v35  ;;  %4434 = vmatprep.subr.bf16.mxu0 %v9031_v20  ;;  %v9065_v18 = vld [vmem:[#allocation8 + $0x780] ss:$16 sps:$4 sm:$0xff]   ;;  %v9068_v37 = vld [vmem:[#allocation8 + $0x788] ss:$16 sps:$4 sm:$0xff]   ;;  %v9073_v31 = vld [vmem:[#allocation8 + $0x7a4] ss:$16 sps:$4 sm:$0xff]  }
 0x30b   :  { %4540 = vmatprep.subr.bf16.mxu1 %v9034_v52  ;;  %v9076_v26 = vld [vmem:[#allocation8 + $0x7ac] ss:$16 sps:$4 sm:$0xff]   ;;  %v9071_v22 = vld [vmem:[#allocation8 + $0x7a0] ss:$16 sps:$4 sm:$0xff]   ;;  %v9074_v29 = vld [vmem:[#allocation8 + $0x7a8] ss:$16 sps:$4 sm:$0xff]  }
 0x30c   :  { %v9079_v62 = vld [vmem:[#allocation8 + $0x7c4] ss:$16 sps:$4 sm:$0xff]   ;;  %v9082_v6 = vld [vmem:[#allocation8 + $0x7cc] ss:$16 sps:$4 sm:$0xff]   ;;  %v9077_v16 = vld [vmem:[#allocation8 + $0x7c0] ss:$16 sps:$4 sm:$0xff]  }
 0x30d   :  { %4435 = vmatpush1.bf16.msra.mxu0 %v9029_v19  ;;  %v9080_v53 = vld [vmem:[#allocation8 + $0x7c8] ss:$16 sps:$4 sm:$0xff]   ;;  %v9085_v35 = vld [vmem:[#allocation8 + $0x7e4] ss:$16 sps:$4 sm:$0xff]   ;;  %v9088_v20 = vld [vmem:[#allocation8 + $0x7ec] ss:$16 sps:$4 sm:$0xff]  }
 0x30e   :  { %4541 = vmatpush1.bf16.msra.mxu1 %v9032_v34  ;;  %4436 = vmatprep.subr.bf16.mxu0 %v9037_v38  ;;  %v9083_v52 = vld [vmem:[#allocation8 + $0x7e0] ss:$16 sps:$4 sm:$0xff]   ;;  %v9086_v19 = vld [vmem:[#allocation8 + $0x7e8] ss:$16 sps:$4 sm:$0xff]   ;;  %v9091_v34 = vld [vmem:[#allocation8 + $0x4] ss:$16 sps:$4 sm:$0xff]  }
 0x30f   :  { %4542 = vmatprep.subr.bf16.mxu1 %v9040_v27  ;;  %v9094_v38 = vld [vmem:[#allocation8 + $0xc] ss:$16 sps:$4 sm:$0xff]   ;;  %v9089_v27 = vld [vmem:[#allocation8] ss:$16 sps:$4 sm:$0xff]  }
 0x311   :  { %4437 = vmatpush1.bf16.msra.mxu0 %v9035_v25  ;;  %v9092_v25 = vld [vmem:[#allocation8 + $0x8] ss:$16 sps:$4 sm:$0xff]  }
 0x312   :  { %4543 = vmatpush1.bf16.msra.mxu1 %v9038_v63  ;;  %4438 = vmatprep.subr.bf16.mxu0 %v9043_v24  ;;  %v9097_v63 = vld [vmem:[#allocation8 + $0x24] ss:$16 sps:$4 sm:$0xff]   ;;  %v9100_v24 = vld [vmem:[#allocation8 + $0x2c] ss:$16 sps:$4 sm:$0xff]  }
 0x313   :  { %4544 = vmatprep.subr.bf16.mxu1 %v9046_v49  ;;  %v9095_v49 = vld [vmem:[#allocation8 + $0x20] ss:$16 sps:$4 sm:$0xff]  }
 0x315   :  { %4439 = vmatpush1.bf16.msra.mxu0 %v9041_v42  ;;  %v9098_v42 = vld [vmem:[#allocation8 + $0x28] ss:$16 sps:$4 sm:$0xff]  }
 0x316   :  { %4545 = vmatpush1.bf16.msra.mxu1 %v9044_v11  ;;  %4440 = vmatprep.subr.bf16.mxu0 %v9049_v28  ;;  %v9103_v11 = vld [vmem:[#allocation8 + $0x44] ss:$16 sps:$4 sm:$0xff]   ;;  %v9106_v28 = vld [vmem:[#allocation8 + $0x4c] ss:$16 sps:$4 sm:$0xff]  }
 0x317   :  { %4546 = vmatprep.subr.bf16.mxu1 %v9052_v32  ;;  %v9101_v32 = vld [vmem:[#allocation8 + $0x40] ss:$16 sps:$4 sm:$0xff]  }
 0x319   :  { %4441 = vmatpush1.bf16.msra.mxu0 %v9047_v21  ;;  %v9104_v21 = vld [vmem:[#allocation8 + $0x48] ss:$16 sps:$4 sm:$0xff]  }
 0x31a   :  { %4547 = vmatpush1.bf16.msra.mxu1 %v9050_v55  ;;  %4442 = vmatprep.subr.bf16.mxu0 %v9055_v47  ;;  %v9109_v55 = vld [vmem:[#allocation8 + $0x64] ss:$16 sps:$4 sm:$0xff]   ;;  %v9110_v47 = vld [vmem:[#allocation8 + $0x68] ss:$16 sps:$4 sm:$0xff]  }
 0x31b   :  { %4548 = vmatprep.subr.bf16.mxu1 %v9058_v50  ;;  %v9115_v50 = vld [vmem:[#allocation8 + $0x84] ss:$16 sps:$4 sm:$0xff]  }
 0x31d   :  { %4443 = vmatpush1.bf16.msra.mxu0 %v9053_v51  ;;  %v9118_v51 = vld [vmem:[#allocation8 + $0x8c] ss:$16 sps:$4 sm:$0xff]  }
 0x31e   :  { %4549 = vmatpush1.bf16.msra.mxu1 %v9056_v39  ;;  %4444 = vmatprep.subr.bf16.mxu0 %v9061_v48  ;;  %v9113_v39 = vld [vmem:[#allocation8 + $0x80] ss:$16 sps:$4 sm:$0xff]   ;;  %v9121_v48 = vld [vmem:[#allocation8 + $0xa4] ss:$16 sps:$4 sm:$0xff]  }
 0x31f   :  { %4550 = vmatprep.subr.bf16.mxu1 %v9064_v59  ;;  %v9124_v59 = vld [vmem:[#allocation8 + $0xac] ss:$16 sps:$4 sm:$0xff]  }
 0x321   :  { %4445 = vmatpush1.bf16.msra.mxu0 %v9059_v0  ;;  %v9119_v0 = vld [vmem:[#allocation8 + $0xa0] ss:$16 sps:$4 sm:$0xff]  }
 0x322   :  { %4551 = vmatpush1.bf16.msra.mxu1 %v9062_v43  ;;  %4446 = vmatprep.subr.bf16.mxu0 %v9067_v5  ;;  %v9127_v43 = vld [vmem:[#allocation8 + $0xc4] ss:$16 sps:$4 sm:$0xff]   ;;  %v9130_v5 = vld [vmem:[#allocation8 + $0xcc] ss:$16 sps:$4 sm:$0xff]  }
 0x323   :  { %4552 = vmatprep.subr.bf16.mxu1 %v9070_v2  ;;  %v9125_v2 = vld [vmem:[#allocation8 + $0xc0] ss:$16 sps:$4 sm:$0xff]  }
 0x325   :  { %4447 = vmatpush1.bf16.msra.mxu0 %v9065_v18  ;;  %v9128_v18 = vld [vmem:[#allocation8 + $0xc8] ss:$16 sps:$4 sm:$0xff]  }
 0x326   :  { %4553 = vmatpush1.bf16.msra.mxu1 %v9068_v37  ;;  %4448 = vmatprep.subr.bf16.mxu0 %v9073_v31  ;;  %v9133_v37 = vld [vmem:[#allocation8 + $0xe4] ss:$16 sps:$4 sm:$0xff]   ;;  %v9136_v31 = vld [vmem:[#allocation8 + $0xec] ss:$16 sps:$4 sm:$0xff]  }
 0x327   :  { %4554 = vmatprep.subr.bf16.mxu1 %v9076_v26  ;;  %v9131_v26 = vld [vmem:[#allocation8 + $0xe0] ss:$16 sps:$4 sm:$0xff]  }
 0x329   :  { %4449 = vmatpush1.bf16.msra.mxu0 %v9071_v22  ;;  %v9134_v22 = vld [vmem:[#allocation8 + $0xe8] ss:$16 sps:$4 sm:$0xff]  }
 0x32a   :  { %4555 = vmatpush1.bf16.msra.mxu1 %v9074_v29  ;;  %4450 = vmatprep.subr.bf16.mxu0 %v9079_v62  ;;  %v9139_v29 = vld [vmem:[#allocation8 + $0x104] ss:$16 sps:$4 sm:$0xff]   ;;  %v9142_v62 = vld [vmem:[#allocation8 + $0x10c] ss:$16 sps:$4 sm:$0xff]  }
 0x32b   :  { %4556 = vmatprep.subr.bf16.mxu1 %v9082_v6  ;;  %v9137_v6 = vld [vmem:[#allocation8 + $0x100] ss:$16 sps:$4 sm:$0xff]  }
 0x32d   :  { %4451 = vmatpush1.bf16.msra.mxu0 %v9077_v16  ;;  %v9140_v16 = vld [vmem:[#allocation8 + $0x108] ss:$16 sps:$4 sm:$0xff]  }
 0x32e   :  { %4557 = vmatpush1.bf16.msra.mxu1 %v9080_v53  ;;  %4452 = vmatprep.subr.bf16.mxu0 %v9085_v35  ;;  %v9145_v53 = vld [vmem:[#allocation8 + $0x124] ss:$16 sps:$4 sm:$0xff]   ;;  %v9148_v35 = vld [vmem:[#allocation8 + $0x12c] ss:$16 sps:$4 sm:$0xff]  }
 0x32f   :  { %4558 = vmatprep.subr.bf16.mxu1 %v9088_v20  ;;  %v9143_v20 = vld [vmem:[#allocation8 + $0x120] ss:$16 sps:$4 sm:$0xff]  }
 0x331   :  { %4453 = vmatpush1.bf16.msra.mxu0 %v9083_v52  ;;  %v9146_v52 = vld [vmem:[#allocation8 + $0x128] ss:$16 sps:$4 sm:$0xff]  }
 0x332   :  { %4559 = vmatpush1.bf16.msra.mxu1 %v9086_v19  ;;  %5221 = vmatprep.subr.bf16.mxu0 %v9091_v34  ;;  %v9151_v19 = vld [vmem:[#allocation8 + $0x144] ss:$16 sps:$4 sm:$0xff]   ;;  %v9154_v34 = vld [vmem:[#allocation8 + $0x14c] ss:$16 sps:$4 sm:$0xff]  }
 0x333   :  { %5327 = vmatprep.subr.bf16.mxu1 %v9094_v38  ;;  %v9149_v38 = vld [vmem:[#allocation8 + $0x140] ss:$16 sps:$4 sm:$0xff]  }
 0x334   :  { %4455 = vmatmul.mubr.bf16.vlgmr.msra.gmra.mrb[8].mxu0 %v10208_v60 }
 0x335   :  { %4561 = vmatmul.mubr.bf16.vlgmr.msra.gmra.mrb[8].mxu1 %v10208_v60  ;;  %4464 = vmatprep.mubr.bf16.mxu0 %v10316_v23  ;;  %v9112_v60 = vld [vmem:[#allocation8 + $0x6c] ss:$16 sps:$4 sm:$0xff]  }
 0x336   :  { %4570 = vmatprep.mubr.bf16.mxu1 %v10316_v23  ;;  %5222 = vmatpush1.bf16.msra.mxu0 %v9089_v27  ;;  %v9107_v23 = vld [vmem:[#allocation8 + $0x60] ss:$16 sps:$4 sm:$0xff]   ;;  %v9152_v27 = vld [vmem:[#allocation8 + $0x148] ss:$16 sps:$4 sm:$0xff]  }
 0x337   :  { %5328 = vmatpush1.bf16.msra.mxu1 %v9092_v25  ;;  %5223 = vmatprep.subr.bf16.mxu0 %v9097_v63  ;;  %v9157_v25 = vld [vmem:[#allocation8 + $0x164] ss:$16 sps:$4 sm:$0xff]   ;;  %v9160_v63 = vld [vmem:[#allocation8 + $0x16c] ss:$16 sps:$4 sm:$0xff]  }
 0x338   :  { %5329 = vmatprep.subr.bf16.mxu1 %v9100_v24  ;;  %v9155_v24 = vld [vmem:[#allocation8 + $0x160] ss:$16 sps:$4 sm:$0xff]  }
 0x33a   :  { %5224 = vmatpush1.bf16.msra.mxu0 %v9095_v49  ;;  %v9158_v49 = vld [vmem:[#allocation8 + $0x168] ss:$16 sps:$4 sm:$0xff]  }
 0x33b   :  { %5330 = vmatpush1.bf16.msra.mxu1 %v9098_v42  ;;  %5225 = vmatprep.subr.bf16.mxu0 %v9103_v11  ;;  %v9163_v42 = vld [vmem:[#allocation8 + $0x184] ss:$16 sps:$4 sm:$0xff]   ;;  %v9166_v11 = vld [vmem:[#allocation8 + $0x18c] ss:$16 sps:$4 sm:$0xff]  }
 0x33c   :  { %5331 = vmatprep.subr.bf16.mxu1 %v9106_v28  ;;  %4465 = vmatmul.mubr.bf16.gmra.mrb[12].mxu0 %v10295_v44  ;;  %v9161_v28 = vld [vmem:[#allocation8 + $0x180] ss:$16 sps:$4 sm:$0xff]  }
 0x33d   :  { %4571 = vmatmul.mubr.bf16.gmra.mrb[12].mxu1 %v10295_v44  ;;  %7783 = vmatprep.mubr.msk.bf16.mxu0 %vm9959_vm3, %v10323_v30  ;;  %v9116_v44 = vld [vmem:[#allocation8 + $0x88] ss:$16 sps:$4 sm:$0xff]  }
 0x33e   :  { %7807 = vmatprep.mubr.msk.bf16.mxu1 %vm9959_vm3, %v10323_v30  ;;  %5226 = vmatpush1.bf16.msra.mxu0 %v9101_v32  ;;  %v9122_v30 = vld [vmem:[#allocation8 + $0xa8] ss:$16 sps:$4 sm:$0xff]  }
 0x33f   :  { %5332 = vmatpush1.bf16.msra.mxu1 %v9104_v21  ;;  %5227 = vmatprep.subr.bf16.mxu0 %v9109_v55  ;;  %v9164_v32 = vld [vmem:[#allocation8 + $0x188] ss:$16 sps:$4 sm:$0xff]   ;;  %v9169_v21 = vld [vmem:[#allocation8 + $0x1a4] ss:$16 sps:$4 sm:$0xff]   ;;  %v9172_v55 = vld [vmem:[#allocation8 + $0x1ac] ss:$16 sps:$4 sm:$0xff]  }
 0x340   :  { %5333 = vmatprep.subr.bf16.mxu1 %v9112_v60  ;;  %v9167_v60 = vld [vmem:[#allocation8 + $0x1a0] ss:$16 sps:$4 sm:$0xff]  }
 0x342   :  { %5228 = vmatpush1.bf16.msra.mxu0 %v9107_v23  ;;  %v9170_v23 = vld [vmem:[#allocation8 + $0x1a8] ss:$16 sps:$4 sm:$0xff]  }
 0x343   :  { %5334 = vmatpush1.bf16.msra.mxu1 %v9110_v47  ;;  %5229 = vmatprep.subr.bf16.mxu0 %v9115_v50  ;;  %v9175_v47 = vld [vmem:[#allocation8 + $0x1c4] ss:$16 sps:$4 sm:$0xff]   ;;  %v9178_v50 = vld [vmem:[#allocation8 + $0x1cc] ss:$16 sps:$4 sm:$0xff]  }
 0x344   :  { %5335 = vmatprep.subr.bf16.mxu1 %v9118_v51  ;;  %v9173_v51 = vld [vmem:[#allocation8 + $0x1c0] ss:$16 sps:$4 sm:$0xff]  }
 0x346   :  { %5230 = vmatpush1.bf16.msra.mxu0 %v9113_v39  ;;  %v9176_v39 = vld [vmem:[#allocation8 + $0x1c8] ss:$16 sps:$4 sm:$0xff]  }
 0x347   :  { %5336 = vmatpush1.bf16.msra.mxu1 %v9116_v44  ;;  %5231 = vmatprep.subr.bf16.mxu0 %v9121_v48  ;;  %v9181_v44 = vld [vmem:[#allocation8 + $0x1e4] ss:$16 sps:$4 sm:$0xff]   ;;  %v9184_v48 = vld [vmem:[#allocation8 + $0x1ec] ss:$16 sps:$4 sm:$0xff]  }
 0x348   :  { %5337 = vmatprep.subr.bf16.mxu1 %v9124_v59  ;;  %v9179_v59 = vld [vmem:[#allocation8 + $0x1e0] ss:$16 sps:$4 sm:$0xff]  }
 0x34a   :  { %5232 = vmatpush1.bf16.msra.mxu0 %v9119_v0  ;;  %v9182_v0 = vld [vmem:[#allocation8 + $0x1e8] ss:$16 sps:$4 sm:$0xff]  }
 0x34b   :  { %5338 = vmatpush1.bf16.msra.mxu1 %v9122_v30  ;;  %5233 = vmatprep.subr.bf16.mxu0 %v9127_v43  ;;  %v9187_v30 = vld [vmem:[#allocation8 + $0x204] ss:$16 sps:$4 sm:$0xff]   ;;  %v9190_v43 = vld [vmem:[#allocation8 + $0x20c] ss:$16 sps:$4 sm:$0xff]  }
 0x34c   :  { %5339 = vmatprep.subr.bf16.mxu1 %v9130_v5  ;;  %v9185_v5 = vld [vmem:[#allocation8 + $0x200] ss:$16 sps:$4 sm:$0xff]  }
 0x34e   :  { %5234 = vmatpush1.bf16.msra.mxu0 %v9125_v2  ;;  %v9188_v2 = vld [vmem:[#allocation8 + $0x208] ss:$16 sps:$4 sm:$0xff]  }
 0x34f   :  { %5340 = vmatpush1.bf16.msra.mxu1 %v9128_v18  ;;  %5235 = vmatprep.subr.bf16.mxu0 %v9133_v37  ;;  %v9193_v18 = vld [vmem:[#allocation8 + $0x224] ss:$16 sps:$4 sm:$0xff]   ;;  %v9196_v37 = vld [vmem:[#allocation8 + $0x22c] ss:$16 sps:$4 sm:$0xff]  }
 0x350   :  { %5341 = vmatprep.subr.bf16.mxu1 %v9136_v31  ;;  %v9191_v31 = vld [vmem:[#allocation8 + $0x220] ss:$16 sps:$4 sm:$0xff]  }
 0x352   :  { %5236 = vmatpush1.bf16.msra.mxu0 %v9131_v26  ;;  %v9194_v26 = vld [vmem:[#allocation8 + $0x228] ss:$16 sps:$4 sm:$0xff]  }
 0x353   :  { %5342 = vmatpush1.bf16.msra.mxu1 %v9134_v22  ;;  %5237 = vmatprep.subr.bf16.mxu0 %v9139_v29  ;;  %v9199_v22 = vld [vmem:[#allocation8 + $0x244] ss:$16 sps:$4 sm:$0xff]   ;;  %v9202_v29 = vld [vmem:[#allocation8 + $0x24c] ss:$16 sps:$4 sm:$0xff]  }
 0x354   :  { %5343 = vmatprep.subr.bf16.mxu1 %v9142_v62  ;;  %v9197_v62 = vld [vmem:[#allocation8 + $0x240] ss:$16 sps:$4 sm:$0xff]  }
 0x356   :  { %5238 = vmatpush1.bf16.msra.mxu0 %v9137_v6  ;;  %v9205_v6 = vld [vmem:[#allocation8 + $0x264] ss:$16 sps:$4 sm:$0xff]  }
 0x357   :  { %5344 = vmatpush1.bf16.msra.mxu1 %v9140_v16  ;;  %5239 = vmatprep.subr.bf16.mxu0 %v9145_v53  ;;  %v9208_v16 = vld [vmem:[#allocation8 + $0x26c] ss:$16 sps:$4 sm:$0xff]   ;;  %v9206_v53 = vld [vmem:[#allocation8 + $0x268] ss:$16 sps:$4 sm:$0xff]  }
 0x358   :  { %5345 = vmatprep.subr.bf16.mxu1 %v9148_v35  ;;  %v9211_v35 = vld [vmem:[#allocation8 + $0x284] ss:$16 sps:$4 sm:$0xff]  }
 0x35a   :  { %5240 = vmatpush1.bf16.msra.mxu0 %v9143_v20  ;;  %v9214_v20 = vld [vmem:[#allocation8 + $0x28c] ss:$16 sps:$4 sm:$0xff]  }
 0x35b   :  { %5346 = vmatpush1.bf16.msra.mxu1 %v9146_v52  ;;  %5241 = vmatprep.subr.bf16.mxu0 %v9151_v19  ;;  %v9209_v52 = vld [vmem:[#allocation8 + $0x280] ss:$16 sps:$4 sm:$0xff]   ;;  %v9217_v19 = vld [vmem:[#allocation8 + $0x2a4] ss:$16 sps:$4 sm:$0xff]  }
 0x35c   :  { %5347 = vmatprep.subr.bf16.mxu1 %v9154_v34  ;;  %v9220_v34 = vld [vmem:[#allocation8 + $0x2ac] ss:$16 sps:$4 sm:$0xff]  }
 0x35e   :  { %5242 = vmatpush1.bf16.msra.mxu0 %v9149_v38  ;;  %v9215_v38 = vld [vmem:[#allocation8 + $0x2a0] ss:$16 sps:$4 sm:$0xff]  }
 0x35f   :  { %5348 = vmatpush1.bf16.msra.mxu1 %v9152_v27  ;;  %5243 = vmatprep.subr.bf16.mxu0 %v9157_v25  ;;  %v9218_v27 = vld [vmem:[#allocation8 + $0x2a8] ss:$16 sps:$4 sm:$0xff]   ;;  %v9223_v25 = vld [vmem:[#allocation8 + $0x2c4] ss:$16 sps:$4 sm:$0xff]  }
 0x360   :  { %5349 = vmatprep.subr.bf16.mxu1 %v9160_v63  ;;  %v9221_v63 = vld [vmem:[#allocation8 + $0x2c0] ss:$16 sps:$4 sm:$0xff]  }
 0x362   :  { %5244 = vmatpush1.bf16.msra.mxu0 %v9155_v24  ;;  %v9224_v24 = vld [vmem:[#allocation8 + $0x2c8] ss:$16 sps:$4 sm:$0xff]  }
 0x363   :  { %5350 = vmatpush1.bf16.msra.mxu1 %v9158_v49  ;;  %5245 = vmatprep.subr.bf16.mxu0 %v9163_v42  ;;  %v9229_v49 = vld [vmem:[#allocation8 + $0x2e4] ss:$16 sps:$4 sm:$0xff]   ;;  %v9232_v42 = vld [vmem:[#allocation8 + $0x2ec] ss:$16 sps:$4 sm:$0xff]  }
 0x364   :  { %5351 = vmatprep.subr.bf16.mxu1 %v9166_v11  ;;  %v9227_v11 = vld [vmem:[#allocation8 + $0x2e0] ss:$16 sps:$4 sm:$0xff]  }
 0x366   :  { %5246 = vmatpush1.bf16.msra.mxu0 %v9161_v28  ;;  %v9230_v28 = vld [vmem:[#allocation8 + $0x2e8] ss:$16 sps:$4 sm:$0xff]  }
 0x367   :  { %5352 = vmatpush1.bf16.msra.mxu1 %v9164_v32  ;;  %5247 = vmatprep.subr.bf16.mxu0 %v9169_v21  ;;  %v9235_v32 = vld [vmem:[#allocation8 + $0x304] ss:$16 sps:$4 sm:$0xff]   ;;  %v9238_v21 = vld [vmem:[#allocation8 + $0x30c] ss:$16 sps:$4 sm:$0xff]  }
 0x368   :  { %5353 = vmatprep.subr.bf16.mxu1 %v9172_v55  ;;  %v9233_v55 = vld [vmem:[#allocation8 + $0x300] ss:$16 sps:$4 sm:$0xff]  }
 0x36a   :  { %5248 = vmatpush1.bf16.msra.mxu0 %v9167_v60  ;;  %v9236_v60 = vld [vmem:[#allocation8 + $0x308] ss:$16 sps:$4 sm:$0xff]  }
 0x36b   :  { %5354 = vmatpush1.bf16.msra.mxu1 %v9170_v23  ;;  %5249 = vmatprep.subr.bf16.mxu0 %v9175_v47  ;;  %v9241_v23 = vld [vmem:[#allocation8 + $0x324] ss:$16 sps:$4 sm:$0xff]   ;;  %v9244_v47 = vld [vmem:[#allocation8 + $0x32c] ss:$16 sps:$4 sm:$0xff]  }
 0x36c   :  { %5355 = vmatprep.subr.bf16.mxu1 %v9178_v50  ;;  %v9239_v50 = vld [vmem:[#allocation8 + $0x320] ss:$16 sps:$4 sm:$0xff]  }
 0x36e   :  { %5250 = vmatpush1.bf16.msra.mxu0 %v9173_v51  ;;  %v9242_v51 = vld [vmem:[#allocation8 + $0x328] ss:$16 sps:$4 sm:$0xff]  }
 0x36f   :  { %5356 = vmatpush1.bf16.msra.mxu1 %v9176_v39  ;;  %5251 = vmatprep.subr.bf16.mxu0 %v9181_v44  ;;  %v9247_v39 = vld [vmem:[#allocation8 + $0x344] ss:$16 sps:$4 sm:$0xff]   ;;  %v9250_v44 = vld [vmem:[#allocation8 + $0x34c] ss:$16 sps:$4 sm:$0xff]  }
 0x370   :  { %5357 = vmatprep.subr.bf16.mxu1 %v9184_v48  ;;  %v9245_v48 = vld [vmem:[#allocation8 + $0x340] ss:$16 sps:$4 sm:$0xff]  }
 0x372   :  { %5252 = vmatpush1.bf16.msra.mxu0 %v9179_v59  ;;  %v9248_v59 = vld [vmem:[#allocation8 + $0x348] ss:$16 sps:$4 sm:$0xff]  }
 0x373   :  { %5358 = vmatpush1.bf16.msra.mxu1 %v9182_v0  ;;  %5274 = vmatprep.subr.bf16.mxu0 %v9187_v30  ;;  %v9253_v0 = vld [vmem:[#allocation8 + $0x364] ss:$16 sps:$4 sm:$0xff]   ;;  %v9256_v30 = vld [vmem:[#allocation8 + $0x36c] ss:$16 sps:$4 sm:$0xff]  }
 0x374   :  { %5380 = vmatprep.subr.bf16.mxu1 %v9190_v43  ;;  %v9251_v43 = vld [vmem:[#allocation8 + $0x360] ss:$16 sps:$4 sm:$0xff]  }
 0x375   :  { %7786 = vmatmul.mubr.msk.bf16.vlgmr.msra.gmra.mrb[8].mxu0 %vm9959_vm3, %v10285_v17 }
 0x376   :  { %7810 = vmatmul.mubr.msk.bf16.vlgmr.msra.gmra.mrb[8].mxu1 %vm9959_vm3, %v10285_v17  ;;  %7789 = vmatprep.mubr.msk.bf16.mxu0 %vm9988_vm5, %v10330_v45  ;;  %v9200_v17 = vld [vmem:[#allocation8 + $0x248] ss:$16 sps:$4 sm:$0xff]  }
 0x377   :  { %5275 = vmatpush1.bf16.msra.mxu0 %v9185_v5  ;;  %7813 = vmatprep.mubr.msk.bf16.mxu1 %vm9988_vm5, %v10330_v45  ;;  %v9203_v45 = vld [vmem:[#allocation8 + $0x260] ss:$16 sps:$4 sm:$0xff]   ;;  %v9254_v5 = vld [vmem:[#allocation8 + $0x368] ss:$16 sps:$4 sm:$0xff]  }
 0x378   :  { %5381 = vmatpush1.bf16.msra.mxu1 %v9188_v2  ;;  %5276 = vmatprep.subr.bf16.mxu0 %v9193_v18  ;;  %v9259_v2 = vld [vmem:[#allocation8 + $0x384] ss:$16 sps:$4 sm:$0xff]   ;;  %v9262_v18 = vld [vmem:[#allocation8 + $0x38c] ss:$16 sps:$4 sm:$0xff]  }
 0x379   :  { %5382 = vmatprep.subr.bf16.mxu1 %v9196_v37  ;;  %v9257_v37 = vld [vmem:[#allocation8 + $0x380] ss:$16 sps:$4 sm:$0xff]  }
 0x37b   :  { %5277 = vmatpush1.bf16.msra.mxu0 %v9191_v31  ;;  %v9260_v31 = vld [vmem:[#allocation8 + $0x388] ss:$16 sps:$4 sm:$0xff]  }
 0x37c   :  { %5383 = vmatpush1.bf16.msra.mxu1 %v9194_v26  ;;  %5278 = vmatprep.subr.bf16.mxu0 %v9199_v22  ;;  %v9265_v26 = vld [vmem:[#allocation8 + $0x3a4] ss:$16 sps:$4 sm:$0xff]   ;;  %v9268_v22 = vld [vmem:[#allocation8 + $0x3ac] ss:$16 sps:$4 sm:$0xff]  }
 0x37d   :  { %5384 = vmatprep.subr.bf16.mxu1 %v9202_v29  ;;  %7792 = vmatmul.mubr.msk.bf16.gmra.mrb[12].mxu0 %vm9988_vm5, %v10343_v46  ;;  %v9263_v29 = vld [vmem:[#allocation8 + $0x3a0] ss:$16 sps:$4 sm:$0xff]  }
 0x37e   :  { %7816 = vmatmul.mubr.msk.bf16.gmra.mrb[12].mxu1 %vm9988_vm5, %v10343_v46  ;;  %7795 = vmatprep.mubr.msk.bf16.mxu0 %vm9959_vm3, %v10352_v7  ;;  %v9212_v46 = vld [vmem:[#allocation8 + $0x288] ss:$16 sps:$4 sm:$0xff]  }
 0x37f   :  { %5279 = vmatpush1.bf16.msra.mxu0 %v9197_v62  ;;  %7819 = vmatprep.mubr.msk.bf16.mxu1 %vm9959_vm3, %v10352_v7  ;;  %v9226_v7 = vld [vmem:[#allocation8 + $0x2cc] ss:$16 sps:$4 sm:$0xff]   ;;  %v9266_v62 = vld [vmem:[#allocation8 + $0x3a8] ss:$16 sps:$4 sm:$0xff]  }
 0x380   :  { %5385 = vmatpush1.bf16.msra.mxu1 %v9200_v17  ;;  %5280 = vmatprep.subr.bf16.mxu0 %v9205_v6  ;;  %v9271_v17 = vld [vmem:[#allocation8 + $0x3c4] ss:$16 sps:$4 sm:$0xff]   ;;  %v9274_v6 = vld [vmem:[#allocation8 + $0x3cc] ss:$16 sps:$4 sm:$0xff]  }
 0x381   :  { %5386 = vmatprep.subr.bf16.mxu1 %v9208_v16  ;;  %v9269_v16 = vld [vmem:[#allocation8 + $0x3c0] ss:$16 sps:$4 sm:$0xff]  }
 0x383   :  { %5281 = vmatpush1.bf16.msra.mxu0 %v9203_v45  ;;  %v9272_v45 = vld [vmem:[#allocation8 + $0x3c8] ss:$16 sps:$4 sm:$0xff]  }
 0x384   :  { %5387 = vmatpush1.bf16.msra.mxu1 %v9206_v53  ;;  %5282 = vmatprep.subr.bf16.mxu0 %v9211_v35  ;;  %v9277_v53 = vld [vmem:[#allocation8 + $0x3e4] ss:$16 sps:$4 sm:$0xff]   ;;  %v9280_v35 = vld [vmem:[#allocation8 + $0x3ec] ss:$16 sps:$4 sm:$0xff]  }
 0x385   :  { %5388 = vmatprep.subr.bf16.mxu1 %v9214_v20  ;;  %v9275_v20 = vld [vmem:[#allocation8 + $0x3e0] ss:$16 sps:$4 sm:$0xff]  }
 0x387   :  { %5283 = vmatpush1.bf16.msra.mxu0 %v9209_v52  ;;  %v9278_v52 = vld [vmem:[#allocation8 + $0x3e8] ss:$16 sps:$4 sm:$0xff]  }
 0x388   :  { %5389 = vmatpush1.bf16.msra.mxu1 %v9212_v46  ;;  %5284 = vmatprep.subr.bf16.mxu0 %v9217_v19  ;;  %v9283_v46 = vld [vmem:[#allocation8 + $0x804] ss:$16 sps:$4 sm:$0xff]   ;;  %v9286_v19 = vld [vmem:[#allocation8 + $0x80c] ss:$16 sps:$4 sm:$0xff]  }
 0x389   :  { %5390 = vmatprep.subr.bf16.mxu1 %v9220_v34  ;;  %v9281_v34 = vld [vmem:[#allocation8 + $0x800] ss:$16 sps:$4 sm:$0xff]  }
 0x38b   :  { %5285 = vmatpush1.bf16.msra.mxu0 %v9215_v38  ;;  %v9284_v38 = vld [vmem:[#allocation8 + $0x808] ss:$16 sps:$4 sm:$0xff]  }
 0x38c   :  { %5391 = vmatpush1.bf16.msra.mxu1 %v9218_v27  ;;  %5286 = vmatprep.subr.bf16.mxu0 %v9223_v25  ;;  %v9289_v27 = vld [vmem:[#allocation8 + $0x824] ss:$16 sps:$4 sm:$0xff]   ;;  %v9292_v25 = vld [vmem:[#allocation8 + $0x82c] ss:$16 sps:$4 sm:$0xff]  }
 0x38d   :  { %5392 = vmatprep.subr.bf16.mxu1 %v9226_v7  ;;  %v9287_v7 = vld [vmem:[#allocation8 + $0x820] ss:$16 sps:$4 sm:$0xff]  }
 0x38f   :  { %5287 = vmatpush1.bf16.msra.mxu0 %v9221_v63  ;;  %v9290_v63 = vld [vmem:[#allocation8 + $0x828] ss:$16 sps:$4 sm:$0xff]  }
 0x390   :  { %5393 = vmatpush1.bf16.msra.mxu1 %v9224_v24  ;;  %5288 = vmatprep.subr.bf16.mxu0 %v9229_v49  ;;  %v9295_v24 = vld [vmem:[#allocation8 + $0x844] ss:$16 sps:$4 sm:$0xff]   ;;  %v9298_v49 = vld [vmem:[#allocation8 + $0x84c] ss:$16 sps:$4 sm:$0xff]  }
 0x391   :  { %5394 = vmatprep.subr.bf16.mxu1 %v9232_v42  ;;  %v9293_v42 = vld [vmem:[#allocation8 + $0x840] ss:$16 sps:$4 sm:$0xff]  }
 0x393   :  { %5289 = vmatpush1.bf16.msra.mxu0 %v9227_v11  ;;  %v9299_v11 = vld [vmem:[#allocation8 + $0x860] ss:$16 sps:$4 sm:$0xff]  }
 0x394   :  { %5395 = vmatpush1.bf16.msra.mxu1 %v9230_v28  ;;  %5290 = vmatprep.subr.bf16.mxu0 %v9235_v32  ;;  %v9302_v28 = vld [vmem:[#allocation8 + $0x868] ss:$16 sps:$4 sm:$0xff]   ;;  %v9307_v32 = vld [vmem:[#allocation8 + $0x884] ss:$16 sps:$4 sm:$0xff]  }
 0x395   :  { %5396 = vmatprep.subr.bf16.mxu1 %v9238_v21  ;;  %v9310_v21 = vld [vmem:[#allocation8 + $0x88c] ss:$16 sps:$4 sm:$0xff]  }
 0x397   :  { %5291 = vmatpush1.bf16.msra.mxu0 %v9233_v55  ;;  %v9305_v55 = vld [vmem:[#allocation8 + $0x880] ss:$16 sps:$4 sm:$0xff]  }
 0x398   :  { %5397 = vmatpush1.bf16.msra.mxu1 %v9236_v60  ;;  %5292 = vmatprep.subr.bf16.mxu0 %v9241_v23  ;;  %v9316_v60 = vld [vmem:[#allocation8 + $0x8ac] ss:$16 sps:$4 sm:$0xff]   ;;  %v9311_v23 = vld [vmem:[#allocation8 + $0x8a0] ss:$16 sps:$4 sm:$0xff]  }
 0x399   :  { %5398 = vmatprep.subr.bf16.mxu1 %v9244_v47  ;;  %v9319_v47 = vld [vmem:[#allocation8 + $0x8c4] ss:$16 sps:$4 sm:$0xff]  }
 0x39b   :  { %5293 = vmatpush1.bf16.msra.mxu0 %v9239_v50  ;;  %v9322_v50 = vld [vmem:[#allocation8 + $0x8cc] ss:$16 sps:$4 sm:$0xff]  }
 0x39c   :  { %5399 = vmatpush1.bf16.msra.mxu1 %v9242_v51  ;;  %5294 = vmatprep.subr.bf16.mxu0 %v9247_v39  ;;  %v9317_v51 = vld [vmem:[#allocation8 + $0x8c0] ss:$16 sps:$4 sm:$0xff]   ;;  %v9320_v39 = vld [vmem:[#allocation8 + $0x8c8] ss:$16 sps:$4 sm:$0xff]  }
 0x39d   :  { %5400 = vmatprep.subr.bf16.mxu1 %v9250_v44  ;;  %v9325_v44 = vld [vmem:[#allocation8 + $0x8e4] ss:$16 sps:$4 sm:$0xff]  }
 0x39f   :  { %5295 = vmatpush1.bf16.msra.mxu0 %v9245_v48  ;;  %v9328_v48 = vld [vmem:[#allocation8 + $0x8ec] ss:$16 sps:$4 sm:$0xff]  }
 0x3a0   :  { %5401 = vmatpush1.bf16.msra.mxu1 %v9248_v59  ;;  %5296 = vmatprep.subr.bf16.mxu0 %v9253_v0  ;;  %v9323_v59 = vld [vmem:[#allocation8 + $0x8e0] ss:$16 sps:$4 sm:$0xff]   ;;  %v9326_v0 = vld [vmem:[#allocation8 + $0x8e8] ss:$16 sps:$4 sm:$0xff]  }
 0x3a1   :  { %5402 = vmatprep.subr.bf16.mxu1 %v9256_v30  ;;  %v9331_v30 = vld [vmem:[#allocation8 + $0x904] ss:$16 sps:$4 sm:$0xff]  }
 0x3a3   :  { %5297 = vmatpush1.bf16.msra.mxu0 %v9251_v43  ;;  %v9334_v43 = vld [vmem:[#allocation8 + $0x90c] ss:$16 sps:$4 sm:$0xff]  }
 0x3a4   :  { %5403 = vmatpush1.bf16.msra.mxu1 %v9254_v5  ;;  %5298 = vmatprep.subr.bf16.mxu0 %v9259_v2  ;;  %v9329_v5 = vld [vmem:[#allocation8 + $0x900] ss:$16 sps:$4 sm:$0xff]   ;;  %v9332_v2 = vld [vmem:[#allocation8 + $0x908] ss:$16 sps:$4 sm:$0xff]  }
 0x3a5   :  { %5404 = vmatprep.subr.bf16.mxu1 %v9262_v18  ;;  %v9337_v18 = vld [vmem:[#allocation8 + $0x924] ss:$16 sps:$4 sm:$0xff]  }
 0x3a7   :  { %5299 = vmatpush1.bf16.msra.mxu0 %v9257_v37  ;;  %v9340_v37 = vld [vmem:[#allocation8 + $0x92c] ss:$16 sps:$4 sm:$0xff]  }
 0x3a8   :  { %5405 = vmatpush1.bf16.msra.mxu1 %v9260_v31  ;;  %5300 = vmatprep.subr.bf16.mxu0 %v9265_v26  ;;  %v9335_v31 = vld [vmem:[#allocation8 + $0x920] ss:$16 sps:$4 sm:$0xff]   ;;  %v9338_v26 = vld [vmem:[#allocation8 + $0x928] ss:$16 sps:$4 sm:$0xff]  }
 0x3a9   :  { %5406 = vmatprep.subr.bf16.mxu1 %v9268_v22  ;;  %v9343_v22 = vld [vmem:[#allocation8 + $0x944] ss:$16 sps:$4 sm:$0xff]  }
 0x3ab   :  { %5301 = vmatpush1.bf16.msra.mxu0 %v9263_v29  ;;  %v9346_v29 = vld [vmem:[#allocation8 + $0x94c] ss:$16 sps:$4 sm:$0xff]  }
 0x3ac   :  { %5407 = vmatpush1.bf16.msra.mxu1 %v9266_v62  ;;  %5302 = vmatprep.subr.bf16.mxu0 %v9271_v17  ;;  %v9341_v62 = vld [vmem:[#allocation8 + $0x940] ss:$16 sps:$4 sm:$0xff]   ;;  %v9344_v17 = vld [vmem:[#allocation8 + $0x948] ss:$16 sps:$4 sm:$0xff]  }
 0x3ad   :  { %5408 = vmatprep.subr.bf16.mxu1 %v9274_v6  ;;  %v9349_v6 = vld [vmem:[#allocation8 + $0x964] ss:$16 sps:$4 sm:$0xff]  }
 0x3af   :  { %5303 = vmatpush1.bf16.msra.mxu0 %v9269_v16  ;;  %v9352_v16 = vld [vmem:[#allocation8 + $0x96c] ss:$16 sps:$4 sm:$0xff]  }
 0x3b0   :  { %5409 = vmatpush1.bf16.msra.mxu1 %v9272_v45  ;;  %5304 = vmatprep.subr.bf16.mxu0 %v9277_v53  ;;  %v9347_v45 = vld [vmem:[#allocation8 + $0x960] ss:$16 sps:$4 sm:$0xff]   ;;  %v9350_v53 = vld [vmem:[#allocation8 + $0x968] ss:$16 sps:$4 sm:$0xff]  }
 0x3b1   :  { %5410 = vmatprep.subr.bf16.mxu1 %v9280_v35  ;;  %v9355_v35 = vld [vmem:[#allocation8 + $0x984] ss:$16 sps:$4 sm:$0xff]  }
 0x3b3   :  { %5305 = vmatpush1.bf16.msra.mxu0 %v9275_v20  ;;  %v9358_v20 = vld [vmem:[#allocation8 + $0x98c] ss:$16 sps:$4 sm:$0xff]  }
 0x3b4   :  { %5411 = vmatpush1.bf16.msra.mxu1 %v9278_v52  ;;  %6210 = vmatprep.subr.bf16.mxu0 %v9283_v46  ;;  %v9353_v52 = vld [vmem:[#allocation8 + $0x980] ss:$16 sps:$4 sm:$0xff]   ;;  %v9356_v46 = vld [vmem:[#allocation8 + $0x988] ss:$16 sps:$4 sm:$0xff]  }
 0x3b5   :  { %6316 = vmatprep.subr.bf16.mxu1 %v9286_v19  ;;  %v9361_v19 = vld [vmem:[#allocation8 + $0x9a4] ss:$16 sps:$4 sm:$0xff]  }
 0x3b6   :  { %7798 = vmatmul.mubr.msk.bf16.vlgmr.msra.gmra.mrb[8].mxu0 %vm9959_vm3, %v10298_v13 }
 0x3b7   :  { %7822 = vmatmul.mubr.msk.bf16.vlgmr.msra.gmra.mrb[8].mxu1 %vm9959_vm3, %v10298_v13  ;;  %7801 = vmatprep.mubr.msk.bf16.mxu0 %vm9988_vm5, %v10361_v12  ;;  %v9301_v13 = vld [vmem:[#allocation8 + $0x864] ss:$16 sps:$4 sm:$0xff]  }
 0x3b8   :  { %7825 = vmatprep.mubr.msk.bf16.mxu1 %vm9988_vm5, %v10361_v12  ;;  %6211 = vmatpush1.bf16.msra.mxu0 %v9281_v34  ;;  %v9304_v12 = vld [vmem:[#allocation8 + $0x86c] ss:$16 sps:$4 sm:$0xff]  }
 0x3b9   :  { %6317 = vmatpush1.bf16.msra.mxu1 %v9284_v38  ;;  %6212 = vmatprep.subr.bf16.mxu0 %v9289_v27  ;;  %v9364_v34 = vld [vmem:[#allocation8 + $0x9ac] ss:$16 sps:$4 sm:$0xff]   ;;  %v9359_v38 = vld [vmem:[#allocation8 + $0x9a0] ss:$16 sps:$4 sm:$0xff]   ;;  %v9362_v27 = vld [vmem:[#allocation8 + $0x9a8] ss:$16 sps:$4 sm:$0xff]  }
 0x3ba   :  { %6318 = vmatprep.subr.bf16.mxu1 %v9292_v25  ;;  %v9367_v25 = vld [vmem:[#allocation8 + $0x9c4] ss:$16 sps:$4 sm:$0xff]  }
 0x3bc   :  { %6213 = vmatpush1.bf16.msra.mxu0 %v9287_v7  ;;  %v9370_v7 = vld [vmem:[#allocation8 + $0x9cc] ss:$16 sps:$4 sm:$0xff]  }
 0x3bd   :  { %6319 = vmatpush1.bf16.msra.mxu1 %v9290_v63  ;;  %6214 = vmatprep.subr.bf16.mxu0 %v9295_v24  ;;  %v9365_v63 = vld [vmem:[#allocation8 + $0x9c0] ss:$16 sps:$4 sm:$0xff]   ;;  %v9368_v24 = vld [vmem:[#allocation8 + $0x9c8] ss:$16 sps:$4 sm:$0xff]  }
 0x3be   :  { %7804 = vmatmul.mubr.msk.bf16.gmra.mrb[12].mxu0 %vm9988_vm5, %v10371_v33  ;;  %6320 = vmatprep.subr.bf16.mxu1 %v9298_v49  ;;  %v9373_v49 = vld [vmem:[#allocation8 + $0x9e4] ss:$16 sps:$4 sm:$0xff]  }
 0x3bf   :  { %7828 = vmatmul.mubr.msk.bf16.gmra.mrb[12].mxu1 %vm9988_vm5, %v10371_v33  ;;  %7959 = vmatprep.mubr.msk.bf16.mxu0 %vm10071_vm8, %v10385_v1  ;;  %v9313_v33 = vld [vmem:[#allocation8 + $0x8a4] ss:$16 sps:$4 sm:$0xff]  }
 0x3c0   :  { %6215 = vmatpush1.bf16.msra.mxu0 %v9293_v42  ;;  %7983 = vmatprep.mubr.msk.bf16.mxu1 %vm10071_vm8, %v10385_v1  ;;  %v9314_v1 = vld [vmem:[#allocation8 + $0x8a8] ss:$16 sps:$4 sm:$0xff]   ;;  %v9376_v42 = vld [vmem:[#allocation8 + $0x9ec] ss:$16 sps:$4 sm:$0xff]  }
 0x3c1   :  { %6321 = vmatpush1.bf16.msra.mxu1 %v9296_v57  ;;  %6216 = vmatprep.subr.bf16.mxu0 %v9301_v13  ;;  %v9371_v57 = vld [vmem:[#allocation8 + $0x9e0] ss:$16 sps:$4 sm:$0xff]   ;;  %v9374_v13 = vld [vmem:[#allocation8 + $0x9e8] ss:$16 sps:$4 sm:$0xff]  }
 0x3c2   :  { %6322 = vmatprep.subr.bf16.mxu1 %v9304_v12  ;;  %v9379_v12 = vld [vmem:[#allocation8 + $0xa04] ss:$16 sps:$4 sm:$0xff]  }
 0x3c4   :  { %6217 = vmatpush1.bf16.msra.mxu0 %v9299_v11  ;;  %v9382_v11 = vld [vmem:[#allocation8 + $0xa0c] ss:$16 sps:$4 sm:$0xff]  }
 0x3c5   :  { %6323 = vmatpush1.bf16.msra.mxu1 %v9302_v28  ;;  %6218 = vmatprep.subr.bf16.mxu0 %v9307_v32  ;;  %v9377_v28 = vld [vmem:[#allocation8 + $0xa00] ss:$16 sps:$4 sm:$0xff]   ;;  %v9380_v32 = vld [vmem:[#allocation8 + $0xa08] ss:$16 sps:$4 sm:$0xff]  }
 0x3c6   :  { %6324 = vmatprep.subr.bf16.mxu1 %v9310_v21  ;;  %v9385_v21 = vld [vmem:[#allocation8 + $0xa24] ss:$16 sps:$4 sm:$0xff]  }
 0x3c8   :  { %6219 = vmatpush1.bf16.msra.mxu0 %v9305_v55  ;;  %v9388_v55 = vld [vmem:[#allocation8 + $0xa2c] ss:$16 sps:$4 sm:$0xff]  }
 0x3c9   :  { %6325 = vmatpush1.bf16.msra.mxu1 %v9308_v40  ;;  %6220 = vmatprep.subr.bf16.mxu0 %v9313_v33  ;;  %v9383_v40 = vld [vmem:[#allocation8 + $0xa20] ss:$16 sps:$4 sm:$0xff]   ;;  %v9386_v33 = vld [vmem:[#allocation8 + $0xa28] ss:$16 sps:$4 sm:$0xff]  }
 0x3ca   :  { %6326 = vmatprep.subr.bf16.mxu1 %v9316_v60  ;;  %v9391_v60 = vld [vmem:[#allocation8 + $0xa44] ss:$16 sps:$4 sm:$0xff]  }
 0x3cc   :  { %6221 = vmatpush1.bf16.msra.mxu0 %v9311_v23  ;;  %v9394_v23 = vld [vmem:[#allocation8 + $0xa4c] ss:$16 sps:$4 sm:$0xff]  }
 0x3cd   :  { %6327 = vmatpush1.bf16.msra.mxu1 %v9314_v1  ;;  %6222 = vmatprep.subr.bf16.mxu0 %v9319_v47  ;;  %v9389_v1 = vld [vmem:[#allocation8 + $0xa40] ss:$16 sps:$4 sm:$0xff]   ;;  %v9397_v47 = vld [vmem:[#allocation8 + $0xa64] ss:$16 sps:$4 sm:$0xff]  }
 0x3ce   :  { %6328 = vmatprep.subr.bf16.mxu1 %v9322_v50  ;;  %v9400_v50 = vld [vmem:[#allocation8 + $0xa6c] ss:$16 sps:$4 sm:$0xff]  }
 0x3d0   :  { %6223 = vmatpush1.bf16.msra.mxu0 %v9317_v51  ;;  %v9398_v51 = vld [vmem:[#allocation8 + $0xa68] ss:$16 sps:$4 sm:$0xff]  }
 0x3d1   :  { %6329 = vmatpush1.bf16.msra.mxu1 %v9320_v39  ;;  %6224 = vmatprep.subr.bf16.mxu0 %v9325_v44  ;;  %v9403_v39 = vld [vmem:[#allocation8 + $0xa84] ss:$16 sps:$4 sm:$0xff]   ;;  %v9406_v44 = vld [vmem:[#allocation8 + $0xa8c] ss:$16 sps:$4 sm:$0xff]  }
 0x3d2   :  { %6330 = vmatprep.subr.bf16.mxu1 %v9328_v48  ;;  %v9401_v48 = vld [vmem:[#allocation8 + $0xa80] ss:$16 sps:$4 sm:$0xff]  }
 0x3d4   :  { %6225 = vmatpush1.bf16.msra.mxu0 %v9323_v59  ;;  %v9409_v59 = vld [vmem:[#allocation8 + $0xaa4] ss:$16 sps:$4 sm:$0xff]  }
 0x3d5   :  { %6331 = vmatpush1.bf16.msra.mxu1 %v9326_v0  ;;  %6226 = vmatprep.subr.bf16.mxu0 %v9331_v30  ;;  %v9412_v0 = vld [vmem:[#allocation8 + $0xaac] ss:$16 sps:$4 sm:$0xff]   ;;  %v9407_v30 = vld [vmem:[#allocation8 + $0xaa0] ss:$16 sps:$4 sm:$0xff]  }
 0x3d6   :  { %6332 = vmatprep.subr.bf16.mxu1 %v9334_v43  ;;  %v9415_v43 = vld [vmem:[#allocation8 + $0xac4] ss:$16 sps:$4 sm:$0xff]  }
 0x3d8   :  { %6227 = vmatpush1.bf16.msra.mxu0 %v9329_v5  ;;  %v9418_v5 = vld [vmem:[#allocation8 + $0xacc] ss:$16 sps:$4 sm:$0xff]  }
 0x3d9   :  { %6333 = vmatpush1.bf16.msra.mxu1 %v9332_v2  ;;  %6228 = vmatprep.subr.bf16.mxu0 %v9337_v18  ;;  %v9413_v2 = vld [vmem:[#allocation8 + $0xac0] ss:$16 sps:$4 sm:$0xff]   ;;  %v9416_v18 = vld [vmem:[#allocation8 + $0xac8] ss:$16 sps:$4 sm:$0xff]  }
 0x3da   :  { %6334 = vmatprep.subr.bf16.mxu1 %v9340_v37  ;;  %v9421_v37 = vld [vmem:[#allocation8 + $0xae4] ss:$16 sps:$4 sm:$0xff]  }
 0x3dc   :  { %6229 = vmatpush1.bf16.msra.mxu0 %v9335_v31  ;;  %v9424_v31 = vld [vmem:[#allocation8 + $0xaec] ss:$16 sps:$4 sm:$0xff]  }
 0x3dd   :  { %6335 = vmatpush1.bf16.msra.mxu1 %v9338_v26  ;;  %6230 = vmatprep.subr.bf16.mxu0 %v9343_v22  ;;  %v9419_v26 = vld [vmem:[#allocation8 + $0xae0] ss:$16 sps:$4 sm:$0xff]   ;;  %v9422_v22 = vld [vmem:[#allocation8 + $0xae8] ss:$16 sps:$4 sm:$0xff]  }
 0x3de   :  { %6336 = vmatprep.subr.bf16.mxu1 %v9346_v29  ;;  %v9427_v29 = vld [vmem:[#allocation8 + $0xb04] ss:$16 sps:$4 sm:$0xff]  }
 0x3e0   :  { %6231 = vmatpush1.bf16.msra.mxu0 %v9341_v62  ;;  %v9430_v62 = vld [vmem:[#allocation8 + $0xb0c] ss:$16 sps:$4 sm:$0xff]  }
 0x3e1   :  { %6337 = vmatpush1.bf16.msra.mxu1 %v9344_v17  ;;  %6232 = vmatprep.subr.bf16.mxu0 %v9349_v6  ;;  %v9425_v17 = vld [vmem:[#allocation8 + $0xb00] ss:$16 sps:$4 sm:$0xff]   ;;  %v9428_v6 = vld [vmem:[#allocation8 + $0xb08] ss:$16 sps:$4 sm:$0xff]  }
 0x3e2   :  { %6338 = vmatprep.subr.bf16.mxu1 %v9352_v16  ;;  %v9433_v16 = vld [vmem:[#allocation8 + $0xb24] ss:$16 sps:$4 sm:$0xff]  }
 0x3e4   :  { %6233 = vmatpush1.bf16.msra.mxu0 %v9347_v45  ;;  %v9436_v45 = vld [vmem:[#allocation8 + $0xb2c] ss:$16 sps:$4 sm:$0xff]  }
 0x3e5   :  { %6339 = vmatpush1.bf16.msra.mxu1 %v9350_v53  ;;  %6234 = vmatprep.subr.bf16.mxu0 %v9355_v35  ;;  %v9431_v53 = vld [vmem:[#allocation8 + $0xb20] ss:$16 sps:$4 sm:$0xff]   ;;  %v9434_v35 = vld [vmem:[#allocation8 + $0xb28] ss:$16 sps:$4 sm:$0xff]  }
 0x3e6   :  { %6340 = vmatprep.subr.bf16.mxu1 %v9358_v20  ;;  %v9439_v20 = vld [vmem:[#allocation8 + $0xb44] ss:$16 sps:$4 sm:$0xff]  }
 0x3e8   :  { %6235 = vmatpush1.bf16.msra.mxu0 %v9353_v52  ;;  %v9442_v52 = vld [vmem:[#allocation8 + $0xb4c] ss:$16 sps:$4 sm:$0xff]  }
 0x3e9   :  { %6341 = vmatpush1.bf16.msra.mxu1 %v9356_v46  ;;  %6236 = vmatprep.subr.bf16.mxu0 %v9361_v19  ;;  %v9437_v46 = vld [vmem:[#allocation8 + $0xb40] ss:$16 sps:$4 sm:$0xff]   ;;  %v9440_v19 = vld [vmem:[#allocation8 + $0xb48] ss:$16 sps:$4 sm:$0xff]  }
 0x3ea   :  { %6342 = vmatprep.subr.bf16.mxu1 %v9364_v34  ;;  %v9445_v34 = vld [vmem:[#allocation8 + $0xb64] ss:$16 sps:$4 sm:$0xff]  }
 0x3ec   :  { %6237 = vmatpush1.bf16.msra.mxu0 %v9359_v38  ;;  %v9448_v38 = vld [vmem:[#allocation8 + $0xb6c] ss:$16 sps:$4 sm:$0xff]  }
 0x3ed   :  { %6343 = vmatpush1.bf16.msra.mxu1 %v9362_v27  ;;  %6238 = vmatprep.subr.bf16.mxu0 %v9367_v25  ;;  %v9443_v27 = vld [vmem:[#allocation8 + $0xb60] ss:$16 sps:$4 sm:$0xff]   ;;  %v9446_v25 = vld [vmem:[#allocation8 + $0xb68] ss:$16 sps:$4 sm:$0xff]  }
 0x3ee   :  { %6344 = vmatprep.subr.bf16.mxu1 %v9370_v7  ;;  %v9451_v7 = vld [vmem:[#allocation8 + $0xb84] ss:$16 sps:$4 sm:$0xff]  }
 0x3f0   :  { %6239 = vmatpush1.bf16.msra.mxu0 %v9365_v63  ;;  %v9454_v63 = vld [vmem:[#allocation8 + $0xb8c] ss:$16 sps:$4 sm:$0xff]  }
 0x3f1   :  { %6345 = vmatpush1.bf16.msra.mxu1 %v9368_v24  ;;  %6240 = vmatprep.subr.bf16.mxu0 %v9373_v49  ;;  %v9449_v24 = vld [vmem:[#allocation8 + $0xb80] ss:$16 sps:$4 sm:$0xff]   ;;  %v9452_v49 = vld [vmem:[#allocation8 + $0xb88] ss:$16 sps:$4 sm:$0xff]  }
 0x3f2   :  { %6346 = vmatprep.subr.bf16.mxu1 %v9376_v42  ;;  %v9457_v42 = vld [vmem:[#allocation8 + $0xba4] ss:$16 sps:$4 sm:$0xff]  }
 0x3f4   :  { %6241 = vmatpush1.bf16.msra.mxu0 %v9371_v57  ;;  %v9460_v57 = vld [vmem:[#allocation8 + $0xbac] ss:$16 sps:$4 sm:$0xff]  }
 0x3f5   :  { %6347 = vmatpush1.bf16.msra.mxu1 %v9374_v13  ;;  %6263 = vmatprep.subr.bf16.mxu0 %v9379_v12  ;;  %v9455_v13 = vld [vmem:[#allocation8 + $0xba0] ss:$16 sps:$4 sm:$0xff]   ;;  %v9458_v12 = vld [vmem:[#allocation8 + $0xba8] ss:$16 sps:$4 sm:$0xff]  }
 0x3f6   :  { %6369 = vmatprep.subr.bf16.mxu1 %v9382_v11  ;;  %v9463_v11 = vld [vmem:[#allocation8 + $0xbc4] ss:$16 sps:$4 sm:$0xff]  }
 0x3f7   :  { %7962 = vmatmul.mubr.msk.bf16.vlgmr.msra.gmra.mrb[8].mxu0 %vm10071_vm8, %v10270_v14 }
 0x3f8   :  { %7986 = vmatmul.mubr.msk.bf16.vlgmr.msra.gmra.mrb[8].mxu1 %vm10071_vm8, %v10270_v14  ;;  %7965 = vmatprep.mubr.msk.bf16.mxu0 %vm10081_vm10, %v10387_v61  ;;  %v9392_v14 = vld [vmem:[#allocation8 + $0xa48] ss:$16 sps:$4 sm:$0xff]  }
 0x3f9   :  { %6264 = vmatpush1.bf16.msra.mxu0 %v9377_v28  ;;  %7989 = vmatprep.mubr.msk.bf16.mxu1 %vm10081_vm10, %v10387_v61  ;;  %v9395_v61 = vld [vmem:[#allocation8 + $0xa60] ss:$16 sps:$4 sm:$0xff]   ;;  %v9466_v28 = vld [vmem:[#allocation8 + $0xbcc] ss:$16 sps:$4 sm:$0xff]  }
 0x3fa   :  { %6370 = vmatpush1.bf16.msra.mxu1 %v9380_v32  ;;  %6265 = vmatprep.subr.bf16.mxu0 %v9385_v21  ;;  %v9461_v32 = vld [vmem:[#allocation8 + $0xbc0] ss:$16 sps:$4 sm:$0xff]   ;;  %v9464_v21 = vld [vmem:[#allocation8 + $0xbc8] ss:$16 sps:$4 sm:$0xff]  }
 0x3fb   :  { %6371 = vmatprep.subr.bf16.mxu1 %v9388_v55  ;;  %v9469_v55 = vld [vmem:[#allocation8 + $0xbe4] ss:$16 sps:$4 sm:$0xff]  }
 0x3fd   :  { %6266 = vmatpush1.bf16.msra.mxu0 %v9383_v40  ;;  %v9472_v40 = vld [vmem:[#allocation8 + $0xbec] ss:$16 sps:$4 sm:$0xff]  }
 0x3fe   :  { %6372 = vmatpush1.bf16.msra.mxu1 %v9386_v33  ;;  %6267 = vmatprep.subr.bf16.mxu0 %v9391_v60  ;;  %v6552_v33 = vld [vmem:[%s10823_s5 + $0x80] sm:$0xff]  ;;  %v6553_v60 = vld [vmem:[%s10823_s5 + $0x88] sm:$0xff] }
 0x3ff   :  { %7968 = vmatmul.mubr.msk.bf16.gmra.mrb[12].mxu0 %vm10081_vm10, %v10407_v56  ;;  %6373 = vmatprep.subr.bf16.mxu1 %v9394_v23  ;;  %v6584_v23 = vld [vmem:[%s10823_s5 + $0x180] sm:$0xff] }
 0x400   :  { %7992 = vmatmul.mubr.msk.bf16.gmra.mrb[12].mxu1 %vm10081_vm10, %v10407_v56  ;;  %7971 = vmatprep.mubr.msk.bf16.mxu0 %vm10071_vm8, %v10409_v4  ;;  %v9404_v56 = vld [vmem:[#allocation8 + $0xa88] ss:$16 sps:$4 sm:$0xff]  }
 0x401   :  { %6268 = vmatpush1.bf16.msra.mxu0 %v9389_v1  ;;  %7995 = vmatprep.mubr.msk.bf16.mxu1 %vm10071_vm8, %v10409_v4  ;;  %v9410_v4 = vld [vmem:[#allocation8 + $0xaa8] ss:$16 sps:$4 sm:$0xff]  }
 0x402   :  { %6374 = vmatpush1.bf16.msra.mxu1 %v9392_v14  ;;  %6269 = vmatprep.subr.bf16.mxu0 %v9397_v47  ;;  %v6585_v1 = vld [vmem:[%s10823_s5 + $0x188] sm:$0xff]  ;;  %v9467_v14 = vld [vmem:[#allocation8 + $0xbe0] ss:$16 sps:$4 sm:$0xff]  }
 0x403   :  { %6375 = vmatprep.subr.bf16.mxu1 %v9400_v50  ;;  %v9470_v47 = vld [vmem:[#allocation8 + $0xbe8] ss:$16 sps:$4 sm:$0xff]   ;;  %v8082_v50 = vpack.c.bf16 %v6553_v60, %v6552_v33 }
 0x404   :  { %v6577_v33 = vld [vmem:[%s10823_s5 + $0x148] sm:$0xff] }
 0x405   :  { %6270 = vmatpush1.bf16.msra.mxu0 %v9395_v61  ;;  %v8114_v61 = vpack.c.bf16 %v6585_v1, %v6584_v23  ;;  %v6562_v23 = vld [vmem:[%s10823_s5 + $0xd0] sm:$0xff]  ;;  %v6563_v1 = vld [vmem:[%s10823_s5 + $0xd8] sm:$0xff] }
 0x406   :  { %6376 = vmatpush1.bf16.msra.mxu1 %v9398_v51  ;;  %6271 = vmatprep.subr.bf16.mxu0 %v9403_v39  ;;  %v6536_v51 = vld [vmem:[%s10823_s5] sm:$0xff]  ;;  %v6537_v39 = vld [vmem:[%s10823_s5 + $0x8] sm:$0xff] }
 0x407   :  { %6377 = vmatprep.subr.bf16.mxu1 %v9406_v44  ;;  %v6568_v44 = vld [vmem:[%s10823_s5 + $0x100] sm:$0xff] }
 0x409   :  { %6272 = vmatpush1.bf16.msra.mxu0 %v9401_v48  ;;  %v6569_v48 = vld [vmem:[%s10823_s5 + $0x108] sm:$0xff] }
 0x40a   :  { %6378 = vmatpush1.bf16.msra.mxu1 %v9404_v56  ;;  %6273 = vmatprep.subr.bf16.mxu0 %v9409_v59  ;;  %v8084_v56 = vpack.c.bf16 %v6537_v39, %v6536_v51  ;;  %v8116_v59 = vpack.c.bf16 %v6569_v48, %v6568_v44  ;;  %v6547_v51 = vld [vmem:[%s10823_s5 + $0x58] sm:$0xff]  ;;  %v6578_v48 = vld [vmem:[%s10823_s5 + $0x150] sm:$0xff] }
 0x40b   :  { %6379 = vmatprep.subr.bf16.mxu1 %v9412_v0 }
 0x40d   :  { %6274 = vmatpush1.bf16.msra.mxu0 %v9407_v30  ;;  %v6587_v30 = vld [vmem:[%s10823_s5 + $0x198] sm:$0xff] }
 0x40e   :  { %6380 = vmatpush1.bf16.msra.mxu1 %v9410_v4  ;;  %6275 = vmatprep.subr.bf16.mxu0 %v9415_v43 }
 0x40f   :  { %6381 = vmatprep.subr.bf16.mxu1 %v9418_v5  ;;  %v6570_v5 = vld [vmem:[%s10823_s5 + $0x110] sm:$0xff] }
 0x411   :  { %6276 = vmatpush1.bf16.msra.mxu0 %v9413_v2  ;;  %v6571_v2 = vld [vmem:[%s10823_s5 + $0x118] sm:$0xff] }
 0x412   :  { %6382 = vmatpush1.bf16.msra.mxu1 %v9416_v18  ;;  %6277 = vmatprep.subr.bf16.mxu0 %v9421_v37  ;;  %v8120_v18 = vpack.c.bf16 %v6571_v2, %v6570_v5  ;;  %v6556_v37 = vld [vmem:[%s10823_s5 + $0xa0] sm:$0xff]  ;;  %v6581_v2 = vld [vmem:[%s10823_s5 + $0x168] sm:$0xff] }
 0x413   :  { %6383 = vmatprep.subr.bf16.mxu1 %v9424_v31  ;;  %v6557_v31 = vld [vmem:[%s10823_s5 + $0xa8] sm:$0xff] }
 0x415   :  { %6278 = vmatpush1.bf16.msra.mxu0 %v9419_v26  ;;  %v6588_v26 = vld [vmem:[%s10823_s5 + $0x1a0] sm:$0xff] }
 0x416   :  { %6384 = vmatpush1.bf16.msra.mxu1 %v9422_v22  ;;  %6279 = vmatprep.subr.bf16.mxu0 %v9427_v29  ;;  %v8090_v22 = vpack.c.bf16 %v6557_v31, %v6556_v37  ;;  %v6589_v29 = vld [vmem:[%s10823_s5 + $0x1a8] sm:$0xff]  ;;  %v6567_v37 = vld [vmem:[%s10823_s5 + $0xf8] sm:$0xff] }
 0x417   :  { %6385 = vmatprep.subr.bf16.mxu1 %v9430_v62  ;;  %v6540_v62 = vld [vmem:[%s10823_s5 + $0x20] sm:$0xff] }
 0x419   :  { %6280 = vmatpush1.bf16.msra.mxu0 %v9425_v17  ;;  %v6541_v17 = vld [vmem:[%s10823_s5 + $0x28] sm:$0xff] }
 0x41a   :  { %6386 = vmatpush1.bf16.msra.mxu1 %v9428_v6  ;;  %6281 = vmatprep.subr.bf16.mxu0 %v9433_v16  ;;  %v8122_v6 = vpack.c.bf16 %v6589_v29, %v6588_v26  ;;  %v8092_v16 = vpack.c.bf16 %v6541_v17, %v6540_v62  ;;  %v6599_v29 = vld [vmem:[%s10823_s5 + $0x1f8] sm:$0xff]  ;;  %v6550_v62 = vld [vmem:[%s10823_s5 + $0x70] sm:$0xff] }
 0x41b   :  { %6387 = vmatprep.subr.bf16.mxu1 %v9436_v45  ;;  %v6572_v45 = vld [vmem:[%s10823_s5 + $0x120] sm:$0xff] }
 0x41d   :  { %6282 = vmatpush1.bf16.msra.mxu0 %v9431_v53  ;;  %v6573_v53 = vld [vmem:[%s10823_s5 + $0x128] sm:$0xff] }
 0x41e   :  { %6388 = vmatpush1.bf16.msra.mxu1 %v9434_v35  ;;  %6283 = vmatprep.subr.bf16.mxu0 %v9439_v20  ;;  %v8124_v35 = vpack.c.bf16 %v6573_v53, %v6572_v45  ;;  %v6558_v20 = vld [vmem:[%s10823_s5 + $0xb0] sm:$0xff]  ;;  %v6583_v45 = vld [vmem:[%s10823_s5 + $0x178] sm:$0xff] }
 0x41f   :  { %6389 = vmatprep.subr.bf16.mxu1 %v9442_v52  ;;  %v6559_v52 = vld [vmem:[%s10823_s5 + $0xb8] sm:$0xff] }
 0x421   :  { %6284 = vmatpush1.bf16.msra.mxu0 %v9437_v46  ;;  %v6590_v46 = vld [vmem:[%s10823_s5 + $0x1b0] sm:$0xff] }
 0x422   :  { %6390 = vmatpush1.bf16.msra.mxu1 %v9440_v19  ;;  %6285 = vmatprep.subr.bf16.mxu0 %v9445_v34  ;;  %v8094_v19 = vpack.c.bf16 %v6559_v52, %v6558_v20  ;;  %v6591_v34 = vld [vmem:[%s10823_s5 + $0x1b8] sm:$0xff]  ;;  %v3359_v20 = vld [vmem:[#allocation10] sm:$0xf] }
 0x423   :  { %6391 = vmatprep.subr.bf16.mxu1 %v9448_v38  ;;  %v6542_v38 = vld [vmem:[%s10823_s5 + $0x30] sm:$0xff]  ;;  %v6442_v52 = vrot.slane %v3359_v20, %v10160_v3 }
 0x425   :  { %6286 = vmatpush1.bf16.msra.mxu0 %v9443_v27  ;;  %v6543_v27 = vld [vmem:[%s10823_s5 + $0x38] sm:$0xff] }
 0x426   :  { %6392 = vmatpush1.bf16.msra.mxu1 %v9446_v25  ;;  %6287 = vmatprep.subr.bf16.mxu0 %v9451_v7  ;;  %v8126_v25 = vpack.c.bf16 %v6591_v34, %v6590_v46  ;;  %v8096_v7 = vpack.c.bf16 %v6543_v27, %v6542_v38  ;;  %v6446_v34 = vrot.slane %v3359_v20, %v10166_v36 }
 0x427   :  { %6393 = vmatprep.subr.bf16.mxu1 %v9454_v63  ;;  %v6574_v63 = vld [vmem:[%s10823_s5 + $0x130] sm:$0xff] }
 0x429   :  { %6288 = vmatpush1.bf16.msra.mxu0 %v9449_v24  ;;  %v6575_v24 = vld [vmem:[%s10823_s5 + $0x138] sm:$0xff] }
 0x42a   :  { %6394 = vmatpush1.bf16.msra.mxu1 %v9452_v49  ;;  %6289 = vmatprep.subr.bf16.mxu0 %v9457_v42  ;;  %v8128_v49 = vpack.c.bf16 %v6575_v24, %v6574_v63  ;;  %v6560_v42 = vld [vmem:[%s10823_s5 + $0xc0] sm:$0xff] }
 0x42b   :  { %6395 = vmatprep.subr.bf16.mxu1 %v9460_v57  ;;  %v6561_v57 = vld [vmem:[%s10823_s5 + $0xc8] sm:$0xff] }
 0x42d   :  { %6290 = vmatpush1.bf16.msra.mxu0 %v9455_v13  ;;  %v6592_v13 = vld [vmem:[%s10823_s5 + $0x1c0] sm:$0xff] }
 0x42e   :  { %6396 = vmatpush1.bf16.msra.mxu1 %v9458_v12  ;;  %6291 = vmatprep.subr.bf16.mxu0 %v9463_v11  ;;  %v8098_v12 = vpack.c.bf16 %v6561_v57, %v6560_v42  ;;  %v6593_v11 = vld [vmem:[%s10823_s5 + $0x1c8] sm:$0xff] }
 0x42f   :  { %6397 = vmatprep.subr.bf16.mxu1 %v9466_v28  ;;  %v6544_v28 = vld [vmem:[%s10823_s5 + $0x40] sm:$0xff] }
 0x431   :  { %6292 = vmatpush1.bf16.msra.mxu0 %v9461_v32  ;;  %v6545_v32 = vld [vmem:[%s10823_s5 + $0x48] sm:$0xff] }
 0x432   :  { %6398 = vmatpush1.bf16.msra.mxu1 %v9464_v21  ;;  %6293 = vmatprep.subr.bf16.mxu0 %v9469_v55  ;;  %v8130_v21 = vpack.c.bf16 %v6593_v11, %v6592_v13  ;;  %v8100_v55 = vpack.c.bf16 %v6545_v32, %v6544_v28 }
 0x433   :  { %6399 = vmatprep.subr.bf16.mxu1 %v9472_v40  ;;  %v6576_v40 = vld [vmem:[%s10823_s5 + $0x140] sm:$0xff] }
 0x434   :  { %v8132_v60 = vpack.c.bf16 %v6577_v33, %v6576_v40 }
 0x435   :  { %6294 = vmatpush1.bf16.msra.mxu0 %v9467_v14  ;;  %v6594_v14 = vld [vmem:[%s10823_s5 + $0x1d0] sm:$0xff] }
 0x436   :  { %6400 = vmatpush1.bf16.msra.mxu1 %v9470_v47  ;;  %8083 = vmatprep.subr.bf16.mxu0 %v8082_v50  ;;  %v8102_v47 = vpack.c.bf16 %v6563_v1, %v6562_v23  ;;  %v6595_v50 = vld [vmem:[%s10823_s5 + $0x1d8] sm:$0xff] }
 0x437   :  { %8115 = vmatprep.subr.bf16.mxu1 %v8114_v61  ;;  %v6546_v61 = vld [vmem:[%s10823_s5 + $0x50] sm:$0xff]  ;;  %v8134_v39 = vpack.c.bf16 %v6595_v50, %v6594_v14 }
 0x438   :  { %7974 = vmatmul.mubr.msk.bf16.vlgmr.msra.gmra.mrb[8].mxu0 %vm10071_vm8, %v10272_v54  ;;  %v8104_v44 = vpack.c.bf16 %v6547_v51, %v6546_v61 }
 0x439   :  { %7998 = vmatmul.mubr.msk.bf16.vlgmr.msra.gmra.mrb[8].mxu1 %vm10071_vm8, %v10272_v54  ;;  %7977 = vmatprep.mubr.msk.bf16.mxu0 %vm10081_vm10, %v10417_v58  ;;  %v6555_v54 = vld [vmem:[%s10823_s5 + $0x98] sm:$0xff] }
 0x43a   :  { %8001 = vmatprep.mubr.msk.bf16.mxu1 %vm10081_vm10, %v10417_v58  ;;  %8085 = vmatpush3.bf16.msra.mxu0 %v8084_v56  ;;  %v6586_v58 = vld [vmem:[%s10823_s5 + $0x190] sm:$0xff]  ;;  %v8086_v0 = vpack.c.bf16 %v6555_v54, %v6554_v9  ;;  %v6579_v56 = vld [vmem:[%s10823_s5 + $0x158] sm:$0xff]  ;;  %v6565_v54 = vld [vmem:[%s10823_s5 + $0xe8] sm:$0xff] }
 0x43b   :  { %8117 = vmatpush3.bf16.msra.mxu1 %v8116_v59  ;;  %v8118_v4 = vpack.c.bf16 %v6587_v30, %v6586_v58  ;;  %v6564_v59 = vld [vmem:[%s10823_s5 + $0xe0] sm:$0xff]  ;;  %v8136_v9 = vpack.c.bf16 %v6579_v56, %v6578_v48 }
 0x43c   :  { %8087 = vmatprep.subr.bf16.mxu0 %v8086_v0  ;;  %v6596_v58 = vld [vmem:[%s10823_s5 + $0x1e0] sm:$0xff]  ;;  %v6597_v0 = vld [vmem:[%s10823_s5 + $0x1e8] sm:$0xff]  ;;  %v8106_v30 = vpack.c.bf16 %v6565_v54, %v6564_v59 }
 0x43d   :  { %8119 = vmatprep.subr.bf16.mxu1 %v8118_v4  ;;  %v6549_v4 = vld [vmem:[%s10823_s5 + $0x68] sm:$0xff] }
 0x43f   :  { %8121 = vmatpush3.bf16.msra.mxu1 %v8120_v18  ;;  %v6566_v18 = vld [vmem:[%s10823_s5 + $0xf0] sm:$0xff] }
 0x440   :  { %7980 = vmatmul.mubr.msk.bf16.gmra.mrb[12].mxu0 %vm10081_vm10, %v10427_v41  ;;  %8123 = vmatprep.subr.bf16.mxu1 %v8122_v6  ;;  %v8110_v26 = vpack.c.bf16 %v6567_v37, %v6566_v18  ;;  %v6551_v6 = vld [vmem:[%s10823_s5 + $0x78] sm:$0xff] }
 0x441   :  { %8004 = vmatmul.mubr.msk.bf16.gmra.mrb[12].mxu1 %vm10081_vm10, %v10427_v41  ;;  %v6539_v41 = vld [vmem:[%s10823_s5 + $0x18] sm:$0xff]  ;;  %v8112_v53 = vpack.c.bf16 %v6551_v6, %v6550_v62 }
 0x442   :  { %v8088_v43 = vpack.c.bf16 %v6539_v41, %v6538_v15  ;;  %v8138_v15 = vpack.c.bf16 %v6597_v0, %v6596_v58  ;;  %v6548_v41 = vld [vmem:[%s10823_s5 + $0x60] sm:$0xff] }
 0x443   :  { %8125 = vmatpush3.bf16.msra.mxu1 %v8124_v35  ;;  %v8108_v5 = vpack.c.bf16 %v6549_v4, %v6548_v41 }
 0x444   :  { %8089 = vmatpush3.bf16.msra.mxu0 %v8088_v43  ;;  %8127 = vmatprep.subr.bf16.mxu1 %v8126_v25  ;;  %v6580_v43 = vld [vmem:[%s10823_s5 + $0x160] sm:$0xff]  ;;  %v6454_v25 = vrot.slane %v3359_v20, %v10169_v10 }
 0x445   :  { %8091 = vmatprep.subr.bf16.mxu0 %v8090_v22  ;;  %v8140_v31 = vpack.c.bf16 %v6581_v2, %v6580_v43  ;;  %v6598_v22 = vld [vmem:[%s10823_s5 + $0x1f0] sm:$0xff] }
 0x446   :  { %v8142_v17 = vpack.c.bf16 %v6599_v29, %v6598_v22 }
 0x447   :  { %8129 = vmatpush3.bf16.msra.mxu1 %v8128_v49 }
 0x448   :  { %8093 = vmatpush3.bf16.msra.mxu0 %v8092_v16  ;;  %8131 = vmatprep.subr.bf16.mxu1 %v8130_v21  ;;  %v6582_v16 = vld [vmem:[%s10823_s5 + $0x170] sm:$0xff]  ;;  %s9745_s5 = smov [#allocation16]  }
 0x449   :  { %8095 = vmatprep.subr.bf16.mxu0 %v8094_v19  ;;  %v8144_v35 = vpack.c.bf16 %v6583_v45, %v6582_v16  ;;  %v6450_v19 = vrot.slane %v3359_v20, %v10163_v8  ;;  %s7029_s11 = sshll.u32 %s9745_s5, 4  ;;  %s7030_s11 = int_to_ptr.vmem [resolvable:$true] %s7029_s11 }
 0x44a   :  { %s9697_s12 = scalar_lea.vmem %s7030_s11, 2048  ;;  %p9702_p9 = scmp.lt.s32.totalorder %s7030_s11, %s7030_s11 }
 0x44b   :  { %8133 = vmatpush3.bf16.msra.mxu1 %v8132_v60  ;;  %p9698_p8 = scmp.ne.s32.totalorder %s7030_s11, %s9697_s12  ;;  %p9703_p10 = scmp.lt.s32.totalorder %s9697_s12, %s9697_s12 }
 0x44c   :  { %8097 = vmatpush3.bf16.msra.mxu0 %v8096_v7  ;;  %8135 = vmatprep.subr.bf16.mxu1 %v8134_v39 }
 0x44d   :  { %8099 = vmatprep.subr.bf16.mxu0 %v8098_v12  ;;  %p9704_p11 = por %p9703_p10, %p9702_p9 }
 0x44f   :  { %8137 = vmatpush3.bf16.msra.mxu1 %v8136_v9  ;;  %p9705_p12 = pnand %p9704_p11, %p9698_p8 }
 0x450   :  { %8101 = vmatpush3.bf16.msra.mxu0 %v8100_v55  ;;  %8139 = vmatprep.subr.bf16.mxu1 %v8138_v15 }
 0x451   :  { %8103 = vmatprep.subr.bf16.mxu0 %v8102_v47 }
 0x453   :  { %8141 = vmatpush3.bf16.msra.mxu1 %v8140_v31 }
 0x454   :  { %8105 = vmatpush3.bf16.msra.mxu0 %v8104_v44  ;;  %8143 = vmatprep.subr.bf16.mxu1 %v8142_v17 }
 0x455   :  { %8107 = vmatprep.subr.bf16.mxu0 %v8106_v30 }
 0x457   :  { %8145 = vmatpush3.bf16.msra.mxu1 %v8144_v35 }
 0x458   :  { %8109 = vmatpush3.bf16.msra.mxu0 %v8108_v5 }
 0x459   :  { %8111 = vmatprep.subr.bf16.mxu0 %v8110_v26 }
 0x45c   :  { %8113 = vmatpush3.bf16.msra.mxu0 %v8112_v53 }
 0x50b   :  { %v6297_v46 = vpop.f32.mrb[8].mxu0 }
 0x50c   :  { %v6403_v38 = vpop.f32.mrb[8].mxu1  ;;  %v6299_v27 = vpop.f32.mrb[9].mxu0  ;;  %v10727_v24 = vadd.f32 %v6442_v52, %v6297_v46 }
 0x50d   :  { %v6405_v7 = vpop.f32.mrb[9].mxu1  ;;  %v6301_v63 = vpop.f32.mrb[10].mxu0  ;;  %v10731_v13 = vadd.f32 %v6450_v19, %v6403_v38  ;;  %v10733_v12 = vadd.f32 %v6446_v34, %v6299_v27 }
 0x50e   :  { %v10729_v49 = vadd.f32 %v6442_v52, %v6301_v63  ;;  %v6407_v42 = vpop.f32.mrb[10].mxu1  ;;  %v6303_v57 = vpop.f32.mrb[11].mxu0  ;;  %v10739_v21 = vadd.f32 %v6454_v25, %v6405_v7 }
 0x50f   :  { %v10735_v11 = vadd.f32 %v6450_v19, %v6407_v42  ;;  %v10737_v28 = vadd.f32 %v6446_v34, %v6303_v57  ;;  %v6409_v32 = vpop.f32.mrb[11].mxu1 }
 0x510   :  { %v6475_v55 = vadd.f32 %v10729_v49, %v10727_v24  ;;  %v10743_v40 = vadd.f32 %v6454_v25, %v6409_v32 }
 0x511   :  { %v6489_v33 = vadd.f32 %v10735_v11, %v10731_v13  ;;  %v6482_v60 = vadd.f32 %v10737_v28, %v10733_v12 }
 0x512   :  { %v6476_v23 = vrot.slane %v6475_v55, 4  ;;  %v6496_v1 = vadd.f32 %v10743_v40, %v10739_v21 }
 0x513   :  { %v6490_v14 = vrot.slane %v6489_v33, 4  ;;  %v6483_v47 = vrot.slane %v6482_v60, 4  ;;  %v6307_v50 = vpop.f32.mrb[12].mxu0 }
 0x514   :  { %v6497_v61 = vrot.slane %v6496_v1, 4  ;;  %v6413_v51 = vpop.f32.mrb[12].mxu1  ;;  %v6309_v39 = vpop.f32.mrb[13].mxu0  ;;  %v6477_v44 = vadd.f32 %v6476_v23, %v6475_v55  ;;  %v10751_v58 = vadd.f32 %v6442_v52, %v6307_v50 }
 0x515   :  { %v6484_v48 = vadd.f32 %v6483_v47, %v6482_v60  ;;  %v6415_v56 = vpop.f32.mrb[13].mxu1  ;;  %v6311_v59 = vpop.f32.mrb[14].mxu0  ;;  %v6491_v9 = vadd.f32 %v6490_v14, %v6489_v33  ;;  %v10755_v41 = vadd.f32 %v6450_v19, %v6413_v51  ;;  %v10757_v4 = vadd.f32 %v6446_v34, %v6309_v39 }
 0x516   :  { %v6498_v54 = vadd.f32 %v6497_v61, %v6496_v1  ;;  %v10753_v0 = vadd.f32 %v6442_v52, %v6311_v59  ;;  %v6417_v30 = vpop.f32.mrb[14].mxu1  ;;  %v6313_v15 = vpop.f32.mrb[15].mxu0  ;;  %v10763_v18 = vadd.f32 %v6454_v25, %v6415_v56  ;;  %v6478_v62 = vrot.slane %v6477_v44, 2 }
 0x517   :  { %v10759_v43 = vadd.f32 %v6450_v19, %v6417_v30  ;;  %v10761_v5 = vadd.f32 %v6446_v34, %v6313_v15  ;;  %v6419_v2 = vpop.f32.mrb[15].mxu1  ;;  %v6485_v26 = vrot.slane %v6484_v48, 2  ;;  %v6492_v45 = vrot.slane %v6491_v9, 2 }
 0x518   :  { %v6503_v37 = vadd.f32 %v10753_v0, %v10751_v58  ;;  %v10767_v31 = vadd.f32 %v6454_v25, %v6419_v2  ;;  %v6499_v17 = vrot.slane %v6498_v54, 2  ;;  %v6479_v38 = vadd.f32 %v6478_v62, %v6477_v44  ;;  %v6749_v62 = vld [vmem:[#allocation13 + $0x8] sm:$0xff] }
 0x519   :  { %v6517_v22 = vadd.f32 %v10759_v43, %v10755_v41  ;;  %v6510_v29 = vadd.f32 %v10761_v5, %v10757_v4  ;;  %v6486_v46 = vadd.f32 %v6485_v26, %v6484_v48  ;;  %v6493_v63 = vadd.f32 %v6492_v45, %v6491_v9  ;;  %6778 = vmatprep.subr.mxu0 %v6749_v62 }
 0x51a   :  { %v6504_v6 = vrot.slane %v6503_v37, 4  ;;  %v6524_v16 = vadd.f32 %v10767_v31, %v10763_v18  ;;  %v6500_v27 = vadd.f32 %v6499_v17, %v6498_v54  ;;  %v6480_v1 = vrot.slane %v6479_v38, 1  ;;  %v6751_v17 = vld [vmem:[#allocation13 + $0x18] sm:$0xff] }
 0x51b   :  { %v6518_v53 = vrot.slane %v6517_v22, 4  ;;  %v6511_v35 = vrot.slane %v6510_v29, 4  ;;  %v6487_v23 = vrot.slane %v6486_v46, 1  ;;  %v6494_v61 = vrot.slane %v6493_v63, 1  ;;  %6849 = vmatprep.subr.mxu1 %v6751_v17 }
 0x51c   :  { %v6505_v20 = vadd.f32 %v6504_v6, %v6503_v37  ;;  %v6525_v52 = vrot.slane %v6524_v16, 4  ;;  %v6501_v50 = vrot.slane %v6500_v27, 1  ;;  %v6481_v54 = vadd.f32 %v6480_v1, %v6479_v38  ;;  %v6748_v6 = vld [vmem:[#allocation13] sm:$0xff] }
 0x51d   :  { %v6519_v19 = vadd.f32 %v6518_v53, %v6517_v22  ;;  %v6512_v34 = vadd.f32 %v6511_v35, %v6510_v29  ;;  %v6488_v59 = vadd.f32 %v6487_v23, %v6486_v46  ;;  %v6495_v2 = vadd.f32 %v6494_v61, %v6493_v63 }
 0x51e   :  { %v6506_v25 = vrot.slane %v6505_v20, 2  ;;  %v6526_v7 = vadd.f32 %v6525_v52, %v6524_v16  ;;  %v6502_v30 = vadd.f32 %v6501_v50, %v6500_v27  ;;  %v6750_v16 = vld [vmem:[#allocation13 + $0x10] sm:$0xff]  ;;  %v9744_v45 = vmov 0.0  }
 0x51f   :  { %v6520_v42 = vrot.slane %v6519_v19, 2  ;;  %v6513_v57 = vrot.slane %v6512_v34, 2 }
 0x520   :  { %v6507_v32 = vadd.f32 %v6506_v25, %v6505_v20  ;;  %v6527_v55 = vrot.slane %v6526_v7, 2  ;;  %v8005_v20 = vld [vmem:[#allocation11] ss:$0 sm:$0xff] }
 0x521   :  { %v6521_v33 = vadd.f32 %v6520_v42, %v6519_v19  ;;  %v6514_v60 = vadd.f32 %v6513_v57, %v6512_v34 }
 0x522   :  { %v6508_v14 = vrot.slane %v6507_v32, 1  ;;  %v6528_v47 = vadd.f32 %v6527_v55, %v6526_v7  ;;  %v6752_v7 = vld [vmem:[#allocation14] sm:$0xf] }
 0x523   :  { %v6522_v51 = vrot.slane %v6521_v33, 1  ;;  %v6515_v39 = vrot.slane %v6514_v60, 1  ;;  %v6757_v63 = vrot.slane %v6752_v7, %v10160_v3  ;;  %v6765_v42 = vrot.slane %v6752_v7, %v10163_v8 }
 0x524   :  { %v6509_v48 = vadd.f32 %v6508_v14, %v6507_v32  ;;  %v6529_v44 = vrot.slane %v6528_v47, 1  ;;  %v6761_v57 = vrot.slane %v6752_v7, %v10166_v36  ;;  %v6769_v32 = vrot.slane %v6752_v7, %v10169_v10 }
 0x525   :  { %v6523_v56 = vadd.f32 %v6522_v51, %v6521_v33  ;;  %v6516_v9 = vadd.f32 %v6515_v39, %v6514_v60 }
 0x526   :  { %v6530_v15 = vadd.f32 %v6529_v44, %v6528_v47  ;;  %v6532_v22 = vsel %vm6531_vm11, %v6481_v54, %v6509_v48 }
 0x527   :  { %v6533_v37 = vsel %vm6531_vm11, %v6488_v59, %v6516_v9  ;;  %v6534_v29 = vsel %vm6531_vm11, %v6495_v2, %v6523_v56 }
 0x528   :  { %6671 = vmatprep.mubr.f32.mxu0 %v6533_v37  ;;  %v6535_v26 = vsel %vm6531_vm11, %v6502_v30, %v6530_v15 }
 0x529   :  { %6741 = vmatprep.mubr.f32.mxu1 %v6535_v26  ;;  %6672 = vmatmul.mubr.f32.vlgmr.msra.gmra.mrb[16].mxu0 %v6532_v22 }
 0x52a   :  { %6742 = vmatmul.mubr.f32.vlgmr.msra.gmra.mrb[16].mxu1 %v6534_v29  ;;  %6779 = vmatpush1.msra.mxu0 %v6748_v6 }
 0x52b   :  { %6850 = vmatpush1.msra.mxu1 %v6750_v16  ;;  %6842 = vmatprep.mubr.f32.mxu0 %v9744_v45 }
 0x52c   :  { %6913 = vmatprep.mubr.f32.mxu1 %v9744_v45 }
 0x5fc   :  { %v8044_v53 = vpop.f32.mrb[16].mxu0 }
 0x5fd   :  { %v8079_v35 = vpop.f32.mrb[16].mxu1  ;;  %v8045_v52 = vpop.f32.mrb[17].mxu0 }
 0x5fe   :  { %v8046_v46 = vadd.f32 %v8045_v52, %v8044_v53  ;;  %v8080_v19 = vpop.f32.mrb[17].mxu1 }
 0x5ff   :  { %v8081_v34 = vadd.f32 %v8080_v19, %v8079_v35  ;;  %v9505_v19 = vld [vmem:[#allocation2] sm:$0xff] }
 0x600   :  { %v6674_v38 = vadd.f32 %v8046_v46, %v8005_v20 }
 0x602   :  { %v6744_v27 = vadd.f32 %v8081_v34, %v6674_v38  ;;  %v9506_v38 = vld [vmem:[#allocation2 + $0x20] sm:$0xff] }
 0x604   :  { %v6747_v25 = vmax.f32 %v6744_v27, 0.0 }
 0x606   :  { %8006 = vmatmul.mubr.msk.f32.vlgmr.msra.gmra.mrb[18].mxu0 %vm6774_vm12, %v6747_v25  ;;  %8007 = vmatmul.mubr.msk.f32.vlgmr.msra.gmra.mrb[18].mxu1 %vm6774_vm12, %v6747_v25 }
 0x6d9   :  { %v6844_v55 = vpop.f32.mrb[18].mxu0  ;;  %v6915_v33 = vpop.f32.mrb[18].mxu1 }
 0x6da   :  { %v6845_v60 = vadd.f32 %v6844_v55, %v6757_v63  ;;  %v6916_v23 = vadd.f32 %v6915_v33, %v6765_v42  ;;  %v6846_v1 = vpop.f32.mrb[19].mxu0  ;;  %v6917_v14 = vpop.f32.mrb[19].mxu1 }
 0x6db   :  { %v6847_v47 = vadd.f32 %v6846_v1, %v6761_v57  ;;  %v6918_v50 = vadd.f32 %v6917_v14, %v6769_v32  ;;  %v9511_v57 = vld [vmem:[#allocation2 + $0x50] sm:$0xff] }
 0x6dc   :  { %v8008_v61 = vmul.f32 -1.442695, %v6845_v60  ;;  %v8010_v51 = vmul.f32 -1.442695, %v6916_v23  ;;  %v9512_v32 = vld [vmem:[#allocation2 + $0x70] sm:$0xff] }
 0x6dd   :  { %v8009_v39 = vmul.f32 -1.442695, %v6847_v47  ;;  %v8011_v48 = vmul.f32 -1.442695, %v6918_v50 }
 0x6de   :  { %9473 = vpow2.f32 %v8008_v61  ;;  %v9513_v61 = vld [vmem:[#allocation2 + $0x8] sm:$0xff] }
 0x6df   :  { %9475 = vpow2.f32 %v8010_v51 }
 0x6e0   :  { %9477 = vpow2.f32 %v8009_v39  ;;  %v9514_v39 = vld [vmem:[#allocation2 + $0x28] sm:$0xff] }
 0x6e1   :  { %9479 = vpow2.f32 %v8011_v48  ;;  %v9515_v48 = vld [vmem:[#allocation2 + $0x48] sm:$0xff] }
 0x6e8   :  { %v9474_v8 = vpop.eup %9473 }
 0x6e9   :  { %v9476_v44 = vpop.eup %9475  ;;  %v6932_v56 = vadd.f32 1.0, %v9474_v8  ;;  %v9516_v8 = vld [vmem:[#allocation2 + $0x68] sm:$0xff] }
 0x6ea   :  { %v9478_v10 = vpop.eup %9477  ;;  %v6934_v59 = vadd.f32 1.0, %v9476_v44  ;;  %v9517_v44 = vld [vmem:[#allocation2 + $0x18] sm:$0xff] }
 0x6eb   :  { %v9480_v9 = vpop.eup %9479  ;;  %9481 = vrcp.f32 %v6932_v56  ;;  %v6933_v54 = vadd.f32 1.0, %v9478_v10  ;;  %v9518_v56 = vld [vmem:[#allocation2 + $0x38] sm:$0xff] }
 0x6ec   :  { %9483 = vrcp.f32 %v6934_v59  ;;  %v6935_v30 = vadd.f32 1.0, %v9480_v9  ;;  %v9519_v59 = vld [vmem:[#allocation2 + $0x58] sm:$0xff] }
 0x6ed   :  { %9485 = vrcp.f32 %v6933_v54  ;;  %v9520_v9 = vld [vmem:[#allocation2 + $0x78] sm:$0xff] }
 0x6ee   :  { %9487 = vrcp.f32 %v6935_v30 }
 0x6f5   :  { %v9482_v15 = vpop.eup %9481 }
 0x6f6   :  { %v9484_v2 = vpop.eup %9483  ;;  %v6947_v37 = vrot.slane %v9482_v15, %v10160_v3  ;;  %v6987_v26 = vrot.slane %v9482_v15, %v10166_v36 }
 0x6f7   :  { %v6955_v22 = vrot.slane %v9484_v2, %v10160_v3  ;;  %v6995_v29 = vrot.slane %v9484_v2, %v10166_v36  ;;  %v9486_v62 = vpop.eup %9485 }
 0x6f8   :  { %v6960_v17 = vmul.f32 %v6947_v37, %v10727_v24  ;;  %v6964_v6 = vmul.f32 %v6947_v37, %v10729_v49  ;;  %v7000_v16 = vmul.f32 %v6987_v26, %v10751_v58  ;;  %v7004_v45 = vmul.f32 %v6987_v26, %v10753_v0  ;;  %v9488_v53 = vpop.eup %9487  ;;  %v9507_v24 = vld [vmem:[#allocation2 + $0x40] sm:$0xff]  ;;  %v9509_v58 = vld [vmem:[#allocation2 + $0x10] sm:$0xff] }
 0x6f9   :  { %v6962_v35 = vmul.f32 %v6955_v22, %v10731_v13  ;;  %v6966_v20 = vmul.f32 %v6955_v22, %v10735_v11  ;;  %v7002_v52 = vmul.f32 %v6995_v29, %v10755_v41  ;;  %v7006_v46 = vmul.f32 %v6995_v29, %v10759_v43  ;;  %v9508_v49 = vld [vmem:[#allocation2 + $0x60] sm:$0xff]  ;;  %v9510_v0 = vld [vmem:[#allocation2 + $0x30] sm:$0xff] }
 0x6fa   :  { %v6968_v34 = vadd.f32 %v9505_v19, %v6960_v17  ;;  %v6972_v27 = vadd.f32 %v9506_v38, %v6964_v6  ;;  %v7008_v25 = vadd.f32 %v9507_v24, %v7000_v16  ;;  %v7012_v7 = vadd.f32 %v9508_v49, %v7004_v45 }
 0x6fb   :  { %v6970_v63 = vadd.f32 %v9509_v58, %v6962_v35  ;;  %v6974_v42 = vadd.f32 %v9510_v0, %v6966_v20  ;;  %v7010_v13 = vadd.f32 %v9511_v57, %v7002_v52  ;;  %v7014_v11 = vadd.f32 %v9512_v32, %v7006_v46 }
 0x6fc   :  { %6976 = vst [vmem:[#allocation16] sm:$0xff] %v6968_v34  ;;  %6980 = vst [vmem:[#allocation16 + $0x20] sm:$0xff] %v6972_v27  ;;  %v6951_v41 = vrot.slane %v9486_v62, %v10160_v3  ;;  %v6991_v43 = vrot.slane %v9486_v62, %v10166_v36  ;;  %v6959_v55 = vrot.slane %v9488_v53, %v10160_v3 }
 0x6fd   :  { %7016 = vst [vmem:[#allocation16 + $0x40] sm:$0xff] %v7008_v25  ;;  %7020 = vst [vmem:[#allocation16 + $0x60] sm:$0xff] %v7012_v7  ;;  %v6999_v33 = vrot.slane %v9488_v53, %v10166_v36 }
 0x6fe   :  { %6978 = vst [vmem:[#allocation16 + $0x10] sm:$0xff] %v6970_v63  ;;  %6982 = vst [vmem:[#allocation16 + $0x30] sm:$0xff] %v6974_v42  ;;  %v6961_v60 = vmul.f32 %v6951_v41, %v10733_v12  ;;  %v6965_v23 = vmul.f32 %v6951_v41, %v10737_v28  ;;  %v7001_v1 = vmul.f32 %v6991_v43, %v10757_v4 }
 0x6ff   :  { %7018 = vst [vmem:[#allocation16 + $0x50] sm:$0xff] %v7010_v13  ;;  %7022 = vst [vmem:[#allocation16 + $0x70] sm:$0xff] %v7014_v11  ;;  %v7005_v14 = vmul.f32 %v6991_v43, %v10761_v5  ;;  %v6963_v47 = vmul.f32 %v6959_v55, %v10739_v21  ;;  %v6967_v3 = vmul.f32 %v6959_v55, %v10743_v40 }
 0x700   :  { %v7003_v36 = vmul.f32 %v6999_v33, %v10763_v18  ;;  %v7007_v50 = vmul.f32 %v6999_v33, %v10767_v31  ;;  %v6969_v51 = vadd.f32 %v9513_v61, %v6961_v60  ;;  %v6973_v12 = vadd.f32 %v9514_v39, %v6965_v23 }
 0x701   :  { %v7009_v28 = vadd.f32 %v9515_v48, %v7001_v1  ;;  %v7013_v4 = vadd.f32 %v9516_v8, %v7005_v14  ;;  %v6971_v5 = vadd.f32 %v9517_v44, %v6963_v47  ;;  %v6975_v10 = vadd.f32 %v9518_v56, %v6967_v3 }
 0x702   :  { %v7011_v21 = vadd.f32 %v9519_v59, %v7003_v36  ;;  %v7015_v40 = vadd.f32 %v9520_v9, %v7007_v50  ;;  %6977 = vst [vmem:[#allocation16 + $0x8] sm:$0xff] %v6969_v51  ;;  %6981 = vst [vmem:[#allocation16 + $0x28] sm:$0xff] %v6973_v12 }
 0x703   :  { %7017 = vst [vmem:[#allocation16 + $0x48] sm:$0xff] %v7009_v28  ;;  %7021 = vst [vmem:[#allocation16 + $0x68] sm:$0xff] %v7013_v4 }
 0x704   :  { %6979 = vst [vmem:[#allocation16 + $0x18] sm:$0xff] %v6971_v5  ;;  %6983 = vst [vmem:[#allocation16 + $0x38] sm:$0xff] %v6975_v10 }
 0x705   :  { %7019 = vst [vmem:[#allocation16 + $0x58] sm:$0xff] %v7011_v21  ;;  %7023 = vst [vmem:[#allocation16 + $0x78] sm:$0xff] %v7015_v40 }
 0x706   :  { %9708 = shalt.err (!%p9705_p12)
}
 0x707   :  { %s9709_s10 = scalar_lea.hbm %s10827_s9, 2048 }
 0x708   :  { %p9710_p13 = scmp.ne.s32.totalorder %s10827_s9, %s9709_s10  ;;  %p9713_p0 = scmp.lt.u32.totalorder %s9709_s10, %s10827_s9 }
 0x70a   :  { %p9715_p1 = pnand %p9713_p0, %p9710_p13 }
 0x70c   :  { %9718 = shalt.err (!%p9715_p1)
}
 0x70d   :  { %7035 = dma.vmem_to_hbm [thread:$0]  %s7030_s11, 2048, %s10827_s9, [#allocation4], %s9737_s6, %s9737_s6, %s9738_s26  }
 0x70e   :  { %9729 = dma.done.wait [#allocation4], 2048  }
 0x70f   :  { %9730 = vsyncadd [#allocation4], 4294965248 }
 0x710   :  { %7039 = vsyncpa [#allocation3], 1 }
 0x711   :  { %7040 = vsyncpa [#allocation6], 1 }
 0x712   :  { %7041 = vsyncpa [#allocation9], 1 }
 0x713   :  { %7042 = vsyncpa [#allocation12], 1 }
 0x714   :  { %7043 = vsyncpa [#allocation15], 1 }
 0x715   :  { %7044 = vsyncpa [#allocation4], 1 }

</bundles_post_ra>
